<compile_context>
chip_gen: v6e
topology: v6e:2x2x1
jax: 0.10.0
libtpu: 0.0.40
codegen_flags: <defaults>
</compile_context>

<pallas_src>
import math

import numpy as np
import jax
import jax.numpy as jnp
from jax import lax
from jax.experimental import pallas as pl
from jax.experimental.pallas import tpu as pltpu


KSIZE = 3  # every conv in Encoder_Block is 3x3, pad 1


# ----------------------------------------------------------------------------
# Fused 3-layer kernel factory
# ----------------------------------------------------------------------------
def _make_fused_encoder_kernel(cfg):
    bn = cfg["bn"]                      # images per grid step
    cin0 = cfg["cin0"]                  # layer-1 input channels
    c1, c2, c3 = cfg["chans"]           # per-layer output channels
    hq, wq = cfg["hq"], cfg["wq"]       # phase-split quarter-plane dims
    ho, wo = cfg["ho"], cfg["wo"]       # spatial output dims (all layers)
    m = ho * wo
    kd0 = KSIZE * KSIZE * cin0
    kd1 = KSIZE * KSIZE * c1
    kd2 = KSIZE * KSIZE * c2

    def build_slab_from_padded(src_ref, slab_ref, cin):
        # src_ref: (bn, ho+2, wo+2, cin) zero-padded activation (stride-1 taps)
        for nn in range(bn):
            for ky in range(KSIZE):
                for kx in range(KSIZE):
                    t = ky * KSIZE + kx
                    xs = src_ref[nn, ky:ky + ho, kx:kx + wo, :].reshape(m, cin)
                    slab_ref[nn * m:(nn + 1) * m, t * cin:(t + 1) * cin] = xs

    def store_padded(dst_ref, y):
        # y: (bn*m, cout) f32 -> bf16 interior of the zero-padded activation.
        dst_ref[...] = jnp.zeros_like(dst_ref)
        yb = y.astype(dst_ref.dtype)
        for nn in range(bn):
            for oy in range(ho):
                r0 = nn * m + oy * wo
                dst_ref[nn, 1 + oy, 1:1 + wo, :] = yb[r0:r0 + wo, :]

    def kernel(planes_ref, w1_ref, b1_ref, w2_ref, b2_ref, w3_ref, b3_ref,
               o_ref, slab_ref, act1_ref, act2_ref):
        # -------- layer 1: stride-2 conv, taps from phase-split planes ------
        for nn in range(bn):
            for ky in range(KSIZE):
                for kx in range(KSIZE):
                    plane = (ky % 2) * 2 + (kx % 2)
                    dy, dx = ky // 2, kx // 2
                    r0 = plane * hq + dy
                    t = ky * KSIZE + kx
                    xs = planes_ref[nn, r0:r0 + ho, dx:dx + wo, :].reshape(m, cin0)
                    slab_ref[nn * m:(nn + 1) * m, t * cin0:(t + 1) * cin0] = xs
        y1 = jnp.dot(slab_ref[:, :kd0], w1_ref[...],
                     preferred_element_type=jnp.float32)        # (bn*m, c1)
        y1 = jnp.maximum(y1 + b1_ref[...], 0.0)
        store_padded(act1_ref, y1)

        # -------- layer 2: stride-1 conv over padded act1 -------------------
        build_slab_from_padded(act1_ref, slab_ref, c1)
        y2 = jnp.dot(slab_ref[:, :kd1], w2_ref[...],
                     preferred_element_type=jnp.float32)        # (bn*m, c2)
        y2 = jnp.maximum(y2 + b2_ref[...], 0.0)
        store_padded(act2_ref, y2)

        # -------- layer 3: stride-1 conv -> lane-dense (c3, bn*m) output ----
        build_slab_from_padded(act2_ref, slab_ref, c2)
        y3 = lax.dot_general(w3_ref[...], slab_ref[:, :kd2],
                             (((1,), (1,)), ((), ())),
                             preferred_element_type=jnp.float32)  # (c3, bn*m)
        y3 = jnp.maximum(y3 + b3_ref[...], 0.0)
        o_ref[...] = y3.astype(o_ref.dtype)

    return kernel


# ----------------------------------------------------------------------------
# Wrapper glue
# ----------------------------------------------------------------------------
def _phase_planes(x_nhwc, stride, pad):
    """(N,H,W,C) -> (N, stride*stride*Hq, Wq, C) space-to-depth phase split:
    planes[n, (py*s+px)*Hq + i, j, :] == xpad[n, i*s+py, j*s+px, :]."""
    n, h, w, c = x_nhwc.shape
    s = stride
    hp, wp = h + 2 * pad, w + 2 * pad
    hq, wq = -(-hp // s), -(-wp // s)
    xp = jnp.pad(x_nhwc, ((0, 0),
                          (pad, pad + (hq * s - hp)),
                          (pad, pad + (wq * s - wp)),
                          (0, 0)))
    xr = xp.reshape(n, hq, s, wq, s, c)
    planes = jnp.transpose(xr, (0, 2, 4, 1, 3, 5)).reshape(n, s * s * hq, wq, c)
    return planes, hq, wq


def _fold_bn(gamma, beta, mean, var, eps):
    scale = gamma / jnp.sqrt(var + eps)
    bias = (beta - mean * scale).astype(jnp.float32)
    return scale, bias


def _w_km(weight_oihw, scale):
    # (Cout,Cin,k,k) -> (k*k*Cin, Cout), K ordered (ky,kx,ci), BN scale folded.
    cout, cin, k, _ = weight_oihw.shape
    w = jnp.transpose(weight_oihw, (2, 3, 1, 0)).reshape(k * k * cin, cout)
    return (w * scale[None, :]).astype(jnp.bfloat16)


def _w_mk(weight_oihw, scale):
    # (Cout,Cin,k,k) -> (Cout, k*k*Cin), same K ordering, BN scale folded.
    cout, cin, k, _ = weight_oihw.shape
    w = jnp.transpose(weight_oihw, (0, 2, 3, 1)).reshape(cout, k * k * cin)
    return (w * scale[:, None]).astype(jnp.bfloat16)


def encoder_block_forward(x_nchw, params, *, eps=1e-5, out_dtype=jnp.float32,
                          batch_tile=None):
    """Encoder_Block: 3x Conv_BN_ReLU with strides (2,1,1). NCHW in / NCHW out."""
    assert len(params) == 3
    n, c0, h, w = x_nchw.shape
    k, pad, s0 = KSIZE, KSIZE // 2, 2
    c1 = params[0]["weight"].shape[0]
    c2 = params[1]["weight"].shape[0]
    c3 = params[2]["weight"].shape[0]
    assert params[0]["weight"].shape[1] == c0
    assert params[1]["weight"].shape[1] == c1 and params[2]["weight"].shape[1] == c2

    ho = (h + 2 * pad - k) // s0 + 1
    wo = (w + 2 * pad - k) // s0 + 1
    m = ho * wo

    # NCHW -> NHWC (channels minor) once, bf16 operands, stride-2 phase split.
    x_nhwc = jnp.transpose(x_nchw, (0, 2, 3, 1)).astype(jnp.bfloat16)
    planes, hq, wq = _phase_planes(x_nhwc, s0, pad)
    # In-kernel tap slices must stay inside the phase-split block (no runtime
    # bounds check on VMEM refs!).
    assert (k - 1) // s0 + ho <= hq and (k - 1) // s0 + wo <= wq, (
        "tap window escapes the phase-split block (kernel/pad mismatch)")

    # Fold eval-mode BatchNorm into weights (scale) + epilogue bias.
    s1, b1 = _fold_bn(params[0]["gamma"], params[0]["beta"],
                      params[0]["mean"], params[0]["var"], eps)
    s2, b2 = _fold_bn(params[1]["gamma"], params[1]["beta"],
                      params[1]["mean"], params[1]["var"], eps)
    s3, b3 = _fold_bn(params[2]["gamma"], params[2]["beta"],
                      params[2]["mean"], params[2]["var"], eps)
    w1 = _w_km(params[0]["weight"], s1); b1 = b1.reshape(1, c1)
    w2 = _w_km(params[1]["weight"], s2); b2 = b2.reshape(1, c2)
    w3 = _w_mk(params[2]["weight"], s3); b3 = b3.reshape(c3, 1)

    # Fold the whole batch into one grid step (lane-dense output, no per-step
    # grid overhead).  TODO(synk): batch/spatial tiling for large inputs.
    bn = n if batch_tile is None else batch_tile
    assert n % bn == 0
    if bn != n:
        assert (bn * m) % 128 == 0, "batch tile must keep output blocks lane-dense"
    grid = (n // bn,)

    kd_max = k * k * max(c0, c1, c2)
    kernel = _make_fused_encoder_kernel(dict(
        bn=bn, cin0=c0, chans=(c1, c2, c3), hq=hq, wq=wq, ho=ho, wo=wo))

    flops = 2 * n * m * (k * k) * (c0 * c1 + c1 * c2 + c2 * c3)
    out_itemsize = np.dtype(out_dtype).itemsize
    bytes_accessed = int(planes.size * 2
                         + (w1.size + w2.size + w3.size) * 2
                         + (b1.size + b2.size + b3.size) * 4
                         + c3 * n * m * out_itemsize)

    out = pl.pallas_call(
        kernel,
        out_shape=jax.ShapeDtypeStruct((c3, n * m), out_dtype),
        grid_spec=pltpu.PrefetchScalarGridSpec(
            num_scalar_prefetch=0,
            grid=grid,
            in_specs=[
                pl.BlockSpec((bn, s0 * s0 * hq, wq, c0), lambda i: (i, 0, 0, 0)),
                pl.BlockSpec((k * k * c0, c1), lambda i: (0, 0)),
                pl.BlockSpec((1, c1), lambda i: (0, 0)),
                pl.BlockSpec((k * k * c1, c2), lambda i: (0, 0)),
                pl.BlockSpec((1, c2), lambda i: (0, 0)),
                pl.BlockSpec((c3, k * k * c2), lambda i: (0, 0)),
                pl.BlockSpec((c3, 1), lambda i: (0, 0)),
            ],
            out_specs=pl.BlockSpec((c3, bn * m), lambda i: (0, i)),
            scratch_shapes=[
                pltpu.VMEM((bn * m, kd_max), jnp.bfloat16),          # im2col slab
                pltpu.VMEM((bn, ho + 2, wo + 2, c1), jnp.bfloat16),  # padded act1
                pltpu.VMEM((bn, ho + 2, wo + 2, c2), jnp.bfloat16),  # padded act2
            ],
        ),
        compiler_params=pltpu.CompilerParams(
            dimension_semantics=("parallel",),
            vmem_limit_bytes=32 * 1024 * 1024,
        ),
        cost_estimate=pl.CostEstimate(
            flops=flops, transcendentals=0, bytes_accessed=bytes_accessed),
    )(planes, w1, b1, w2, b2, w3, b3)

    # (Cout, N*Ho*Wo) -> NCHW (single layout conversion at the block boundary).
    return jnp.transpose(out.reshape(c3, n, ho, wo), (1, 0, 2, 3))


# ----------------------------------------------------------------------------
# Parameter init (PyTorch-equivalent structure) and pure-JAX reference
# ----------------------------------------------------------------------------
def init_encoder_block_params(key, in_channel, out_channel):
    assert out_channel == in_channel * 2, (
        "the out_channel is not in_channel*2 in encoder block")
    keys = jax.random.split(key, 3)
    chans = [(in_channel, out_channel), (out_channel, out_channel),
             (out_channel, out_channel)]
    params = []
    for k_i, (cin, cout) in zip(keys, chans):
        fan_in = cin * KSIZE * KSIZE
        wgt = jax.random.normal(k_i, (cout, cin, KSIZE, KSIZE),
                                jnp.float32) / math.sqrt(fan_in)
        params.append(dict(
            weight=wgt,
            gamma=jnp.ones((cout,), jnp.float32),     # BN default init
            beta=jnp.zeros((cout,), jnp.float32),
            mean=jnp.zeros((cout,), jnp.float32),     # running stats (eval mode)
            var=jnp.ones((cout,), jnp.float32),
        ))
    return params


def _reference_forward(x_nchw, params, eps=1e-5):
    x = x_nchw
    strides = (2, 1, 1)
    for p, s in zip(params, strides):
        y = lax.conv_general_dilated(
            x, p["weight"], window_strides=(s, s), padding=((1, 1), (1, 1)),
            dimension_numbers=("NCHW", "OIHW", "NCHW"),
            precision=lax.Precision.HIGHEST)
        scale = (p["gamma"] / jnp.sqrt(p["var"] + eps))[None, :, None, None]
        bias = (p["beta"] - p["mean"] * p["gamma"]
                / jnp.sqrt(p["var"] + eps))[None, :, None, None]
        x = jnp.maximum(y * scale + bias, 0.0)
    return x


if __name__ == "__main__":
    key = jax.random.PRNGKey(0)
    k_x, k_p = jax.random.split(key)

    in_channel, out_channel = 4, 8
    x = jax.random.normal(k_x, (2, in_channel, 16, 16), jnp.float32)  # NCHW

    params = init_encoder_block_params(k_p, in_channel, out_channel)

    fwd = jax.jit(encoder_block_forward)
    out = jax.block_until_ready(fwd(x, params))

    assert out.shape == (2, out_channel, 8, 8), out.shape

    # Sanity check against an f32 reference (loose tol: bf16 MXU operands and
    # bf16 inter-layer activations).
    ref = jax.block_until_ready(_reference_forward(x, params))
    max_err = float(jnp.max(jnp.abs(out - ref)))
    assert jnp.allclose(out, ref, atol=6e-2, rtol=6e-2), max_err

    print("KERNEL_OK")
</pallas_src>

<mosaic_0001>
module attributes {stable_mosaic.version = 11 : i64} {
  func.func @kernel(%arg0: i32, %arg1: memref<2x36x9x4xbf16, #tpu.memory_space<vmem>>, %arg2: memref<36x8xbf16, #tpu.memory_space<vmem>>, %arg3: memref<1x8xf32, #tpu.memory_space<vmem>>, %arg4: memref<72x8xbf16, #tpu.memory_space<vmem>>, %arg5: memref<1x8xf32, #tpu.memory_space<vmem>>, %arg6: memref<8x72xbf16, #tpu.memory_space<vmem>>, %arg7: memref<8x1xf32, #tpu.memory_space<vmem>>, %arg8: memref<8x128xf32, #tpu.memory_space<vmem>>, %arg9: memref<128x72xbf16, #tpu.memory_space<vmem>>, %arg10: memref<2x10x10x8xbf16, #tpu.memory_space<vmem>>, %arg11: memref<2x10x10x8xbf16, #tpu.memory_space<vmem>>) attributes {dimension_semantics = [#tpu.dimension_semantics<parallel>], iteration_bounds = array<i64: 1>, scalar_prefetch = 0 : i64, scratch_operands = 3 : i64, tpu.core_type = #tpu.core_type<tc>, window_params = [{transform_indices = @transform_0, window_bounds = array<i64: 2, 36, 9, 4>}, {pipeline_mode = #tpu.pipeline_mode<synchronous>, transform_indices = @transform_1, window_bounds = array<i64: 36, 8>}, {pipeline_mode = #tpu.pipeline_mode<synchronous>, transform_indices = @transform_2, window_bounds = array<i64: 1, 8>}, {pipeline_mode = #tpu.pipeline_mode<synchronous>, transform_indices = @transform_3, window_bounds = array<i64: 72, 8>}, {pipeline_mode = #tpu.pipeline_mode<synchronous>, transform_indices = @transform_4, window_bounds = array<i64: 1, 8>}, {pipeline_mode = #tpu.pipeline_mode<synchronous>, transform_indices = @transform_5, window_bounds = array<i64: 8, 72>}, {pipeline_mode = #tpu.pipeline_mode<synchronous>, transform_indices = @transform_6, window_bounds = array<i64: 8, 1>}, {transform_indices = @transform_7, window_bounds = array<i64: 8, 128>}]} {
    %c0 = arith.constant 0 : index
    %c0_0 = arith.constant 0 : index
    %c0_1 = arith.constant 0 : index
    %c0_2 = arith.constant 0 : index
    %0 = vector.load %arg1[%c0, %c0_0, %c0_1, %c0_2] : memref<2x36x9x4xbf16, #tpu.memory_space<vmem>>, vector<1x8x8x4xbf16>
    %1 = vector.shape_cast %0 : vector<1x8x8x4xbf16> to vector<8x8x4xbf16>
    %2 = vector.shape_cast %1 : vector<8x8x4xbf16> to vector<64x4xbf16>
    %c0_3 = arith.constant 0 : index
    %c0_4 = arith.constant 0 : index
    %3 = vector.load %arg9[%c0_3, %c0_4] : memref<128x72xbf16, #tpu.memory_space<vmem>>, vector<64x4xbf16>
    tpu.vector_store %arg9[%c0_3, %c0_4], %2 {strides = array<i32>} : memref<128x72xbf16, #tpu.memory_space<vmem>>, vector<64x4xbf16>,
    %c0_5 = arith.constant 0 : index
    %c9 = arith.constant 9 : index
    %c0_6 = arith.constant 0 : index
    %c0_7 = arith.constant 0 : index
    %4 = vector.load %arg1[%c0_5, %c9, %c0_6, %c0_7] : memref<2x36x9x4xbf16, #tpu.memory_space<vmem>>, vector<1x8x8x4xbf16>
    %5 = vector.shape_cast %4 : vector<1x8x8x4xbf16> to vector<8x8x4xbf16>
    %6 = vector.shape_cast %5 : vector<8x8x4xbf16> to vector<64x4xbf16>
    %c0_8 = arith.constant 0 : index
    %c4 = arith.constant 4 : index
    %7 = vector.load %arg9[%c0_8, %c4] : memref<128x72xbf16, #tpu.memory_space<vmem>>, vector<64x4xbf16>
    tpu.vector_store %arg9[%c0_8, %c4], %6 {strides = array<i32>} : memref<128x72xbf16, #tpu.memory_space<vmem>>, vector<64x4xbf16>,
    %c0_9 = arith.constant 0 : index
    %c0_10 = arith.constant 0 : index
    %c1 = arith.constant 1 : index
    %c0_11 = arith.constant 0 : index
    %8 = vector.load %arg1[%c0_9, %c0_10, %c1, %c0_11] : memref<2x36x9x4xbf16, #tpu.memory_space<vmem>>, vector<1x8x8x4xbf16>
    %9 = vector.shape_cast %8 : vector<1x8x8x4xbf16> to vector<8x8x4xbf16>
    %10 = vector.shape_cast %9 : vector<8x8x4xbf16> to vector<64x4xbf16>
    %c0_12 = arith.constant 0 : index
    %c8 = arith.constant 8 : index
    %11 = vector.load %arg9[%c0_12, %c8] : memref<128x72xbf16, #tpu.memory_space<vmem>>, vector<64x4xbf16>
    tpu.vector_store %arg9[%c0_12, %c8], %10 {strides = array<i32>} : memref<128x72xbf16, #tpu.memory_space<vmem>>, vector<64x4xbf16>,
    %c0_13 = arith.constant 0 : index
    %c18 = arith.constant 18 : index
    %c0_14 = arith.constant 0 : index
    %c0_15 = arith.constant 0 : index
    %12 = vector.load %arg1[%c0_13, %c18, %c0_14, %c0_15] : memref<2x36x9x4xbf16, #tpu.memory_space<vmem>>, vector<1x8x8x4xbf16>
    %13 = vector.shape_cast %12 : vector<1x8x8x4xbf16> to vector<8x8x4xbf16>
    %14 = vector.shape_cast %13 : vector<8x8x4xbf16> to vector<64x4xbf16>
    %c0_16 = arith.constant 0 : index
    %c12 = arith.constant 12 : index
    %15 = vector.load %arg9[%c0_16, %c12] : memref<128x72xbf16, #tpu.memory_space<vmem>>, vector<64x4xbf16>
    tpu.vector_store %arg9[%c0_16, %c12], %14 {strides = array<i32>} : memref<128x72xbf16, #tpu.memory_space<vmem>>, vector<64x4xbf16>,
    %c0_17 = arith.constant 0 : index
    %c27 = arith.constant 27 : index
    %c0_18 = arith.constant 0 : index
    %c0_19 = arith.constant 0 : index
    %16 = vector.load %arg1[%c0_17, %c27, %c0_18, %c0_19] : memref<2x36x9x4xbf16, #tpu.memory_space<vmem>>, vector<1x8x8x4xbf16>
    %17 = vector.shape_cast %16 : vector<1x8x8x4xbf16> to vector<8x8x4xbf16>
    %18 = vector.shape_cast %17 : vector<8x8x4xbf16> to vector<64x4xbf16>
    %c0_20 = arith.constant 0 : index
    %c16 = arith.constant 16 : index
    %19 = vector.load %arg9[%c0_20, %c16] : memref<128x72xbf16, #tpu.memory_space<vmem>>, vector<64x4xbf16>
    tpu.vector_store %arg9[%c0_20, %c16], %18 {strides = array<i32>} : memref<128x72xbf16, #tpu.memory_space<vmem>>, vector<64x4xbf16>,
    %c0_21 = arith.constant 0 : index
    %c18_22 = arith.constant 18 : index
    %c1_23 = arith.constant 1 : index
    %c0_24 = arith.constant 0 : index
    %20 = vector.load %arg1[%c0_21, %c18_22, %c1_23, %c0_24] : memref<2x36x9x4xbf16, #tpu.memory_space<vmem>>, vector<1x8x8x4xbf16>
    %21 = vector.shape_cast %20 : vector<1x8x8x4xbf16> to vector<8x8x4xbf16>
    %22 = vector.shape_cast %21 : vector<8x8x4xbf16> to vector<64x4xbf16>
    %c0_25 = arith.constant 0 : index
    %c20 = arith.constant 20 : index
    %23 = vector.load %arg9[%c0_25, %c20] : memref<128x72xbf16, #tpu.memory_space<vmem>>, vector<64x4xbf16>
    tpu.vector_store %arg9[%c0_25, %c20], %22 {strides = array<i32>} : memref<128x72xbf16, #tpu.memory_space<vmem>>, vector<64x4xbf16>,
    %c0_26 = arith.constant 0 : index
    %c1_27 = arith.constant 1 : index
    %c0_28 = arith.constant 0 : index
    %c0_29 = arith.constant 0 : index
    %24 = vector.load %arg1[%c0_26, %c1_27, %c0_28, %c0_29] : memref<2x36x9x4xbf16, #tpu.memory_space<vmem>>, vector<1x8x8x4xbf16>
    %25 = vector.shape_cast %24 : vector<1x8x8x4xbf16> to vector<8x8x4xbf16>
    %26 = vector.shape_cast %25 : vector<8x8x4xbf16> to vector<64x4xbf16>
    %c0_30 = arith.constant 0 : index
    %c24 = arith.constant 24 : index
    %27 = vector.load %arg9[%c0_30, %c24] : memref<128x72xbf16, #tpu.memory_space<vmem>>, vector<64x4xbf16>
    tpu.vector_store %arg9[%c0_30, %c24], %26 {strides = array<i32>} : memref<128x72xbf16, #tpu.memory_space<vmem>>, vector<64x4xbf16>,
    %c0_31 = arith.constant 0 : index
    %c10 = arith.constant 10 : index
    %c0_32 = arith.constant 0 : index
    %c0_33 = arith.constant 0 : index
    %28 = vector.load %arg1[%c0_31, %c10, %c0_32, %c0_33] : memref<2x36x9x4xbf16, #tpu.memory_space<vmem>>, vector<1x8x8x4xbf16>
    %29 = vector.shape_cast %28 : vector<1x8x8x4xbf16> to vector<8x8x4xbf16>
    %30 = vector.shape_cast %29 : vector<8x8x4xbf16> to vector<64x4xbf16>
    %c0_34 = arith.constant 0 : index
    %c28 = arith.constant 28 : index
    %31 = vector.load %arg9[%c0_34, %c28] : memref<128x72xbf16, #tpu.memory_space<vmem>>, vector<64x4xbf16>
    tpu.vector_store %arg9[%c0_34, %c28], %30 {strides = array<i32>} : memref<128x72xbf16, #tpu.memory_space<vmem>>, vector<64x4xbf16>,
    %c0_35 = arith.constant 0 : index
    %c1_36 = arith.constant 1 : index
    %c1_37 = arith.constant 1 : index
    %c0_38 = arith.constant 0 : index
    %32 = vector.load %arg1[%c0_35, %c1_36, %c1_37, %c0_38] : memref<2x36x9x4xbf16, #tpu.memory_space<vmem>>, vector<1x8x8x4xbf16>
    %33 = vector.shape_cast %32 : vector<1x8x8x4xbf16> to vector<8x8x4xbf16>
    %34 = vector.shape_cast %33 : vector<8x8x4xbf16> to vector<64x4xbf16>
    %c0_39 = arith.constant 0 : index
    %c32 = arith.constant 32 : index
    %35 = vector.load %arg9[%c0_39, %c32] : memref<128x72xbf16, #tpu.memory_space<vmem>>, vector<64x4xbf16>
    tpu.vector_store %arg9[%c0_39, %c32], %34 {strides = array<i32>} : memref<128x72xbf16, #tpu.memory_space<vmem>>, vector<64x4xbf16>,
    %c1_40 = arith.constant 1 : index
    %c0_41 = arith.constant 0 : index
    %c0_42 = arith.constant 0 : index
    %c0_43 = arith.constant 0 : index
    %36 = vector.load %arg1[%c1_40, %c0_41, %c0_42, %c0_43] : memref<2x36x9x4xbf16, #tpu.memory_space<vmem>>, vector<1x8x8x4xbf16>
    %37 = vector.shape_cast %36 : vector<1x8x8x4xbf16> to vector<8x8x4xbf16>
    %38 = vector.shape_cast %37 : vector<8x8x4xbf16> to vector<64x4xbf16>
    %c64 = arith.constant 64 : index
    %c0_44 = arith.constant 0 : index
    %39 = vector.load %arg9[%c64, %c0_44] : memref<128x72xbf16, #tpu.memory_space<vmem>>, vector<64x4xbf16>
    tpu.vector_store %arg9[%c64, %c0_44], %38 {strides = array<i32>} : memref<128x72xbf16, #tpu.memory_space<vmem>>, vector<64x4xbf16>,
    %c1_45 = arith.constant 1 : index
    %c9_46 = arith.constant 9 : index
    %c0_47 = arith.constant 0 : index
    %c0_48 = arith.constant 0 : index
    %40 = vector.load %arg1[%c1_45, %c9_46, %c0_47, %c0_48] : memref<2x36x9x4xbf16, #tpu.memory_space<vmem>>, vector<1x8x8x4xbf16>
    %41 = vector.shape_cast %40 : vector<1x8x8x4xbf16> to vector<8x8x4xbf16>
    %42 = vector.shape_cast %41 : vector<8x8x4xbf16> to vector<64x4xbf16>
    %c64_49 = arith.constant 64 : index
    %c4_50 = arith.constant 4 : index
    %43 = vector.load %arg9[%c64_49, %c4_50] : memref<128x72xbf16, #tpu.memory_space<vmem>>, vector<64x4xbf16>
    tpu.vector_store %arg9[%c64_49, %c4_50], %42 {strides = array<i32>} : memref<128x72xbf16, #tpu.memory_space<vmem>>, vector<64x4xbf16>,
    %c1_51 = arith.constant 1 : index
    %c0_52 = arith.constant 0 : index
    %c1_53 = arith.constant 1 : index
    %c0_54 = arith.constant 0 : index
    %44 = vector.load %arg1[%c1_51, %c0_52, %c1_53, %c0_54] : memref<2x36x9x4xbf16, #tpu.memory_space<vmem>>, vector<1x8x8x4xbf16>
    %45 = vector.shape_cast %44 : vector<1x8x8x4xbf16> to vector<8x8x4xbf16>
    %46 = vector.shape_cast %45 : vector<8x8x4xbf16> to vector<64x4xbf16>
    %c64_55 = arith.constant 64 : index
    %c8_56 = arith.constant 8 : index
    %47 = vector.load %arg9[%c64_55, %c8_56] : memref<128x72xbf16, #tpu.memory_space<vmem>>, vector<64x4xbf16>
    tpu.vector_store %arg9[%c64_55, %c8_56], %46 {strides = array<i32>} : memref<128x72xbf16, #tpu.memory_space<vmem>>, vector<64x4xbf16>,
    %c1_57 = arith.constant 1 : index
    %c18_58 = arith.constant 18 : index
    %c0_59 = arith.constant 0 : index
    %c0_60 = arith.constant 0 : index
    %48 = vector.load %arg1[%c1_57, %c18_58, %c0_59, %c0_60] : memref<2x36x9x4xbf16, #tpu.memory_space<vmem>>, vector<1x8x8x4xbf16>
    %49 = vector.shape_cast %48 : vector<1x8x8x4xbf16> to vector<8x8x4xbf16>
    %50 = vector.shape_cast %49 : vector<8x8x4xbf16> to vector<64x4xbf16>
    %c64_61 = arith.constant 64 : index
    %c12_62 = arith.constant 12 : index
    %51 = vector.load %arg9[%c64_61, %c12_62] : memref<128x72xbf16, #tpu.memory_space<vmem>>, vector<64x4xbf16>
    tpu.vector_store %arg9[%c64_61, %c12_62], %50 {strides = array<i32>} : memref<128x72xbf16, #tpu.memory_space<vmem>>, vector<64x4xbf16>,
    %c1_63 = arith.constant 1 : index
    %c27_64 = arith.constant 27 : index
    %c0_65 = arith.constant 0 : index
    %c0_66 = arith.constant 0 : index
    %52 = vector.load %arg1[%c1_63, %c27_64, %c0_65, %c0_66] : memref<2x36x9x4xbf16, #tpu.memory_space<vmem>>, vector<1x8x8x4xbf16>
    %53 = vector.shape_cast %52 : vector<1x8x8x4xbf16> to vector<8x8x4xbf16>
    %54 = vector.shape_cast %53 : vector<8x8x4xbf16> to vector<64x4xbf16>
    %c64_67 = arith.constant 64 : index
    %c16_68 = arith.constant 16 : index
    %55 = vector.load %arg9[%c64_67, %c16_68] : memref<128x72xbf16, #tpu.memory_space<vmem>>, vector<64x4xbf16>
    tpu.vector_store %arg9[%c64_67, %c16_68], %54 {strides = array<i32>} : memref<128x72xbf16, #tpu.memory_space<vmem>>, vector<64x4xbf16>,
    %c1_69 = arith.constant 1 : index
    %c18_70 = arith.constant 18 : index
    %c1_71 = arith.constant 1 : index
    %c0_72 = arith.constant 0 : index
    %56 = vector.load %arg1[%c1_69, %c18_70, %c1_71, %c0_72] : memref<2x36x9x4xbf16, #tpu.memory_space<vmem>>, vector<1x8x8x4xbf16>
    %57 = vector.shape_cast %56 : vector<1x8x8x4xbf16> to vector<8x8x4xbf16>
    %58 = vector.shape_cast %57 : vector<8x8x4xbf16> to vector<64x4xbf16>
    %c64_73 = arith.constant 64 : index
    %c20_74 = arith.constant 20 : index
    %59 = vector.load %arg9[%c64_73, %c20_74] : memref<128x72xbf16, #tpu.memory_space<vmem>>, vector<64x4xbf16>
    tpu.vector_store %arg9[%c64_73, %c20_74], %58 {strides = array<i32>} : memref<128x72xbf16, #tpu.memory_space<vmem>>, vector<64x4xbf16>,
    %c1_75 = arith.constant 1 : index
    %c1_76 = arith.constant 1 : index
    %c0_77 = arith.constant 0 : index
    %c0_78 = arith.constant 0 : index
    %60 = vector.load %arg1[%c1_75, %c1_76, %c0_77, %c0_78] : memref<2x36x9x4xbf16, #tpu.memory_space<vmem>>, vector<1x8x8x4xbf16>
    %61 = vector.shape_cast %60 : vector<1x8x8x4xbf16> to vector<8x8x4xbf16>
    %62 = vector.shape_cast %61 : vector<8x8x4xbf16> to vector<64x4xbf16>
    %c64_79 = arith.constant 64 : index
    %c24_80 = arith.constant 24 : index
    %63 = vector.load %arg9[%c64_79, %c24_80] : memref<128x72xbf16, #tpu.memory_space<vmem>>, vector<64x4xbf16>
    tpu.vector_store %arg9[%c64_79, %c24_80], %62 {strides = array<i32>} : memref<128x72xbf16, #tpu.memory_space<vmem>>, vector<64x4xbf16>,
    %c1_81 = arith.constant 1 : index
    %c10_82 = arith.constant 10 : index
    %c0_83 = arith.constant 0 : index
    %c0_84 = arith.constant 0 : index
    %64 = vector.load %arg1[%c1_81, %c10_82, %c0_83, %c0_84] : memref<2x36x9x4xbf16, #tpu.memory_space<vmem>>, vector<1x8x8x4xbf16>
    %65 = vector.shape_cast %64 : vector<1x8x8x4xbf16> to vector<8x8x4xbf16>
    %66 = vector.shape_cast %65 : vector<8x8x4xbf16> to vector<64x4xbf16>
    %c64_85 = arith.constant 64 : index
    %c28_86 = arith.constant 28 : index
    %67 = vector.load %arg9[%c64_85, %c28_86] : memref<128x72xbf16, #tpu.memory_space<vmem>>, vector<64x4xbf16>
    tpu.vector_store %arg9[%c64_85, %c28_86], %66 {strides = array<i32>} : memref<128x72xbf16, #tpu.memory_space<vmem>>, vector<64x4xbf16>,
    %c1_87 = arith.constant 1 : index
    %c1_88 = arith.constant 1 : index
    %c1_89 = arith.constant 1 : index
    %c0_90 = arith.constant 0 : index
    %68 = vector.load %arg1[%c1_87, %c1_88, %c1_89, %c0_90] : memref<2x36x9x4xbf16, #tpu.memory_space<vmem>>, vector<1x8x8x4xbf16>
    %69 = vector.shape_cast %68 : vector<1x8x8x4xbf16> to vector<8x8x4xbf16>
    %70 = vector.shape_cast %69 : vector<8x8x4xbf16> to vector<64x4xbf16>
    %c64_91 = arith.constant 64 : index
    %c32_92 = arith.constant 32 : index
    %71 = vector.load %arg9[%c64_91, %c32_92] : memref<128x72xbf16, #tpu.memory_space<vmem>>, vector<64x4xbf16>
    tpu.vector_store %arg9[%c64_91, %c32_92], %70 {strides = array<i32>} : memref<128x72xbf16, #tpu.memory_space<vmem>>, vector<64x4xbf16>,
    %c0_93 = arith.constant 0 : index
    %c0_94 = arith.constant 0 : index
    %72 = vector.load %arg9[%c0_93, %c0_94] : memref<128x72xbf16, #tpu.memory_space<vmem>>, vector<128x36xbf16>
    %c0_95 = arith.constant 0 : index
    %c0_96 = arith.constant 0 : index
    %73 = vector.load %arg2[%c0_95, %c0_96] : memref<36x8xbf16, #tpu.memory_space<vmem>>, vector<36x8xbf16>
    %cst = arith.constant dense<0.000000e+00> : vector<128x8xf32>
    %74 = tpu.matmul %72, %73, %cst {dimension_numbers = #tpu.dot_dimension_numbers<[1], [0], [0], [1], [0, 0, 1, 1], [], []>} : vector<128x36xbf16>, vector<36x8xbf16>, vector<128x8xf32> -> vector<128x8xf32>
    %c0_97 = arith.constant 0 : index
    %c0_98 = arith.constant 0 : index
    %75 = vector.load %arg3[%c0_97, %c0_98] : memref<1x8xf32, #tpu.memory_space<vmem>>, vector<1x8xf32>
    %76 = vector.broadcast %75 : vector<1x8xf32> to vector<128x8xf32>
    %77 = arith.addf %74, %76 : vector<128x8xf32>
    %cst_99 = arith.constant 0.000000e+00 : f32
    %78 = vector.broadcast %cst_99 : f32 to vector<128x8xf32>
    %79 = arith.maximumf %77, %78 : vector<128x8xf32>
    %cst_100 = arith.constant 0.000000e+00 : bf16
    %80 = vector.broadcast %cst_100 : bf16 to vector<2x10x10x8xbf16>
    %c0_101 = arith.constant 0 : index
    %c0_102 = arith.constant 0 : index
    %c0_103 = arith.constant 0 : index
    %c0_104 = arith.constant 0 : index
    %81 = vector.load %arg10[%c0_101, %c0_102, %c0_103, %c0_104] : memref<2x10x10x8xbf16, #tpu.memory_space<vmem>>, vector<2x10x10x8xbf16>
    tpu.vector_store %arg10[%c0_101, %c0_102, %c0_103, %c0_104], %80 {strides = array<i32>} : memref<2x10x10x8xbf16, #tpu.memory_space<vmem>>, vector<2x10x10x8xbf16>,
    %82 = arith.truncf %79 : vector<128x8xf32> to vector<128x8xbf16>
    %83 = vector.extract_strided_slice %82 {offsets = [0, 0], sizes = [8, 8], strides = [1, 1]} : vector<128x8xbf16> to vector<8x8xbf16>
    %c0_105 = arith.constant 0 : index
    %c1_106 = arith.constant 1 : index
    %c1_107 = arith.constant 1 : index
    %c0_108 = arith.constant 0 : index
    %84 = vector.load %arg10[%c0_105, %c1_106, %c1_107, %c0_108] : memref<2x10x10x8xbf16, #tpu.memory_space<vmem>>, vector<1x1x8x8xbf16>
    %85 = vector.shape_cast %84 : vector<1x1x8x8xbf16> to vector<8x8xbf16>
    %86 = vector.shape_cast %83 : vector<8x8xbf16> to vector<1x1x8x8xbf16>
    tpu.vector_store %arg10[%c0_105, %c1_106, %c1_107, %c0_108], %86 {strides = array<i32>} : memref<2x10x10x8xbf16, #tpu.memory_space<vmem>>, vector<1x1x8x8xbf16>,
    %87 = vector.extract_strided_slice %82 {offsets = [8, 0], sizes = [8, 8], strides = [1, 1]} : vector<128x8xbf16> to vector<8x8xbf16>
    %c0_109 = arith.constant 0 : index
    %c2 = arith.constant 2 : index
    %c1_110 = arith.constant 1 : index
    %c0_111 = arith.constant 0 : index
    %88 = vector.load %arg10[%c0_109, %c2, %c1_110, %c0_111] : memref<2x10x10x8xbf16, #tpu.memory_space<vmem>>, vector<1x1x8x8xbf16>
    %89 = vector.shape_cast %88 : vector<1x1x8x8xbf16> to vector<8x8xbf16>
    %90 = vector.shape_cast %87 : vector<8x8xbf16> to vector<1x1x8x8xbf16>
    tpu.vector_store %arg10[%c0_109, %c2, %c1_110, %c0_111], %90 {strides = array<i32>} : memref<2x10x10x8xbf16, #tpu.memory_space<vmem>>, vector<1x1x8x8xbf16>,
    %91 = vector.extract_strided_slice %82 {offsets = [16, 0], sizes = [8, 8], strides = [1, 1]} : vector<128x8xbf16> to vector<8x8xbf16>
    %c0_112 = arith.constant 0 : index
    %c3 = arith.constant 3 : index
    %c1_113 = arith.constant 1 : index
    %c0_114 = arith.constant 0 : index
    %92 = vector.load %arg10[%c0_112, %c3, %c1_113, %c0_114] : memref<2x10x10x8xbf16, #tpu.memory_space<vmem>>, vector<1x1x8x8xbf16>
    %93 = vector.shape_cast %92 : vector<1x1x8x8xbf16> to vector<8x8xbf16>
    %94 = vector.shape_cast %91 : vector<8x8xbf16> to vector<1x1x8x8xbf16>
    tpu.vector_store %arg10[%c0_112, %c3, %c1_113, %c0_114], %94 {strides = array<i32>} : memref<2x10x10x8xbf16, #tpu.memory_space<vmem>>, vector<1x1x8x8xbf16>,
    %95 = vector.extract_strided_slice %82 {offsets = [24, 0], sizes = [8, 8], strides = [1, 1]} : vector<128x8xbf16> to vector<8x8xbf16>
    %c0_115 = arith.constant 0 : index
    %c4_116 = arith.constant 4 : index
    %c1_117 = arith.constant 1 : index
    %c0_118 = arith.constant 0 : index
    %96 = vector.load %arg10[%c0_115, %c4_116, %c1_117, %c0_118] : memref<2x10x10x8xbf16, #tpu.memory_space<vmem>>, vector<1x1x8x8xbf16>
    %97 = vector.shape_cast %96 : vector<1x1x8x8xbf16> to vector<8x8xbf16>
    %98 = vector.shape_cast %95 : vector<8x8xbf16> to vector<1x1x8x8xbf16>
    tpu.vector_store %arg10[%c0_115, %c4_116, %c1_117, %c0_118], %98 {strides = array<i32>} : memref<2x10x10x8xbf16, #tpu.memory_space<vmem>>, vector<1x1x8x8xbf16>,
    %99 = vector.extract_strided_slice %82 {offsets = [32, 0], sizes = [8, 8], strides = [1, 1]} : vector<128x8xbf16> to vector<8x8xbf16>
    %c0_119 = arith.constant 0 : index
    %c5 = arith.constant 5 : index
    %c1_120 = arith.constant 1 : index
    %c0_121 = arith.constant 0 : index
    %100 = vector.load %arg10[%c0_119, %c5, %c1_120, %c0_121] : memref<2x10x10x8xbf16, #tpu.memory_space<vmem>>, vector<1x1x8x8xbf16>
    %101 = vector.shape_cast %100 : vector<1x1x8x8xbf16> to vector<8x8xbf16>
    %102 = vector.shape_cast %99 : vector<8x8xbf16> to vector<1x1x8x8xbf16>
    tpu.vector_store %arg10[%c0_119, %c5, %c1_120, %c0_121], %102 {strides = array<i32>} : memref<2x10x10x8xbf16, #tpu.memory_space<vmem>>, vector<1x1x8x8xbf16>,
    %103 = vector.extract_strided_slice %82 {offsets = [40, 0], sizes = [8, 8], strides = [1, 1]} : vector<128x8xbf16> to vector<8x8xbf16>
    %c0_122 = arith.constant 0 : index
    %c6 = arith.constant 6 : index
    %c1_123 = arith.constant 1 : index
    %c0_124 = arith.constant 0 : index
    %104 = vector.load %arg10[%c0_122, %c6, %c1_123, %c0_124] : memref<2x10x10x8xbf16, #tpu.memory_space<vmem>>, vector<1x1x8x8xbf16>
    %105 = vector.shape_cast %104 : vector<1x1x8x8xbf16> to vector<8x8xbf16>
    %106 = vector.shape_cast %103 : vector<8x8xbf16> to vector<1x1x8x8xbf16>
    tpu.vector_store %arg10[%c0_122, %c6, %c1_123, %c0_124], %106 {strides = array<i32>} : memref<2x10x10x8xbf16, #tpu.memory_space<vmem>>, vector<1x1x8x8xbf16>,
    %107 = vector.extract_strided_slice %82 {offsets = [48, 0], sizes = [8, 8], strides = [1, 1]} : vector<128x8xbf16> to vector<8x8xbf16>
    %c0_125 = arith.constant 0 : index
    %c7 = arith.constant 7 : index
    %c1_126 = arith.constant 1 : index
    %c0_127 = arith.constant 0 : index
    %108 = vector.load %arg10[%c0_125, %c7, %c1_126, %c0_127] : memref<2x10x10x8xbf16, #tpu.memory_space<vmem>>, vector<1x1x8x8xbf16>
    %109 = vector.shape_cast %108 : vector<1x1x8x8xbf16> to vector<8x8xbf16>
    %110 = vector.shape_cast %107 : vector<8x8xbf16> to vector<1x1x8x8xbf16>
    tpu.vector_store %arg10[%c0_125, %c7, %c1_126, %c0_127], %110 {strides = array<i32>} : memref<2x10x10x8xbf16, #tpu.memory_space<vmem>>, vector<1x1x8x8xbf16>,
    %111 = vector.extract_strided_slice %82 {offsets = [56, 0], sizes = [8, 8], strides = [1, 1]} : vector<128x8xbf16> to vector<8x8xbf16>
    %c0_128 = arith.constant 0 : index
    %c8_129 = arith.constant 8 : index
    %c1_130 = arith.constant 1 : index
    %c0_131 = arith.constant 0 : index
    %112 = vector.load %arg10[%c0_128, %c8_129, %c1_130, %c0_131] : memref<2x10x10x8xbf16, #tpu.memory_space<vmem>>, vector<1x1x8x8xbf16>
    %113 = vector.shape_cast %112 : vector<1x1x8x8xbf16> to vector<8x8xbf16>
    %114 = vector.shape_cast %111 : vector<8x8xbf16> to vector<1x1x8x8xbf16>
    tpu.vector_store %arg10[%c0_128, %c8_129, %c1_130, %c0_131], %114 {strides = array<i32>} : memref<2x10x10x8xbf16, #tpu.memory_space<vmem>>, vector<1x1x8x8xbf16>,
    %115 = vector.extract_strided_slice %82 {offsets = [64, 0], sizes = [8, 8], strides = [1, 1]} : vector<128x8xbf16> to vector<8x8xbf16>
    %c1_132 = arith.constant 1 : index
    %c1_133 = arith.constant 1 : index
    %c1_134 = arith.constant 1 : index
    %c0_135 = arith.constant 0 : index
    %116 = vector.load %arg10[%c1_132, %c1_133, %c1_134, %c0_135] : memref<2x10x10x8xbf16, #tpu.memory_space<vmem>>, vector<1x1x8x8xbf16>
    %117 = vector.shape_cast %116 : vector<1x1x8x8xbf16> to vector<8x8xbf16>
    %118 = vector.shape_cast %115 : vector<8x8xbf16> to vector<1x1x8x8xbf16>
    tpu.vector_store %arg10[%c1_132, %c1_133, %c1_134, %c0_135], %118 {strides = array<i32>} : memref<2x10x10x8xbf16, #tpu.memory_space<vmem>>, vector<1x1x8x8xbf16>,
    %119 = vector.extract_strided_slice %82 {offsets = [72, 0], sizes = [8, 8], strides = [1, 1]} : vector<128x8xbf16> to vector<8x8xbf16>
    %c1_136 = arith.constant 1 : index
    %c2_137 = arith.constant 2 : index
    %c1_138 = arith.constant 1 : index
    %c0_139 = arith.constant 0 : index
    %120 = vector.load %arg10[%c1_136, %c2_137, %c1_138, %c0_139] : memref<2x10x10x8xbf16, #tpu.memory_space<vmem>>, vector<1x1x8x8xbf16>
    %121 = vector.shape_cast %120 : vector<1x1x8x8xbf16> to vector<8x8xbf16>
    %122 = vector.shape_cast %119 : vector<8x8xbf16> to vector<1x1x8x8xbf16>
    tpu.vector_store %arg10[%c1_136, %c2_137, %c1_138, %c0_139], %122 {strides = array<i32>} : memref<2x10x10x8xbf16, #tpu.memory_space<vmem>>, vector<1x1x8x8xbf16>,
    %123 = vector.extract_strided_slice %82 {offsets = [80, 0], sizes = [8, 8], strides = [1, 1]} : vector<128x8xbf16> to vector<8x8xbf16>
    %c1_140 = arith.constant 1 : index
    %c3_141 = arith.constant 3 : index
    %c1_142 = arith.constant 1 : index
    %c0_143 = arith.constant 0 : index
    %124 = vector.load %arg10[%c1_140, %c3_141, %c1_142, %c0_143] : memref<2x10x10x8xbf16, #tpu.memory_space<vmem>>, vector<1x1x8x8xbf16>
    %125 = vector.shape_cast %124 : vector<1x1x8x8xbf16> to vector<8x8xbf16>
    %126 = vector.shape_cast %123 : vector<8x8xbf16> to vector<1x1x8x8xbf16>
    tpu.vector_store %arg10[%c1_140, %c3_141, %c1_142, %c0_143], %126 {strides = array<i32>} : memref<2x10x10x8xbf16, #tpu.memory_space<vmem>>, vector<1x1x8x8xbf16>,
    %127 = vector.extract_strided_slice %82 {offsets = [88, 0], sizes = [8, 8], strides = [1, 1]} : vector<128x8xbf16> to vector<8x8xbf16>
    %c1_144 = arith.constant 1 : index
    %c4_145 = arith.constant 4 : index
    %c1_146 = arith.constant 1 : index
    %c0_147 = arith.constant 0 : index
    %128 = vector.load %arg10[%c1_144, %c4_145, %c1_146, %c0_147] : memref<2x10x10x8xbf16, #tpu.memory_space<vmem>>, vector<1x1x8x8xbf16>
    %129 = vector.shape_cast %128 : vector<1x1x8x8xbf16> to vector<8x8xbf16>
    %130 = vector.shape_cast %127 : vector<8x8xbf16> to vector<1x1x8x8xbf16>
    tpu.vector_store %arg10[%c1_144, %c4_145, %c1_146, %c0_147], %130 {strides = array<i32>} : memref<2x10x10x8xbf16, #tpu.memory_space<vmem>>, vector<1x1x8x8xbf16>,
    %131 = vector.extract_strided_slice %82 {offsets = [96, 0], sizes = [8, 8], strides = [1, 1]} : vector<128x8xbf16> to vector<8x8xbf16>
    %c1_148 = arith.constant 1 : index
    %c5_149 = arith.constant 5 : index
    %c1_150 = arith.constant 1 : index
    %c0_151 = arith.constant 0 : index
    %132 = vector.load %arg10[%c1_148, %c5_149, %c1_150, %c0_151] : memref<2x10x10x8xbf16, #tpu.memory_space<vmem>>, vector<1x1x8x8xbf16>
    %133 = vector.shape_cast %132 : vector<1x1x8x8xbf16> to vector<8x8xbf16>
    %134 = vector.shape_cast %131 : vector<8x8xbf16> to vector<1x1x8x8xbf16>
    tpu.vector_store %arg10[%c1_148, %c5_149, %c1_150, %c0_151], %134 {strides = array<i32>} : memref<2x10x10x8xbf16, #tpu.memory_space<vmem>>, vector<1x1x8x8xbf16>,
    %135 = vector.extract_strided_slice %82 {offsets = [104, 0], sizes = [8, 8], strides = [1, 1]} : vector<128x8xbf16> to vector<8x8xbf16>
    %c1_152 = arith.constant 1 : index
    %c6_153 = arith.constant 6 : index
    %c1_154 = arith.constant 1 : index
    %c0_155 = arith.constant 0 : index
    %136 = vector.load %arg10[%c1_152, %c6_153, %c1_154, %c0_155] : memref<2x10x10x8xbf16, #tpu.memory_space<vmem>>, vector<1x1x8x8xbf16>
    %137 = vector.shape_cast %136 : vector<1x1x8x8xbf16> to vector<8x8xbf16>
    %138 = vector.shape_cast %135 : vector<8x8xbf16> to vector<1x1x8x8xbf16>
    tpu.vector_store %arg10[%c1_152, %c6_153, %c1_154, %c0_155], %138 {strides = array<i32>} : memref<2x10x10x8xbf16, #tpu.memory_space<vmem>>, vector<1x1x8x8xbf16>,
    %139 = vector.extract_strided_slice %82 {offsets = [112, 0], sizes = [8, 8], strides = [1, 1]} : vector<128x8xbf16> to vector<8x8xbf16>
    %c1_156 = arith.constant 1 : index
    %c7_157 = arith.constant 7 : index
    %c1_158 = arith.constant 1 : index
    %c0_159 = arith.constant 0 : index
    %140 = vector.load %arg10[%c1_156, %c7_157, %c1_158, %c0_159] : memref<2x10x10x8xbf16, #tpu.memory_space<vmem>>, vector<1x1x8x8xbf16>
    %141 = vector.shape_cast %140 : vector<1x1x8x8xbf16> to vector<8x8xbf16>
    %142 = vector.shape_cast %139 : vector<8x8xbf16> to vector<1x1x8x8xbf16>
    tpu.vector_store %arg10[%c1_156, %c7_157, %c1_158, %c0_159], %142 {strides = array<i32>} : memref<2x10x10x8xbf16, #tpu.memory_space<vmem>>, vector<1x1x8x8xbf16>,
    %143 = vector.extract_strided_slice %82 {offsets = [120, 0], sizes = [8, 8], strides = [1, 1]} : vector<128x8xbf16> to vector<8x8xbf16>
    %c1_160 = arith.constant 1 : index
    %c8_161 = arith.constant 8 : index
    %c1_162 = arith.constant 1 : index
    %c0_163 = arith.constant 0 : index
    %144 = vector.load %arg10[%c1_160, %c8_161, %c1_162, %c0_163] : memref<2x10x10x8xbf16, #tpu.memory_space<vmem>>, vector<1x1x8x8xbf16>
    %145 = vector.shape_cast %144 : vector<1x1x8x8xbf16> to vector<8x8xbf16>
    %146 = vector.shape_cast %143 : vector<8x8xbf16> to vector<1x1x8x8xbf16>
    tpu.vector_store %arg10[%c1_160, %c8_161, %c1_162, %c0_163], %146 {strides = array<i32>} : memref<2x10x10x8xbf16, #tpu.memory_space<vmem>>, vector<1x1x8x8xbf16>,
    %c0_164 = arith.constant 0 : index
    %c0_165 = arith.constant 0 : index
    %c0_166 = arith.constant 0 : index
    %c0_167 = arith.constant 0 : index
    %147 = vector.load %arg10[%c0_164, %c0_165, %c0_166, %c0_167] : memref<2x10x10x8xbf16, #tpu.memory_space<vmem>>, vector<1x8x8x8xbf16>
    %148 = vector.shape_cast %147 : vector<1x8x8x8xbf16> to vector<8x8x8xbf16>
    %149 = vector.shape_cast %148 : vector<8x8x8xbf16> to vector<64x8xbf16>
    %c0_168 = arith.constant 0 : index
    %c0_169 = arith.constant 0 : index
    %150 = vector.load %arg9[%c0_168, %c0_169] : memref<128x72xbf16, #tpu.memory_space<vmem>>, vector<64x8xbf16>
    tpu.vector_store %arg9[%c0_168, %c0_169], %149 {strides = array<i32>} : memref<128x72xbf16, #tpu.memory_space<vmem>>, vector<64x8xbf16>,
    %c0_170 = arith.constant 0 : index
    %c0_171 = arith.constant 0 : index
    %c1_172 = arith.constant 1 : index
    %c0_173 = arith.constant 0 : index
    %151 = vector.load %arg10[%c0_170, %c0_171, %c1_172, %c0_173] : memref<2x10x10x8xbf16, #tpu.memory_space<vmem>>, vector<1x8x8x8xbf16>
    %152 = vector.shape_cast %151 : vector<1x8x8x8xbf16> to vector<8x8x8xbf16>
    %153 = vector.shape_cast %152 : vector<8x8x8xbf16> to vector<64x8xbf16>
    %c0_174 = arith.constant 0 : index
    %c8_175 = arith.constant 8 : index
    %154 = vector.load %arg9[%c0_174, %c8_175] : memref<128x72xbf16, #tpu.memory_space<vmem>>, vector<64x8xbf16>
    tpu.vector_store %arg9[%c0_174, %c8_175], %153 {strides = array<i32>} : memref<128x72xbf16, #tpu.memory_space<vmem>>, vector<64x8xbf16>,
    %c0_176 = arith.constant 0 : index
    %c0_177 = arith.constant 0 : index
    %c2_178 = arith.constant 2 : index
    %c0_179 = arith.constant 0 : index
    %155 = vector.load %arg10[%c0_176, %c0_177, %c2_178, %c0_179] : memref<2x10x10x8xbf16, #tpu.memory_space<vmem>>, vector<1x8x8x8xbf16>
    %156 = vector.shape_cast %155 : vector<1x8x8x8xbf16> to vector<8x8x8xbf16>
    %157 = vector.shape_cast %156 : vector<8x8x8xbf16> to vector<64x8xbf16>
    %c0_180 = arith.constant 0 : index
    %c16_181 = arith.constant 16 : index
    %158 = vector.load %arg9[%c0_180, %c16_181] : memref<128x72xbf16, #tpu.memory_space<vmem>>, vector<64x8xbf16>
    tpu.vector_store %arg9[%c0_180, %c16_181], %157 {strides = array<i32>} : memref<128x72xbf16, #tpu.memory_space<vmem>>, vector<64x8xbf16>,
    %c0_182 = arith.constant 0 : index
    %c1_183 = arith.constant 1 : index
    %c0_184 = arith.constant 0 : index
    %c0_185 = arith.constant 0 : index
    %159 = vector.load %arg10[%c0_182, %c1_183, %c0_184, %c0_185] : memref<2x10x10x8xbf16, #tpu.memory_space<vmem>>, vector<1x8x8x8xbf16>
    %160 = vector.shape_cast %159 : vector<1x8x8x8xbf16> to vector<8x8x8xbf16>
    %161 = vector.shape_cast %160 : vector<8x8x8xbf16> to vector<64x8xbf16>
    %c0_186 = arith.constant 0 : index
    %c24_187 = arith.constant 24 : index
    %162 = vector.load %arg9[%c0_186, %c24_187] : memref<128x72xbf16, #tpu.memory_space<vmem>>, vector<64x8xbf16>
    tpu.vector_store %arg9[%c0_186, %c24_187], %161 {strides = array<i32>} : memref<128x72xbf16, #tpu.memory_space<vmem>>, vector<64x8xbf16>,
    %c0_188 = arith.constant 0 : index
    %c1_189 = arith.constant 1 : index
    %c1_190 = arith.constant 1 : index
    %c0_191 = arith.constant 0 : index
    %163 = vector.load %arg10[%c0_188, %c1_189, %c1_190, %c0_191] : memref<2x10x10x8xbf16, #tpu.memory_space<vmem>>, vector<1x8x8x8xbf16>
    %164 = vector.shape_cast %163 : vector<1x8x8x8xbf16> to vector<8x8x8xbf16>
    %165 = vector.shape_cast %164 : vector<8x8x8xbf16> to vector<64x8xbf16>
    %c0_192 = arith.constant 0 : index
    %c32_193 = arith.constant 32 : index
    %166 = vector.load %arg9[%c0_192, %c32_193] : memref<128x72xbf16, #tpu.memory_space<vmem>>, vector<64x8xbf16>
    tpu.vector_store %arg9[%c0_192, %c32_193], %165 {strides = array<i32>} : memref<128x72xbf16, #tpu.memory_space<vmem>>, vector<64x8xbf16>,
    %c0_194 = arith.constant 0 : index
    %c1_195 = arith.constant 1 : index
    %c2_196 = arith.constant 2 : index
    %c0_197 = arith.constant 0 : index
    %167 = vector.load %arg10[%c0_194, %c1_195, %c2_196, %c0_197] : memref<2x10x10x8xbf16, #tpu.memory_space<vmem>>, vector<1x8x8x8xbf16>
    %168 = vector.shape_cast %167 : vector<1x8x8x8xbf16> to vector<8x8x8xbf16>
    %169 = vector.shape_cast %168 : vector<8x8x8xbf16> to vector<64x8xbf16>
    %c0_198 = arith.constant 0 : index
    %c40 = arith.constant 40 : index
    %170 = vector.load %arg9[%c0_198, %c40] : memref<128x72xbf16, #tpu.memory_space<vmem>>, vector<64x8xbf16>
    tpu.vector_store %arg9[%c0_198, %c40], %169 {strides = array<i32>} : memref<128x72xbf16, #tpu.memory_space<vmem>>, vector<64x8xbf16>,
    %c0_199 = arith.constant 0 : index
    %c2_200 = arith.constant 2 : index
    %c0_201 = arith.constant 0 : index
    %c0_202 = arith.constant 0 : index
    %171 = vector.load %arg10[%c0_199, %c2_200, %c0_201, %c0_202] : memref<2x10x10x8xbf16, #tpu.memory_space<vmem>>, vector<1x8x8x8xbf16>
    %172 = vector.shape_cast %171 : vector<1x8x8x8xbf16> to vector<8x8x8xbf16>
    %173 = vector.shape_cast %172 : vector<8x8x8xbf16> to vector<64x8xbf16>
    %c0_203 = arith.constant 0 : index
    %c48 = arith.constant 48 : index
    %174 = vector.load %arg9[%c0_203, %c48] : memref<128x72xbf16, #tpu.memory_space<vmem>>, vector<64x8xbf16>
    tpu.vector_store %arg9[%c0_203, %c48], %173 {strides = array<i32>} : memref<128x72xbf16, #tpu.memory_space<vmem>>, vector<64x8xbf16>,
    %c0_204 = arith.constant 0 : index
    %c2_205 = arith.constant 2 : index
    %c1_206 = arith.constant 1 : index
    %c0_207 = arith.constant 0 : index
    %175 = vector.load %arg10[%c0_204, %c2_205, %c1_206, %c0_207] : memref<2x10x10x8xbf16, #tpu.memory_space<vmem>>, vector<1x8x8x8xbf16>
    %176 = vector.shape_cast %175 : vector<1x8x8x8xbf16> to vector<8x8x8xbf16>
    %177 = vector.shape_cast %176 : vector<8x8x8xbf16> to vector<64x8xbf16>
    %c0_208 = arith.constant 0 : index
    %c56 = arith.constant 56 : index
    %178 = vector.load %arg9[%c0_208, %c56] : memref<128x72xbf16, #tpu.memory_space<vmem>>, vector<64x8xbf16>
    tpu.vector_store %arg9[%c0_208, %c56], %177 {strides = array<i32>} : memref<128x72xbf16, #tpu.memory_space<vmem>>, vector<64x8xbf16>,
    %c0_209 = arith.constant 0 : index
    %c2_210 = arith.constant 2 : index
    %c2_211 = arith.constant 2 : index
    %c0_212 = arith.constant 0 : index
    %179 = vector.load %arg10[%c0_209, %c2_210, %c2_211, %c0_212] : memref<2x10x10x8xbf16, #tpu.memory_space<vmem>>, vector<1x8x8x8xbf16>
    %180 = vector.shape_cast %179 : vector<1x8x8x8xbf16> to vector<8x8x8xbf16>
    %181 = vector.shape_cast %180 : vector<8x8x8xbf16> to vector<64x8xbf16>
    %c0_213 = arith.constant 0 : index
    %c64_214 = arith.constant 64 : index
    %182 = vector.load %arg9[%c0_213, %c64_214] : memref<128x72xbf16, #tpu.memory_space<vmem>>, vector<64x8xbf16>
    tpu.vector_store %arg9[%c0_213, %c64_214], %181 {strides = array<i32>} : memref<128x72xbf16, #tpu.memory_space<vmem>>, vector<64x8xbf16>,
    %c1_215 = arith.constant 1 : index
    %c0_216 = arith.constant 0 : index
    %c0_217 = arith.constant 0 : index
    %c0_218 = arith.constant 0 : index
    %183 = vector.load %arg10[%c1_215, %c0_216, %c0_217, %c0_218] : memref<2x10x10x8xbf16, #tpu.memory_space<vmem>>, vector<1x8x8x8xbf16>
    %184 = vector.shape_cast %183 : vector<1x8x8x8xbf16> to vector<8x8x8xbf16>
    %185 = vector.shape_cast %184 : vector<8x8x8xbf16> to vector<64x8xbf16>
    %c64_219 = arith.constant 64 : index
    %c0_220 = arith.constant 0 : index
    %186 = vector.load %arg9[%c64_219, %c0_220] : memref<128x72xbf16, #tpu.memory_space<vmem>>, vector<64x8xbf16>
    tpu.vector_store %arg9[%c64_219, %c0_220], %185 {strides = array<i32>} : memref<128x72xbf16, #tpu.memory_space<vmem>>, vector<64x8xbf16>,
    %c1_221 = arith.constant 1 : index
    %c0_222 = arith.constant 0 : index
    %c1_223 = arith.constant 1 : index
    %c0_224 = arith.constant 0 : index
    %187 = vector.load %arg10[%c1_221, %c0_222, %c1_223, %c0_224] : memref<2x10x10x8xbf16, #tpu.memory_space<vmem>>, vector<1x8x8x8xbf16>
    %188 = vector.shape_cast %187 : vector<1x8x8x8xbf16> to vector<8x8x8xbf16>
    %189 = vector.shape_cast %188 : vector<8x8x8xbf16> to vector<64x8xbf16>
    %c64_225 = arith.constant 64 : index
    %c8_226 = arith.constant 8 : index
    %190 = vector.load %arg9[%c64_225, %c8_226] : memref<128x72xbf16, #tpu.memory_space<vmem>>, vector<64x8xbf16>
    tpu.vector_store %arg9[%c64_225, %c8_226], %189 {strides = array<i32>} : memref<128x72xbf16, #tpu.memory_space<vmem>>, vector<64x8xbf16>,
    %c1_227 = arith.constant 1 : index
    %c0_228 = arith.constant 0 : index
    %c2_229 = arith.constant 2 : index
    %c0_230 = arith.constant 0 : index
    %191 = vector.load %arg10[%c1_227, %c0_228, %c2_229, %c0_230] : memref<2x10x10x8xbf16, #tpu.memory_space<vmem>>, vector<1x8x8x8xbf16>
    %192 = vector.shape_cast %191 : vector<1x8x8x8xbf16> to vector<8x8x8xbf16>
    %193 = vector.shape_cast %192 : vector<8x8x8xbf16> to vector<64x8xbf16>
    %c64_231 = arith.constant 64 : index
    %c16_232 = arith.constant 16 : index
    %194 = vector.load %arg9[%c64_231, %c16_232] : memref<128x72xbf16, #tpu.memory_space<vmem>>, vector<64x8xbf16>
    tpu.vector_store %arg9[%c64_231, %c16_232], %193 {strides = array<i32>} : memref<128x72xbf16, #tpu.memory_space<vmem>>, vector<64x8xbf16>,
    %c1_233 = arith.constant 1 : index
    %c1_234 = arith.constant 1 : index
    %c0_235 = arith.constant 0 : index
    %c0_236 = arith.constant 0 : index
    %195 = vector.load %arg10[%c1_233, %c1_234, %c0_235, %c0_236] : memref<2x10x10x8xbf16, #tpu.memory_space<vmem>>, vector<1x8x8x8xbf16>
    %196 = vector.shape_cast %195 : vector<1x8x8x8xbf16> to vector<8x8x8xbf16>
    %197 = vector.shape_cast %196 : vector<8x8x8xbf16> to vector<64x8xbf16>
    %c64_237 = arith.constant 64 : index
    %c24_238 = arith.constant 24 : index
    %198 = vector.load %arg9[%c64_237, %c24_238] : memref<128x72xbf16, #tpu.memory_space<vmem>>, vector<64x8xbf16>
    tpu.vector_store %arg9[%c64_237, %c24_238], %197 {strides = array<i32>} : memref<128x72xbf16, #tpu.memory_space<vmem>>, vector<64x8xbf16>,
    %c1_239 = arith.constant 1 : index
    %c1_240 = arith.constant 1 : index
    %c1_241 = arith.constant 1 : index
    %c0_242 = arith.constant 0 : index
    %199 = vector.load %arg10[%c1_239, %c1_240, %c1_241, %c0_242] : memref<2x10x10x8xbf16, #tpu.memory_space<vmem>>, vector<1x8x8x8xbf16>
    %200 = vector.shape_cast %199 : vector<1x8x8x8xbf16> to vector<8x8x8xbf16>
    %201 = vector.shape_cast %200 : vector<8x8x8xbf16> to vector<64x8xbf16>
    %c64_243 = arith.constant 64 : index
    %c32_244 = arith.constant 32 : index
    %202 = vector.load %arg9[%c64_243, %c32_244] : memref<128x72xbf16, #tpu.memory_space<vmem>>, vector<64x8xbf16>
    tpu.vector_store %arg9[%c64_243, %c32_244], %201 {strides = array<i32>} : memref<128x72xbf16, #tpu.memory_space<vmem>>, vector<64x8xbf16>,
    %c1_245 = arith.constant 1 : index
    %c1_246 = arith.constant 1 : index
    %c2_247 = arith.constant 2 : index
    %c0_248 = arith.constant 0 : index
    %203 = vector.load %arg10[%c1_245, %c1_246, %c2_247, %c0_248] : memref<2x10x10x8xbf16, #tpu.memory_space<vmem>>, vector<1x8x8x8xbf16>
    %204 = vector.shape_cast %203 : vector<1x8x8x8xbf16> to vector<8x8x8xbf16>
    %205 = vector.shape_cast %204 : vector<8x8x8xbf16> to vector<64x8xbf16>
    %c64_249 = arith.constant 64 : index
    %c40_250 = arith.constant 40 : index
    %206 = vector.load %arg9[%c64_249, %c40_250] : memref<128x72xbf16, #tpu.memory_space<vmem>>, vector<64x8xbf16>
    tpu.vector_store %arg9[%c64_249, %c40_250], %205 {strides = array<i32>} : memref<128x72xbf16, #tpu.memory_space<vmem>>, vector<64x8xbf16>,
    %c1_251 = arith.constant 1 : index
    %c2_252 = arith.constant 2 : index
    %c0_253 = arith.constant 0 : index
    %c0_254 = arith.constant 0 : index
    %207 = vector.load %arg10[%c1_251, %c2_252, %c0_253, %c0_254] : memref<2x10x10x8xbf16, #tpu.memory_space<vmem>>, vector<1x8x8x8xbf16>
    %208 = vector.shape_cast %207 : vector<1x8x8x8xbf16> to vector<8x8x8xbf16>
    %209 = vector.shape_cast %208 : vector<8x8x8xbf16> to vector<64x8xbf16>
    %c64_255 = arith.constant 64 : index
    %c48_256 = arith.constant 48 : index
    %210 = vector.load %arg9[%c64_255, %c48_256] : memref<128x72xbf16, #tpu.memory_space<vmem>>, vector<64x8xbf16>
    tpu.vector_store %arg9[%c64_255, %c48_256], %209 {strides = array<i32>} : memref<128x72xbf16, #tpu.memory_space<vmem>>, vector<64x8xbf16>,
    %c1_257 = arith.constant 1 : index
    %c2_258 = arith.constant 2 : index
    %c1_259 = arith.constant 1 : index
    %c0_260 = arith.constant 0 : index
    %211 = vector.load %arg10[%c1_257, %c2_258, %c1_259, %c0_260] : memref<2x10x10x8xbf16, #tpu.memory_space<vmem>>, vector<1x8x8x8xbf16>
    %212 = vector.shape_cast %211 : vector<1x8x8x8xbf16> to vector<8x8x8xbf16>
    %213 = vector.shape_cast %212 : vector<8x8x8xbf16> to vector<64x8xbf16>
    %c64_261 = arith.constant 64 : index
    %c56_262 = arith.constant 56 : index
    %214 = vector.load %arg9[%c64_261, %c56_262] : memref<128x72xbf16, #tpu.memory_space<vmem>>, vector<64x8xbf16>
    tpu.vector_store %arg9[%c64_261, %c56_262], %213 {strides = array<i32>} : memref<128x72xbf16, #tpu.memory_space<vmem>>, vector<64x8xbf16>,
    %c1_263 = arith.constant 1 : index
    %c2_264 = arith.constant 2 : index
    %c2_265 = arith.constant 2 : index
    %c0_266 = arith.constant 0 : index
    %215 = vector.load %arg10[%c1_263, %c2_264, %c2_265, %c0_266] : memref<2x10x10x8xbf16, #tpu.memory_space<vmem>>, vector<1x8x8x8xbf16>
    %216 = vector.shape_cast %215 : vector<1x8x8x8xbf16> to vector<8x8x8xbf16>
    %217 = vector.shape_cast %216 : vector<8x8x8xbf16> to vector<64x8xbf16>
    %c64_267 = arith.constant 64 : index
    %c64_268 = arith.constant 64 : index
    %218 = vector.load %arg9[%c64_267, %c64_268] : memref<128x72xbf16, #tpu.memory_space<vmem>>, vector<64x8xbf16>
    tpu.vector_store %arg9[%c64_267, %c64_268], %217 {strides = array<i32>} : memref<128x72xbf16, #tpu.memory_space<vmem>>, vector<64x8xbf16>,
    %c0_269 = arith.constant 0 : index
    %c0_270 = arith.constant 0 : index
    %219 = vector.load %arg9[%c0_269, %c0_270] : memref<128x72xbf16, #tpu.memory_space<vmem>>, vector<128x72xbf16>
    %c0_271 = arith.constant 0 : index
    %c0_272 = arith.constant 0 : index
    %220 = vector.load %arg4[%c0_271, %c0_272] : memref<72x8xbf16, #tpu.memory_space<vmem>>, vector<72x8xbf16>
    %cst_273 = arith.constant dense<0.000000e+00> : vector<128x8xf32>
    %221 = tpu.matmul %219, %220, %cst_273 {dimension_numbers = #tpu.dot_dimension_numbers<[1], [0], [0], [1], [0, 0, 1, 1], [], []>} : vector<128x72xbf16>, vector<72x8xbf16>, vector<128x8xf32> -> vector<128x8xf32>
    %c0_274 = arith.constant 0 : index
    %c0_275 = arith.constant 0 : index
    %222 = vector.load %arg5[%c0_274, %c0_275] : memref<1x8xf32, #tpu.memory_space<vmem>>, vector<1x8xf32>
    %223 = vector.broadcast %222 : vector<1x8xf32> to vector<128x8xf32>
    %224 = arith.addf %221, %223 : vector<128x8xf32>
    %cst_276 = arith.constant 0.000000e+00 : f32
    %225 = vector.broadcast %cst_276 : f32 to vector<128x8xf32>
    %226 = arith.maximumf %224, %225 : vector<128x8xf32>
    %cst_277 = arith.constant 0.000000e+00 : bf16
    %227 = vector.broadcast %cst_277 : bf16 to vector<2x10x10x8xbf16>
    %c0_278 = arith.constant 0 : index
    %c0_279 = arith.constant 0 : index
    %c0_280 = arith.constant 0 : index
    %c0_281 = arith.constant 0 : index
    %228 = vector.load %arg11[%c0_278, %c0_279, %c0_280, %c0_281] : memref<2x10x10x8xbf16, #tpu.memory_space<vmem>>, vector<2x10x10x8xbf16>
    tpu.vector_store %arg11[%c0_278, %c0_279, %c0_280, %c0_281], %227 {strides = array<i32>} : memref<2x10x10x8xbf16, #tpu.memory_space<vmem>>, vector<2x10x10x8xbf16>,
    %229 = arith.truncf %226 : vector<128x8xf32> to vector<128x8xbf16>
    %230 = vector.extract_strided_slice %229 {offsets = [0, 0], sizes = [8, 8], strides = [1, 1]} : vector<128x8xbf16> to vector<8x8xbf16>
    %c0_282 = arith.constant 0 : index
    %c1_283 = arith.constant 1 : index
    %c1_284 = arith.constant 1 : index
    %c0_285 = arith.constant 0 : index
    %231 = vector.load %arg11[%c0_282, %c1_283, %c1_284, %c0_285] : memref<2x10x10x8xbf16, #tpu.memory_space<vmem>>, vector<1x1x8x8xbf16>
    %232 = vector.shape_cast %231 : vector<1x1x8x8xbf16> to vector<8x8xbf16>
    %233 = vector.shape_cast %230 : vector<8x8xbf16> to vector<1x1x8x8xbf16>
    tpu.vector_store %arg11[%c0_282, %c1_283, %c1_284, %c0_285], %233 {strides = array<i32>} : memref<2x10x10x8xbf16, #tpu.memory_space<vmem>>, vector<1x1x8x8xbf16>,
    %234 = vector.extract_strided_slice %229 {offsets = [8, 0], sizes = [8, 8], strides = [1, 1]} : vector<128x8xbf16> to vector<8x8xbf16>
    %c0_286 = arith.constant 0 : index
    %c2_287 = arith.constant 2 : index
    %c1_288 = arith.constant 1 : index
    %c0_289 = arith.constant 0 : index
    %235 = vector.load %arg11[%c0_286, %c2_287, %c1_288, %c0_289] : memref<2x10x10x8xbf16, #tpu.memory_space<vmem>>, vector<1x1x8x8xbf16>
    %236 = vector.shape_cast %235 : vector<1x1x8x8xbf16> to vector<8x8xbf16>
    %237 = vector.shape_cast %234 : vector<8x8xbf16> to vector<1x1x8x8xbf16>
    tpu.vector_store %arg11[%c0_286, %c2_287, %c1_288, %c0_289], %237 {strides = array<i32>} : memref<2x10x10x8xbf16, #tpu.memory_space<vmem>>, vector<1x1x8x8xbf16>,
    %238 = vector.extract_strided_slice %229 {offsets = [16, 0], sizes = [8, 8], strides = [1, 1]} : vector<128x8xbf16> to vector<8x8xbf16>
    %c0_290 = arith.constant 0 : index
    %c3_291 = arith.constant 3 : index
    %c1_292 = arith.constant 1 : index
    %c0_293 = arith.constant 0 : index
    %239 = vector.load %arg11[%c0_290, %c3_291, %c1_292, %c0_293] : memref<2x10x10x8xbf16, #tpu.memory_space<vmem>>, vector<1x1x8x8xbf16>
    %240 = vector.shape_cast %239 : vector<1x1x8x8xbf16> to vector<8x8xbf16>
    %241 = vector.shape_cast %238 : vector<8x8xbf16> to vector<1x1x8x8xbf16>
    tpu.vector_store %arg11[%c0_290, %c3_291, %c1_292, %c0_293], %241 {strides = array<i32>} : memref<2x10x10x8xbf16, #tpu.memory_space<vmem>>, vector<1x1x8x8xbf16>,
    %242 = vector.extract_strided_slice %229 {offsets = [24, 0], sizes = [8, 8], strides = [1, 1]} : vector<128x8xbf16> to vector<8x8xbf16>
    %c0_294 = arith.constant 0 : index
    %c4_295 = arith.constant 4 : index
    %c1_296 = arith.constant 1 : index
    %c0_297 = arith.constant 0 : index
    %243 = vector.load %arg11[%c0_294, %c4_295, %c1_296, %c0_297] : memref<2x10x10x8xbf16, #tpu.memory_space<vmem>>, vector<1x1x8x8xbf16>
    %244 = vector.shape_cast %243 : vector<1x1x8x8xbf16> to vector<8x8xbf16>
    %245 = vector.shape_cast %242 : vector<8x8xbf16> to vector<1x1x8x8xbf16>
    tpu.vector_store %arg11[%c0_294, %c4_295, %c1_296, %c0_297], %245 {strides = array<i32>} : memref<2x10x10x8xbf16, #tpu.memory_space<vmem>>, vector<1x1x8x8xbf16>,
    %246 = vector.extract_strided_slice %229 {offsets = [32, 0], sizes = [8, 8], strides = [1, 1]} : vector<128x8xbf16> to vector<8x8xbf16>
    %c0_298 = arith.constant 0 : index
    %c5_299 = arith.constant 5 : index
    %c1_300 = arith.constant 1 : index
    %c0_301 = arith.constant 0 : index
    %247 = vector.load %arg11[%c0_298, %c5_299, %c1_300, %c0_301] : memref<2x10x10x8xbf16, #tpu.memory_space<vmem>>, vector<1x1x8x8xbf16>
    %248 = vector.shape_cast %247 : vector<1x1x8x8xbf16> to vector<8x8xbf16>
    %249 = vector.shape_cast %246 : vector<8x8xbf16> to vector<1x1x8x8xbf16>
    tpu.vector_store %arg11[%c0_298, %c5_299, %c1_300, %c0_301], %249 {strides = array<i32>} : memref<2x10x10x8xbf16, #tpu.memory_space<vmem>>, vector<1x1x8x8xbf16>,
    %250 = vector.extract_strided_slice %229 {offsets = [40, 0], sizes = [8, 8], strides = [1, 1]} : vector<128x8xbf16> to vector<8x8xbf16>
    %c0_302 = arith.constant 0 : index
    %c6_303 = arith.constant 6 : index
    %c1_304 = arith.constant 1 : index
    %c0_305 = arith.constant 0 : index
    %251 = vector.load %arg11[%c0_302, %c6_303, %c1_304, %c0_305] : memref<2x10x10x8xbf16, #tpu.memory_space<vmem>>, vector<1x1x8x8xbf16>
    %252 = vector.shape_cast %251 : vector<1x1x8x8xbf16> to vector<8x8xbf16>
    %253 = vector.shape_cast %250 : vector<8x8xbf16> to vector<1x1x8x8xbf16>
    tpu.vector_store %arg11[%c0_302, %c6_303, %c1_304, %c0_305], %253 {strides = array<i32>} : memref<2x10x10x8xbf16, #tpu.memory_space<vmem>>, vector<1x1x8x8xbf16>,
    %254 = vector.extract_strided_slice %229 {offsets = [48, 0], sizes = [8, 8], strides = [1, 1]} : vector<128x8xbf16> to vector<8x8xbf16>
    %c0_306 = arith.constant 0 : index
    %c7_307 = arith.constant 7 : index
    %c1_308 = arith.constant 1 : index
    %c0_309 = arith.constant 0 : index
    %255 = vector.load %arg11[%c0_306, %c7_307, %c1_308, %c0_309] : memref<2x10x10x8xbf16, #tpu.memory_space<vmem>>, vector<1x1x8x8xbf16>
    %256 = vector.shape_cast %255 : vector<1x1x8x8xbf16> to vector<8x8xbf16>
    %257 = vector.shape_cast %254 : vector<8x8xbf16> to vector<1x1x8x8xbf16>
    tpu.vector_store %arg11[%c0_306, %c7_307, %c1_308, %c0_309], %257 {strides = array<i32>} : memref<2x10x10x8xbf16, #tpu.memory_space<vmem>>, vector<1x1x8x8xbf16>,
    %258 = vector.extract_strided_slice %229 {offsets = [56, 0], sizes = [8, 8], strides = [1, 1]} : vector<128x8xbf16> to vector<8x8xbf16>
    %c0_310 = arith.constant 0 : index
    %c8_311 = arith.constant 8 : index
    %c1_312 = arith.constant 1 : index
    %c0_313 = arith.constant 0 : index
    %259 = vector.load %arg11[%c0_310, %c8_311, %c1_312, %c0_313] : memref<2x10x10x8xbf16, #tpu.memory_space<vmem>>, vector<1x1x8x8xbf16>
    %260 = vector.shape_cast %259 : vector<1x1x8x8xbf16> to vector<8x8xbf16>
    %261 = vector.shape_cast %258 : vector<8x8xbf16> to vector<1x1x8x8xbf16>
    tpu.vector_store %arg11[%c0_310, %c8_311, %c1_312, %c0_313], %261 {strides = array<i32>} : memref<2x10x10x8xbf16, #tpu.memory_space<vmem>>, vector<1x1x8x8xbf16>,
    %262 = vector.extract_strided_slice %229 {offsets = [64, 0], sizes = [8, 8], strides = [1, 1]} : vector<128x8xbf16> to vector<8x8xbf16>
    %c1_314 = arith.constant 1 : index
    %c1_315 = arith.constant 1 : index
    %c1_316 = arith.constant 1 : index
    %c0_317 = arith.constant 0 : index
    %263 = vector.load %arg11[%c1_314, %c1_315, %c1_316, %c0_317] : memref<2x10x10x8xbf16, #tpu.memory_space<vmem>>, vector<1x1x8x8xbf16>
    %264 = vector.shape_cast %263 : vector<1x1x8x8xbf16> to vector<8x8xbf16>
    %265 = vector.shape_cast %262 : vector<8x8xbf16> to vector<1x1x8x8xbf16>
    tpu.vector_store %arg11[%c1_314, %c1_315, %c1_316, %c0_317], %265 {strides = array<i32>} : memref<2x10x10x8xbf16, #tpu.memory_space<vmem>>, vector<1x1x8x8xbf16>,
    %266 = vector.extract_strided_slice %229 {offsets = [72, 0], sizes = [8, 8], strides = [1, 1]} : vector<128x8xbf16> to vector<8x8xbf16>
    %c1_318 = arith.constant 1 : index
    %c2_319 = arith.constant 2 : index
    %c1_320 = arith.constant 1 : index
    %c0_321 = arith.constant 0 : index
    %267 = vector.load %arg11[%c1_318, %c2_319, %c1_320, %c0_321] : memref<2x10x10x8xbf16, #tpu.memory_space<vmem>>, vector<1x1x8x8xbf16>
    %268 = vector.shape_cast %267 : vector<1x1x8x8xbf16> to vector<8x8xbf16>
    %269 = vector.shape_cast %266 : vector<8x8xbf16> to vector<1x1x8x8xbf16>
    tpu.vector_store %arg11[%c1_318, %c2_319, %c1_320, %c0_321], %269 {strides = array<i32>} : memref<2x10x10x8xbf16, #tpu.memory_space<vmem>>, vector<1x1x8x8xbf16>,
    %270 = vector.extract_strided_slice %229 {offsets = [80, 0], sizes = [8, 8], strides = [1, 1]} : vector<128x8xbf16> to vector<8x8xbf16>
    %c1_322 = arith.constant 1 : index
    %c3_323 = arith.constant 3 : index
    %c1_324 = arith.constant 1 : index
    %c0_325 = arith.constant 0 : index
    %271 = vector.load %arg11[%c1_322, %c3_323, %c1_324, %c0_325] : memref<2x10x10x8xbf16, #tpu.memory_space<vmem>>, vector<1x1x8x8xbf16>
    %272 = vector.shape_cast %271 : vector<1x1x8x8xbf16> to vector<8x8xbf16>
    %273 = vector.shape_cast %270 : vector<8x8xbf16> to vector<1x1x8x8xbf16>
    tpu.vector_store %arg11[%c1_322, %c3_323, %c1_324, %c0_325], %273 {strides = array<i32>} : memref<2x10x10x8xbf16, #tpu.memory_space<vmem>>, vector<1x1x8x8xbf16>,
    %274 = vector.extract_strided_slice %229 {offsets = [88, 0], sizes = [8, 8], strides = [1, 1]} : vector<128x8xbf16> to vector<8x8xbf16>
    %c1_326 = arith.constant 1 : index
    %c4_327 = arith.constant 4 : index
    %c1_328 = arith.constant 1 : index
    %c0_329 = arith.constant 0 : index
    %275 = vector.load %arg11[%c1_326, %c4_327, %c1_328, %c0_329] : memref<2x10x10x8xbf16, #tpu.memory_space<vmem>>, vector<1x1x8x8xbf16>
    %276 = vector.shape_cast %275 : vector<1x1x8x8xbf16> to vector<8x8xbf16>
    %277 = vector.shape_cast %274 : vector<8x8xbf16> to vector<1x1x8x8xbf16>
    tpu.vector_store %arg11[%c1_326, %c4_327, %c1_328, %c0_329], %277 {strides = array<i32>} : memref<2x10x10x8xbf16, #tpu.memory_space<vmem>>, vector<1x1x8x8xbf16>,
    %278 = vector.extract_strided_slice %229 {offsets = [96, 0], sizes = [8, 8], strides = [1, 1]} : vector<128x8xbf16> to vector<8x8xbf16>
    %c1_330 = arith.constant 1 : index
    %c5_331 = arith.constant 5 : index
    %c1_332 = arith.constant 1 : index
    %c0_333 = arith.constant 0 : index
    %279 = vector.load %arg11[%c1_330, %c5_331, %c1_332, %c0_333] : memref<2x10x10x8xbf16, #tpu.memory_space<vmem>>, vector<1x1x8x8xbf16>
    %280 = vector.shape_cast %279 : vector<1x1x8x8xbf16> to vector<8x8xbf16>
    %281 = vector.shape_cast %278 : vector<8x8xbf16> to vector<1x1x8x8xbf16>
    tpu.vector_store %arg11[%c1_330, %c5_331, %c1_332, %c0_333], %281 {strides = array<i32>} : memref<2x10x10x8xbf16, #tpu.memory_space<vmem>>, vector<1x1x8x8xbf16>,
    %282 = vector.extract_strided_slice %229 {offsets = [104, 0], sizes = [8, 8], strides = [1, 1]} : vector<128x8xbf16> to vector<8x8xbf16>
    %c1_334 = arith.constant 1 : index
    %c6_335 = arith.constant 6 : index
    %c1_336 = arith.constant 1 : index
    %c0_337 = arith.constant 0 : index
    %283 = vector.load %arg11[%c1_334, %c6_335, %c1_336, %c0_337] : memref<2x10x10x8xbf16, #tpu.memory_space<vmem>>, vector<1x1x8x8xbf16>
    %284 = vector.shape_cast %283 : vector<1x1x8x8xbf16> to vector<8x8xbf16>
    %285 = vector.shape_cast %282 : vector<8x8xbf16> to vector<1x1x8x8xbf16>
    tpu.vector_store %arg11[%c1_334, %c6_335, %c1_336, %c0_337], %285 {strides = array<i32>} : memref<2x10x10x8xbf16, #tpu.memory_space<vmem>>, vector<1x1x8x8xbf16>,
    %286 = vector.extract_strided_slice %229 {offsets = [112, 0], sizes = [8, 8], strides = [1, 1]} : vector<128x8xbf16> to vector<8x8xbf16>
    %c1_338 = arith.constant 1 : index
    %c7_339 = arith.constant 7 : index
    %c1_340 = arith.constant 1 : index
    %c0_341 = arith.constant 0 : index
    %287 = vector.load %arg11[%c1_338, %c7_339, %c1_340, %c0_341] : memref<2x10x10x8xbf16, #tpu.memory_space<vmem>>, vector<1x1x8x8xbf16>
    %288 = vector.shape_cast %287 : vector<1x1x8x8xbf16> to vector<8x8xbf16>
    %289 = vector.shape_cast %286 : vector<8x8xbf16> to vector<1x1x8x8xbf16>
    tpu.vector_store %arg11[%c1_338, %c7_339, %c1_340, %c0_341], %289 {strides = array<i32>} : memref<2x10x10x8xbf16, #tpu.memory_space<vmem>>, vector<1x1x8x8xbf16>,
    %290 = vector.extract_strided_slice %229 {offsets = [120, 0], sizes = [8, 8], strides = [1, 1]} : vector<128x8xbf16> to vector<8x8xbf16>
    %c1_342 = arith.constant 1 : index
    %c8_343 = arith.constant 8 : index
    %c1_344 = arith.constant 1 : index
    %c0_345 = arith.constant 0 : index
    %291 = vector.load %arg11[%c1_342, %c8_343, %c1_344, %c0_345] : memref<2x10x10x8xbf16, #tpu.memory_space<vmem>>, vector<1x1x8x8xbf16>
    %292 = vector.shape_cast %291 : vector<1x1x8x8xbf16> to vector<8x8xbf16>
    %293 = vector.shape_cast %290 : vector<8x8xbf16> to vector<1x1x8x8xbf16>
    tpu.vector_store %arg11[%c1_342, %c8_343, %c1_344, %c0_345], %293 {strides = array<i32>} : memref<2x10x10x8xbf16, #tpu.memory_space<vmem>>, vector<1x1x8x8xbf16>,
    %c0_346 = arith.constant 0 : index
    %c0_347 = arith.constant 0 : index
    %c0_348 = arith.constant 0 : index
    %c0_349 = arith.constant 0 : index
    %294 = vector.load %arg11[%c0_346, %c0_347, %c0_348, %c0_349] : memref<2x10x10x8xbf16, #tpu.memory_space<vmem>>, vector<1x8x8x8xbf16>
    %295 = vector.shape_cast %294 : vector<1x8x8x8xbf16> to vector<8x8x8xbf16>
    %296 = vector.shape_cast %295 : vector<8x8x8xbf16> to vector<64x8xbf16>
    %c0_350 = arith.constant 0 : index
    %c0_351 = arith.constant 0 : index
    %297 = vector.load %arg9[%c0_350, %c0_351] : memref<128x72xbf16, #tpu.memory_space<vmem>>, vector<64x8xbf16>
    tpu.vector_store %arg9[%c0_350, %c0_351], %296 {strides = array<i32>} : memref<128x72xbf16, #tpu.memory_space<vmem>>, vector<64x8xbf16>,
    %c0_352 = arith.constant 0 : index
    %c0_353 = arith.constant 0 : index
    %c1_354 = arith.constant 1 : index
    %c0_355 = arith.constant 0 : index
    %298 = vector.load %arg11[%c0_352, %c0_353, %c1_354, %c0_355] : memref<2x10x10x8xbf16, #tpu.memory_space<vmem>>, vector<1x8x8x8xbf16>
    %299 = vector.shape_cast %298 : vector<1x8x8x8xbf16> to vector<8x8x8xbf16>
    %300 = vector.shape_cast %299 : vector<8x8x8xbf16> to vector<64x8xbf16>
    %c0_356 = arith.constant 0 : index
    %c8_357 = arith.constant 8 : index
    %301 = vector.load %arg9[%c0_356, %c8_357] : memref<128x72xbf16, #tpu.memory_space<vmem>>, vector<64x8xbf16>
    tpu.vector_store %arg9[%c0_356, %c8_357], %300 {strides = array<i32>} : memref<128x72xbf16, #tpu.memory_space<vmem>>, vector<64x8xbf16>,
    %c0_358 = arith.constant 0 : index
    %c0_359 = arith.constant 0 : index
    %c2_360 = arith.constant 2 : index
    %c0_361 = arith.constant 0 : index
    %302 = vector.load %arg11[%c0_358, %c0_359, %c2_360, %c0_361] : memref<2x10x10x8xbf16, #tpu.memory_space<vmem>>, vector<1x8x8x8xbf16>
    %303 = vector.shape_cast %302 : vector<1x8x8x8xbf16> to vector<8x8x8xbf16>
    %304 = vector.shape_cast %303 : vector<8x8x8xbf16> to vector<64x8xbf16>
    %c0_362 = arith.constant 0 : index
    %c16_363 = arith.constant 16 : index
    %305 = vector.load %arg9[%c0_362, %c16_363] : memref<128x72xbf16, #tpu.memory_space<vmem>>, vector<64x8xbf16>
    tpu.vector_store %arg9[%c0_362, %c16_363], %304 {strides = array<i32>} : memref<128x72xbf16, #tpu.memory_space<vmem>>, vector<64x8xbf16>,
    %c0_364 = arith.constant 0 : index
    %c1_365 = arith.constant 1 : index
    %c0_366 = arith.constant 0 : index
    %c0_367 = arith.constant 0 : index
    %306 = vector.load %arg11[%c0_364, %c1_365, %c0_366, %c0_367] : memref<2x10x10x8xbf16, #tpu.memory_space<vmem>>, vector<1x8x8x8xbf16>
    %307 = vector.shape_cast %306 : vector<1x8x8x8xbf16> to vector<8x8x8xbf16>
    %308 = vector.shape_cast %307 : vector<8x8x8xbf16> to vector<64x8xbf16>
    %c0_368 = arith.constant 0 : index
    %c24_369 = arith.constant 24 : index
    %309 = vector.load %arg9[%c0_368, %c24_369] : memref<128x72xbf16, #tpu.memory_space<vmem>>, vector<64x8xbf16>
    tpu.vector_store %arg9[%c0_368, %c24_369], %308 {strides = array<i32>} : memref<128x72xbf16, #tpu.memory_space<vmem>>, vector<64x8xbf16>,
    %c0_370 = arith.constant 0 : index
    %c1_371 = arith.constant 1 : index
    %c1_372 = arith.constant 1 : index
    %c0_373 = arith.constant 0 : index
    %310 = vector.load %arg11[%c0_370, %c1_371, %c1_372, %c0_373] : memref<2x10x10x8xbf16, #tpu.memory_space<vmem>>, vector<1x8x8x8xbf16>
    %311 = vector.shape_cast %310 : vector<1x8x8x8xbf16> to vector<8x8x8xbf16>
    %312 = vector.shape_cast %311 : vector<8x8x8xbf16> to vector<64x8xbf16>
    %c0_374 = arith.constant 0 : index
    %c32_375 = arith.constant 32 : index
    %313 = vector.load %arg9[%c0_374, %c32_375] : memref<128x72xbf16, #tpu.memory_space<vmem>>, vector<64x8xbf16>
    tpu.vector_store %arg9[%c0_374, %c32_375], %312 {strides = array<i32>} : memref<128x72xbf16, #tpu.memory_space<vmem>>, vector<64x8xbf16>,
    %c0_376 = arith.constant 0 : index
    %c1_377 = arith.constant 1 : index
    %c2_378 = arith.constant 2 : index
    %c0_379 = arith.constant 0 : index
    %314 = vector.load %arg11[%c0_376, %c1_377, %c2_378, %c0_379] : memref<2x10x10x8xbf16, #tpu.memory_space<vmem>>, vector<1x8x8x8xbf16>
    %315 = vector.shape_cast %314 : vector<1x8x8x8xbf16> to vector<8x8x8xbf16>
    %316 = vector.shape_cast %315 : vector<8x8x8xbf16> to vector<64x8xbf16>
    %c0_380 = arith.constant 0 : index
    %c40_381 = arith.constant 40 : index
    %317 = vector.load %arg9[%c0_380, %c40_381] : memref<128x72xbf16, #tpu.memory_space<vmem>>, vector<64x8xbf16>
    tpu.vector_store %arg9[%c0_380, %c40_381], %316 {strides = array<i32>} : memref<128x72xbf16, #tpu.memory_space<vmem>>, vector<64x8xbf16>,
    %c0_382 = arith.constant 0 : index
    %c2_383 = arith.constant 2 : index
    %c0_384 = arith.constant 0 : index
    %c0_385 = arith.constant 0 : index
    %318 = vector.load %arg11[%c0_382, %c2_383, %c0_384, %c0_385] : memref<2x10x10x8xbf16, #tpu.memory_space<vmem>>, vector<1x8x8x8xbf16>
    %319 = vector.shape_cast %318 : vector<1x8x8x8xbf16> to vector<8x8x8xbf16>
    %320 = vector.shape_cast %319 : vector<8x8x8xbf16> to vector<64x8xbf16>
    %c0_386 = arith.constant 0 : index
    %c48_387 = arith.constant 48 : index
    %321 = vector.load %arg9[%c0_386, %c48_387] : memref<128x72xbf16, #tpu.memory_space<vmem>>, vector<64x8xbf16>
    tpu.vector_store %arg9[%c0_386, %c48_387], %320 {strides = array<i32>} : memref<128x72xbf16, #tpu.memory_space<vmem>>, vector<64x8xbf16>,
    %c0_388 = arith.constant 0 : index
    %c2_389 = arith.constant 2 : index
    %c1_390 = arith.constant 1 : index
    %c0_391 = arith.constant 0 : index
    %322 = vector.load %arg11[%c0_388, %c2_389, %c1_390, %c0_391] : memref<2x10x10x8xbf16, #tpu.memory_space<vmem>>, vector<1x8x8x8xbf16>
    %323 = vector.shape_cast %322 : vector<1x8x8x8xbf16> to vector<8x8x8xbf16>
    %324 = vector.shape_cast %323 : vector<8x8x8xbf16> to vector<64x8xbf16>
    %c0_392 = arith.constant 0 : index
    %c56_393 = arith.constant 56 : index
    %325 = vector.load %arg9[%c0_392, %c56_393] : memref<128x72xbf16, #tpu.memory_space<vmem>>, vector<64x8xbf16>
    tpu.vector_store %arg9[%c0_392, %c56_393], %324 {strides = array<i32>} : memref<128x72xbf16, #tpu.memory_space<vmem>>, vector<64x8xbf16>,
    %c0_394 = arith.constant 0 : index
    %c2_395 = arith.constant 2 : index
    %c2_396 = arith.constant 2 : index
    %c0_397 = arith.constant 0 : index
    %326 = vector.load %arg11[%c0_394, %c2_395, %c2_396, %c0_397] : memref<2x10x10x8xbf16, #tpu.memory_space<vmem>>, vector<1x8x8x8xbf16>
    %327 = vector.shape_cast %326 : vector<1x8x8x8xbf16> to vector<8x8x8xbf16>
    %328 = vector.shape_cast %327 : vector<8x8x8xbf16> to vector<64x8xbf16>
    %c0_398 = arith.constant 0 : index
    %c64_399 = arith.constant 64 : index
    %329 = vector.load %arg9[%c0_398, %c64_399] : memref<128x72xbf16, #tpu.memory_space<vmem>>, vector<64x8xbf16>
    tpu.vector_store %arg9[%c0_398, %c64_399], %328 {strides = array<i32>} : memref<128x72xbf16, #tpu.memory_space<vmem>>, vector<64x8xbf16>,
    %c1_400 = arith.constant 1 : index
    %c0_401 = arith.constant 0 : index
    %c0_402 = arith.constant 0 : index
    %c0_403 = arith.constant 0 : index
    %330 = vector.load %arg11[%c1_400, %c0_401, %c0_402, %c0_403] : memref<2x10x10x8xbf16, #tpu.memory_space<vmem>>, vector<1x8x8x8xbf16>
    %331 = vector.shape_cast %330 : vector<1x8x8x8xbf16> to vector<8x8x8xbf16>
    %332 = vector.shape_cast %331 : vector<8x8x8xbf16> to vector<64x8xbf16>
    %c64_404 = arith.constant 64 : index
    %c0_405 = arith.constant 0 : index
    %333 = vector.load %arg9[%c64_404, %c0_405] : memref<128x72xbf16, #tpu.memory_space<vmem>>, vector<64x8xbf16>
    tpu.vector_store %arg9[%c64_404, %c0_405], %332 {strides = array<i32>} : memref<128x72xbf16, #tpu.memory_space<vmem>>, vector<64x8xbf16>,
    %c1_406 = arith.constant 1 : index
    %c0_407 = arith.constant 0 : index
    %c1_408 = arith.constant 1 : index
    %c0_409 = arith.constant 0 : index
    %334 = vector.load %arg11[%c1_406, %c0_407, %c1_408, %c0_409] : memref<2x10x10x8xbf16, #tpu.memory_space<vmem>>, vector<1x8x8x8xbf16>
    %335 = vector.shape_cast %334 : vector<1x8x8x8xbf16> to vector<8x8x8xbf16>
    %336 = vector.shape_cast %335 : vector<8x8x8xbf16> to vector<64x8xbf16>
    %c64_410 = arith.constant 64 : index
    %c8_411 = arith.constant 8 : index
    %337 = vector.load %arg9[%c64_410, %c8_411] : memref<128x72xbf16, #tpu.memory_space<vmem>>, vector<64x8xbf16>
    tpu.vector_store %arg9[%c64_410, %c8_411], %336 {strides = array<i32>} : memref<128x72xbf16, #tpu.memory_space<vmem>>, vector<64x8xbf16>,
    %c1_412 = arith.constant 1 : index
    %c0_413 = arith.constant 0 : index
    %c2_414 = arith.constant 2 : index
    %c0_415 = arith.constant 0 : index
    %338 = vector.load %arg11[%c1_412, %c0_413, %c2_414, %c0_415] : memref<2x10x10x8xbf16, #tpu.memory_space<vmem>>, vector<1x8x8x8xbf16>
    %339 = vector.shape_cast %338 : vector<1x8x8x8xbf16> to vector<8x8x8xbf16>
    %340 = vector.shape_cast %339 : vector<8x8x8xbf16> to vector<64x8xbf16>
    %c64_416 = arith.constant 64 : index
    %c16_417 = arith.constant 16 : index
    %341 = vector.load %arg9[%c64_416, %c16_417] : memref<128x72xbf16, #tpu.memory_space<vmem>>, vector<64x8xbf16>
    tpu.vector_store %arg9[%c64_416, %c16_417], %340 {strides = array<i32>} : memref<128x72xbf16, #tpu.memory_space<vmem>>, vector<64x8xbf16>,
    %c1_418 = arith.constant 1 : index
    %c1_419 = arith.constant 1 : index
    %c0_420 = arith.constant 0 : index
    %c0_421 = arith.constant 0 : index
    %342 = vector.load %arg11[%c1_418, %c1_419, %c0_420, %c0_421] : memref<2x10x10x8xbf16, #tpu.memory_space<vmem>>, vector<1x8x8x8xbf16>
    %343 = vector.shape_cast %342 : vector<1x8x8x8xbf16> to vector<8x8x8xbf16>
    %344 = vector.shape_cast %343 : vector<8x8x8xbf16> to vector<64x8xbf16>
    %c64_422 = arith.constant 64 : index
    %c24_423 = arith.constant 24 : index
    %345 = vector.load %arg9[%c64_422, %c24_423] : memref<128x72xbf16, #tpu.memory_space<vmem>>, vector<64x8xbf16>
    tpu.vector_store %arg9[%c64_422, %c24_423], %344 {strides = array<i32>} : memref<128x72xbf16, #tpu.memory_space<vmem>>, vector<64x8xbf16>,
    %c1_424 = arith.constant 1 : index
    %c1_425 = arith.constant 1 : index
    %c1_426 = arith.constant 1 : index
    %c0_427 = arith.constant 0 : index
    %346 = vector.load %arg11[%c1_424, %c1_425, %c1_426, %c0_427] : memref<2x10x10x8xbf16, #tpu.memory_space<vmem>>, vector<1x8x8x8xbf16>
    %347 = vector.shape_cast %346 : vector<1x8x8x8xbf16> to vector<8x8x8xbf16>
    %348 = vector.shape_cast %347 : vector<8x8x8xbf16> to vector<64x8xbf16>
    %c64_428 = arith.constant 64 : index
    %c32_429 = arith.constant 32 : index
    %349 = vector.load %arg9[%c64_428, %c32_429] : memref<128x72xbf16, #tpu.memory_space<vmem>>, vector<64x8xbf16>
    tpu.vector_store %arg9[%c64_428, %c32_429], %348 {strides = array<i32>} : memref<128x72xbf16, #tpu.memory_space<vmem>>, vector<64x8xbf16>,
    %c1_430 = arith.constant 1 : index
    %c1_431 = arith.constant 1 : index
    %c2_432 = arith.constant 2 : index
    %c0_433 = arith.constant 0 : index
    %350 = vector.load %arg11[%c1_430, %c1_431, %c2_432, %c0_433] : memref<2x10x10x8xbf16, #tpu.memory_space<vmem>>, vector<1x8x8x8xbf16>
    %351 = vector.shape_cast %350 : vector<1x8x8x8xbf16> to vector<8x8x8xbf16>
    %352 = vector.shape_cast %351 : vector<8x8x8xbf16> to vector<64x8xbf16>
    %c64_434 = arith.constant 64 : index
    %c40_435 = arith.constant 40 : index
    %353 = vector.load %arg9[%c64_434, %c40_435] : memref<128x72xbf16, #tpu.memory_space<vmem>>, vector<64x8xbf16>
    tpu.vector_store %arg9[%c64_434, %c40_435], %352 {strides = array<i32>} : memref<128x72xbf16, #tpu.memory_space<vmem>>, vector<64x8xbf16>,
    %c1_436 = arith.constant 1 : index
    %c2_437 = arith.constant 2 : index
    %c0_438 = arith.constant 0 : index
    %c0_439 = arith.constant 0 : index
    %354 = vector.load %arg11[%c1_436, %c2_437, %c0_438, %c0_439] : memref<2x10x10x8xbf16, #tpu.memory_space<vmem>>, vector<1x8x8x8xbf16>
    %355 = vector.shape_cast %354 : vector<1x8x8x8xbf16> to vector<8x8x8xbf16>
    %356 = vector.shape_cast %355 : vector<8x8x8xbf16> to vector<64x8xbf16>
    %c64_440 = arith.constant 64 : index
    %c48_441 = arith.constant 48 : index
    %357 = vector.load %arg9[%c64_440, %c48_441] : memref<128x72xbf16, #tpu.memory_space<vmem>>, vector<64x8xbf16>
    tpu.vector_store %arg9[%c64_440, %c48_441], %356 {strides = array<i32>} : memref<128x72xbf16, #tpu.memory_space<vmem>>, vector<64x8xbf16>,
    %c1_442 = arith.constant 1 : index
    %c2_443 = arith.constant 2 : index
    %c1_444 = arith.constant 1 : index
    %c0_445 = arith.constant 0 : index
    %358 = vector.load %arg11[%c1_442, %c2_443, %c1_444, %c0_445] : memref<2x10x10x8xbf16, #tpu.memory_space<vmem>>, vector<1x8x8x8xbf16>
    %359 = vector.shape_cast %358 : vector<1x8x8x8xbf16> to vector<8x8x8xbf16>
    %360 = vector.shape_cast %359 : vector<8x8x8xbf16> to vector<64x8xbf16>
    %c64_446 = arith.constant 64 : index
    %c56_447 = arith.constant 56 : index
    %361 = vector.load %arg9[%c64_446, %c56_447] : memref<128x72xbf16, #tpu.memory_space<vmem>>, vector<64x8xbf16>
    tpu.vector_store %arg9[%c64_446, %c56_447], %360 {strides = array<i32>} : memref<128x72xbf16, #tpu.memory_space<vmem>>, vector<64x8xbf16>,
    %c1_448 = arith.constant 1 : index
    %c2_449 = arith.constant 2 : index
    %c2_450 = arith.constant 2 : index
    %c0_451 = arith.constant 0 : index
    %362 = vector.load %arg11[%c1_448, %c2_449, %c2_450, %c0_451] : memref<2x10x10x8xbf16, #tpu.memory_space<vmem>>, vector<1x8x8x8xbf16>
    %363 = vector.shape_cast %362 : vector<1x8x8x8xbf16> to vector<8x8x8xbf16>
    %364 = vector.shape_cast %363 : vector<8x8x8xbf16> to vector<64x8xbf16>
    %c64_452 = arith.constant 64 : index
    %c64_453 = arith.constant 64 : index
    %365 = vector.load %arg9[%c64_452, %c64_453] : memref<128x72xbf16, #tpu.memory_space<vmem>>, vector<64x8xbf16>
    tpu.vector_store %arg9[%c64_452, %c64_453], %364 {strides = array<i32>} : memref<128x72xbf16, #tpu.memory_space<vmem>>, vector<64x8xbf16>,
    %c0_454 = arith.constant 0 : index
    %c0_455 = arith.constant 0 : index
    %366 = vector.load %arg6[%c0_454, %c0_455] : memref<8x72xbf16, #tpu.memory_space<vmem>>, vector<8x72xbf16>
    %c0_456 = arith.constant 0 : index
    %c0_457 = arith.constant 0 : index
    %367 = vector.load %arg9[%c0_456, %c0_457] : memref<128x72xbf16, #tpu.memory_space<vmem>>, vector<128x72xbf16>
    %cst_458 = arith.constant dense<0.000000e+00> : vector<8x128xf32>
    %368 = tpu.matmul %366, %367, %cst_458 {dimension_numbers = #tpu.dot_dimension_numbers<[1], [1], [0], [0], [0, 0, 1, 0], [], []>} : vector<8x72xbf16>, vector<128x72xbf16>, vector<8x128xf32> -> vector<8x128xf32>
    %c0_459 = arith.constant 0 : index
    %c0_460 = arith.constant 0 : index
    %369 = vector.load %arg7[%c0_459, %c0_460] : memref<8x1xf32, #tpu.memory_space<vmem>>, vector<8x1xf32>
    %370 = vector.broadcast %369 : vector<8x1xf32> to vector<8x128xf32>
    %371 = arith.addf %368, %370 : vector<8x128xf32>
    %cst_461 = arith.constant 0.000000e+00 : f32
    %372 = vector.broadcast %cst_461 : f32 to vector<8x128xf32>
    %373 = arith.maximumf %371, %372 : vector<8x128xf32>
    %c0_462 = arith.constant 0 : index
    %c0_463 = arith.constant 0 : index
    %374 = vector.load %arg8[%c0_462, %c0_463] : memref<8x128xf32, #tpu.memory_space<vmem>>, vector<8x128xf32>
    tpu.vector_store %arg8[%c0_462, %c0_463], %373 {strides = array<i32>} : memref<8x128xf32, #tpu.memory_space<vmem>>, vector<8x128xf32>,
    return
  }
  func.func @transform_0(%arg0: i32) -> (i32, i32, i32, i32) {
    %c0_i32 = arith.constant 0 : i32
    %c0_i32_0 = arith.constant 0 : i32
    %c0_i32_1 = arith.constant 0 : i32
    %c0_i32_2 = arith.constant 0 : i32
    return %arg0, %c0_i32, %c0_i32_0, %c0_i32_1 : i32, i32, i32, i32
  }
  func.func @transform_1(%arg0: i32) -> (i32, i32) {
    %c0_i32 = arith.constant 0 : i32
    %c0_i32_0 = arith.constant 0 : i32
    %c0_i32_1 = arith.constant 0 : i32
    return %c0_i32, %c0_i32_0 : i32, i32
  }
  func.func @transform_2(%arg0: i32) -> (i32, i32) {
    %c0_i32 = arith.constant 0 : i32
    %c0_i32_0 = arith.constant 0 : i32
    %c0_i32_1 = arith.constant 0 : i32
    return %c0_i32, %c0_i32_0 : i32, i32
  }
  func.func @transform_3(%arg0: i32) -> (i32, i32) {
    %c0_i32 = arith.constant 0 : i32
    %c0_i32_0 = arith.constant 0 : i32
    %c0_i32_1 = arith.constant 0 : i32
    return %c0_i32, %c0_i32_0 : i32, i32
  }
  func.func @transform_4(%arg0: i32) -> (i32, i32) {
    %c0_i32 = arith.constant 0 : i32
    %c0_i32_0 = arith.constant 0 : i32
    %c0_i32_1 = arith.constant 0 : i32
    return %c0_i32, %c0_i32_0 : i32, i32
  }
  func.func @transform_5(%arg0: i32) -> (i32, i32) {
    %c0_i32 = arith.constant 0 : i32
    %c0_i32_0 = arith.constant 0 : i32
    %c0_i32_1 = arith.constant 0 : i32
    return %c0_i32, %c0_i32_0 : i32, i32
  }
  func.func @transform_6(%arg0: i32) -> (i32, i32) {
    %c0_i32 = arith.constant 0 : i32
    %c0_i32_0 = arith.constant 0 : i32
    %c0_i32_1 = arith.constant 0 : i32
    return %c0_i32, %c0_i32_0 : i32, i32
  }
  func.func @transform_7(%arg0: i32) -> (i32, i32) {
    %c0_i32 = arith.constant 0 : i32
    %c0_i32_0 = arith.constant 0 : i32
    return %c0_i32, %arg0 : i32, i32
  }
}

</mosaic_0001>

<bundles_post_ra>
// kernel: encoder_block_forward.1
= control target key start
LH: loop header
LB: loop body
LE: loop exit
PB: predicated region body
PF: predicated region fallthrough
CT: control target
= control target key end

     0   :  { %vm110_vm0 = vsmask.f32 3328  ;;  %s6908_s30 = smov 4   ;;  %vm111_vm1 = vsmask.f32 7440  ;;  %s6909_s26 = smov 8   ;;  %s9781_s0 = inlined_call_operand.vmem [shape: bf16[2,36,9,4], index: 0, kind: input, shape index: {}]   ;;  %s9782_s1 = inlined_call_operand.vmem [shape: bf16[36,8], index: 1, kind: input, shape index: {}]   ;;  %s9783_s2 = inlined_call_operand.vmem [shape: f32[1,8], index: 2, kind: input, shape index: {}]   ;;  %s9784_s3 = inlined_call_operand.vmem [shape: bf16[72,8], index: 3, kind: input, shape index: {}]   ;;  %s9785_s4 = inlined_call_operand.vmem [shape: f32[1,8], index: 4, kind: input, shape index: {}]   ;;  %s9786_s6 = inlined_call_operand.vmem [shape: f32[8,1], index: 6, kind: input, shape index: {}]   ;;  %s9787_s5 = inlined_call_operand.vmem [shape: bf16[8,72], index: 5, kind: input, shape index: {}]   ;;  %s9788_s7 = inlined_call_operand.vmem [shape: f32[8,128], index: 7, kind: output, shape index: {}]  }
   0x1   :  { %v6387_v0 = vld [vmem:[%s9781_s0 + $0x58] sm:$0xf]  ;;  %v6385_v1 = vld [vmem:[%s9781_s0 + $0x48] sm:$0xf]  ;;  %v6388_v2 = vld [vmem:[%s9781_s0 + $0x60] sm:$0xf] }
   0x2   :  { %65 = vrot.lane.b32.xlu1 %v6387_v0, %s6908_s30  ;;  %61 = vrot.lane.b32.xlu0 %v6385_v1, %s6908_s30  ;;  %v6386_v3 = vld [vmem:[%s9781_s0 + $0x50] sm:$0xf]  ;;  %v96_v4 = vld [vmem:[%s9781_s0 + $0x8] sm:$0xf]  ;;  %vm7002_vm2 = vmor %vm110_vm0, %vm111_vm1  ;;  %s6910_s17 = smov 12   ;;  %s6911_s13 = smov 16  }
   0x3   :  { %v97_v5 = vld [vmem:[%s9781_s0 + $0xc] sm:$0x1]  ;;  %v128_v6 = vshrl.u32 %v96_v4, 16  ;;  %v131_v7 = vshll.u32 %v96_v4, 16  ;;  %v94_v8 = vld [vmem:[%s9781_s0] sm:$0xf] }
   0x4   :  { %v137_v9 = vshll.u32 %v97_v5, 16  ;;  %v95_v10 = vld [vmem:[%s9781_s0 + $0x4] sm:$0x1]  ;;  %v114_v11 = vshrl.u32 %v94_v8, 16  ;;  %v117_v12 = vshll.u32 %v94_v8, 16  ;;  %s6912_s19 = smov 20  }
   0x5   :  { %v130_v13 = vrot.slane %v128_v6, 4  ;;  %v133_v14 = vrot.slane %v131_v7, 5  ;;  %v123_v15 = vshll.u32 %v95_v10, 16  ;;  %v100_v16 = vld [vmem:[%s9781_s0 + $0x18] sm:$0xf]  ;;  %s6913_s29 = smov 24  }
   0x6   :  { %67 = vrot.lane.b32.xlu1 %v6388_v2, %s6908_s30  ;;  %63 = vrot.lane.b32.xlu0 %v6386_v3, %s6908_s30  ;;  %v139_v17 = vrot.slane %v137_v9, 5  ;;  %v116_v18 = vrot.slane %v114_v11, 4  ;;  %v119_v19 = vrot.slane %v117_v12, 5  ;;  %v101_v20 = vld [vmem:[%s9781_s0 + $0x1c] sm:$0x1]  ;;  %v156_v21 = vshrl.u32 %v100_v16, 16 }
   0x7   :  { %v134_v22 = vor.u32 %v133_v14, %v130_v13  ;;  %v125_v23 = vrot.slane %v123_v15, 5  ;;  %v159_v24 = vshll.u32 %v100_v16, 16  ;;  %v165_v25 = vshll.u32 %v101_v20, 16  ;;  %v98_v26 = vld [vmem:[%s9781_s0 + $0x10] sm:$0xf]  ;;  %s6914_s9 = smov 28  }
   0x8   :  { %v120_v28 = vor.u32 %v119_v19, %v116_v18  ;;  %v158_v29 = vrot.slane %v156_v21, 4  ;;  %v99_v30 = vld [vmem:[%s9781_s0 + $0x14] sm:$0x1]  ;;  %v142_v31 = vshrl.u32 %v98_v26, 16  ;;  %v145_v32 = vshll.u32 %v98_v26, 16  ;;  %s6916_s21 = smov 32  }
   0x9   :  { %v135_v33 = vrot.slane %v134_v22, 4  ;;  %v161_v34 = vrot.slane %v159_v24, 5  ;;  %v151_v35 = vshll.u32 %v99_v30, 16  ;;  %v167_v41 = vrot.slane %v165_v25, 5  ;;  %v6411_v47 = vld [vmem:[%s9781_s0 + $0x98] sm:$0xf] }
   0xa   :  { %v121_v36 = vrot.slane %v120_v28, 4  ;;  %v144_v37 = vrot.slane %v142_v31, 4  ;;  %v147_v38 = vrot.slane %v145_v32, 5  ;;  %v6409_v49 = vld [vmem:[%s9781_s0 + $0x90] sm:$0xf]  ;;  %v389_v52 = vshrl.u32 %v6411_v47, 16 }
   0xb   :  { %v140_v39 = vsel %vm7002_vm2, %v135_v33, %v139_v17  ;;  %v162_v40 = vor.u32 %v161_v34, %v158_v29  ;;  %v153_v44 = vrot.slane %v151_v35, 5  ;;  %v6394_v51 = vld [vmem:[%s9781_s0 + $0x98] sm:$0xf]  ;;  %v392_v53 = vshll.u32 %v6411_v47, 16  ;;  %v6393_v54 = vld [vmem:[%s9781_s0 + $0x90] sm:$0xf] }
   0xc   :  { %227 = vrot.lane.b32.xlu1 %v140_v39, %s6909_s26  ;;  %v126_v42 = vsel %vm7002_vm2, %v121_v36, %v125_v23  ;;  %v148_v43 = vor.u32 %v147_v38, %v144_v37  ;;  %v375_v55 = vshrl.u32 %v6409_v49, 16  ;;  %v378_v56 = vshll.u32 %v6409_v49, 16  ;;  %v6415_v57 = vld [vmem:[%s9781_s0 + $0xa8] sm:$0xf]  ;;  %v6413_v58 = vld [vmem:[%s9781_s0 + $0xa0] sm:$0xf] }
   0xd   :  { %225 = vrot.lane.b32.xlu0 %v126_v42, %s6909_s26  ;;  %v163_v45 = vrot.slane %v162_v40, 4  ;;  %v6396_v59 = vld [vmem:[%s9781_s0 + $0xa8] sm:$0xf]  ;;  %v6395_v60 = vld [vmem:[%s9781_s0 + $0xa0] sm:$0xf]  ;;  %v391_v61 = vrot.slane %v389_v52, 4 }
   0xe   :  { %v149_v46 = vrot.slane %v148_v43, 4  ;;  %v394_v62 = vrot.slane %v392_v53, 5  ;;  %v417_v63 = vshrl.u32 %v6415_v57, 16  ;;  %v420_v0 = vshll.u32 %v6415_v57, 16  ;;  %v6412_v1 = vld [vmem:[%s9781_s0 + $0x9c] sm:$0x1] }
   0xf   :  { %v168_v48 = vsel %vm7002_vm2, %v163_v45, %v167_v41  ;;  %v377_v2 = vrot.slane %v375_v55, 4  ;;  %v380_v3 = vrot.slane %v378_v56, 5  ;;  %v403_v4 = vshrl.u32 %v6413_v58, 16  ;;  %v6410_v6 = vld [vmem:[%s9781_s0 + $0x94] sm:$0x1]  ;;  %s6920_s12 = smov 40  }
  0x10   :  { %231 = vrot.lane.b32.xlu1 %v168_v48, %s6909_s26  ;;  %v154_v50 = vsel %vm7002_vm2, %v149_v46, %v153_v44  ;;  %v406_v5 = vshll.u32 %v6413_v58, 16  ;;  %v6402_v7 = vld [vmem:[%s9781_s0 + $0xe0] sm:$0xf]  ;;  %v6401_v8 = vld [vmem:[%s9781_s0 + $0xd8] sm:$0xf]  ;;  %v395_v9 = vor.u32 %v394_v62, %v391_v61  ;;  %v398_v10 = vshll.u32 %v6412_v1, 16 }
  0x11   :  { %229 = vrot.lane.b32.xlu0 %v154_v50, %s6909_s26  ;;  %v419_v11 = vrot.slane %v417_v63, 4  ;;  %v422_v12 = vrot.slane %v420_v0, 5  ;;  %v381_v13 = vor.u32 %v380_v3, %v377_v2  ;;  %v384_v14 = vshll.u32 %v6410_v6, 16  ;;  %v6416_v15 = vld [vmem:[%s9781_s0 + $0xac] sm:$0x1] }
  0x12   :  { %v405_v16 = vrot.slane %v403_v4, 4  ;;  %v408_v17 = vrot.slane %v406_v5, 5  ;;  %v6414_v18 = vld [vmem:[%s9781_s0 + $0xa4] sm:$0x1]  ;;  %v6404_v19 = vld [vmem:[%s9781_s0 + $0xf0] sm:$0xf] }
  0x13   :  { %v396_v20 = vrot.slane %v395_v9, 4  ;;  %v400_v21 = vrot.slane %v398_v10, 5  ;;  %v423_v22 = vor.u32 %v422_v12, %v419_v11  ;;  %v426_v23 = vshll.u32 %v6416_v15, 16  ;;  %v6403_v24 = vld [vmem:[%s9781_s0 + $0xe8] sm:$0xf] }
  0x14   :  { %277 = vrot.lane.b32.xlu1 %v6394_v51, %s6910_s17  ;;  %v382_v25 = vrot.slane %v381_v13, 4  ;;  %v386_v26 = vrot.slane %v384_v14, 5  ;;  %v409_v28 = vor.u32 %v408_v17, %v405_v16  ;;  %v412_v29 = vshll.u32 %v6414_v18, 16  ;;  %v6443_v38 = vld [vmem:[%s9781_s0 + $0x10] sm:$0xf] }
  0x15   :  { %275 = vrot.lane.b32.xlu0 %v6393_v54, %s6910_s17  ;;  %v401_v30 = vsel %vm7002_vm2, %v396_v20, %v400_v21  ;;  %v424_v31 = vrot.slane %v423_v22, 4  ;;  %v428_v32 = vrot.slane %v426_v23, 5  ;;  %v6441_v39 = vld [vmem:[%s9781_s0 + $0x8] sm:$0xf]  ;;  %v6426_v40 = vld [vmem:[%s9781_s0 + $0x10] sm:$0xf] }
  0x16   :  { %v387_v33 = vsel %vm7002_vm2, %v382_v25, %v386_v26  ;;  %v410_v34 = vrot.slane %v409_v28, 4  ;;  %v414_v35 = vrot.slane %v412_v29, 5  ;;  %v650_v41 = vshrl.u32 %v6443_v38, 16  ;;  %v6425_v43 = vld [vmem:[%s9781_s0 + $0x8] sm:$0xf] }
  0x17   :  { %v429_v36 = vsel %vm7002_vm2, %v424_v31, %v428_v32  ;;  %v653_v42 = vshll.u32 %v6443_v38, 16  ;;  %v636_v44 = vshrl.u32 %v6441_v39, 16  ;;  %v639_v45 = vshll.u32 %v6441_v39, 16  ;;  %v6428_v46 = vld [vmem:[%s9781_s0 + $0x20] sm:$0xf] }
  0x18   :  { %281 = vrot.lane.b32.xlu1 %v6396_v59, %s6910_s17  ;;  %v415_v37 = vsel %vm7002_vm2, %v410_v34, %v414_v35  ;;  %v6444_v47 = vld [vmem:[%s9781_s0 + $0x14] sm:$0x1]  ;;  %v652_v48 = vrot.slane %v650_v41, 4  ;;  %v6447_v50 = vld [vmem:[%s9781_s0 + $0x20] sm:$0xf]  ;;  %vm35_vm3 = vcmask 27648  }
  0x19   :  { %279 = vrot.lane.b32.xlu0 %v6395_v60, %s6910_s17  ;;  %v655_v49 = vrot.slane %v653_v42, 5  ;;  %v6427_v51 = vld [vmem:[%s9781_s0 + $0x18] sm:$0xf]  ;;  %v6442_v52 = vld [vmem:[%s9781_s0 + $0xc] sm:$0x1]  ;;  %v638_v53 = vrot.slane %v636_v44, 4 }
  0x1a   :  { %v641_v54 = vrot.slane %v639_v45, 5  ;;  %v6445_v55 = vld [vmem:[%s9781_s0 + $0x18] sm:$0xf]  ;;  %v659_v56 = vshll.u32 %v6444_v47, 16  ;;  %v678_v57 = vshrl.u32 %v6447_v50, 16  ;;  %v681_v58 = vshll.u32 %v6447_v50, 16 }
  0x1b   :  { %v6434_v59 = vld [vmem:[%s9781_s0 + $0x58] sm:$0xf]  ;;  %v656_v60 = vor.u32 %v655_v49, %v652_v48  ;;  %v645_v61 = vshll.u32 %v6442_v52, 16  ;;  %v6433_v62 = vld [vmem:[%s9781_s0 + $0x50] sm:$0xf]  ;;  %v664_v0 = vshrl.u32 %v6445_v55, 16 }
  0x1c   :  { %327 = vrot.lane.b32.xlu1 %v6402_v7, %s6911_s13  ;;  %v642_v63 = vor.u32 %v641_v54, %v638_v53  ;;  %v667_v1 = vshll.u32 %v6445_v55, 16  ;;  %v6436_v2 = vld [vmem:[%s9781_s0 + $0x68] sm:$0xf]  ;;  %v6435_v3 = vld [vmem:[%s9781_s0 + $0x60] sm:$0xf]  ;;  %v7136_v4 = vrot.slane %v659_v56, 5 }
  0x1d   :  { %325 = vrot.lane.b32.xlu0 %v6401_v8, %s6911_s13  ;;  %v7141_v5 = vld [vmem:[%s9781_s0 + $0x24] sm:$0x1]  ;;  %v7143_v6 = vrot.slane %v678_v57, 4  ;;  %v7145_v7 = vrot.slane %v681_v58, 5  ;;  %v7148_v8 = vrot.slane %v656_v60, 4  ;;  %v7150_v9 = vrot.slane %v645_v61, 5 }
  0x1e   :  { %v7155_v10 = vld [vmem:[%s9781_s0 + $0x1c] sm:$0x1]  ;;  %v7160_v11 = vld [vmem:[%s9781_s0 + $0x28] sm:$0xf]  ;;  %v7162_v12 = vrot.slane %v642_v63, 4  ;;  %v7164_v13 = vrot.slane %v664_v0, 4 }
  0x1f   :  { %v7166_v14 = vrot.slane %v667_v1, 5  ;;  %v7171_v15 = vld [vmem:[%s9781_s0 + $0x20] sm:$0xf]  ;;  %vm1747_vm4 = vcmask 60416   ;;  %v687_v16 = vshll.u32 %v7141_v5, 16  ;;  %v684_v18 = vor.u32 %v7145_v7, %v7143_v6 }
  0x20   :  { %331 = vrot.lane.b32.xlu1 %v6404_v19, %s6911_s13  ;;  %v29_v17 = vld [vmem:[%s9781_s0 + $0x10] sm:$0xf]  ;;  %v673_v19 = vshll.u32 %v7155_v10, 16  ;;  %v184_v20 = vshrl.u32 %v7160_v11, 16  ;;  %v27_v21 = vld [vmem:[%s9781_s0] sm:$0xf]  ;;  %v662_v22 = vsel %vm7002_vm2, %v7148_v8, %v7136_v4  ;;  %v648_v28 = vsel %vm7002_vm2, %v7162_v12, %v7150_v9 }
  0x21   :  { %329 = vrot.lane.b32.xlu0 %v6403_v24, %s6911_s13  ;;  %38 = vst.msk [vmem:[#allocation2 + $0x8] sm:$0xf] %vm35_vm3, %v29_v17  ;;  %v187_v23 = vshll.u32 %v7160_v11, 16  ;;  %v170_v24 = vshrl.u32 %v7171_v15, 16  ;;  %36 = vst.msk [vmem:[#allocation2] sm:$0xf] %vm35_vm3, %v27_v21  ;;  %v670_v29 = vor.u32 %v7166_v14, %v7164_v13 }
  0x22   :  { %v30_v25 = vld [vmem:[%s9781_s0 + $0x18] sm:$0xf]  ;;  %v6915_v26 = vmov 0   ;;  %v28_v32 = vld [vmem:[%s9781_s0 + $0x8] sm:$0xf]  ;;  %v685_v35 = vrot.slane %v684_v18, 4 }
  0x23   :  { %1748 = vst.msk [vmem:[#allocation3] sm:$0xf] %vm1747_vm4, %v6915_v26  ;;  %1751 = vst.msk [vmem:[#allocation3 + $0x8] sm:$0xf] %vm1747_vm4, %v6915_v26  ;;  %v108_v31 = vld [vmem:[%s9781_s0 + $0x38] sm:$0xf]  ;;  %6882 = vset.pattern.permute.xlu0 %v6915_v26 }
  0x24   :  { %488 = vrot.lane.b32.xlu1 %v401_v30, %s6912_s19  ;;  %1753 = vst.msk [vmem:[#allocation3 + $0x10] sm:$0xf] %vm1747_vm4, %v6915_v26  ;;  %1755 = vst.msk [vmem:[#allocation3 + $0x18] sm:$0xf] %vm1747_vm4, %v6915_v26  ;;  %v173_v30 = vshll.u32 %v7171_v15, 16  ;;  %v186_v39 = vrot.slane %v184_v20, 4 }
  0x25   :  { %486 = vrot.lane.b32.xlu0 %v387_v33, %s6912_s19  ;;  %1757 = vst.msk [vmem:[#allocation3 + $0x20] sm:$0xf] %vm1747_vm4, %v6915_v26  ;;  %1759 = vst.msk [vmem:[#allocation3 + $0x28] sm:$0xf] %vm1747_vm4, %v6915_v26  ;;  %v6390_v33 = vld [vmem:[%s9781_s0 + $0x70] sm:$0xf] }
  0x26   :  { %1761 = vst.msk [vmem:[#allocation3 + $0x30] sm:$0xf] %vm1747_vm4, %v6915_v26  ;;  %1763 = vst.msk [vmem:[#allocation3 + $0x38] sm:$0xf] %vm1747_vm4, %v6915_v26  ;;  %v106_v34 = vld [vmem:[%s9781_s0 + $0x30] sm:$0xf] }
  0x27   :  { %1765 = vst.msk [vmem:[#allocation3 + $0x40] sm:$0xf] %vm1747_vm4, %v6915_v26  ;;  %1767 = vst.msk [vmem:[#allocation3 + $0x48] sm:$0xf] %vm1747_vm4, %v6915_v26  ;;  %v105_v38 = vld [vmem:[%s9781_s0 + $0x2c] sm:$0x1] }
  0x28   :  { %492 = vrot.lane.b32.xlu1 %v429_v36, %s6912_s19  ;;  %1769 = vst.msk [vmem:[#allocation3 + $0x50] sm:$0xf] %vm1747_vm4, %v6915_v26  ;;  %1771 = vst.msk [vmem:[#allocation3 + $0x58] sm:$0xf] %vm1747_vm4, %v6915_v26  ;;  %v689_v36 = vrot.slane %v687_v16, 5  ;;  %v172_v42 = vrot.slane %v170_v24, 4 }
  0x29   :  { %490 = vrot.lane.b32.xlu0 %v415_v37, %s6912_s19  ;;  %1773 = vst.msk [vmem:[#allocation3 + $0x60] sm:$0xf] %vm1747_vm4, %v6915_v26  ;;  %1775 = vst.msk [vmem:[#allocation3 + $0x68] sm:$0xf] %vm1747_vm4, %v6915_v26  ;;  %v675_v37 = vrot.slane %v673_v19, 5  ;;  %v215_v44 = vshll.u32 %v108_v31, 16 }
  0x2a   :  { %1777 = vst.msk [vmem:[#allocation3 + $0x70] sm:$0xf] %vm1747_vm4, %v6915_v26  ;;  %1779 = vst.msk [vmem:[#allocation3 + $0x78] sm:$0xf] %vm1747_vm4, %v6915_v26  ;;  %v103_v41 = vld [vmem:[%s9781_s0 + $0x24] sm:$0x1]  ;;  %v690_v52 = vsel %vm7002_vm2, %v685_v35, %v689_v36 }
  0x2b   :  { %1781 = vst.msk [vmem:[#allocation3 + $0x80] sm:$0xf] %vm1747_vm4, %v6915_v26  ;;  %1783 = vst.msk [vmem:[#allocation3 + $0x88] sm:$0xf] %vm1747_vm4, %v6915_v26  ;;  %v6389_v45 = vld [vmem:[%s9781_s0 + $0x68] sm:$0xf] }
  0x2c   :  { %538 = vrot.lane.b32.xlu1 %v6426_v40, %s6913_s29  ;;  %1785 = vst.msk [vmem:[#allocation3 + $0x90] sm:$0xf] %vm1747_vm4, %v6915_v26  ;;  %1787 = vst.msk [vmem:[#allocation3 + $0x98] sm:$0xf] %vm1747_vm4, %v6915_v26  ;;  %v189_v40 = vrot.slane %v187_v23, 5  ;;  %v175_v47 = vrot.slane %v173_v30, 5 }
  0x2d   :  { %536 = vrot.lane.b32.xlu0 %v6425_v43, %s6913_s29  ;;  %4128 = vst.msk [vmem:[#allocation4] sm:$0xf] %vm1747_vm4, %v6915_v26  ;;  %4130 = vst.msk [vmem:[#allocation4 + $0x8] sm:$0xf] %vm1747_vm4, %v6915_v26  ;;  %v212_v43 = vshrl.u32 %v108_v31, 16  ;;  %v198_v48 = vshrl.u32 %v106_v34, 16 }
  0x2e   :  { %4132 = vst.msk [vmem:[#allocation4 + $0x10] sm:$0xf] %vm1747_vm4, %v6915_v26  ;;  %4134 = vst.msk [vmem:[#allocation4 + $0x18] sm:$0xf] %vm1747_vm4, %v6915_v26  ;;  %v201_v49 = vshll.u32 %v106_v34, 16  ;;  %v193_v50 = vshll.u32 %v105_v38, 16  ;;  %v190_v53 = vor.u32 %v189_v40, %v186_v39  ;;  %v176_v57 = vor.u32 %v175_v47, %v172_v42 }
  0x2f   :  { %4136 = vst.msk [vmem:[#allocation4 + $0x20] sm:$0xf] %vm1747_vm4, %v6915_v26  ;;  %4138 = vst.msk [vmem:[#allocation4 + $0x28] sm:$0xf] %vm1747_vm4, %v6915_v26  ;;  %v214_v54 = vrot.slane %v212_v43, 4  ;;  %v217_v55 = vrot.slane %v215_v44, 5 }
  0x30   :  { %542 = vrot.lane.b32.xlu1 %v6428_v46, %s6913_s29  ;;  %4140 = vst.msk [vmem:[#allocation4 + $0x30] sm:$0xf] %vm1747_vm4, %v6915_v26  ;;  %4142 = vst.msk [vmem:[#allocation4 + $0x38] sm:$0xf] %vm1747_vm4, %v6915_v26  ;;  %v671_v46 = vrot.slane %v670_v29, 4  ;;  %v203_v60 = vrot.slane %v201_v49, 5 }
  0x31   :  { %540 = vrot.lane.b32.xlu0 %v6427_v51, %s6913_s29  ;;  %4144 = vst.msk [vmem:[#allocation4 + $0x40] sm:$0xf] %vm1747_vm4, %v6915_v26  ;;  %4146 = vst.msk [vmem:[#allocation4 + $0x48] sm:$0xf] %vm1747_vm4, %v6915_v26  ;;  %v179_v51 = vshll.u32 %v103_v41, 16  ;;  %v191_v63 = vrot.slane %v190_v53, 4  ;;  %v218_v1 = vor.u32 %v217_v55, %v214_v54 }
  0x32   :  { %4148 = vst.msk [vmem:[#allocation4 + $0x50] sm:$0xf] %vm1747_vm4, %v6915_v26  ;;  %4150 = vst.msk [vmem:[#allocation4 + $0x58] sm:$0xf] %vm1747_vm4, %v6915_v26  ;;  %v676_v56 = vsel %vm7002_vm2, %v671_v46, %v675_v37  ;;  %v109_v58 = vld [vmem:[%s9781_s0 + $0x3c] sm:$0x1] }
  0x33   :  { %4152 = vst.msk [vmem:[#allocation4 + $0x60] sm:$0xf] %vm1747_vm4, %v6915_v26  ;;  %4154 = vst.msk [vmem:[#allocation4 + $0x68] sm:$0xf] %vm1747_vm4, %v6915_v26  ;;  %v107_v61 = vld [vmem:[%s9781_s0 + $0x34] sm:$0x1] }
  0x34   :  { %588 = vrot.lane.b32.xlu1 %v6434_v59, %s6914_s9  ;;  %4156 = vst.msk [vmem:[#allocation4 + $0x70] sm:$0xf] %vm1747_vm4, %v6915_v26  ;;  %4158 = vst.msk [vmem:[#allocation4 + $0x78] sm:$0xf] %vm1747_vm4, %v6915_v26  ;;  %v200_v59 = vrot.slane %v198_v48, 4  ;;  %v195_v0 = vrot.slane %v193_v50, 5 }
  0x35   :  { %586 = vrot.lane.b32.xlu0 %v6433_v62, %s6914_s9  ;;  %4160 = vst.msk [vmem:[#allocation4 + $0x80] sm:$0xf] %vm1747_vm4, %v6915_v26  ;;  %4162 = vst.msk [vmem:[#allocation4 + $0x88] sm:$0xf] %vm1747_vm4, %v6915_v26  ;;  %v6392_v62 = vld [vmem:[%s9781_s0 + $0x80] sm:$0xf] }
  0x36   :  { %4164 = vst.msk [vmem:[#allocation4 + $0x90] sm:$0xf] %vm1747_vm4, %v6915_v26  ;;  %4166 = vst.msk [vmem:[#allocation4 + $0x98] sm:$0xf] %vm1747_vm4, %v6915_v26  ;;  %v177_v4 = vrot.slane %v176_v57, 4  ;;  %v181_v5 = vrot.slane %v179_v51, 5  ;;  %v204_v6 = vor.u32 %v203_v60, %v200_v59  ;;  %v196_v8 = vsel %vm7002_vm2, %v191_v63, %v195_v0 }
  0x37   :  { %39 = vst.msk [vmem:[#allocation2 + $0xc] sm:$0xf] %vm35_vm3, %v30_v25  ;;  %37 = vst.msk [vmem:[#allocation2 + $0x4] sm:$0xf] %vm35_vm3, %v28_v32  ;;  %v207_v7 = vshll.u32 %v107_v61, 16  ;;  %v219_v9 = vrot.slane %v218_v1, 4 }
  0x38   :  { %592 = vrot.lane.b32.xlu1 %v6436_v2, %s6914_s9  ;;  %v221_v2 = vshll.u32 %v109_v58, 16  ;;  %v182_v11 = vsel %vm7002_vm2, %v177_v4, %v181_v5  ;;  %v205_v12 = vrot.slane %v204_v6, 4  ;;  %v6419_v16 = vld [vmem:[%s9781_s0 + $0xb8] sm:$0xf]  ;;  %v6417_v17 = vld [vmem:[%s9781_s0 + $0xb0] sm:$0xf] }
  0x39   :  { %590 = vrot.lane.b32.xlu0 %v6435_v3, %s6914_s9  ;;  %v6391_v3 = vld [vmem:[%s9781_s0 + $0x78] sm:$0xf]  ;;  %v209_v13 = vrot.slane %v207_v7, 5  ;;  %v445_v19 = vshrl.u32 %v6419_v16, 16  ;;  %v448_v20 = vshll.u32 %v6419_v16, 16  ;;  %v434_v23 = vshll.u32 %v6417_v17, 16 }
  0x3a   :  { %v223_v10 = vrot.slane %v221_v2, 5  ;;  %v6398_v18 = vld [vmem:[%s9781_s0 + $0xb8] sm:$0xf]  ;;  %v6397_v21 = vld [vmem:[%s9781_s0 + $0xb0] sm:$0xf]  ;;  %vm1630_vm5 = vcmask 1041408  }
  0x3b   :  { %v210_v15 = vsel %vm7002_vm2, %v205_v12, %v209_v13  ;;  %v6423_v24 = vld [vmem:[%s9781_s0 + $0xc8] sm:$0xf]  ;;  %v6421_v25 = vld [vmem:[%s9781_s0 + $0xc0] sm:$0xf]  ;;  %v6420_v29 = vld [vmem:[%s9781_s0 + $0xbc] sm:$0x1] }
  0x3c   :  { %749 = vrot.lane.b32.xlu1 %v662_v22, %s6916_s21  ;;  %v224_v14 = vsel %vm7002_vm2, %v219_v9, %v223_v10  ;;  %v431_v22 = vshrl.u32 %v6417_v17, 16  ;;  %v447_v30 = vrot.slane %v445_v19, 4  ;;  %v450_v31 = vrot.slane %v448_v20, 5  ;;  %v6418_v32 = vld [vmem:[%s9781_s0 + $0xb4] sm:$0x1]  ;;  %v6884_v54 = vld [vmem:[%s9782_s1 + $0x8] sm:$0xff]  }
  0x3d   :  { %747 = vrot.lane.b32.xlu0 %v648_v28, %s6916_s21  ;;  %v6400_v28 = vld [vmem:[%s9781_s0 + $0xc8] sm:$0xf]  ;;  %v476_v34 = vshll.u32 %v6423_v24, 16  ;;  %v6399_v35 = vld [vmem:[%s9781_s0 + $0xc0] sm:$0xf]  ;;  %v436_v37 = vrot.slane %v434_v23, 5 }
  0x3e   :  { %v433_v36 = vrot.slane %v431_v22, 4  ;;  %v459_v38 = vshrl.u32 %v6421_v25, 16  ;;  %v462_v39 = vshll.u32 %v6421_v25, 16  ;;  %v6406_v40 = vld [vmem:[%s9781_s0 + $0x100] sm:$0xf]  ;;  %v454_v43 = vshll.u32 %v6420_v29, 16 }
  0x3f   :  { %v32_v41 = vld [vmem:[%s9781_s0 + $0x28] sm:$0xf]  ;;  %v6405_v42 = vld [vmem:[%s9781_s0 + $0xf8] sm:$0xf]  ;;  %v440_v44 = vshll.u32 %v6418_v32, 16  ;;  %v451_v47 = vor.u32 %v450_v31, %v447_v30  ;;  %v478_v49 = vrot.slane %v476_v34, 5 }
  0x40   :  { %71 = vrot.lane.b32.xlu1 %v6390_v33, %s6908_s30  ;;  %v473_v33 = vshrl.u32 %v6423_v24, 16  ;;  %41 = vst.msk [vmem:[#allocation2 + $0x14] sm:$0xf] %vm35_vm3, %v32_v41  ;;  %v31_v46 = vld [vmem:[%s9781_s0 + $0x20] sm:$0xf]  ;;  %v437_v50 = vor.u32 %v436_v37, %v433_v36  ;;  %v461_v51 = vrot.slane %v459_v38, 4 }
  0x41   :  { %69 = vrot.lane.b32.xlu0 %v6389_v45, %s6908_s30  ;;  %v6424_v45 = vld [vmem:[%s9781_s0 + $0xcc] sm:$0x1]  ;;  %40 = vst.msk [vmem:[#allocation2 + $0x10] sm:$0xf] %vm35_vm3, %v31_v46  ;;  %v6422_v55 = vld [vmem:[%s9781_s0 + $0xc4] sm:$0x1] }
  0x42   :  { %v475_v48 = vrot.slane %v473_v33, 4  ;;  %v6883_v53 = vld [vmem:[%s9782_s1 + $0x10] ss:$0 sps:$4 sm:$0x33]   ;;  %v34_v57 = vld [vmem:[%s9781_s0 + $0x38] sm:$0xf] }
  0x43   :  { %6865 = vmatprep.subr.msk.bf16.mxu1 %vm1630_vm5, %v6883_v53  ;;  %v33_v58 = vld [vmem:[%s9781_s0 + $0x30] sm:$0xf]  ;;  %v452_v60 = vrot.slane %v451_v47, 4  ;;  %v456_v61 = vrot.slane %v454_v43, 5  ;;  %v482_v63 = vshll.u32 %v6424_v45, 16  ;;  %v438_v1 = vrot.slane %v437_v50, 4 }
  0x44   :  { %753 = vrot.lane.b32.xlu1 %v690_v52, %s6916_s21  ;;  %v464_v52 = vrot.slane %v462_v39, 5  ;;  %v6408_v59 = vld [vmem:[%s9781_s0 + $0x110] sm:$0xf]  ;;  %43 = vst.msk [vmem:[#allocation2 + $0x1c] sm:$0xf] %vm35_vm3, %v34_v57  ;;  %v442_v2 = vrot.slane %v440_v44, 5 }
  0x45   :  { %751 = vrot.lane.b32.xlu0 %v676_v56, %s6916_s21  ;;  %v1632_v56 = vsel %vm1630_vm5, %v6883_v53, 0  ;;  %42 = vst.msk [vmem:[#allocation2 + $0x18] sm:$0xf] %vm35_vm3, %v33_v58  ;;  %v6407_v0 = vld [vmem:[%s9781_s0 + $0x108] sm:$0xf]  ;;  %v468_v4 = vshll.u32 %v6422_v55, 16  ;;  %v457_v6 = vsel %vm7002_vm2, %v452_v60, %v456_v61 }
  0x46   :  { %6798 = vmatpush3.bf16.msra.mxu1 %v1632_v56  ;;  %v6885_v5 = vld [vmem:[%s9782_s1] sm:$0xff]   ;;  %v443_v9 = vsel %vm7002_vm2, %v438_v1, %v442_v2  ;;  %v6430_v16 = vld [vmem:[%s9781_s0 + $0x30] sm:$0xf]  ;;  %v6429_v20 = vld [vmem:[%s9781_s0 + $0x28] sm:$0xf]  ;;  %vm85_vm6 = vcmask 60448  }
  0x47   :  { %6799 = vmatprep.subr.bf16.mxu1 %v6884_v54  ;;  %v6455_v19 = vld [vmem:[%s9781_s0 + $0x40] sm:$0xf]  ;;  %v6453_v23 = vld [vmem:[%s9781_s0 + $0x38] sm:$0xf]  ;;  %v6452_v32 = vld [vmem:[%s9781_s0 + $0x34] sm:$0x1] }
  0x48   :  { %75 = vrot.lane.b32.xlu1 %v6392_v62, %s6908_s30  ;;  %v479_v62 = vor.u32 %v478_v49, %v475_v48  ;;  %v734_v24 = vshrl.u32 %v6455_v19, 16  ;;  %v737_v25 = vshll.u32 %v6455_v19, 16  ;;  %v6431_v29 = vld [vmem:[%s9781_s0 + $0x38] sm:$0xf]  ;;  %v723_v36 = vshll.u32 %v6453_v23, 16 }
  0x49   :  { %73 = vrot.lane.b32.xlu0 %v6391_v3, %s6908_s30  ;;  %v465_v3 = vor.u32 %v464_v52, %v461_v51  ;;  %v6450_v37 = vld [vmem:[%s9781_s0 + $0x2c] sm:$0x1]  ;;  %v6438_v38 = vld [vmem:[%s9781_s0 + $0x78] sm:$0xf]  ;;  %v6437_v41 = vld [vmem:[%s9781_s0 + $0x70] sm:$0xf] }
  0x4a   :  { %v480_v7 = vrot.slane %v479_v62, 4  ;;  %6800 = vmatpush3.bf16.msra.mxu1 %v6884_v54  ;;  %v736_v39 = vrot.slane %v734_v24, 4  ;;  %v715_v43 = vshll.u32 %v6452_v32, 16  ;;  %v6456_v44 = vld [vmem:[%s9781_s0 + $0x44] sm:$0x1]  ;;  %v701_v46 = vshll.u32 %v6450_v37, 16 }
  0x4b   :  { %v466_v10 = vrot.slane %v465_v3, 4  ;;  %6801 = vmatprep.subr.bf16.mxu1 %v6885_v5  ;;  %v6454_v47 = vld [vmem:[%s9781_s0 + $0x3c] sm:$0x1]  ;;  %v725_v49 = vrot.slane %v723_v36, 5  ;;  %v6440_v52 = vld [vmem:[%s9781_s0 + $0x88] sm:$0xf] }
  0x4c   :  { %235 = vrot.lane.b32.xlu1 %v196_v8, %s6909_s26  ;;  %v484_v8 = vrot.slane %v482_v63, 5  ;;  %v743_v54 = vshll.u32 %v6456_v44, 16  ;;  %v717_v56 = vrot.slane %v715_v43, 5  ;;  %v729_v57 = vshll.u32 %v6454_v47, 16  ;;  %v6475_v58 = vld [vmem:[%s9781_s0 + $0x128] sm:$0xf] }
  0x4d   :  { %233 = vrot.lane.b32.xlu0 %v182_v11, %s6909_s26  ;;  %v470_v11 = vrot.slane %v468_v4, 5  ;;  %v703_v61 = vrot.slane %v701_v46, 5  ;;  %v6473_v63 = vld [vmem:[%s9781_s0 + $0x120] sm:$0xf]  ;;  %v877_v4 = vshrl.u32 %v6475_v58, 16  ;;  %vm249_vm7 = vcmask 93248  }
  0x4e   :  { %v485_v12 = vsel %vm7002_vm2, %v480_v7, %v484_v8  ;;  %6802 = vmatpush3.bf16.msra.mxu1 %v6885_v5  ;;  %v745_v3 = vrot.slane %v743_v54, 5  ;;  %v880_v7 = vshll.u32 %v6475_v58, 16  ;;  %v863_v8 = vshrl.u32 %v6473_v63, 16  ;;  %v6459_v19 = vld [vmem:[%s9781_s0 + $0x130] sm:$0xf] }
  0x4f   :  { %v471_v13 = vsel %vm7002_vm2, %v466_v10, %v470_v11  ;;  %791 = vst.msk [vmem:[#allocation2 + $0x28] sm:$0xf] %vm35_vm3, %v6459_v19  ;;  %v6480_v43 = vld [vmem:[%s9781_s0 + $0x13c] sm:$0x1]  ;;  %v6478_v47 = vld [vmem:[%s9781_s0 + $0x134] sm:$0x1] }
  0x50   :  { %239 = vrot.lane.b32.xlu1 %v224_v14, %s6909_s26  ;;  %v6451_v14 = vld [vmem:[%s9781_s0 + $0x30] sm:$0xf]  ;;  %vm299_vm8 = vcmask 126048   ;;  %v6467_v54 = vld [vmem:[%s9781_s0 + $0x178] sm:$0xf]  ;;  %v900_v58 = vshll.u32 %v6478_v47, 16 }
  0x51   :  { %237 = vrot.lane.b32.xlu0 %v210_v15, %s6909_s26  ;;  %v6449_v15 = vld [vmem:[%s9781_s0 + $0x28] sm:$0xf]  ;;  %v706_v17 = vshrl.u32 %v6451_v14, 16  ;;  %vm349_vm9 = vcmask 158848   ;;  %v6509_v19 = vld [vmem:[%s9781_s0 + $0x1c0] sm:$0xf] }
  0x52   :  { %v695_v22 = vshll.u32 %v6449_v15, 16  ;;  %vm510_vm10 = vcmask 191648   ;;  %vm560_vm11 = vcmask 224448   ;;  %vm610_vm12 = vcmask 257248  }
  0x53   :  { %v708_v30 = vrot.slane %v706_v17, 4  ;;  %vm771_vm13 = vcmask 290048   ;;  %vm1605_vm14 = vcmask 293888   ;;  %vm1749_vm15 = vcmask 57344  }
  0x54   :  { %285 = vrot.lane.b32.xlu1 %v6398_v18, %s6910_s17  ;;  %v709_v18 = vshll.u32 %v6451_v14, 16  ;;  %v697_v34 = vrot.slane %v695_v22, 5  ;;  %v6457_v14 = vld [vmem:[%s9781_s0 + $0x120] sm:$0xf]  ;;  %1756 = vst.msk [vmem:[#allocation3 + $0x1c] sm:$0x1] %vm1749_vm15, %v6915_v26 }
  0x55   :  { %283 = vrot.lane.b32.xlu0 %v6397_v21, %s6910_s17  ;;  %v692_v21 = vshrl.u32 %v6449_v15, 16  ;;  %v6477_v15 = vld [vmem:[%s9781_s0 + $0x130] sm:$0xf]  ;;  %789 = vst.msk [vmem:[#allocation2 + $0x20] sm:$0xf] %vm35_vm3, %v6457_v14  ;;  %vm2324_vm0 = vcmask 1042432  }
  0x56   :  { %v711_v31 = vrot.slane %v709_v18, 5  ;;  %v879_v18 = vrot.slane %v877_v4, 4  ;;  %v6489_v14 = vld [vmem:[%s9781_s0 + $0x1b0] sm:$0xf]  ;;  %1750 = vst.msk [vmem:[#allocation3 + $0x4] sm:$0x1] %vm1749_vm15, %v6915_v26 }
  0x57   :  { %v694_v33 = vrot.slane %v692_v21, 4  ;;  %v865_v21 = vrot.slane %v863_v8, 4  ;;  %1752 = vst.msk [vmem:[#allocation3 + $0xc] sm:$0x1] %vm1749_vm15, %v6915_v26  ;;  %1754 = vst.msk [vmem:[#allocation3 + $0x14] sm:$0x1] %vm1749_vm15, %v6915_v26 }
  0x58   :  { %289 = vrot.lane.b32.xlu1 %v6400_v28, %s6910_s17  ;;  %v6432_v28 = vld [vmem:[%s9781_s0 + $0x40] sm:$0xf]  ;;  %1758 = vst.msk [vmem:[#allocation3 + $0x24] sm:$0x1] %vm1749_vm15, %v6915_v26  ;;  %1760 = vst.msk [vmem:[#allocation3 + $0x2c] sm:$0x1] %vm1749_vm15, %v6915_v26 }
  0x59   :  { %287 = vrot.lane.b32.xlu0 %v6399_v35, %s6910_s17  ;;  %v720_v35 = vshrl.u32 %v6453_v23, 16  ;;  %v698_v45 = vor.u32 %v697_v34, %v694_v33  ;;  %v6474_v33 = vld [vmem:[%s9781_s0 + $0x124] sm:$0x1]  ;;  %v6466_v34 = vld [vmem:[%s9781_s0 + $0x170] sm:$0xf]  ;;  %vm2325_vm1 = vcmask 1046532  }
  0x5a   :  { %1762 = vst.msk [vmem:[#allocation3 + $0x34] sm:$0x1] %vm1749_vm15, %v6915_v26  ;;  %1764 = vst.msk [vmem:[#allocation3 + $0x3c] sm:$0x1] %vm1749_vm15, %v6915_v26  ;;  %vm2283_vm5 = vcmask 126016  }
  0x5b   :  { %v722_v48 = vrot.slane %v720_v35, 4  ;;  %v699_v60 = vrot.slane %v698_v45, 4  ;;  %v6465_v35 = vld [vmem:[%s9781_s0 + $0x168] sm:$0xf]  ;;  %1766 = vst.msk [vmem:[#allocation3 + $0x44] sm:$0x1] %vm1749_vm15, %v6915_v26 }
  0x5c   :  { %335 = vrot.lane.b32.xlu1 %v6406_v40, %s6911_s13  ;;  %v739_v40 = vrot.slane %v737_v25, 5  ;;  %1768 = vst.msk [vmem:[#allocation3 + $0x4c] sm:$0x1] %vm1749_vm15, %v6915_v26  ;;  %1770 = vst.msk [vmem:[#allocation3 + $0x54] sm:$0x1] %vm1749_vm15, %v6915_v26 }
  0x5d   :  { %333 = vrot.lane.b32.xlu0 %v6405_v42, %s6911_s13  ;;  %v712_v42 = vor.u32 %v711_v31, %v708_v30  ;;  %v726_v62 = vor.u32 %v725_v49, %v722_v48  ;;  %v704_v10 = vsel %vm7002_vm2, %v699_v60, %v703_v61  ;;  %v891_v30 = vshrl.u32 %v6477_v15, 16  ;;  %v6468_v48 = vld [vmem:[%s9781_s0 + $0x180] sm:$0xf]  ;;  %1772 = vst.msk [vmem:[#allocation3 + $0x5c] sm:$0x1] %vm1749_vm15, %v6915_v26 }
  0x5e   :  { %v740_v53 = vor.u32 %v739_v40, %v736_v39  ;;  %v894_v31 = vshll.u32 %v6477_v15, 16  ;;  %1774 = vst.msk [vmem:[#allocation3 + $0x64] sm:$0x1] %vm1749_vm15, %v6915_v26  ;;  %1776 = vst.msk [vmem:[#allocation3 + $0x6c] sm:$0x1] %vm1749_vm15, %v6915_v26 }
  0x5f   :  { %v713_v55 = vrot.slane %v712_v42, 4  ;;  %v727_v11 = vrot.slane %v726_v62, 4  ;;  %v872_v42 = vshll.u32 %v6474_v33, 16  ;;  %v893_v44 = vrot.slane %v891_v30, 4  ;;  %1778 = vst.msk [vmem:[#allocation3 + $0x74] sm:$0x1] %vm1749_vm15, %v6915_v26 }
  0x60   :  { %339 = vrot.lane.b32.xlu1 %v6408_v59, %s6911_s13  ;;  %v6439_v59 = vld [vmem:[%s9781_s0 + $0x80] sm:$0xf]  ;;  %v741_v2 = vrot.slane %v740_v53, 4  ;;  %v896_v45 = vrot.slane %v894_v31, 5  ;;  %v1152_v33 = vshll.u32 %v6509_v19, 16 }
  0x61   :  { %337 = vrot.lane.b32.xlu0 %v6407_v0, %s6911_s13  ;;  %v718_v5 = vsel %vm7002_vm2, %v713_v55, %v717_v56  ;;  %v874_v56 = vrot.slane %v872_v42, 5  ;;  %1780 = vst.msk [vmem:[#allocation3 + $0x7c] sm:$0x1] %vm1749_vm15, %v6915_v26  ;;  %1782 = vst.msk [vmem:[#allocation3 + $0x84] sm:$0x1] %vm1749_vm15, %v6915_v26 }
  0x62   :  { %v746_v17 = vsel %vm7002_vm2, %v741_v2, %v745_v3  ;;  %v902_v2 = vrot.slane %v900_v58, 5  ;;  %v1154_v47 = vrot.slane %v1152_v33, 5  ;;  %v6538_v33 = vld [vmem:[%s9781_s0 + $0x12c] sm:$0x1]  ;;  %1784 = vst.msk [vmem:[#allocation3 + $0x8c] sm:$0x1] %vm1749_vm15, %v6915_v26 }
  0x63   :  { %1786 = vst.msk [vmem:[#allocation3 + $0x94] sm:$0x1] %vm1749_vm15, %v6915_v26  ;;  %1788 = vst.msk [vmem:[#allocation3 + $0x9c] sm:$0x1] %vm1749_vm15, %v6915_v26 }
  0x64   :  { %496 = vrot.lane.b32.xlu1 %v457_v6, %s6912_s19  ;;  %v731_v6 = vrot.slane %v729_v57, 5  ;;  %v897_v57 = vor.u32 %v896_v45, %v893_v44  ;;  %v6512_v45 = vld [vmem:[%s9781_s0 + $0x1cc] sm:$0x1]  ;;  %4129 = vst.msk [vmem:[#allocation4 + $0x4] sm:$0x1] %vm1749_vm15, %v6915_v26 }
  0x65   :  { %494 = vrot.lane.b32.xlu0 %v443_v9, %s6912_s19  ;;  %v6479_v9 = vld [vmem:[%s9781_s0 + $0x138] sm:$0xf]  ;;  %4131 = vst.msk [vmem:[#allocation4 + $0xc] sm:$0x1] %vm1749_vm15, %v6915_v26  ;;  %4133 = vst.msk [vmem:[#allocation4 + $0x14] sm:$0x1] %vm1749_vm15, %v6915_v26 }
  0x66   :  { %v905_v22 = vshrl.u32 %v6479_v9, 16  ;;  %v908_v23 = vshll.u32 %v6479_v9, 16  ;;  %v732_v25 = vsel %vm7002_vm2, %v727_v11, %v731_v6  ;;  %v6505_v9 = vld [vmem:[%s9781_s0 + $0x1b0] sm:$0xf]  ;;  %4135 = vst.msk [vmem:[#allocation4 + $0x1c] sm:$0x1] %vm1749_vm15, %v6915_v26 }
  0x67   :  { %v1121_v15 = vshrl.u32 %v6505_v9, 16  ;;  %4137 = vst.msk [vmem:[#allocation4 + $0x24] sm:$0x1] %vm1749_vm15, %v6915_v26  ;;  %4139 = vst.msk [vmem:[#allocation4 + $0x2c] sm:$0x1] %vm1749_vm15, %v6915_v26 }
  0x68   :  { %500 = vrot.lane.b32.xlu1 %v485_v12, %s6912_s19  ;;  %v866_v12 = vshll.u32 %v6473_v63, 16  ;;  %v910_v39 = vrot.slane %v908_v23, 5  ;;  %4141 = vst.msk [vmem:[#allocation4 + $0x34] sm:$0x1] %vm1749_vm15, %v6915_v26  ;;  %4143 = vst.msk [vmem:[#allocation4 + $0x3c] sm:$0x1] %vm1749_vm15, %v6915_v26 }
  0x69   :  { %498 = vrot.lane.b32.xlu0 %v471_v13, %s6912_s19  ;;  %v6458_v13 = vld [vmem:[%s9781_s0 + $0x128] sm:$0xf]  ;;  %v1123_v30 = vrot.slane %v1121_v15, 4  ;;  %4145 = vst.msk [vmem:[#allocation4 + $0x44] sm:$0x1] %vm1749_vm15, %v6915_v26 }
  0x6a   :  { %790 = vst.msk [vmem:[#allocation2 + $0x24] sm:$0xf] %vm35_vm3, %v6458_v13 }
  0x6b   :  { %4147 = vst.msk [vmem:[#allocation4 + $0x4c] sm:$0x1] %vm1749_vm15, %v6915_v26  ;;  %4149 = vst.msk [vmem:[#allocation4 + $0x54] sm:$0x1] %vm1749_vm15, %v6915_v26 }
  0x6c   :  { %546 = vrot.lane.b32.xlu1 %v6430_v16, %s6913_s29  ;;  %v6460_v16 = vld [vmem:[%s9781_s0 + $0x138] sm:$0xf]  ;;  %4151 = vst.msk [vmem:[#allocation4 + $0x5c] sm:$0x1] %vm1749_vm15, %v6915_v26  ;;  %4153 = vst.msk [vmem:[#allocation4 + $0x64] sm:$0x1] %vm1749_vm15, %v6915_v26 }
  0x6d   :  { %544 = vrot.lane.b32.xlu0 %v6429_v20, %s6913_s29  ;;  %792 = vst.msk [vmem:[#allocation2 + $0x2c] sm:$0xf] %vm35_vm3, %v6460_v16  ;;  %v882_v20 = vrot.slane %v880_v7, 5  ;;  %v6507_v7 = vld [vmem:[%s9781_s0 + $0x1b8] sm:$0xf]  ;;  %v1124_v16 = vshll.u32 %v6505_v9, 16 }
  0x6e   :  { %v1135_v11 = vshrl.u32 %v6507_v7, 16  ;;  %v6539_v9 = vld [vmem:[%s9781_s0 + $0x130] sm:$0xf]  ;;  %4155 = vst.msk [vmem:[#allocation4 + $0x6c] sm:$0x1] %vm1749_vm15, %v6915_v26 }
  0x6f   :  { %v883_v36 = vor.u32 %v882_v20, %v879_v18  ;;  %v6492_v20 = vld [vmem:[%s9781_s0 + $0x1c8] sm:$0xf]  ;;  %v1126_v31 = vrot.slane %v1124_v16, 5  ;;  %4157 = vst.msk [vmem:[#allocation4 + $0x74] sm:$0x1] %vm1749_vm15, %v6915_v26 }
  0x70   :  { %550 = vrot.lane.b32.xlu1 %v6432_v28, %s6913_s29  ;;  %v6476_v28 = vld [vmem:[%s9781_s0 + $0x12c] sm:$0x1]  ;;  %v6521_v16 = vld [vmem:[%s9781_s0 + $0x128] sm:$0xf]  ;;  %4159 = vst.msk [vmem:[#allocation4 + $0x7c] sm:$0x1] %vm1749_vm15, %v6915_v26 }
  0x71   :  { %548 = vrot.lane.b32.xlu0 %v6431_v29, %s6913_s29  ;;  %v868_v29 = vrot.slane %v866_v12, 5  ;;  %v886_v37 = vshll.u32 %v6476_v28, 16  ;;  %v884_v49 = vrot.slane %v883_v36, 4  ;;  %v1138_v12 = vshll.u32 %v6507_v7, 16  ;;  %v6498_v36 = vld [vmem:[%s9781_s0 + $0x200] sm:$0xf] }
  0x72   :  { %4161 = vst.msk [vmem:[#allocation4 + $0x84] sm:$0x1] %vm1749_vm15, %v6915_v26  ;;  %4163 = vst.msk [vmem:[#allocation4 + $0x8c] sm:$0x1] %vm1749_vm15, %v6915_v26 }
  0x73   :  { %v1140_v23 = vrot.slane %v1138_v12, 5  ;;  %v6522_v12 = vld [vmem:[%s9781_s0 + $0x130] sm:$0xf]  ;;  %4165 = vst.msk [vmem:[#allocation4 + $0x94] sm:$0x1] %vm1749_vm15, %v6915_v26 }
  0x74   :  { %596 = vrot.lane.b32.xlu1 %v6438_v38, %s6914_s9  ;;  %v66_v50 = vpop.permute.xlu1 %65  ;;  %v62_v51 = vpop.permute.xlu0 %61  ;;  %v907_v38 = vrot.slane %v905_v22, 4  ;;  %v1137_v22 = vrot.slane %v1135_v11, 4  ;;  %v6537_v11 = vld [vmem:[%s9781_s0 + $0x128] sm:$0xf]  ;;  %4167 = vst.msk [vmem:[#allocation4 + $0x9c] sm:$0x1] %vm1749_vm15, %v6915_v26 }
  0x75   :  { %594 = vrot.lane.b32.xlu0 %v6437_v41, %s6914_s9  ;;  %88 = vst.msk [vmem:[#allocation2 + $0x8] sm:$0xf] %vm85_vm6, %v66_v50  ;;  %86 = vst.msk [vmem:[#allocation2] sm:$0xf] %vm85_vm6, %v62_v51  ;;  %v869_v41 = vor.u32 %v868_v29, %v865_v21  ;;  %v888_v50 = vrot.slane %v886_v37, 5 }
  0x76   :  { %v911_v51 = vor.u32 %v910_v39, %v907_v38  ;;  %v6491_v21 = vld [vmem:[%s9781_s0 + $0x1c0] sm:$0xf]  ;;  %v6508_v29 = vld [vmem:[%s9781_s0 + $0x1bc] sm:$0x1]  ;;  %v6497_v37 = vld [vmem:[%s9781_s0 + $0x1f8] sm:$0xf]  ;;  %v1141_v38 = vor.u32 %v1140_v23, %v1137_v22 }
  0x77   :  { %v870_v55 = vrot.slane %v869_v41, 4  ;;  %v889_v60 = vsel %vm7002_vm2, %v884_v49, %v888_v50  ;;  %v1144_v39 = vshll.u32 %v6508_v29, 16  ;;  %v6510_v49 = vld [vmem:[%s9781_s0 + $0x1c4] sm:$0x1]  ;;  %v6500_v50 = vld [vmem:[%s9781_s0 + $0x210] sm:$0xf] }
  0x78   :  { %600 = vrot.lane.b32.xlu1 %v6440_v52, %s6914_s9  ;;  %v68_v0 = vpop.permute.xlu1 %67  ;;  %v64_v1 = vpop.permute.xlu0 %63  ;;  %v914_v52 = vshll.u32 %v6480_v43, 16  ;;  %v912_v61 = vrot.slane %v911_v51, 4  ;;  %v1127_v43 = vor.u32 %v1126_v31, %v1123_v30  ;;  %v1142_v51 = vrot.slane %v1141_v38, 4  ;;  %v6543_v23 = vld [vmem:[%s9781_s0 + $0x140] sm:$0xf] }
  0x79   :  { %598 = vrot.lane.b32.xlu0 %v6439_v59, %s6914_s9  ;;  %89 = vst.msk [vmem:[#allocation2 + $0xc] sm:$0xf] %vm85_vm6, %v68_v0  ;;  %87 = vst.msk [vmem:[#allocation2 + $0x4] sm:$0xf] %vm85_vm6, %v64_v1  ;;  %v875_v0 = vsel %vm7002_vm2, %v870_v55, %v874_v56  ;;  %v898_v1 = vrot.slane %v897_v57, 4 }
  0x7a   :  { %v916_v62 = vrot.slane %v914_v52, 5  ;;  %v1146_v52 = vrot.slane %v1144_v39, 5  ;;  %v6499_v56 = vld [vmem:[%s9781_s0 + $0x208] sm:$0xf]  ;;  %v1128_v57 = vrot.slane %v1127_v43, 4 }
  0x7b   :  { %v903_v6 = vsel %vm7002_vm2, %v898_v1, %v902_v2  ;;  %v6540_v29 = vld [vmem:[%s9781_s0 + $0x134] sm:$0x1]  ;;  %v6530_v38 = vld [vmem:[%s9781_s0 + $0x178] sm:$0xf] }
  0x7c   :  { %757 = vrot.lane.b32.xlu1 %v718_v5, %s6916_s21  ;;  %v917_v4 = vsel %vm7002_vm2, %v912_v61, %v916_v62  ;;  %v1147_v62 = vsel %vm7002_vm2, %v1142_v51, %v1146_v52 }
  0x7d   :  { %755 = vrot.lane.b32.xlu0 %v704_v10, %s6916_s21  ;;  %v6490_v10 = vld [vmem:[%s9781_s0 + $0x1b8] sm:$0xf] }
  0x7e   :  { %v228_v24 = vpop.permute.xlu1 %227 }
  0x7f   :  { %251 = vst.msk [vmem:[#allocation2 + $0x4] sm:$0xf] %vm249_vm7, %v228_v24  ;;  %v226_v32 = vpop.permute.xlu0 %225 }
  0x80   :  { %250 = vst.msk [vmem:[#allocation2] sm:$0xf] %vm249_vm7, %v226_v32  ;;  %761 = vrot.lane.b32.xlu1 %v746_v17, %s6916_s21  ;;  %v6511_v17 = vld [vmem:[%s9781_s0 + $0x1c8] sm:$0xf]  ;;  %v1149_v32 = vshrl.u32 %v6509_v19, 16 }
  0x81   :  { %759 = vrot.lane.b32.xlu0 %v732_v25, %s6916_s21  ;;  %v1163_v24 = vshrl.u32 %v6511_v17, 16  ;;  %v1166_v25 = vshll.u32 %v6511_v17, 16  ;;  %v1379_v17 = vshrl.u32 %v6537_v11, 16 }
  0x82   :  { %v232_v40 = vpop.permute.xlu1 %231 }
  0x83   :  { %253 = vst.msk [vmem:[#allocation2 + $0xc] sm:$0xf] %vm249_vm7, %v232_v40  ;;  %v230_v46 = vpop.permute.xlu0 %229  ;;  %v1165_v40 = vrot.slane %v1163_v24, 4  ;;  %v1168_v41 = vrot.slane %v1166_v25, 5  ;;  %v6541_v24 = vld [vmem:[%s9781_s0 + $0x138] sm:$0xf] }
  0x84   :  { %252 = vst.msk [vmem:[#allocation2 + $0x8] sm:$0xf] %vm249_vm7, %v230_v46  ;;  %816 = vrot.lane.b32.xlu1 %v6466_v34, %s6908_s30  ;;  %v1151_v46 = vrot.slane %v1149_v32, 4  ;;  %v1381_v30 = vrot.slane %v1379_v17, 4  ;;  %v6470_v17 = vld [vmem:[%s9781_s0 + $0x190] sm:$0xf] }
  0x85   :  { %814 = vrot.lane.b32.xlu0 %v6465_v35, %s6908_s30  ;;  %v6506_v35 = vld [vmem:[%s9781_s0 + $0x1b4] sm:$0x1] }
  0x86   :  { %v278_v53 = vpop.permute.xlu1 %277  ;;  %v1130_v44 = vshll.u32 %v6506_v35, 16  ;;  %v1424_v35 = vshll.u32 %v6543_v23, 16 }
  0x87   :  { %301 = vst.msk [vmem:[#allocation2 + $0x4] sm:$0xf] %vm299_vm8, %v278_v53  ;;  %v276_v59 = vpop.permute.xlu0 %275  ;;  %v1169_v53 = vor.u32 %v1168_v41, %v1165_v40  ;;  %v1402_v40 = vshll.u32 %v6540_v29, 16 }
  0x88   :  { %300 = vst.msk [vmem:[#allocation2] sm:$0xf] %vm299_vm8, %v276_v59  ;;  %820 = vrot.lane.b32.xlu1 %v6468_v48, %s6908_s30  ;;  %v1132_v58 = vrot.slane %v1130_v44, 5  ;;  %v1155_v59 = vor.u32 %v1154_v47, %v1151_v46  ;;  %v1388_v44 = vshll.u32 %v6538_v33, 16  ;;  %v6532_v47 = vld [vmem:[%s9781_s0 + $0x188] sm:$0xf] }
  0x89   :  { %818 = vrot.lane.b32.xlu0 %v6467_v54, %s6908_s30  ;;  %v1172_v54 = vshll.u32 %v6512_v45, 16  ;;  %v2115_v45 = vld [vmem:[#allocation3] sm:$0xf]  ;;  %v1426_v52 = vrot.slane %v1424_v35, 5 }
  0x8a   :  { %v282_v63 = vpop.permute.xlu1 %281  ;;  %v1133_v2 = vsel %vm7002_vm2, %v1128_v57, %v1132_v58  ;;  %v1404_v57 = vrot.slane %v1402_v40, 5  ;;  %v6542_v58 = vld [vmem:[%s9781_s0 + $0x13c] sm:$0x1] }
  0x8b   :  { %303 = vst.msk [vmem:[#allocation2 + $0xc] sm:$0xf] %vm299_vm8, %v282_v63  ;;  %v280_v3 = vpop.permute.xlu0 %279  ;;  %v1170_v63 = vrot.slane %v1169_v53, 4 }
  0x8c   :  { %302 = vst.msk [vmem:[#allocation2 + $0x8] sm:$0xf] %vm299_vm8, %v280_v3  ;;  %976 = vrot.lane.b32.xlu1 %v889_v60, %s6909_s26  ;;  %v1158_v60 = vshll.u32 %v6510_v49, 16  ;;  %v1156_v3 = vrot.slane %v1155_v59, 4  ;;  %v6461_v49 = vld [vmem:[%s9781_s0 + $0x140] sm:$0xf] }
  0x8d   :  { %974 = vrot.lane.b32.xlu0 %v875_v0, %s6909_s26  ;;  %v1174_v0 = vrot.slane %v1172_v54, 5  ;;  %793 = vst.msk [vmem:[#allocation2 + $0x30] sm:$0xf] %vm35_vm3, %v6461_v49 }
  0x8e   :  { %v328_v5 = vpop.permute.xlu1 %327 }
  0x8f   :  { %351 = vst.msk [vmem:[#allocation2 + $0x4] sm:$0xf] %vm349_vm9, %v328_v5  ;;  %v326_v8 = vpop.permute.xlu0 %325 }
  0x90   :  { %350 = vst.msk [vmem:[#allocation2] sm:$0xf] %vm349_vm9, %v326_v8  ;;  %980 = vrot.lane.b32.xlu1 %v917_v4, %s6909_s26  ;;  %v1160_v4 = vrot.slane %v1158_v60, 5 }
  0x91   :  { %978 = vrot.lane.b32.xlu0 %v903_v6, %s6909_s26  ;;  %v1175_v6 = vsel %vm7002_vm2, %v1170_v63, %v1174_v0  ;;  %v6483_v63 = vld [vmem:[%s9781_s0 + $0x148] sm:$0xf] }
  0x92   :  { %v332_v13 = vpop.permute.xlu1 %331  ;;  %v1161_v8 = vsel %vm7002_vm2, %v1156_v3, %v1160_v4  ;;  %v6481_v3 = vld [vmem:[%s9781_s0 + $0x140] sm:$0xf] }
  0x93   :  { %353 = vst.msk [vmem:[#allocation2 + $0xc] sm:$0xf] %vm349_vm9, %v332_v13  ;;  %v330_v18 = vpop.permute.xlu0 %329  ;;  %v1393_v13 = vshrl.u32 %v6539_v9, 16 }
  0x94   :  { %352 = vst.msk [vmem:[#allocation2 + $0x8] sm:$0xf] %vm349_vm9, %v330_v18  ;;  %1025 = vrot.lane.b32.xlu1 %v6490_v10, %s6910_s17  ;;  %v1382_v18 = vshll.u32 %v6537_v11, 16 }
  0x95   :  { %1023 = vrot.lane.b32.xlu0 %v6489_v14, %s6910_s17  ;;  %v1396_v14 = vshll.u32 %v6539_v9, 16  ;;  %v933_v9 = vshrl.u32 %v6483_v63, 16 }
  0x96   :  { %v489_v28 = vpop.permute.xlu1 %488  ;;  %v1384_v31 = vrot.slane %v1382_v18, 5  ;;  %v6485_v18 = vld [vmem:[%s9781_s0 + $0x150] sm:$0xf] }
  0x97   :  { %512 = vst.msk [vmem:[#allocation2 + $0x4] sm:$0xf] %vm510_vm10, %v489_v28  ;;  %v487_v34 = vpop.permute.xlu0 %486  ;;  %v1398_v22 = vrot.slane %v1396_v14, 5  ;;  %v6523_v28 = vld [vmem:[%s9781_s0 + $0x138] sm:$0xf]  ;;  %v922_v14 = vshll.u32 %v6481_v3, 16 }
  0x98   :  { %511 = vst.msk [vmem:[#allocation2] sm:$0xf] %vm510_vm10, %v487_v34  ;;  %1029 = vrot.lane.b32.xlu1 %v6492_v20, %s6910_s17  ;;  %v6524_v20 = vld [vmem:[%s9781_s0 + $0x140] sm:$0xf]  ;;  %v1421_v34 = vshrl.u32 %v6543_v23, 16  ;;  %v1385_v43 = vor.u32 %v1384_v31, %v1381_v30  ;;  %v935_v29 = vrot.slane %v933_v9, 4 }
  0x99   :  { %1027 = vrot.lane.b32.xlu0 %v6491_v21, %s6910_s17  ;;  %v1395_v21 = vrot.slane %v1393_v13, 4  ;;  %v919_v13 = vshrl.u32 %v6481_v3, 16  ;;  %v6482_v31 = vld [vmem:[%s9781_s0 + $0x144] sm:$0x1] }
  0x9a   :  { %v493_v42 = vpop.permute.xlu1 %492  ;;  %v1423_v51 = vrot.slane %v1421_v34, 4 }
  0x9b   :  { %514 = vst.msk [vmem:[#allocation2 + $0xc] sm:$0xf] %vm510_vm10, %v493_v42  ;;  %v491_v48 = vpop.permute.xlu0 %490  ;;  %v1399_v39 = vor.u32 %v1398_v22, %v1395_v21  ;;  %v6529_v42 = vld [vmem:[%s9781_s0 + $0x170] sm:$0xf]  ;;  %v6469_v21 = vld [vmem:[%s9781_s0 + $0x188] sm:$0xf] }
  0x9c   :  { %513 = vst.msk [vmem:[#allocation2 + $0x8] sm:$0xf] %vm510_vm10, %v491_v48  ;;  %1074 = vrot.lane.b32.xlu1 %v6498_v36, %s6911_s13  ;;  %v1407_v36 = vshrl.u32 %v6541_v24, 16  ;;  %v6462_v48 = vld [vmem:[%s9781_s0 + $0x148] sm:$0xf] }
  0x9d   :  { %1072 = vrot.lane.b32.xlu0 %v6497_v37, %s6911_s13  ;;  %v1410_v37 = vshll.u32 %v6541_v24, 16  ;;  %794 = vst.msk [vmem:[#allocation2 + $0x34] sm:$0xf] %vm35_vm3, %v6462_v48 }
  0x9e   :  { %v539_v55 = vpop.permute.xlu1 %538  ;;  %v1409_v53 = vrot.slane %v1407_v36, 4  ;;  %v921_v36 = vrot.slane %v919_v13, 4 }
  0x9f   :  { %562 = vst.msk [vmem:[#allocation2 + $0x4] sm:$0xf] %vm560_vm11, %v539_v55  ;;  %v537_v61 = vpop.permute.xlu0 %536  ;;  %v1412_v54 = vrot.slane %v1410_v37, 5  ;;  %v6531_v55 = vld [vmem:[%s9781_s0 + $0x180] sm:$0xf]  ;;  %v924_v37 = vrot.slane %v922_v14, 5 }
  0xa0   :  { %561 = vst.msk [vmem:[#allocation2] sm:$0xf] %vm560_vm11, %v537_v61  ;;  %1078 = vrot.lane.b32.xlu1 %v6500_v50, %s6911_s13  ;;  %v6544_v50 = vld [vmem:[%s9781_s0 + $0x144] sm:$0x1]  ;;  %v1386_v61 = vrot.slane %v1385_v43, 4 }
  0xa1   :  { %1076 = vrot.lane.b32.xlu0 %v6499_v56, %s6911_s13  ;;  %v1400_v56 = vrot.slane %v1399_v39, 4  ;;  %v950_v39 = vshll.u32 %v6485_v18, 16 }
  0xa2   :  { %v543_v1 = vpop.permute.xlu1 %542 }
  0xa3   :  { %564 = vst.msk [vmem:[#allocation2 + $0xc] sm:$0xf] %vm560_vm11, %v543_v1  ;;  %v541_v5 = vpop.permute.xlu0 %540 }
  0xa4   :  { %563 = vst.msk [vmem:[#allocation2 + $0x8] sm:$0xf] %vm560_vm11, %v541_v5  ;;  %1234 = vrot.lane.b32.xlu1 %v1147_v62, %s6912_s19  ;;  %v1390_v62 = vrot.slane %v1388_v44, 5  ;;  %v1427_v5 = vor.u32 %v1426_v52, %v1423_v51  ;;  %v928_v44 = vshll.u32 %v6482_v31, 16  ;;  %v925_v51 = vor.u32 %v924_v37, %v921_v36  ;;  %v6488_v52 = vld [vmem:[%s9781_s0 + $0x15c] sm:$0x1] }
  0xa5   :  { %1232 = vrot.lane.b32.xlu0 %v1133_v2, %s6912_s19  ;;  %v1430_v2 = vshll.u32 %v6544_v50, 16  ;;  %v6496_v31 = vld [vmem:[%s9781_s0 + $0x1e8] sm:$0xf] }
  0xa6   :  { %v589_v7 = vpop.permute.xlu1 %588  ;;  %v1428_v22 = vrot.slane %v1427_v5, 4 }
  0xa7   :  { %612 = vst.msk [vmem:[#allocation2 + $0x4] sm:$0xf] %vm610_vm12, %v589_v7  ;;  %v587_v10 = vpop.permute.xlu0 %586  ;;  %v1416_v7 = vshll.u32 %v6542_v58, 16  ;;  %v1432_v23 = vrot.slane %v1430_v2, 5 }
  0xa8   :  { %611 = vst.msk [vmem:[#allocation2] sm:$0xf] %vm610_vm12, %v587_v10  ;;  %1238 = vrot.lane.b32.xlu1 %v1175_v6, %s6912_s19  ;;  %v1413_v6 = vor.u32 %v1412_v54, %v1409_v53  ;;  %v936_v10 = vshll.u32 %v6483_v63, 16  ;;  %v952_v54 = vrot.slane %v950_v39, 5  ;;  %v6471_v63 = vld [vmem:[%s9781_s0 + $0x198] sm:$0xf] }
  0xa9   :  { %1236 = vrot.lane.b32.xlu0 %v1161_v8, %s6912_s19  ;;  %v1405_v8 = vsel %vm7002_vm2, %v1400_v56, %v1404_v57  ;;  %v6486_v56 = vld [vmem:[%s9781_s0 + $0x154] sm:$0x1]  ;;  %v6472_v57 = vld [vmem:[%s9781_s0 + $0x1a0] sm:$0xf] }
  0xaa   :  { %v593_v15 = vpop.permute.xlu1 %592  ;;  %v1414_v24 = vrot.slane %v1413_v6, 4  ;;  %v938_v30 = vrot.slane %v936_v10, 5  ;;  %v956_v3 = vshll.u32 %v6486_v56, 16 }
  0xab   :  { %614 = vst.msk [vmem:[#allocation2 + $0xc] sm:$0xf] %vm610_vm12, %v593_v15  ;;  %v591_v19 = vpop.permute.xlu0 %590  ;;  %v6487_v15 = vld [vmem:[%s9781_s0 + $0x158] sm:$0xf] }
  0xac   :  { %613 = vst.msk [vmem:[#allocation2 + $0x8] sm:$0xf] %vm610_vm12, %v591_v19  ;;  %1283 = vrot.lane.b32.xlu1 %v6522_v12, %s6913_s29  ;;  %v1391_v12 = vsel %vm7002_vm2, %v1386_v61, %v1390_v62  ;;  %v6464_v19 = vld [vmem:[%s9781_s0 + $0x158] sm:$0xf]  ;;  %v964_v33 = vshll.u32 %v6487_v15, 16  ;;  %v970_v61 = vshll.u32 %v6488_v52, 16 }
  0xad   :  { %1281 = vrot.lane.b32.xlu0 %v6521_v16, %s6913_s29  ;;  %796 = vst.msk [vmem:[#allocation2 + $0x3c] sm:$0xf] %vm35_vm3, %v6464_v19  ;;  %v6494_v19 = vld [vmem:[%s9781_s0 + $0x1d8] sm:$0xf] }
  0xae   :  { %v750_v25 = vpop.permute.xlu1 %749  ;;  %v966_v48 = vrot.slane %v964_v33, 5 }
  0xaf   :  { %773 = vst.msk [vmem:[#allocation2 + $0x4] sm:$0xf] %vm771_vm13, %v750_v25  ;;  %v748_v32 = vpop.permute.xlu0 %747  ;;  %v1418_v25 = vrot.slane %v1416_v7, 5  ;;  %v972_v7 = vrot.slane %v970_v61, 5 }
  0xb0   :  { %772 = vst.msk [vmem:[#allocation2] sm:$0xf] %vm771_vm13, %v748_v32  ;;  %1287 = vrot.lane.b32.xlu1 %v6524_v20, %s6913_s29  ;;  %v6463_v20 = vld [vmem:[%s9781_s0 + $0x150] sm:$0xf]  ;;  %v961_v32 = vshrl.u32 %v6487_v15, 16 }
  0xb1   :  { %1285 = vrot.lane.b32.xlu0 %v6523_v28, %s6913_s29  ;;  %v6484_v28 = vld [vmem:[%s9781_s0 + $0x14c] sm:$0x1]  ;;  %795 = vst.msk [vmem:[#allocation2 + $0x38] sm:$0xf] %vm35_vm3, %v6463_v20  ;;  %v1419_v50 = vsel %vm7002_vm2, %v1414_v24, %v1418_v25  ;;  %vm8095_vm3 = vmor %vm2324_vm0, %vm2325_vm1  ;;  %vm2900_vm0 = vcmask 519616   ;;  %vm2997_vm1 = vcmask 585216  }
  0xb2   :  { %v72_v41 = vpop.permute.xlu1 %71  ;;  %v942_v43 = vshll.u32 %v6484_v28, 16  ;;  %v6519_v28 = vld [vmem:[%s9781_s0 + $0x1e8] sm:$0xf] }
  0xb3   :  { %91 = vst.msk [vmem:[#allocation2 + $0x14] sm:$0xf] %vm85_vm6, %v72_v41  ;;  %v70_v46 = vpop.permute.xlu0 %69  ;;  %v1222_v36 = vshll.u32 %v6519_v28, 16 }
  0xb4   :  { %90 = vst.msk [vmem:[#allocation2 + $0x10] sm:$0xf] %vm85_vm6, %v70_v46  ;;  %1332 = vrot.lane.b32.xlu1 %v6530_v38, %s6914_s9  ;;  %v947_v38 = vshrl.u32 %v6485_v18, 16  ;;  %v939_v46 = vor.u32 %v938_v30, %v935_v29  ;;  %v6513_v18 = vld [vmem:[%s9781_s0 + $0x1d0] sm:$0xf] }
  0xb5   :  { %1330 = vrot.lane.b32.xlu0 %v6529_v42, %s6914_s9  ;;  %v1177_v24 = vshrl.u32 %v6513_v18, 16  ;;  %v1180_v25 = vshll.u32 %v6513_v18, 16  ;;  %v6517_v30 = vld [vmem:[%s9781_s0 + $0x1e0] sm:$0xf]  ;;  %v6547_v18 = vld [vmem:[%s9781_s0 + $0x150] sm:$0xf] }
  0xb6   :  { %v1523_v59 = vld [vmem:[#allocation2 + $0x4] sm:$0xf]  ;;  %v754_v60 = vpop.permute.xlu1 %753  ;;  %v949_v53 = vrot.slane %v947_v38, 4  ;;  %v940_v58 = vrot.slane %v939_v46, 4  ;;  %v6516_v38 = vld [vmem:[%s9781_s0 + $0x1dc] sm:$0x1] }
  0xb7   :  { %v1522_v0 = vld [vmem:[#allocation2] sm:$0xf]  ;;  %775 = vst.msk [vmem:[#allocation2 + $0xc] sm:$0xf] %vm771_vm13, %v754_v60  ;;  %v752_v1 = vpop.permute.xlu0 %751  ;;  %v1179_v39 = vrot.slane %v1177_v24, 4 }
  0xb8   :  { %2123 = vst.msk [vmem:[#allocation2] sm:$0xf] %vm1747_vm4, %v2115_v45  ;;  %1336 = vrot.lane.b32.xlu1 %v6532_v47, %s6914_s9  ;;  %v6554_v4 = vcombine.low %v1522_v0, %v1523_v59  ;;  %v1433_v45 = vsel %vm7002_vm2, %v1428_v22, %v1432_v23  ;;  %v963_v47 = vrot.slane %v961_v32, 4  ;;  %v944_v59 = vrot.slane %v942_v43, 5  ;;  %v6493_v23 = vld [vmem:[%s9781_s0 + $0x1d0] sm:$0xf] }
  0xb9   :  { %774 = vst.msk [vmem:[#allocation2 + $0x8] sm:$0xf] %vm771_vm13, %v752_v1  ;;  %1334 = vrot.lane.b32.xlu0 %v6531_v55, %s6914_s9  ;;  %v926_v0 = vrot.slane %v925_v51, 4  ;;  %v930_v1 = vrot.slane %v928_v44, 5  ;;  %v953_v2 = vor.u32 %v952_v54, %v949_v53  ;;  %v6495_v32 = vld [vmem:[%s9781_s0 + $0x1e0] sm:$0xf] }
  0xba   :  { %6803 = vmatprep.mubr.msk.bf16.mxu1 %vm1605_vm14, %v6554_v4  ;;  %v76_v11 = vpop.permute.xlu1 %75  ;;  %v967_v60 = vor.u32 %v966_v48, %v963_v47  ;;  %v945_v5 = vsel %vm7002_vm2, %v940_v58, %v944_v59  ;;  %v6514_v44 = vld [vmem:[%s9781_s0 + $0x1d4] sm:$0x1]  ;;  %v6501_v46 = vld [vmem:[%s9781_s0 + $0x218] sm:$0xf]  ;;  %v1200_v48 = vshll.u32 %v6516_v38, 16 }
  0xbb   :  { %93 = vst.msk [vmem:[#allocation2 + $0x1c] sm:$0xf] %vm85_vm6, %v76_v11  ;;  %v74_v16 = vpop.permute.xlu0 %73  ;;  %v931_v9 = vsel %vm7002_vm2, %v926_v0, %v930_v1  ;;  %v954_v10 = vrot.slane %v953_v2, 4  ;;  %v958_v11 = vrot.slane %v956_v3, 5  ;;  %v1186_v53 = vshll.u32 %v6514_v44, 16 }
  0xbc   :  { %92 = vst.msk [vmem:[#allocation2 + $0x18] sm:$0xf] %vm85_vm6, %v74_v16  ;;  %1492 = vrot.lane.b32.xlu1 %v1405_v8, %s6916_s21  ;;  %v968_v6 = vrot.slane %v967_v60, 4  ;;  %v6515_v16 = vld [vmem:[%s9781_s0 + $0x1d8] sm:$0xf]  ;;  %v1202_v61 = vrot.slane %v1200_v48, 5 }
  0xbd   :  { %1490 = vrot.lane.b32.xlu0 %v1391_v12, %s6916_s21  ;;  %v959_v15 = vsel %vm7002_vm2, %v954_v10, %v958_v11  ;;  %v1191_v20 = vshrl.u32 %v6515_v16, 16  ;;  %v6520_v54 = vld [vmem:[%s9781_s0 + $0x1ec] sm:$0x1]  ;;  %v6518_v58 = vld [vmem:[%s9781_s0 + $0x1e4] sm:$0x1]  ;;  %v1188_v3 = vrot.slane %v1186_v53, 5 }
  0xbe   :  { %v1525_v34 = vld [vmem:[#allocation2 + $0xc] sm:$0xf]  ;;  %v236_v35 = vpop.permute.xlu1 %235  ;;  %v973_v13 = vsel %vm7002_vm2, %v968_v6, %v972_v7  ;;  %v6504_v59 = vld [vmem:[%s9781_s0 + $0x230] sm:$0xf]  ;;  %v6503_v1 = vld [vmem:[%s9781_s0 + $0x228] sm:$0xf] }
  0xbf   :  { %255 = vst.msk [vmem:[#allocation2 + $0x14] sm:$0xf] %vm249_vm7, %v236_v35  ;;  %v234_v41 = vpop.permute.xlu0 %233  ;;  %v1193_v33 = vrot.slane %v1191_v20, 4  ;;  %v1219_v35 = vshrl.u32 %v6519_v28, 16  ;;  %v6545_v20 = vld [vmem:[%s9781_s0 + $0x148] sm:$0xf] }
  0xc0   :  { %v1524_v40 = vld [vmem:[#allocation2 + $0x8] sm:$0xf]  ;;  %254 = vst.msk [vmem:[#allocation2 + $0x10] sm:$0xf] %vm249_vm7, %v234_v41  ;;  %824 = vrot.lane.b32.xlu1 %v6470_v17, %s6908_s30  ;;  %v1205_v41 = vshrl.u32 %v6517_v30, 16  ;;  %v1435_v28 = vshrl.u32 %v6545_v20, 16 }
  0xc1   :  { %v6555_v42 = vcombine.low %v1524_v40, %v1525_v34  ;;  %822 = vrot.lane.b32.xlu0 %v6469_v21, %s6908_s30  ;;  %v1194_v21 = vshll.u32 %v6515_v16, 16  ;;  %v1182_v40 = vrot.slane %v1180_v25, 5  ;;  %v6525_v25 = vld [vmem:[%s9781_s0 + $0x148] sm:$0xf]  ;;  %v6533_v48 = vld [vmem:[%s9781_s0 + $0x190] sm:$0xf] }
  0xc2   :  { %v240_v49 = vpop.permute.xlu1 %239 }
  0xc3   :  { %6804 = vmatmul.mubr.msk.bf16.vlgmr.msra.gmra.mxu1 %vm1605_vm14, %v6555_v42  ;;  %257 = vst.msk [vmem:[#allocation2 + $0x1c] sm:$0xf] %vm249_vm7, %v240_v49  ;;  %v238_v55 = vpop.permute.xlu0 %237  ;;  %v1196_v34 = vrot.slane %v1194_v21, 5  ;;  %v1208_v42 = vshll.u32 %v6517_v30, 16  ;;  %v1221_v49 = vrot.slane %v1219_v35, 4  ;;  %v1183_v52 = vor.u32 %v1182_v40, %v1179_v39 }
  0xc4   :  { %256 = vst.msk [vmem:[#allocation2 + $0x18] sm:$0xf] %vm249_vm7, %v238_v55  ;;  %1496 = vrot.lane.b32.xlu1 %v1433_v45, %s6916_s21  ;;  %v6502_v45 = vld [vmem:[%s9781_s0 + $0x220] sm:$0xf]  ;;  %v1207_v55 = vrot.slane %v1205_v41, 4  ;;  %v1437_v41 = vrot.slane %v1435_v28, 4 }
  0xc5   :  { %1494 = vrot.lane.b32.xlu0 %v1419_v50, %s6916_s21  ;;  %v1197_v47 = vor.u32 %v1196_v34, %v1193_v33  ;;  %v1224_v50 = vrot.slane %v1222_v36, 5  ;;  %v1210_v56 = vrot.slane %v1208_v42, 5  ;;  %v1184_v2 = vrot.slane %v1183_v52, 4  ;;  %v6526_v21 = vld [vmem:[%s9781_s0 + $0x150] sm:$0xf] }
  0xc6   :  { %v286_v62 = vpop.permute.xlu1 %285  ;;  %v6551_v30 = vld [vmem:[%s9781_s0 + $0x160] sm:$0xf]  ;;  %v6527_v34 = vld [vmem:[%s9781_s0 + $0x158] sm:$0xf]  ;;  %v6548_v40 = vld [vmem:[%s9781_s0 + $0x154] sm:$0x1] }
  0xc7   :  { %305 = vst.msk [vmem:[#allocation2 + $0x14] sm:$0xf] %vm299_vm8, %v286_v62  ;;  %v284_v4 = vpop.permute.xlu0 %283  ;;  %v1198_v60 = vrot.slane %v1197_v47, 4  ;;  %v1225_v62 = vor.u32 %v1224_v50, %v1221_v49  ;;  %v1189_v11 = vsel %vm7002_vm2, %v1184_v2, %v1188_v3  ;;  %v6528_v33 = vld [vmem:[%s9781_s0 + $0x160] sm:$0xf]  ;;  %v1480_v38 = vshll.u32 %v6551_v30, 16 }
  0xc8   :  { %304 = vst.msk [vmem:[#allocation2 + $0x10] sm:$0xf] %vm299_vm8, %v284_v4  ;;  %828 = vrot.lane.b32.xlu1 %v6472_v57, %s6908_s30  ;;  %v1211_v4 = vor.u32 %v1210_v56, %v1207_v55  ;;  %v6534_v47 = vld [vmem:[%s9781_s0 + $0x198] sm:$0xf]  ;;  %v1458_v50 = vshll.u32 %v6548_v40, 16 }
  0xc9   :  { %826 = vrot.lane.b32.xlu0 %v6471_v63, %s6908_s30  ;;  %v1228_v63 = vshll.u32 %v6520_v54, 16  ;;  %v1203_v7 = vsel %vm7002_vm2, %v1198_v60, %v1202_v61  ;;  %v1482_v52 = vrot.slane %v1480_v38, 5  ;;  %v6552_v56 = vld [vmem:[%s9781_s0 + $0x164] sm:$0x1]  ;;  %v6550_v60 = vld [vmem:[%s9781_s0 + $0x15c] sm:$0x1] }
  0xca   :  { %v290_v8 = vpop.permute.xlu1 %289  ;;  %v6536_v61 = vld [vmem:[%s9781_s0 + $0x1a8] sm:$0xf]  ;;  %v1486_v2 = vshll.u32 %v6552_v56, 16 }
  0xcb   :  { %307 = vst.msk [vmem:[#allocation2 + $0x1c] sm:$0xf] %vm299_vm8, %v290_v8  ;;  %v288_v12 = vpop.permute.xlu0 %287  ;;  %v1226_v8 = vrot.slane %v1225_v62, 4  ;;  %v6535_v62 = vld [vmem:[%s9781_s0 + $0x1a0] sm:$0xf] }
  0xcc   :  { %306 = vst.msk [vmem:[#allocation2 + $0x18] sm:$0xf] %vm299_vm8, %v288_v12  ;;  %984 = vrot.lane.b32.xlu1 %v945_v5, %s6909_s26  ;;  %v1214_v5 = vshll.u32 %v6518_v58, 16  ;;  %v1212_v12 = vrot.slane %v1211_v4, 4 }
  0xcd   :  { %982 = vrot.lane.b32.xlu0 %v931_v9, %s6909_s26  ;;  %v1230_v9 = vrot.slane %v1228_v63, 5 }
  0xce   :  { %v336_v14 = vpop.permute.xlu1 %335 }
  0xcf   :  { %355 = vst.msk [vmem:[#allocation2 + $0x14] sm:$0xf] %vm349_vm9, %v336_v14  ;;  %v334_v17 = vpop.permute.xlu0 %333 }
  0xd0   :  { %354 = vst.msk [vmem:[#allocation2 + $0x10] sm:$0xf] %vm349_vm9, %v334_v17  ;;  %988 = vrot.lane.b32.xlu1 %v973_v13, %s6909_s26  ;;  %v1216_v13 = vrot.slane %v1214_v5, 5 }
  0xd1   :  { %986 = vrot.lane.b32.xlu0 %v959_v15, %s6909_s26  ;;  %v1231_v15 = vsel %vm7002_vm2, %v1226_v8, %v1230_v9  ;;  %v1472_v8 = vshll.u32 %v6550_v60, 16  ;;  %v2924_v60 = vld [vmem:[#allocation3 + $0x4c] sm:$0x1] }
  0xd2   :  { %v340_v22 = vpop.permute.xlu1 %339  ;;  %v1217_v17 = vsel %vm7002_vm2, %v1212_v12, %v1216_v13 }
  0xd3   :  { %357 = vst.msk [vmem:[#allocation2 + $0x1c] sm:$0xf] %vm349_vm9, %v340_v22  ;;  %v338_v29 = vpop.permute.xlu0 %337  ;;  %v1449_v22 = vshrl.u32 %v6547_v18, 16 }
  0xd4   :  { %356 = vst.msk [vmem:[#allocation2 + $0x18] sm:$0xf] %vm349_vm9, %v338_v29  ;;  %1033 = vrot.lane.b32.xlu1 %v6494_v19, %s6910_s17  ;;  %v1438_v29 = vshll.u32 %v6545_v20, 16 }
  0xd5   :  { %1031 = vrot.lane.b32.xlu0 %v6493_v23, %s6910_s17  ;;  %v1452_v23 = vshll.u32 %v6547_v18, 16  ;;  %v1451_v35 = vrot.slane %v1449_v22, 4 }
  0xd6   :  { %v497_v37 = vpop.permute.xlu1 %496  ;;  %v1440_v42 = vrot.slane %v1438_v29, 5 }
  0xd7   :  { %516 = vst.msk [vmem:[#allocation2 + $0x14] sm:$0xf] %vm510_vm10, %v497_v37  ;;  %v495_v43 = vpop.permute.xlu0 %494  ;;  %v1454_v36 = vrot.slane %v1452_v23, 5  ;;  %v1477_v37 = vshrl.u32 %v6551_v30, 16 }
  0xd8   :  { %515 = vst.msk [vmem:[#allocation2 + $0x10] sm:$0xf] %vm510_vm10, %v495_v43  ;;  %1037 = vrot.lane.b32.xlu1 %v6496_v31, %s6910_s17  ;;  %v1441_v54 = vor.u32 %v1440_v42, %v1437_v41 }
  0xd9   :  { %1035 = vrot.lane.b32.xlu0 %v6495_v32, %s6910_s17  ;;  %v6549_v32 = vld [vmem:[%s9781_s0 + $0x158] sm:$0xf]  ;;  %v1455_v49 = vor.u32 %v1454_v36, %v1451_v35  ;;  %s6919_s17 = smov 64  }
  0xda   :  { %v501_v51 = vpop.permute.xlu1 %500  ;;  %v1463_v43 = vshrl.u32 %v6549_v32, 16  ;;  %v1466_v44 = vshll.u32 %v6549_v32, 16  ;;  %v1442_v5 = vrot.slane %v1441_v54, 4 }
  0xdb   :  { %518 = vst.msk [vmem:[#allocation2 + $0x1c] sm:$0xf] %vm510_vm10, %v501_v51  ;;  %v499_v57 = vpop.permute.xlu0 %498  ;;  %v1479_v51 = vrot.slane %v1477_v37, 4  ;;  %v1456_v63 = vrot.slane %v1455_v49, 4 }
  0xdc   :  { %517 = vst.msk [vmem:[#allocation2 + $0x18] sm:$0xf] %vm510_vm10, %v499_v57  ;;  %1082 = vrot.lane.b32.xlu1 %v6502_v45, %s6911_s13  ;;  %v1465_v57 = vrot.slane %v1463_v43, 4  ;;  %v1468_v58 = vrot.slane %v1466_v44, 5  ;;  %v2763_v44 = vld [vmem:[#allocation3 + $0x4c] sm:$0x1] }
  0xdd   :  { %1080 = vrot.lane.b32.xlu0 %v6501_v46, %s6911_s13  ;;  %v6546_v46 = vld [vmem:[%s9781_s0 + $0x14c] sm:$0x1]  ;;  %s6917_s0 = smov 48  }
  0xde   :  { %v547_v0 = vpop.permute.xlu1 %546  ;;  %v1444_v55 = vshll.u32 %v6546_v46, 16  ;;  %v2706_v46 = vld [vmem:[#allocation3 + $0x48] sm:$0xf] }
  0xdf   :  { %566 = vst.msk [vmem:[#allocation2 + $0x14] sm:$0xf] %vm560_vm11, %v547_v0  ;;  %v545_v6 = vpop.permute.xlu0 %544  ;;  %v1460_v0 = vrot.slane %v1458_v50, 5 }
  0xe0   :  { %565 = vst.msk [vmem:[#allocation2 + $0x10] sm:$0xf] %vm560_vm11, %v545_v6  ;;  %1086 = vrot.lane.b32.xlu1 %v6504_v59, %s6911_s13  ;;  %v1446_v6 = vrot.slane %v1444_v55, 5 }
  0xe1   :  { %1084 = vrot.lane.b32.xlu0 %v6503_v1, %s6911_s13  ;;  %v1483_v1 = vor.u32 %v1482_v52, %v1479_v51  ;;  %v1461_v12 = vsel %vm7002_vm2, %v1456_v63, %v1460_v0  ;;  %v2971_v0 = vrot.slane %v2924_v60, 5 }
  0xe2   :  { %v551_v10 = vpop.permute.xlu1 %550 }
  0xe3   :  { %568 = vst.msk [vmem:[#allocation2 + $0x1c] sm:$0xf] %vm560_vm11, %v551_v10  ;;  %v549_v14 = vpop.permute.xlu0 %548  ;;  %v1484_v13 = vrot.slane %v1483_v1, 4 }
  0xe4   :  { %567 = vst.msk [vmem:[#allocation2 + $0x18] sm:$0xf] %vm560_vm11, %v549_v14  ;;  %1242 = vrot.lane.b32.xlu1 %v1203_v7, %s6912_s19  ;;  %v1469_v7 = vor.u32 %v1468_v58, %v1465_v57  ;;  %v1488_v14 = vrot.slane %v1486_v2, 5  ;;  %v6266_v2 = vld [vmem:[%s9786_s6] sm:$0xff] }
  0xe5   :  { %1240 = vrot.lane.b32.xlu0 %v1189_v11, %s6912_s19 }
  0xe6   :  { %v597_v16 = vpop.permute.xlu1 %596  ;;  %v1470_v18 = vrot.slane %v1469_v7, 4  ;;  %v1489_v23 = vsel %vm7002_vm2, %v1484_v13, %v1488_v14 }
  0xe7   :  { %616 = vst.msk [vmem:[#allocation2 + $0x14] sm:$0xf] %vm610_vm12, %v597_v16  ;;  %v595_v19 = vpop.permute.xlu0 %594 }
  0xe8   :  { %615 = vst.msk [vmem:[#allocation2 + $0x10] sm:$0xf] %vm610_vm12, %v595_v19  ;;  %1246 = vrot.lane.b32.xlu1 %v1231_v15, %s6912_s19  ;;  %v1474_v19 = vrot.slane %v1472_v8, 5 }
  0xe9   :  { %1244 = vrot.lane.b32.xlu0 %v1217_v17, %s6912_s19  ;;  %v1447_v17 = vsel %vm7002_vm2, %v1442_v5, %v1446_v6 }
  0xea   :  { %v601_v24 = vpop.permute.xlu1 %600 }
  0xeb   :  { %618 = vst.msk [vmem:[#allocation2 + $0x1c] sm:$0xf] %vm610_vm12, %v601_v24  ;;  %v599_v31 = vpop.permute.xlu0 %598 }
  0xec   :  { %617 = vst.msk [vmem:[#allocation2 + $0x18] sm:$0xf] %vm610_vm12, %v599_v31  ;;  %1291 = vrot.lane.b32.xlu1 %v6526_v21, %s6913_s29 }
  0xed   :  { %1289 = vrot.lane.b32.xlu0 %v6525_v25, %s6913_s29  ;;  %v1475_v25 = vsel %vm7002_vm2, %v1470_v18, %v1474_v19 }
  0xee   :  { %v758_v39 = vpop.permute.xlu1 %757 }
  0xef   :  { %777 = vst.msk [vmem:[#allocation2 + $0x14] sm:$0xf] %vm771_vm13, %v758_v39  ;;  %v756_v45 = vpop.permute.xlu0 %755 }
  0xf0   :  { %776 = vst.msk [vmem:[#allocation2 + $0x10] sm:$0xf] %vm771_vm13, %v756_v45  ;;  %1295 = vrot.lane.b32.xlu1 %v6528_v33, %s6913_s29  ;;  %v2762_v33 = vld [vmem:[#allocation3 + $0x48] sm:$0xf]  ;;  %v2132_v45 = vld [vmem:[#allocation3 + $0x4] sm:$0x1] }
  0xf1   :  { %1293 = vrot.lane.b32.xlu0 %v6527_v34, %s6913_s29  ;;  %v2131_v34 = vld [vmem:[#allocation3] sm:$0xf]  ;;  %v2863_v35 = vshrl.u32 %v2762_v33, 16  ;;  %v2866_v36 = vshll.u32 %v2762_v33, 16  ;;  %v2157_v50 = vshll.u32 %v2132_v45, 16 }
  0xf2   :  { %v762_v53 = vpop.permute.xlu1 %761  ;;  %v2148_v37 = vshrl.u32 %v2131_v34, 16  ;;  %v2151_v38 = vshll.u32 %v2131_v34, 16 }
  0xf3   :  { %779 = vst.msk [vmem:[#allocation2 + $0x1c] sm:$0xf] %vm771_vm13, %v762_v53  ;;  %v760_v59 = vpop.permute.xlu0 %759  ;;  %v2865_v40 = vrot.slane %v2863_v35, 4  ;;  %v2868_v41 = vrot.slane %v2866_v36, 5  ;;  %v2159_v55 = vrot.slane %v2157_v50, 5 }
  0xf4   :  { %778 = vst.msk [vmem:[#allocation2 + $0x18] sm:$0xf] %vm771_vm13, %v760_v59  ;;  %1340 = vrot.lane.b32.xlu1 %v6534_v47, %s6914_s9  ;;  %v2150_v42 = vrot.slane %v2148_v37, 4  ;;  %v2153_v43 = vrot.slane %v2151_v38, 5  ;;  %v2923_v59 = vld [vmem:[#allocation3 + $0x48] sm:$0xe] }
  0xf5   :  { %1338 = vrot.lane.b32.xlu0 %v6533_v48, %s6914_s9  ;;  %v2869_v47 = vor.u32 %v2868_v41, %v2865_v40  ;;  %v2872_v48 = vshll.u32 %v2763_v44, 16  ;;  %v6612_v63 = vrot.slane %v2923_v59, 9 }
  0xf6   :  { %v1527_v3 = vld [vmem:[#allocation2 + $0x14] sm:$0xf]  ;;  %v817_v4 = vpop.permute.xlu1 %816  ;;  %v2154_v49 = vor.u32 %v2153_v43, %v2150_v42 }
  0xf7   :  { %v1526_v9 = vld [vmem:[#allocation2 + $0x10] sm:$0xf]  ;;  %839 = vst.msk [vmem:[#allocation2 + $0x24] sm:$0xf] %vm85_vm6, %v817_v4  ;;  %v815_v10 = vpop.permute.xlu0 %814  ;;  %v2870_v52 = vrot.slane %v2869_v47, 4  ;;  %v2874_v53 = vrot.slane %v2872_v48, 5  ;;  %v2972_v5 = vsel %vm8095_vm3, %v6612_v63, %v2971_v0 }
  0xf8   :  { %838 = vst.msk [vmem:[#allocation2 + $0x20] sm:$0xf] %vm85_vm6, %v815_v10  ;;  %1344 = vrot.lane.b32.xlu1 %v6536_v61, %s6914_s9  ;;  %v6556_v11 = vcombine.low %v1526_v9, %v1527_v3  ;;  %v2155_v54 = vrot.slane %v2154_v49, 4  ;;  %v2292_v61 = vld [vmem:[#allocation3] sm:$0xe] }
  0xf9   :  { %1342 = vrot.lane.b32.xlu0 %v6535_v62, %s6914_s9  ;;  %v2875_v57 = vsel %vm7002_vm2, %v2870_v52, %v2874_v53  ;;  %s6918_s9 = smov 56   ;;  %v2293_v3 = vld [vmem:[#allocation3 + $0x4] sm:$0x1]  ;;  %v6589_v4 = vrot.slane %v2292_v61, 9 }
  0xfa   :  { %v1529_v15 = vld [vmem:[#allocation2 + $0x1c] sm:$0xf]  ;;  %6807 = vmatprep.mubr.msk.bf16.mxu1 %vm1605_vm14, %v6556_v11  ;;  %v821_v16 = vpop.permute.xlu1 %820  ;;  %v2160_v58 = vsel %vm7002_vm2, %v2155_v54, %v2159_v55  ;;  %v2329_v6 = vrot.slane %v2293_v3, 5 }
  0xfb   :  { %v1528_v20 = vld [vmem:[#allocation2 + $0x18] sm:$0xf]  ;;  %841 = vst.msk [vmem:[#allocation2 + $0x2c] sm:$0xf] %vm85_vm6, %v821_v16  ;;  %v819_v21 = vpop.permute.xlu0 %818 }
  0xfc   :  { %840 = vst.msk [vmem:[#allocation2 + $0x28] sm:$0xf] %vm85_vm6, %v819_v21  ;;  %1500 = vrot.lane.b32.xlu1 %v1461_v12, %s6916_s21  ;;  %v6557_v22 = vcombine.low %v1528_v20, %v1529_v15  ;;  %v2330_v8 = vsel %vm8095_vm3, %v6589_v4, %v2329_v6 }
  0xfd   :  { %1498 = vrot.lane.b32.xlu0 %v1447_v17, %s6916_s21 }
  0xfe   :  { %6808 = vmatmul.mubr.msk.bf16.gmra.mxu1 %vm1605_vm14, %v6557_v22  ;;  %v977_v24 = vpop.permute.xlu1 %976 }
  0xff   :  { %999 = vst.msk [vmem:[#allocation2 + $0x24] sm:$0xf] %vm249_vm7, %v977_v24  ;;  %v975_v28 = vpop.permute.xlu0 %974  ;;  %v3007_v24 = vld [vmem:[#allocation3 + $0x50] sm:$0xf] }
 0x100   :  { %998 = vst.msk [vmem:[#allocation2 + $0x20] sm:$0xf] %vm249_vm7, %v975_v28  ;;  %1504 = vrot.lane.b32.xlu1 %v1489_v23, %s6916_s21 }
 0x101   :  { %1502 = vrot.lane.b32.xlu0 %v1475_v25, %s6916_s21 }
 0x102   :  { %v981_v29 = vpop.permute.xlu1 %980 }
 0x103   :  { %1001 = vst.msk [vmem:[#allocation2 + $0x2c] sm:$0xf] %vm249_vm7, %v981_v29  ;;  %v979_v30 = vpop.permute.xlu0 %978 }
 0x104   :  { %1000 = vst.msk [vmem:[#allocation2 + $0x28] sm:$0xf] %vm249_vm7, %v979_v30  ;;  %2729 = vrot.lane.b32.xlu1 %v2706_v46, %s6917_s0 }
 0x105   :  { %2259 = vrot.lane.b32.xlu0 %v2160_v58, %s6909_s26 }
 0x106   :  { %v1026_v31 = vpop.permute.xlu1 %1025 }
 0x107   :  { %1048 = vst.msk [vmem:[#allocation2 + $0x24] sm:$0xf] %vm299_vm8, %v1026_v31  ;;  %v1024_v32 = vpop.permute.xlu0 %1023 }
 0x108   :  { %1047 = vst.msk [vmem:[#allocation2 + $0x20] sm:$0xf] %vm299_vm8, %v1024_v32  ;;  %2890 = vrot.lane.b32.xlu1 %v2875_v57, %s6918_s9 }
 0x109   :  { %2359 = vrot.lane.b32.xlu0 %v2330_v8, %s6911_s13 }
 0x10a   :  { %v1030_v39 = vpop.permute.xlu1 %1029 }
 0x10b   :  { %1050 = vst.msk [vmem:[#allocation2 + $0x2c] sm:$0xf] %vm299_vm8, %v1030_v39  ;;  %v1028_v26 = vpop.permute.xlu0 %1027 }
 0x10c   :  { %1049 = vst.msk [vmem:[#allocation2 + $0x28] sm:$0xf] %vm299_vm8, %v1028_v26  ;;  %2987 = vrot.lane.b32.xlu1 %v2972_v5, %s6919_s17 }
 0x10e   :  { %v1075_v51 = vpop.permute.xlu1 %1074 }
 0x10f   :  { %1097 = vst.msk [vmem:[#allocation2 + $0x24] sm:$0xf] %vm349_vm9, %v1075_v51  ;;  %v1073_v56 = vpop.permute.xlu0 %1072 }
 0x110   :  { %1096 = vst.msk [vmem:[#allocation2 + $0x20] sm:$0xf] %vm349_vm9, %v1073_v56 }
 0x112   :  { %v1079_v62 = vpop.permute.xlu1 %1078 }
 0x113   :  { %1099 = vst.msk [vmem:[#allocation2 + $0x2c] sm:$0xf] %vm349_vm9, %v1079_v62  ;;  %v1077_v1 = vpop.permute.xlu0 %1076 }
 0x114   :  { %1098 = vst.msk [vmem:[#allocation2 + $0x28] sm:$0xf] %vm349_vm9, %v1077_v1 }
 0x116   :  { %v1235_v7 = vpop.permute.xlu1 %1234 }
 0x117   :  { %1257 = vst.msk [vmem:[#allocation2 + $0x24] sm:$0xf] %vm510_vm10, %v1235_v7  ;;  %v1233_v9 = vpop.permute.xlu0 %1232  ;;  %v8162_v7 = vld [vmem:[%s9783_s2] ss:$0 sm:$0xff] }
 0x118   :  { %1256 = vst.msk [vmem:[#allocation2 + $0x20] sm:$0xf] %vm510_vm10, %v1233_v9 }
 0x11a   :  { %v1239_v10 = vpop.permute.xlu1 %1238 }
 0x11b   :  { %1259 = vst.msk [vmem:[#allocation2 + $0x2c] sm:$0xf] %vm510_vm10, %v1239_v10  ;;  %v1237_v11 = vpop.permute.xlu0 %1236 }
 0x11c   :  { %1258 = vst.msk [vmem:[#allocation2 + $0x28] sm:$0xf] %vm510_vm10, %v1237_v11 }
 0x11e   :  { %v1284_v12 = vpop.permute.xlu1 %1283 }
 0x11f   :  { %1306 = vst.msk [vmem:[#allocation2 + $0x24] sm:$0xf] %vm560_vm11, %v1284_v12  ;;  %v1282_v13 = vpop.permute.xlu0 %1281 }
 0x120   :  { %1305 = vst.msk [vmem:[#allocation2 + $0x20] sm:$0xf] %vm560_vm11, %v1282_v13 }
 0x122   :  { %v1288_v14 = vpop.permute.xlu1 %1287 }
 0x123   :  { %1308 = vst.msk [vmem:[#allocation2 + $0x2c] sm:$0xf] %vm560_vm11, %v1288_v14  ;;  %v1286_v15 = vpop.permute.xlu0 %1285 }
 0x124   :  { %1307 = vst.msk [vmem:[#allocation2 + $0x28] sm:$0xf] %vm560_vm11, %v1286_v15 }
 0x126   :  { %v1333_v16 = vpop.permute.xlu1 %1332 }
 0x127   :  { %1355 = vst.msk [vmem:[#allocation2 + $0x24] sm:$0xf] %vm610_vm12, %v1333_v16  ;;  %v1331_v17 = vpop.permute.xlu0 %1330 }
 0x128   :  { %1354 = vst.msk [vmem:[#allocation2 + $0x20] sm:$0xf] %vm610_vm12, %v1331_v17 }
 0x12a   :  { %v1337_v18 = vpop.permute.xlu1 %1336 }
 0x12b   :  { %1357 = vst.msk [vmem:[#allocation2 + $0x2c] sm:$0xf] %vm610_vm12, %v1337_v18  ;;  %v1335_v19 = vpop.permute.xlu0 %1334 }
 0x12c   :  { %1356 = vst.msk [vmem:[#allocation2 + $0x28] sm:$0xf] %vm610_vm12, %v1335_v19 }
 0x12e   :  { %v1493_v20 = vpop.permute.xlu1 %1492 }
 0x12f   :  { %1515 = vst.msk [vmem:[#allocation2 + $0x24] sm:$0xf] %vm771_vm13, %v1493_v20  ;;  %v1491_v21 = vpop.permute.xlu0 %1490 }
 0x130   :  { %1514 = vst.msk [vmem:[#allocation2 + $0x20] sm:$0xf] %vm771_vm13, %v1491_v21 }
 0x132   :  { %v825_v22 = vpop.permute.xlu1 %824 }
 0x133   :  { %843 = vst.msk [vmem:[#allocation2 + $0x34] sm:$0xf] %vm85_vm6, %v825_v22  ;;  %v823_v23 = vpop.permute.xlu0 %822 }
 0x134   :  { %842 = vst.msk [vmem:[#allocation2 + $0x30] sm:$0xf] %vm85_vm6, %v823_v23 }
 0x136   :  { %v1531_v25 = vld [vmem:[#allocation2 + $0x24] sm:$0xf]  ;;  %v1497_v28 = vpop.permute.xlu1 %1496 }
 0x137   :  { %v1530_v29 = vld [vmem:[#allocation2 + $0x20] sm:$0xf]  ;;  %1517 = vst.msk [vmem:[#allocation2 + $0x2c] sm:$0xf] %vm771_vm13, %v1497_v28  ;;  %v1495_v30 = vpop.permute.xlu0 %1494 }
 0x138   :  { %3015 = vst.msk [vmem:[#allocation2 + $0x20] sm:$0xf] %vm1747_vm4, %v3007_v24  ;;  %v6558_v31 = vcombine.low %v1530_v29, %v1531_v25 }
 0x139   :  { %1516 = vst.msk [vmem:[#allocation2 + $0x28] sm:$0xf] %vm771_vm13, %v1495_v30 }
 0x13a   :  { %v829_v32 = vpop.permute.xlu1 %828  ;;  %6811 = vmatprep.mubr.msk.bf16.mxu1 %vm1605_vm14, %v6558_v31  ;;  %v1856_v31 = vld [vmem:[#allocation3 + $0x18] sm:$0xf] }
 0x13b   :  { %845 = vst.msk [vmem:[#allocation2 + $0x3c] sm:$0xf] %vm85_vm6, %v829_v32  ;;  %v827_v33 = vpop.permute.xlu0 %826  ;;  %v1859_v32 = vld [vmem:[#allocation3 + $0x1c] sm:$0x1] }
 0x13c   :  { %844 = vst.msk [vmem:[#allocation2 + $0x38] sm:$0xf] %vm85_vm6, %v827_v33  ;;  %vm1812_vm6 = vsmask.f32 7938 }
 0x13e   :  { %v1533_v34 = vld [vmem:[#allocation2 + $0x2c] sm:$0xf]  ;;  %v985_v35 = vpop.permute.xlu1 %984 }
 0x13f   :  { %1003 = vst.msk [vmem:[#allocation2 + $0x34] sm:$0xf] %vm249_vm7, %v985_v35  ;;  %v983_v37 = vpop.permute.xlu0 %982 }
 0x140   :  { %v1532_v36 = vld [vmem:[#allocation2 + $0x28] sm:$0xf]  ;;  %1002 = vst.msk [vmem:[#allocation2 + $0x30] sm:$0xf] %vm249_vm7, %v983_v37 }
 0x141   :  { %v6559_v38 = vcombine.low %v1532_v36, %v1533_v34 }
 0x142   :  { %v989_v39 = vpop.permute.xlu1 %988 }
 0x143   :  { %6812 = vmatmul.mubr.msk.bf16.gmra.mxu1 %vm1605_vm14, %v6559_v38  ;;  %1005 = vst.msk [vmem:[#allocation2 + $0x3c] sm:$0xf] %vm249_vm7, %v989_v39  ;;  %v987_v40 = vpop.permute.xlu0 %986  ;;  %v1814_v39 = vld [vmem:[#allocation3 + $0x8] sm:$0xf] }
 0x144   :  { %1004 = vst.msk [vmem:[#allocation2 + $0x38] sm:$0xf] %vm249_vm7, %v987_v40  ;;  %vm1818_vm7 = vsmask.f32 256  ;;  %v1820_v40 = vld [vmem:[#allocation3 + $0xc] sm:$0x1] }
 0x146   :  { %v1034_v41 = vpop.permute.xlu1 %1033 }
 0x147   :  { %1052 = vst.msk [vmem:[#allocation2 + $0x34] sm:$0xf] %vm299_vm8, %v1034_v41  ;;  %v1032_v42 = vpop.permute.xlu0 %1031 }
 0x148   :  { %1051 = vst.msk [vmem:[#allocation2 + $0x30] sm:$0xf] %vm299_vm8, %v1032_v42 }
 0x14a   :  { %v1038_v43 = vpop.permute.xlu1 %1037 }
 0x14b   :  { %1054 = vst.msk [vmem:[#allocation2 + $0x3c] sm:$0xf] %vm299_vm8, %v1038_v43  ;;  %v1036_v26 = vpop.permute.xlu0 %1035 }
 0x14c   :  { %1053 = vst.msk [vmem:[#allocation2 + $0x38] sm:$0xf] %vm299_vm8, %v1036_v26  ;;  %vm8170_vm8 = vmand %vm1747_vm4, %vm1812_vm6  ;;  %vm3986_vm6 = vcmask 588800  }
 0x14e   :  { %v1083_v44 = vpop.permute.xlu1 %1082 }
 0x14f   :  { %1101 = vst.msk [vmem:[#allocation2 + $0x34] sm:$0xf] %vm349_vm9, %v1083_v44  ;;  %v1081_v45 = vpop.permute.xlu0 %1080 }
 0x150   :  { %1100 = vst.msk [vmem:[#allocation2 + $0x30] sm:$0xf] %vm349_vm9, %v1081_v45 }
 0x152   :  { %v1087_v46 = vpop.permute.xlu1 %1086 }
 0x153   :  { %1103 = vst.msk [vmem:[#allocation2 + $0x3c] sm:$0xf] %vm349_vm9, %v1087_v46  ;;  %v1085_v47 = vpop.permute.xlu0 %1084 }
 0x154   :  { %1102 = vst.msk [vmem:[#allocation2 + $0x38] sm:$0xf] %vm349_vm9, %v1085_v47  ;;  %vm8175_vm9 = vmand %vm1749_vm15, %vm1818_vm7  ;;  %vm2739_vm15 = vcmask 454016  }
 0x156   :  { %v1243_v48 = vpop.permute.xlu1 %1242 }
 0x157   :  { %1261 = vst.msk [vmem:[#allocation2 + $0x34] sm:$0xf] %vm510_vm10, %v1243_v48  ;;  %v1241_v49 = vpop.permute.xlu0 %1240 }
 0x158   :  { %1260 = vst.msk [vmem:[#allocation2 + $0x30] sm:$0xf] %vm510_vm10, %v1241_v49 }
 0x15a   :  { %v1247_v50 = vpop.permute.xlu1 %1246 }
 0x15b   :  { %1263 = vst.msk [vmem:[#allocation2 + $0x3c] sm:$0xf] %vm510_vm10, %v1247_v50  ;;  %v1245_v51 = vpop.permute.xlu0 %1244  ;;  %v1875_v50 = vld [vmem:[#allocation3 + $0x20] sm:$0xf] }
 0x15c   :  { %1262 = vst.msk [vmem:[#allocation2 + $0x38] sm:$0xf] %vm510_vm10, %v1245_v51  ;;  %v1878_v51 = vld [vmem:[#allocation3 + $0x24] sm:$0x1]  ;;  %vm2383_vm10 = vcmask 191616  }
 0x15e   :  { %v1292_v52 = vpop.permute.xlu1 %1291 }
 0x15f   :  { %1310 = vst.msk [vmem:[#allocation2 + $0x34] sm:$0xf] %vm560_vm11, %v1292_v52  ;;  %v1290_v53 = vpop.permute.xlu0 %1289 }
 0x160   :  { %1309 = vst.msk [vmem:[#allocation2 + $0x30] sm:$0xf] %vm560_vm11, %v1290_v53 }
 0x162   :  { %v1296_v54 = vpop.permute.xlu1 %1295 }
 0x163   :  { %1312 = vst.msk [vmem:[#allocation2 + $0x3c] sm:$0xf] %vm560_vm11, %v1296_v54  ;;  %v1294_v55 = vpop.permute.xlu0 %1293 }
 0x164   :  { %1311 = vst.msk [vmem:[#allocation2 + $0x38] sm:$0xf] %vm560_vm11, %v1294_v55  ;;  %vm2432_vm11 = vcmask 257216  }
 0x166   :  { %v1341_v56 = vpop.permute.xlu1 %1340 }
 0x167   :  { %1359 = vst.msk [vmem:[#allocation2 + $0x34] sm:$0xf] %vm610_vm12, %v1341_v56  ;;  %v1339_v57 = vpop.permute.xlu0 %1338 }
 0x168   :  { %1358 = vst.msk [vmem:[#allocation2 + $0x30] sm:$0xf] %vm610_vm12, %v1339_v57  ;;  %v1836_v57 = vld [vmem:[#allocation3 + $0x10] sm:$0xf] }
 0x16a   :  { %v1345_v58 = vpop.permute.xlu1 %1344 }
 0x16b   :  { %1361 = vst.msk [vmem:[#allocation2 + $0x3c] sm:$0xf] %vm610_vm12, %v1345_v58  ;;  %v1343_v59 = vpop.permute.xlu0 %1342  ;;  %v1839_v58 = vld [vmem:[#allocation3 + $0x14] sm:$0x1] }
 0x16c   :  { %1360 = vst.msk [vmem:[#allocation2 + $0x38] sm:$0xf] %vm610_vm12, %v1343_v59  ;;  %vm4011_vm12 = vcmask 1043456  }
 0x16e   :  { %v1501_v60 = vpop.permute.xlu1 %1500 }
 0x16f   :  { %1519 = vst.msk [vmem:[#allocation2 + $0x34] sm:$0xf] %vm771_vm13, %v1501_v60  ;;  %v1499_v61 = vpop.permute.xlu0 %1498 }
 0x170   :  { %1518 = vst.msk [vmem:[#allocation2 + $0x30] sm:$0xf] %vm771_vm13, %v1499_v61 }
 0x172   :  { %v1505_v62 = vpop.permute.xlu1 %1504 }
 0x173   :  { %1521 = vst.msk [vmem:[#allocation2 + $0x3c] sm:$0xf] %vm771_vm13, %v1505_v62  ;;  %v1503_v63 = vpop.permute.xlu0 %1502 }
 0x174   :  { %1520 = vst.msk [vmem:[#allocation2 + $0x38] sm:$0xf] %vm771_vm13, %v1503_v63  ;;  %vm2593_vm13 = vcmask 322816  }
 0x176   :  { %v1535_v0 = vld [vmem:[#allocation2 + $0x34] sm:$0xf] }
 0x177   :  { %v1534_v1 = vld [vmem:[#allocation2 + $0x30] sm:$0xf]  ;;  %v2260_v10 = vpop.permute.xlu0 %2259 }
 0x178   :  { %v6560_v3 = vcombine.low %v1534_v1, %v1535_v0  ;;  %2284 = vst.msk [vmem:[#allocation2] sm:$0xf] %vm2283_vm5, %v2260_v10 }
 0x17a   :  { %v1537_v4 = vld [vmem:[#allocation2 + $0x3c] sm:$0xf]  ;;  %6815 = vmatprep.mubr.msk.bf16.mxu1 %vm1605_vm14, %v6560_v3 }
 0x17b   :  { %v1536_v5 = vld [vmem:[#allocation2 + $0x38] sm:$0xf]  ;;  %v2360_v56 = vpop.permute.xlu0 %2359 }
 0x17c   :  { %v6561_v6 = vcombine.low %v1536_v5, %v1537_v4  ;;  %2384 = vst.msk [vmem:[#allocation2] sm:$0xf] %vm2383_vm10, %v2360_v56 }
 0x17e   :  { %6816 = vmatmul.mubr.msk.bf16.gmra.mxu1 %vm1605_vm14, %v6561_v6  ;;  %vm2690_vm14 = vcmask 388416  }
 0x183   :  { %v6805_v8 = vpop.f32.mrf.mxu1 }
 0x184   :  { %v1677_v9 = vadd.f32 %v6805_v8, %v8162_v7 }
 0x185   :  { %v1668_v11 = vpop.f32.mrf.mxu1 }
 0x186   :  { %v1733_v12 = vmax.f32 %v1677_v9, 0.0  ;;  %v1669_v13 = vadd.f32 %v8162_v7, %v1668_v11 }
 0x187   :  { %v6806_v14 = vpop.f32.mrf.mxu1 }
 0x188   :  { %v6734_v15 = vpack.c.bf16 %v1733_v12, %v1733_v12  ;;  %v1731_v16 = vmax.f32 %v1669_v13, 0.0  ;;  %v1680_v17 = vadd.f32 %v6806_v14, %v8162_v7 }
 0x189   :  { %v1671_v18 = vpop.f32.mrf.mxu1 }
 0x18a   :  { %v1846_v19 = vshrl.u32 %v6734_v15, 16  ;;  %v6732_v20 = vpack.c.bf16 %v1731_v16, %v1731_v16  ;;  %v1734_v21 = vmax.f32 %v1680_v17, 0.0  ;;  %v1672_v22 = vadd.f32 %v8162_v7, %v1671_v18 }
 0x18b   :  { %v1849_v25 = vshll.u32 %v6734_v15, 16 }
 0x18c   :  { %v1848_v24 = vrot.slane %v1846_v19, 7  ;;  %v1801_v28 = vshrl.u32 %v6732_v20, 16  ;;  %v6735_v29 = vpack.c.bf16 %v1734_v21, %v1734_v21  ;;  %v1804_v33 = vshll.u32 %v6732_v20, 16 }
 0x18d   :  { %v1732_v34 = vmax.f32 %v1672_v22, 0.0 }
 0x18e   :  { %v1851_v35 = vor.u32 %v1849_v25, %v1848_v24  ;;  %v1852_v36 = vrot.slane %v1848_v24, 4  ;;  %v1803_v37 = vrot.slane %v1801_v28, 7  ;;  %v1865_v38 = vshrl.u32 %v6735_v29, 16 }
 0x18f   :  { %v6733_v41 = vpack.c.bf16 %v1732_v34, %v1732_v34  ;;  %v1868_v46 = vshll.u32 %v6735_v29, 16 }
 0x190   :  { %v1857_v42 = vsel %vm8170_vm8, %v1851_v35, %v1856_v31  ;;  %v1860_v43 = vsel %vm8175_vm9, %v1852_v36, %v1859_v32  ;;  %v1806_v26 = vor.u32 %v1804_v33, %v1803_v37  ;;  %v1807_v44 = vrot.slane %v1803_v37, 4 }
 0x191   :  { %1858 = vst [vmem:[#allocation3 + $0x18] sm:$0xf] %v1857_v42  ;;  %1861 = vst [vmem:[#allocation3 + $0x1c] sm:$0x1] %v1860_v43  ;;  %v1867_v45 = vrot.slane %v1865_v38, 7  ;;  %v1826_v47 = vshrl.u32 %v6733_v41, 16 }
 0x192   :  { %v1815_v48 = vsel %vm8170_vm8, %v1806_v26, %v1814_v39  ;;  %v1821_v49 = vsel %vm8175_vm9, %v1807_v44, %v1820_v40  ;;  %v1829_v52 = vshll.u32 %v6733_v41, 16 }
 0x193   :  { %1816 = vst [vmem:[#allocation3 + $0x8] sm:$0xf] %v1815_v48  ;;  %1822 = vst [vmem:[#allocation3 + $0xc] sm:$0x1] %v1821_v49  ;;  %v1870_v53 = vor.u32 %v1868_v46, %v1867_v45  ;;  %v1871_v54 = vrot.slane %v1867_v45, 4  ;;  %v1828_v55 = vrot.slane %v1826_v47, 7 }
 0x195   :  { %v1876_v59 = vsel %vm8170_vm8, %v1870_v53, %v1875_v50  ;;  %v1879_v60 = vsel %vm8175_vm9, %v1871_v54, %v1878_v51  ;;  %v1831_v61 = vor.u32 %v1829_v52, %v1828_v55  ;;  %v1832_v62 = vrot.slane %v1828_v55, 4 }
 0x196   :  { %1877 = vst [vmem:[#allocation3 + $0x20] sm:$0xf] %v1876_v59  ;;  %1880 = vst [vmem:[#allocation3 + $0x24] sm:$0x1] %v1879_v60 }
 0x197   :  { %v1837_v63 = vsel %vm8170_vm8, %v1831_v61, %v1836_v57  ;;  %v1840_v0 = vsel %vm8175_vm9, %v1832_v62, %v1839_v58 }
 0x198   :  { %1838 = vst [vmem:[#allocation3 + $0x10] sm:$0xf] %v1837_v63  ;;  %1841 = vst [vmem:[#allocation3 + $0x14] sm:$0x1] %v1840_v0  ;;  %v2700_v1 = vld [vmem:[#allocation3 + $0x18] sm:$0xf] }
 0x199   :  { %v2394_v3 = vld [vmem:[#allocation3 + $0x18] sm:$0xf]  ;;  %2717 = vrot.lane.b32.xlu1 %v2700_v1, %s6917_s0  ;;  %v2299_v5 = vld [vmem:[#allocation3 + $0x1c] sm:$0x1] }
 0x19a   :  { %v2298_v4 = vld [vmem:[#allocation3 + $0x18] sm:$0xe]  ;;  %2412 = vrot.lane.b32.xlu0 %v2394_v3, %s6913_s29  ;;  %v2341_v9 = vrot.slane %v2299_v5, 5  ;;  %v2912_v10 = vld [vmem:[#allocation3 + $0x1c] sm:$0x1] }
 0x19b   :  { %v6592_v6 = vrot.slane %v2298_v4, 9  ;;  %v2911_v8 = vld [vmem:[#allocation3 + $0x18] sm:$0xe]  ;;  %v2607_v13 = vld [vmem:[#allocation3 + $0x1c] sm:$0x1]  ;;  %v2947_v16 = vrot.slane %v2912_v10, 5 }
 0x19c   :  { %v6606_v11 = vrot.slane %v2911_v8, 9  ;;  %v2606_v12 = vld [vmem:[#allocation3 + $0x18] sm:$0xe]  ;;  %v2392_v15 = vld [vmem:[#allocation3 + $0x8] sm:$0xf]  ;;  %v2644_v18 = vrot.slane %v2607_v13, 5 }
 0x19d   :  { %v2342_v14 = vsel %vm8095_vm3, %v6592_v6, %v2341_v9  ;;  %v6599_v17 = vrot.slane %v2606_v12, 9  ;;  %v2602_v21 = vld [vmem:[#allocation3 + $0x8] sm:$0xe]  ;;  %v2603_v22 = vld [vmem:[#allocation3 + $0xc] sm:$0x1] }
 0x19e   :  { %2365 = vrot.lane.b32.xlu1 %v2342_v14, %s6911_s13  ;;  %2408 = vrot.lane.b32.xlu0 %v2392_v15, %s6913_s29  ;;  %v2948_v19 = vsel %vm8095_vm3, %v6606_v11, %v2947_v16  ;;  %v2294_v24 = vld [vmem:[#allocation3 + $0x8] sm:$0xe]  ;;  %v2295_v25 = vld [vmem:[#allocation3 + $0xc] sm:$0x1]  ;;  %v2395_v28 = vld [vmem:[#allocation3 + $0x20] sm:$0xf] }
 0x19f   :  { %v2645_v20 = vsel %vm8095_vm3, %v6599_v17, %v2644_v18  ;;  %v2701_v29 = vld [vmem:[#allocation3 + $0x20] sm:$0xf]  ;;  %v6597_v31 = vrot.slane %v2602_v21, 9  ;;  %v2636_v32 = vrot.slane %v2603_v22, 5  ;;  %v6590_v33 = vrot.slane %v2294_v24, 9 }
 0x1a0   :  { %v2333_v34 = vrot.slane %v2295_v25, 5  ;;  %v2913_v37 = vld [vmem:[#allocation3 + $0x20] sm:$0xe]  ;;  %v2914_v38 = vld [vmem:[#allocation3 + $0x24] sm:$0x1] }
 0x1a1   :  { %v2637_v35 = vsel %vm8095_vm3, %v6597_v31, %v2636_v32  ;;  %v2608_v39 = vld [vmem:[#allocation3 + $0x20] sm:$0xe]  ;;  %v2609_v40 = vld [vmem:[#allocation3 + $0x24] sm:$0x1]  ;;  %v2699_v41 = vld [vmem:[#allocation3 + $0x10] sm:$0xf] }
 0x1a2   :  { %2975 = vrot.lane.b32.xlu1 %v2948_v19, %s6919_s17  ;;  %2670 = vrot.lane.b32.xlu0 %v2645_v20, %s6920_s12  ;;  %v2334_v36 = vsel %vm8095_vm3, %v6590_v33, %v2333_v34  ;;  %v2393_v42 = vld [vmem:[#allocation3 + $0x10] sm:$0xf]  ;;  %v6607_v43 = vrot.slane %v2913_v37, 9  ;;  %v2951_v26 = vrot.slane %v2914_v38, 5  ;;  %v6600_v44 = vrot.slane %v2608_v39, 9 }
 0x1a3   :  { %v2648_v45 = vrot.slane %v2609_v40, 5  ;;  %v2300_v46 = vld [vmem:[#allocation3 + $0x20] sm:$0xe]  ;;  %v2301_v47 = vld [vmem:[#allocation3 + $0x24] sm:$0x1] }
 0x1a4   :  { %v2952_v48 = vsel %vm8095_vm3, %v6607_v43, %v2951_v26  ;;  %v6593_v50 = vrot.slane %v2300_v46, 9  ;;  %v2345_v51 = vrot.slane %v2301_v47, 5  ;;  %v2118_v53 = vld [vmem:[#allocation3 + $0x18] sm:$0xf]  ;;  %v2116_v54 = vld [vmem:[#allocation3 + $0x8] sm:$0xf] }
 0x1a5   :  { %v2649_v49 = vsel %vm8095_vm3, %v6600_v44, %v2648_v45  ;;  %2126 = vst.msk [vmem:[#allocation2 + $0xc] sm:$0xf] %vm1747_vm4, %v2118_v53  ;;  %2124 = vst.msk [vmem:[#allocation2 + $0x4] sm:$0xf] %vm1747_vm4, %v2116_v54  ;;  %v2119_v55 = vld [vmem:[#allocation3 + $0x20] sm:$0xf] }
 0x1a6   :  { %2414 = vrot.lane.b32.xlu1 %v2395_v28, %s6913_s29  ;;  %2719 = vrot.lane.b32.xlu0 %v2701_v29, %s6917_s0  ;;  %v2346_v52 = vsel %vm8095_vm3, %v6593_v50, %v2345_v51  ;;  %2127 = vst.msk [vmem:[#allocation2 + $0x10] sm:$0xf] %vm1747_vm4, %v2119_v55  ;;  %v2117_v57 = vld [vmem:[#allocation3 + $0x10] sm:$0xf]  ;;  %v2137_v62 = vld [vmem:[#allocation3 + $0x18] sm:$0xf] }
 0x1a7   :  { %2125 = vst.msk [vmem:[#allocation2 + $0x8] sm:$0xf] %vm1747_vm4, %v2117_v57  ;;  %v2190_v5 = vshrl.u32 %v2137_v62, 16  ;;  %v2193_v6 = vshll.u32 %v2137_v62, 16  ;;  %v1934_v11 = vld [vmem:[#allocation3 + $0x38] sm:$0xf] }
 0x1a8   :  { %v1937_v12 = vld [vmem:[#allocation3 + $0x3c] sm:$0x1]  ;;  %v2445_v18 = vld [vmem:[#allocation3 + $0x18] sm:$0xf]  ;;  %v1895_v20 = vld [vmem:[#allocation3 + $0x28] sm:$0xf] }
 0x1a9   :  { %v2192_v22 = vrot.slane %v2190_v5, 4  ;;  %v2195_v24 = vrot.slane %v2193_v6, 5  ;;  %v8235_v32 = vld [vmem:[#allocation3 + $0x10] sm:$0xe]  ;;  %v1898_v33 = vld [vmem:[#allocation3 + $0x2c] sm:$0x1] }
 0x1aa   :  { %2666 = vrot.lane.b32.xlu0 %v2637_v35, %s6920_s12  ;;  %2361 = vrot.lane.b32.xlu1 %v2334_v36, %s6911_s13  ;;  %v2138_v35 = vld [vmem:[#allocation3 + $0x1c] sm:$0x1]  ;;  %v2486_v36 = vshrl.u32 %v2445_v18, 16  ;;  %v2489_v37 = vshll.u32 %v2445_v18, 16  ;;  %v6591_v45 = vrot.slane %v8235_v32, 9 }
 0x1ab   :  { %v2750_v46 = vld [vmem:[#allocation3 + $0x18] sm:$0xf]  ;;  %v1914_v50 = vld [vmem:[#allocation3 + $0x30] sm:$0xf]  ;;  %v2196_v51 = vor.u32 %v2195_v24, %v2192_v22  ;;  %v1917_v57 = vld [vmem:[#allocation3 + $0x34] sm:$0x1] }
 0x1ac   :  { %v2782_v62 = vshll.u32 %v2750_v46, 16  ;;  %v2441_v5 = vld [vmem:[#allocation3 + $0x8] sm:$0xf]  ;;  %v2910_v32 = vld [vmem:[#allocation3 + $0x14] sm:$0x1] }
 0x1ad   :  { %v2133_v6 = vld [vmem:[#allocation3 + $0x8] sm:$0xf] }
 0x1ae   :  { %2715 = vrot.lane.b32.xlu0 %v2699_v41, %s6917_s0  ;;  %2410 = vrot.lane.b32.xlu1 %v2393_v42, %s6913_s29  ;;  %v1953_v42 = vld [vmem:[#allocation3 + $0x40] sm:$0xf]  ;;  %v2784_v18 = vrot.slane %v2782_v62, 5  ;;  %v2165_v22 = vshll.u32 %v2133_v6, 16 }
 0x1b2   :  { %2977 = vrot.lane.b32.xlu0 %v2952_v48, %s6919_s17  ;;  %2672 = vrot.lane.b32.xlu1 %v2649_v49, %s6920_s12  ;;  %v1956_v49 = vld [vmem:[#allocation3 + $0x44] sm:$0x1] }
 0x1b6   :  { %2367 = vrot.lane.b32.xlu0 %v2346_v52, %s6911_s13  ;;  %v2199_v52 = vshll.u32 %v2138_v35, 16 }
 0x1b8   :  { %v2201_v24 = vrot.slane %v2199_v52, 5 }
 0x1be   :  { %v6809_v56 = vpop.f32.mrf.mxu1 }
 0x1bf   :  { %v1693_v58 = vadd.f32 %v6809_v56, %v8162_v7 }
 0x1c0   :  { %v1684_v59 = vpop.f32.mrf.mxu1 }
 0x1c1   :  { %v1737_v60 = vmax.f32 %v1693_v58, 0.0  ;;  %v1685_v61 = vadd.f32 %v8162_v7, %v1684_v59  ;;  %v2297_v58 = vld [vmem:[#allocation3 + $0x14] sm:$0x1]  ;;  %v2488_v59 = vrot.slane %v2486_v36, 4 }
 0x1c2   :  { %v6810_v63 = vpop.f32.mrf.mxu1 }
 0x1c3   :  { %v6738_v0 = vpack.c.bf16 %v1737_v60, %v1737_v60  ;;  %v1735_v1 = vmax.f32 %v1685_v61, 0.0  ;;  %v1696_v3 = vadd.f32 %v6810_v63, %v8162_v7  ;;  %v2491_v60 = vrot.slane %v2489_v37, 5 }
 0x1c4   :  { %v1687_v4 = vpop.f32.mrf.mxu1  ;;  %v2779_v61 = vshrl.u32 %v2750_v46, 16 }
 0x1c5   :  { %v1924_v8 = vshrl.u32 %v6738_v0, 16  ;;  %v6736_v9 = vpack.c.bf16 %v1735_v1, %v1735_v1  ;;  %v1738_v10 = vmax.f32 %v1696_v3, 0.0  ;;  %v1688_v13 = vadd.f32 %v8162_v7, %v1687_v4  ;;  %v2446_v4 = vld [vmem:[#allocation3 + $0x1c] sm:$0x1] }
 0x1c6   :  { %v1927_v15 = vshll.u32 %v6738_v0, 16 }
 0x1c7   :  { %v1926_v14 = vrot.slane %v1924_v8, 7  ;;  %v1885_v16 = vshrl.u32 %v6736_v9, 16  ;;  %v6739_v17 = vpack.c.bf16 %v1738_v10, %v1738_v10  ;;  %v1888_v19 = vshll.u32 %v6736_v9, 16 }
 0x1c8   :  { %v1736_v21 = vmax.f32 %v1688_v13, 0.0  ;;  %v2337_v10 = vrot.slane %v2297_v58, 5  ;;  %v2605_v13 = vld [vmem:[#allocation3 + $0x14] sm:$0x1] }
 0x1c9   :  { %v1929_v25 = vor.u32 %v1927_v15, %v1926_v14  ;;  %v1930_v28 = vrot.slane %v1926_v14, 4  ;;  %v1887_v29 = vrot.slane %v1885_v16, 7  ;;  %v1943_v31 = vshrl.u32 %v6739_v17, 16 }
 0x1ca   :  { %v6737_v34 = vpack.c.bf16 %v1736_v21, %v1736_v21  ;;  %v1946_v26 = vshll.u32 %v6739_v17, 16  ;;  %v2492_v16 = vor.u32 %v2491_v60, %v2488_v59  ;;  %v2781_v17 = vrot.slane %v2779_v61, 4 }
 0x1cb   :  { %v1935_v38 = vsel %vm8170_vm8, %v1929_v25, %v1934_v11  ;;  %v1938_v39 = vsel %vm8175_vm9, %v1930_v28, %v1937_v12  ;;  %v1890_v40 = vor.u32 %v1888_v19, %v1887_v29  ;;  %v1891_v41 = vrot.slane %v1887_v29, 4  ;;  %v2604_v12 = vld [vmem:[#allocation3 + $0x10] sm:$0xe] }
 0x1cc   :  { %1936 = vst [vmem:[#allocation3 + $0x38] sm:$0xf] %v1935_v38  ;;  %1939 = vst [vmem:[#allocation3 + $0x3c] sm:$0x1] %v1938_v39  ;;  %v1945_v43 = vrot.slane %v1943_v31, 7  ;;  %v1904_v44 = vshrl.u32 %v6737_v34, 16  ;;  %v2785_v37 = vor.u32 %v2784_v18, %v2781_v17 }
 0x1cd   :  { %v1896_v47 = vsel %vm8170_vm8, %v1890_v40, %v1895_v20  ;;  %v1899_v48 = vsel %vm8175_vm9, %v1891_v41, %v1898_v33  ;;  %v1907_v56 = vshll.u32 %v6737_v34, 16  ;;  %v2197_v11 = vrot.slane %v2196_v51, 4  ;;  %v2909_v31 = vld [vmem:[#allocation3 + $0x10] sm:$0xe]  ;;  %v2751_v33 = vld [vmem:[#allocation3 + $0x1c] sm:$0x1] }
 0x1ce   :  { %1897 = vst [vmem:[#allocation3 + $0x28] sm:$0xf] %v1896_v47  ;;  %1900 = vst [vmem:[#allocation3 + $0x2c] sm:$0x1] %v1899_v48  ;;  %v1948_v53 = vor.u32 %v1946_v26, %v1945_v43  ;;  %v1949_v54 = vrot.slane %v1945_v43, 4  ;;  %v1906_v55 = vrot.slane %v1904_v44, 7  ;;  %v2338_v34 = vsel %vm8095_vm3, %v6591_v45, %v2337_v10 }
 0x1cf   :  { %v2458_v19 = vshrl.u32 %v2441_v5, 16  ;;  %v2461_v20 = vshll.u32 %v2441_v5, 16  ;;  %v2162_v21 = vshrl.u32 %v2133_v6, 16  ;;  %v2495_v25 = vshll.u32 %v2446_v4, 16  ;;  %v2442_v38 = vld [vmem:[#allocation3 + $0xc] sm:$0x1] }
 0x1d0   :  { %v1954_v63 = vsel %vm8170_vm8, %v1948_v53, %v1953_v42  ;;  %v1957_v0 = vsel %vm8175_vm9, %v1949_v54, %v1956_v49  ;;  %v1909_v1 = vor.u32 %v1907_v56, %v1906_v55  ;;  %v1910_v3 = vrot.slane %v1906_v55, 4  ;;  %v2134_v39 = vld [vmem:[#allocation3 + $0xc] sm:$0x1]  ;;  %v2752_v26 = vld [vmem:[#allocation3 + $0x20] sm:$0xf] }
 0x1d1   :  { %1955 = vst [vmem:[#allocation3 + $0x40] sm:$0xf] %v1954_v63  ;;  %1958 = vst [vmem:[#allocation3 + $0x44] sm:$0x1] %v1957_v0  ;;  %v6598_v28 = vrot.slane %v2604_v12, 9  ;;  %v2640_v29 = vrot.slane %v2605_v13, 5  ;;  %v2202_v35 = vsel %vm7002_vm2, %v2197_v11, %v2201_v24 }
 0x1d2   :  { %v1915_v8 = vsel %vm8170_vm8, %v1909_v1, %v1914_v50  ;;  %v1918_v9 = vsel %vm8175_vm9, %v1910_v3, %v1917_v57  ;;  %v2493_v36 = vrot.slane %v2492_v16, 4  ;;  %v2460_v40 = vrot.slane %v2458_v19, 4  ;;  %v2139_v47 = vld [vmem:[#allocation3 + $0x20] sm:$0xf]  ;;  %v8268_v57 = vld [vmem:[#allocation3 + $0x24] sm:$0x1] }
 0x1d3   :  { %1916 = vst [vmem:[#allocation3 + $0x30] sm:$0xf] %v1915_v8  ;;  %1919 = vst [vmem:[#allocation3 + $0x34] sm:$0x1] %v1918_v9  ;;  %v2398_v14 = vld [vmem:[#allocation3 + $0x38] sm:$0xf]  ;;  %v2641_v45 = vsel %vm8095_vm3, %v6598_v28, %v2640_v29 }
 0x1d4   :  { %v2704_v15 = vld [vmem:[#allocation3 + $0x38] sm:$0xf]  ;;  %2420 = vrot.lane.b32.xlu0 %v2398_v14, %s6913_s29  ;;  %v2463_v41 = vrot.slane %v2461_v20, 5  ;;  %v2164_v42 = vrot.slane %v2162_v21, 4  ;;  %v2167_v43 = vrot.slane %v2165_v22, 5  ;;  %v2497_v44 = vrot.slane %v2495_v25, 5 }
 0x1d5   :  { %2725 = vrot.lane.b32.xlu1 %v2704_v15, %s6917_s0  ;;  %v2788_v46 = vshll.u32 %v2751_v33, 16  ;;  %v6605_v48 = vrot.slane %v2909_v31, 9  ;;  %v2943_v49 = vrot.slane %v2910_v32, 5  ;;  %v2467_v50 = vshll.u32 %v2442_v38, 16  ;;  %v8272_v0 = vld [vmem:[#allocation3 + $0x24] sm:$0x1] }
 0x1d6   :  { %v2498_v51 = vsel %vm7002_vm2, %v2493_v36, %v2497_v44  ;;  %v2786_v52 = vrot.slane %v2785_v37, 4  ;;  %v2171_v53 = vshll.u32 %v2134_v39, 16  ;;  %v2793_v54 = vshrl.u32 %v2752_v26, 16  ;;  %v2447_v1 = vld [vmem:[#allocation3 + $0x20] sm:$0xf] }
 0x1d7   :  { %v2464_v55 = vor.u32 %v2463_v41, %v2460_v40  ;;  %v2168_v56 = vor.u32 %v2167_v43, %v2164_v42  ;;  %v2796_v58 = vshll.u32 %v2752_v26, 16  ;;  %v2204_v59 = vshrl.u32 %v2139_v47, 16  ;;  %v2135_v8 = vld [vmem:[#allocation3 + $0x10] sm:$0xf]  ;;  %v2448_v15 = vld [vmem:[#allocation3 + $0x24] sm:$0x1] }
 0x1d8   :  { %2363 = vrot.lane.b32.xlu0 %v2338_v34, %s6911_s13  ;;  %v2790_v60 = vrot.slane %v2788_v46, 5  ;;  %v2207_v61 = vshll.u32 %v2139_v47, 16  ;;  %v2944_v62 = vsel %vm8095_vm3, %v6605_v48, %v2943_v49  ;;  %v2469_v63 = vrot.slane %v2467_v50, 5  ;;  %v2748_v20 = vld [vmem:[#allocation3 + $0x10] sm:$0xf] }
 0x1d9   :  { %2265 = vrot.lane.b32.xlu1 %v2202_v35, %s6909_s26  ;;  %v2173_v4 = vrot.slane %v2171_v53, 5  ;;  %v8276_v5 = vrot.slane %v2793_v54, 4  ;;  %v2802_v6 = vshll.u32 %v8268_v57, 16  ;;  %v2465_v9 = vrot.slane %v2464_v55, 4  ;;  %v2443_v21 = vld [vmem:[#allocation3 + $0x10] sm:$0xf] }
 0x1da   :  { %v2791_v3 = vsel %vm7002_vm2, %v2786_v52, %v2790_v60  ;;  %v2169_v10 = vrot.slane %v2168_v56, 4  ;;  %v2798_v11 = vrot.slane %v2796_v58, 5  ;;  %v8281_v12 = vrot.slane %v2204_v59, 4  ;;  %v2396_v22 = vld [vmem:[#allocation3 + $0x28] sm:$0xf] }
 0x1db   :  { %v2209_v13 = vrot.slane %v2207_v61, 5  ;;  %v2213_v14 = vshll.u32 %v8272_v0, 16  ;;  %v2500_v16 = vshrl.u32 %v2447_v1, 16  ;;  %v2503_v17 = vshll.u32 %v2447_v1, 16  ;;  %v2702_v24 = vld [vmem:[#allocation3 + $0x28] sm:$0xf] }
 0x1dc   :  { %2573 = vrot.lane.b32.xlu0 %v2498_v51, %s6916_s21  ;;  %v2176_v18 = vshrl.u32 %v2135_v8, 16  ;;  %v2179_v19 = vshll.u32 %v2135_v8, 16  ;;  %v2614_v25 = vld [vmem:[#allocation3 + $0x38] sm:$0xe]  ;;  %v2470_v28 = vsel %vm7002_vm2, %v2465_v9, %v2469_v63  ;;  %v2615_v29 = vld [vmem:[#allocation3 + $0x3c] sm:$0x1]  ;;  %v2174_v37 = vsel %vm7002_vm2, %v2169_v10, %v2173_v4 }
 0x1dd   :  { %2668 = vrot.lane.b32.xlu1 %v2641_v45, %s6920_s12  ;;  %v2306_v31 = vld [vmem:[#allocation3 + $0x38] sm:$0xe]  ;;  %v2307_v32 = vld [vmem:[#allocation3 + $0x3c] sm:$0x1]  ;;  %v2765_v33 = vshrl.u32 %v2748_v20, 16  ;;  %v2768_v34 = vshll.u32 %v2748_v20, 16  ;;  %v2799_v48 = vor.u32 %v2798_v11, %v8276_v5  ;;  %v2210_v56 = vor.u32 %v2209_v13, %v8281_v12 }
 0x1de   :  { %v2472_v35 = vshrl.u32 %v2443_v21, 16  ;;  %v2475_v36 = vshll.u32 %v2443_v21, 16  ;;  %v2502_v38 = vrot.slane %v2500_v16, 4  ;;  %v2505_v39 = vrot.slane %v2503_v17, 5  ;;  %v2136_v41 = vld [vmem:[#allocation3 + $0x14] sm:$0x1] }
 0x1df   :  { %v2509_v40 = vshll.u32 %v2448_v15, 16  ;;  %v6603_v42 = vrot.slane %v2614_v25, 9  ;;  %v2660_v43 = vrot.slane %v2615_v29, 5  ;;  %v6596_v26 = vrot.slane %v2306_v31, 9  ;;  %v2749_v46 = vld [vmem:[#allocation3 + $0x14] sm:$0x1] }
 0x1e0   :  { %2973 = vrot.lane.b32.xlu0 %v2944_v62, %s6919_s17  ;;  %v2357_v44 = vrot.slane %v2307_v32, 5  ;;  %v2919_v47 = vld [vmem:[#allocation3 + $0x38] sm:$0xe]  ;;  %v2920_v45 = vld [vmem:[#allocation3 + $0x3c] sm:$0x1]  ;;  %v2178_v49 = vrot.slane %v2176_v18, 4  ;;  %v2506_v57 = vor.u32 %v2505_v39, %v2502_v38 }
 0x1e1   :  { %2878 = vrot.lane.b32.xlu1 %v2791_v3, %s6918_s9  ;;  %v2181_v50 = vrot.slane %v2179_v19, 5  ;;  %v2767_v51 = vrot.slane %v2765_v33, 4  ;;  %v2770_v52 = vrot.slane %v2768_v34, 5  ;;  %v2444_v53 = vld [vmem:[#allocation3 + $0x14] sm:$0x1]  ;;  %v2474_v54 = vrot.slane %v2472_v35, 4 }
 0x1e2   :  { %v2477_v55 = vrot.slane %v2475_v36, 5  ;;  %v2185_v58 = vshll.u32 %v2136_v41, 16  ;;  %v2774_v59 = vshll.u32 %v2749_v46, 16  ;;  %v2661_v60 = vsel %vm8095_vm3, %v6603_v42, %v2660_v43  ;;  %v8300_v10 = vld [vmem:[#allocation3 + $0x50] sm:$0xf] }
 0x1e3   :  { %v2358_v61 = vsel %vm8095_vm3, %v6596_v26, %v2357_v44  ;;  %v6610_v62 = vrot.slane %v2919_v47, 9  ;;  %v2963_v63 = vrot.slane %v2920_v45, 5  ;;  %v2804_v0 = vrot.slane %v2802_v6, 5  ;;  %v8302_v13 = vld [vmem:[#allocation3 + $0x28] sm:$0xe] }
 0x1e4   :  { %2416 = vrot.lane.b32.xlu0 %v2396_v22, %s6913_s29  ;;  %v2182_v1 = vor.u32 %v2181_v50, %v2178_v49  ;;  %v2481_v3 = vshll.u32 %v2444_v53, 16  ;;  %v2800_v4 = vrot.slane %v2799_v48, 4  ;;  %v2215_v5 = vrot.slane %v2213_v14, 5  ;;  %v8304_v15 = vld [vmem:[#allocation3 + $0x2c] sm:$0x1] }
 0x1e5   :  { %2721 = vrot.lane.b32.xlu1 %v2702_v24, %s6917_s0  ;;  %v2771_v8 = vor.u32 %v2770_v52, %v2767_v51  ;;  %v2478_v9 = vor.u32 %v2477_v55, %v2474_v54  ;;  %v2211_v11 = vrot.slane %v2210_v56, 4  ;;  %v2511_v12 = vrot.slane %v2509_v40, 5  ;;  %v2705_v16 = vld [vmem:[#allocation3 + $0x40] sm:$0xf]  ;;  %v2915_v32 = vld [vmem:[#allocation3 + $0x28] sm:$0xe] }
 0x1e6   :  { %v2964_v17 = vsel %vm8095_vm3, %v6610_v62, %v2963_v63  ;;  %v2507_v18 = vrot.slane %v2506_v57, 4  ;;  %v8308_v6 = vrot.slane %v2185_v58, 5  ;;  %v8310_v19 = vrot.slane %v2774_v59, 5  ;;  %v2399_v24 = vld [vmem:[#allocation3 + $0x40] sm:$0xf] }
 0x1e7   :  { %v8314_v14 = vrot.slane %v2182_v1, 4  ;;  %v8316_v20 = vrot.slane %v2481_v3, 5  ;;  %v3040_v21 = vshrl.u32 %v8300_v10, 16  ;;  %v3043_v22 = vshll.u32 %v8300_v10, 16  ;;  %v2916_v33 = vld [vmem:[#allocation3 + $0x2c] sm:$0x1] }
 0x1e8   :  { %2569 = vrot.lane.b32.xlu0 %v2470_v28, %s6916_s21  ;;  %v6601_v25 = vrot.slane %v8302_v13, 9  ;;  %v2652_v28 = vrot.slane %v8304_v15, 5  ;;  %v8322_v29 = vrot.slane %v2771_v8, 4  ;;  %v8324_v31 = vrot.slane %v2478_v9, 4  ;;  %v2302_v34 = vld [vmem:[#allocation3 + $0x28] sm:$0xe] }
 0x1e9   :  { %2261 = vrot.lane.b32.xlu1 %v2174_v37, %s6909_s26  ;;  %v2303_v35 = vld [vmem:[#allocation3 + $0x2c] sm:$0x1]  ;;  %v2805_v36 = vsel %vm7002_vm2, %v2800_v4, %v2804_v0  ;;  %v2145_v37 = vld [vmem:[#allocation3 + $0x38] sm:$0xf]  ;;  %v8330_v40 = vld [vmem:[#allocation3 + $0x40] sm:$0xe]  ;;  %v2216_v43 = vsel %vm7002_vm2, %v2211_v11, %v2215_v5  ;;  %v2512_v26 = vsel %vm7002_vm2, %v2507_v18, %v2511_v12 }
 0x1ea   :  { %v2453_v38 = vld [vmem:[#allocation3 + $0x38] sm:$0xf]  ;;  %v8332_v41 = vld [vmem:[#allocation3 + $0x44] sm:$0x1]  ;;  %v2120_v42 = vld [vmem:[#allocation3 + $0x28] sm:$0xf]  ;;  %v2653_v9 = vsel %vm8095_vm3, %v6601_v25, %v2652_v28 }
 0x1eb   :  { %v2122_v39 = vld [vmem:[#allocation3 + $0x38] sm:$0xf]  ;;  %v8339_v44 = vld [vmem:[#allocation3 + $0x40] sm:$0xe]  ;;  %2128 = vst.msk [vmem:[#allocation2 + $0x14] sm:$0xf] %vm1747_vm4, %v2120_v42 }
 0x1ec   :  { %2678 = vrot.lane.b32.xlu0 %v2661_v60, %s6920_s12  ;;  %2130 = vst.msk [vmem:[#allocation2 + $0x1c] sm:$0xf] %vm1747_vm4, %v2122_v39  ;;  %v2758_v46 = vld [vmem:[#allocation3 + $0x38] sm:$0xf]  ;;  %v2121_v47 = vld [vmem:[#allocation3 + $0x30] sm:$0xf] }
 0x1ed   :  { %2373 = vrot.lane.b32.xlu1 %v2358_v61, %s6911_s13  ;;  %v8342_v45 = vld [vmem:[#allocation3 + $0x44] sm:$0x1]  ;;  %v2246_v48 = vshrl.u32 %v2145_v37, 16  ;;  %v2249_v49 = vshll.u32 %v2145_v37, 16  ;;  %v2542_v50 = vshrl.u32 %v2453_v38, 16  ;;  %v2545_v51 = vshll.u32 %v2453_v38, 16 }
 0x1ee   :  { %2129 = vst.msk [vmem:[#allocation2 + $0x18] sm:$0xf] %vm1747_vm4, %v2121_v47  ;;  %v6608_v52 = vrot.slane %v2915_v32, 9  ;;  %v2955_v53 = vrot.slane %v2916_v33, 5  ;;  %v6594_v54 = vrot.slane %v2302_v34, 9  ;;  %v2349_v55 = vrot.slane %v2303_v35, 5 }
 0x1ef   :  { %v8347_v56 = vld [vmem:[#allocation3 + $0x30] sm:$0xe]  ;;  %v2146_v57 = vld [vmem:[#allocation3 + $0x3c] sm:$0x1]  ;;  %v2835_v58 = vshrl.u32 %v2758_v46, 16  ;;  %v2838_v59 = vshll.u32 %v2758_v46, 16  ;;  %v2777_v33 = vsel %vm7002_vm2, %v8322_v29, %v8310_v19 }
 0x1f0   :  { %2727 = vrot.lane.b32.xlu0 %v2705_v16, %s6917_s0  ;;  %v6611_v60 = vrot.slane %v8330_v40, 9  ;;  %v2967_v61 = vrot.slane %v8332_v41, 5  ;;  %v6604_v62 = vrot.slane %v8339_v44, 9  ;;  %v2664_v63 = vrot.slane %v8342_v45, 5  ;;  %v8353_v0 = vld [vmem:[#allocation3 + $0x34] sm:$0x1] }
 0x1f1   :  { %2983 = vrot.lane.b32.xlu1 %v2964_v17, %s6919_s17  ;;  %v2248_v1 = vrot.slane %v2246_v48, 4  ;;  %v2251_v3 = vrot.slane %v2249_v49, 5  ;;  %v2454_v4 = vld [vmem:[#allocation3 + $0x3c] sm:$0x1]  ;;  %v2544_v5 = vrot.slane %v2542_v50, 4  ;;  %v2547_v8 = vrot.slane %v2545_v51, 5 }
 0x1f2   :  { %v2956_v11 = vsel %vm8095_vm3, %v6608_v52, %v2955_v53  ;;  %v6595_v12 = vrot.slane %v8347_v56, 9  ;;  %v2255_v13 = vshll.u32 %v2146_v57, 16  ;;  %v8360_v15 = vld [vmem:[#allocation3 + $0x30] sm:$0xe]  ;;  %v2449_v16 = vld [vmem:[#allocation3 + $0x28] sm:$0xf]  ;;  %v2188_v17 = vsel %vm7002_vm2, %v8314_v14, %v8308_v6 }
 0x1f3   :  { %v8368_v18 = vld [vmem:[#allocation3 + $0x34] sm:$0x1]  ;;  %v2837_v25 = vrot.slane %v2835_v58, 4  ;;  %v2840_v28 = vrot.slane %v2838_v59, 5  ;;  %v2350_v32 = vsel %vm8095_vm3, %v6594_v54, %v2349_v55  ;;  %v2353_v34 = vrot.slane %v8353_v0, 5  ;;  %v6888_v19 = vld [vmem:[%s9784_s3 + $0x18] sm:$0xff]  }
 0x1f4   :  { %2880 = vrot.lane.b32.xlu0 %v2805_v36, %s6918_s9  ;;  %v2551_v35 = vshll.u32 %v2454_v4, 16  ;;  %v2450_v36 = vld [vmem:[#allocation3 + $0x2c] sm:$0x1]  ;;  %v2754_v37 = vld [vmem:[#allocation3 + $0x28] sm:$0xf]  ;;  %v2252_v38 = vor.u32 %v2251_v3, %v2248_v1  ;;  %v2548_v6 = vor.u32 %v2547_v8, %v2544_v5  ;;  %v2514_v42 = vshrl.u32 %v2449_v16, 16 }
 0x1f5   :  { %2422 = vrot.lane.b32.xlu1 %v2399_v24, %s6913_s29  ;;  %v2759_v24 = vld [vmem:[#allocation3 + $0x3c] sm:$0x1]  ;;  %v8377_v14 = vld [vmem:[#allocation3 + $0x30] sm:$0xe]  ;;  %v8379_v39 = vld [vmem:[#allocation3 + $0x34] sm:$0x1]  ;;  %v2484_v50 = vsel %vm7002_vm2, %v8324_v31, %v8316_v20  ;;  %v2841_v51 = vor.u32 %v2840_v28, %v2837_v25 }
 0x1f6   :  { %v8381_v46 = vrot.slane %v2255_v13, 5  ;;  %v6602_v47 = vrot.slane %v8360_v15, 9  ;;  %v2656_v48 = vrot.slane %v8368_v18, 5  ;;  %v2844_v49 = vshll.u32 %v2759_v24, 16  ;;  %v8391_v53 = vld [vmem:[#allocation3 + $0x2c] sm:$0x1] }
 0x1f7   :  { %v2523_v52 = vshll.u32 %v2450_v36, 16  ;;  %v2807_v54 = vshrl.u32 %v2754_v37, 16  ;;  %v8393_v55 = vld [vmem:[#allocation3 + $0x40] sm:$0xf]  ;;  %v8395_v57 = vrot.slane %v2551_v35, 5  ;;  %v6609_v58 = vrot.slane %v8377_v14, 9 }
 0x1f8   :  { %2267 = vrot.lane.b32.xlu0 %v2216_v43, %s6909_s26  ;;  %v2517_v43 = vshll.u32 %v2449_v16, 16  ;;  %v2959_v59 = vrot.slane %v8379_v39, 5  ;;  %v2810_v0 = vshll.u32 %v2754_v37, 16  ;;  %v8399_v3 = vrot.slane %v2252_v38, 4  ;;  %v2397_v8 = vld [vmem:[#allocation3 + $0x30] sm:$0xf] }
 0x1f9   :  { %2575 = vrot.lane.b32.xlu1 %v2512_v26, %s6916_s21  ;;  %v2703_v26 = vld [vmem:[#allocation3 + $0x30] sm:$0xf]  ;;  %v8401_v4 = vrot.slane %v2548_v6, 4  ;;  %v2516_v20 = vrot.slane %v2514_v42, 4  ;;  %v2849_v13 = vshrl.u32 %v8393_v55, 16  ;;  %v8410_v16 = vrot.slane %v2841_v51, 4 }
 0x1fa   :  { %v2519_v31 = vrot.slane %v2517_v43, 5  ;;  %v8412_v18 = vrot.slane %v2523_v52, 5  ;;  %v8414_v24 = vrot.slane %v2807_v54, 4  ;;  %v2852_v25 = vshll.u32 %v8393_v55, 16  ;;  %v2141_v36 = vld [vmem:[#allocation3 + $0x28] sm:$0xf]  ;;  %v8480_v54 = vpop.permute.xlu1 %2729 }
 0x1fb   :  { %v8418_v35 = vrot.slane %v2810_v0, 5  ;;  %v2665_v38 = vsel %vm8095_vm3, %v6604_v62, %v2664_v63  ;;  %v8436_v6 = vsel %vm8095_vm3, %v6595_v12, %v2353_v34  ;;  %v6886_v40 = vld [vmem:[%s9784_s3 + $0x20] ss:$0 sps:$4 sm:$0xff]   ;;  %v8444_v44 = vrot.slane %v2849_v13, 4  ;;  %v2012_v29 = vld [vmem:[#allocation3 + $0x68] sm:$0xf] }
 0x1fc   :  { %2674 = vrot.lane.b32.xlu0 %v2653_v9, %s6920_s12  ;;  %v8404_v9 = vrot.slane %v2844_v49, 5  ;;  %v2520_v42 = vor.u32 %v2519_v31, %v2516_v20  ;;  %v2258_v56 = vsel %vm7002_vm2, %v8399_v3, %v8381_v46  ;;  %v2218_v63 = vshrl.u32 %v2141_v36, 16  ;;  %6866 = vmatprep.subr.msk.bf16.mxu1 %vm4011_vm12, %v6886_v40  ;;  %v8469_v46 = vld [vmem:[%s9783_s2] ss:$0 sm:$0xff]  ;;  %v2143_v20 = vld [vmem:[#allocation3 + $0x30] sm:$0xf] }
 0x1fd   :  { %2979 = vrot.lane.b32.xlu1 %v2956_v11, %s6919_s17  ;;  %v2816_v11 = vshll.u32 %v8391_v53, 16  ;;  %v4013_v12 = vsel %vm4011_vm12, %v6886_v40, 0  ;;  %v2221_v52 = vshll.u32 %v2141_v36, 16  ;;  %v8482_v3 = vrot.slane %v2852_v25, 5 }
 0x1fe   :  { %v8478_v51 = vrot.slane %v2520_v42, 4  ;;  %6820 = vmatpush3.bf16.msra.mxu1 %v4013_v12 }
 0x1ff   :  { %6821 = vmatprep.subr.bf16.mxu1 %v6888_v19  ;;  %v2818_v14 = vrot.slane %v2816_v11, 5 }
 0x200   :  { %2723 = vrot.lane.b32.xlu0 %v2703_v26, %s6917_s0  ;;  %v2526_v39 = vsel %vm7002_vm2, %v8478_v51, %v8412_v18 }
 0x201   :  { %2369 = vrot.lane.b32.xlu1 %v2350_v32, %s6911_s13 }
 0x202   :  { %6822 = vmatpush3.bf16.msra.mxu1 %v6888_v19  ;;  %v2813_v19 = vor.u32 %v8418_v35, %v8414_v24  ;;  %v1995_v24 = vld [vmem:[#allocation3 + $0x64] sm:$0x1]  ;;  %v2855_v35 = vor.u32 %v8482_v3, %v8444_v44  ;;  %v2142_v44 = vld [vmem:[#allocation3 + $0x2c] sm:$0x1] }
 0x203   :  { %v6813_v1 = vpop.f32.mrf.mxu1 }
 0x204   :  { %v1709_v5 = vadd.f32 %v6813_v1, %v8162_v7  ;;  %2263 = vrot.lane.b32.xlu0 %v2188_v17, %s6909_s26  ;;  %v2968_v17 = vsel %vm8095_vm3, %v6611_v60, %v2967_v61  ;;  %v8442_v61 = vld [vmem:[#allocation3 + $0x44] sm:$0x1] }
 0x205   :  { %v1700_v15 = vpop.f32.mrf.mxu1  ;;  %2418 = vrot.lane.b32.xlu1 %v2397_v8, %s6913_s29  ;;  %v2858_v13 = vshll.u32 %v8442_v61, 16 }
 0x206   :  { %v1741_v28 = vmax.f32 %v1709_v5, 0.0  ;;  %v1701_v32 = vadd.f32 %v8162_v7, %v1700_v15  ;;  %v1973_v5 = vld [vmem:[#allocation3 + $0x58] sm:$0xf]  ;;  %v8487_v15 = vrot.slane %v2218_v63, 4 }
 0x207   :  { %v6814_v37 = vpop.f32.mrf.mxu1 }
 0x208   :  { %v6742_v41 = vpack.c.bf16 %v1741_v28, %v1741_v28  ;;  %v1739_v60 = vmax.f32 %v1701_v32, 0.0  ;;  %v1712_v45 = vadd.f32 %v6814_v37, %v8162_v7  ;;  %2876 = vrot.lane.b32.xlu0 %v2777_v33, %s6918_s9  ;;  %v8459_v7 = vsel %vm8095_vm3, %v6602_v47, %v2656_v48  ;;  %v2015_v33 = vld [vmem:[#allocation3 + $0x6c] sm:$0x1]  ;;  %v6889_v28 = vld [vmem:[%s9784_s3 + $0x10] sm:$0xff]   ;;  %v1976_v37 = vld [vmem:[#allocation3 + $0x5c] sm:$0x1] }
 0x209   :  { %v1703_v62 = vpop.f32.mrf.mxu1  ;;  %2571 = vrot.lane.b32.xlu1 %v2484_v50, %s6916_s21  ;;  %v2554_v50 = vsel %vm7002_vm2, %v8401_v4, %v8395_v57  ;;  %6823 = vmatprep.subr.bf16.mxu1 %v6889_v28 }
 0x20a   :  { %v2002_v34 = vshrl.u32 %v6742_v41, 16  ;;  %v2005_v43 = vshll.u32 %v6742_v41, 16  ;;  %v6740_v26 = vpack.c.bf16 %v1739_v60, %v1739_v60  ;;  %v1742_v49 = vmax.f32 %v1712_v45, 0.0  ;;  %6824 = vmatpush3.bf16.msra.mxu1 %v6889_v28 }
 0x20b   :  { %v1704_v47 = vadd.f32 %v8469_v46, %v1703_v62  ;;  %v8492_v60 = vrot.slane %v2221_v52, 5  ;;  %v2235_v45 = vshll.u32 %v2143_v20, 16 }
 0x20c   :  { %v8472_v48 = vpop.permute.xlu0 %2412  ;;  %v2004_v55 = vrot.slane %v2002_v34, 7  ;;  %v1963_v0 = vshrl.u32 %v6740_v26, 16  ;;  %v6743_v1 = vpack.c.bf16 %v1742_v49, %v1742_v49  ;;  %v1966_v31 = vshll.u32 %v6740_v26, 16  ;;  %2985 = vrot.lane.b32.xlu0 %v2968_v17, %s6919_s17  ;;  %v2031_v49 = vld [vmem:[#allocation3 + $0x70] sm:$0xf] }
 0x20d   :  { %v1740_v8 = vmax.f32 %v1704_v47, 0.0  ;;  %2680 = vrot.lane.b32.xlu1 %v2665_v38, %s6920_s12  ;;  %v2232_v17 = vshrl.u32 %v2143_v20, 16  ;;  %v2455_v38 = vld [vmem:[#allocation3 + $0x40] sm:$0xf] }
 0x20e   :  { %v2007_v32 = vor.u32 %v2005_v43, %v2004_v55  ;;  %v2008_v25 = vrot.slane %v2004_v55, 4  ;;  %v1965_v36 = vrot.slane %v1963_v0, 7  ;;  %v2021_v42 = vshrl.u32 %v6743_v1, 16  ;;  %v2034_v55 = vld [vmem:[#allocation3 + $0x74] sm:$0x1] }
 0x20f   :  { %v6741_v40 = vpack.c.bf16 %v1740_v8, %v1740_v8  ;;  %v2024_v26 = vshll.u32 %v6743_v1, 16  ;;  %v1992_v0 = vld [vmem:[#allocation3 + $0x60] sm:$0xf]  ;;  %v2556_v1 = vshrl.u32 %v2455_v38, 16  ;;  %v2559_v20 = vshll.u32 %v2455_v38, 16 }
 0x210   :  { %v2409_v41 = vpop.permute.xlu0 %2408  ;;  %v2013_v62 = vsel %vm8170_vm8, %v2007_v32, %v2012_v29  ;;  %v2016_v63 = vsel %vm8175_vm9, %v2008_v25, %v2015_v33  ;;  %v1968_v12 = vor.u32 %v1966_v31, %v1965_v36  ;;  %v1969_v34 = vrot.slane %v1965_v36, 4  ;;  %2371 = vrot.lane.b32.xlu0 %v8436_v6, %s6911_s13  ;;  %v8504_v29 = vpop.permute.xlu1 %2890  ;;  %v2756_v32 = vld [vmem:[#allocation3 + $0x30] sm:$0xf] }
 0x211   :  { %2433 = vst.msk [vmem:[#allocation2] sm:$0xf] %vm2432_vm11, %v2409_v41  ;;  %2014 = vst [vmem:[#allocation3 + $0x68] sm:$0xf] %v2013_v62  ;;  %v2023_v43 = vrot.slane %v2021_v42, 7  ;;  %v1982_v47 = vshrl.u32 %v6741_v40, 16  ;;  %2273 = vrot.lane.b32.xlu1 %v2258_v56, %s6909_s26 }
 0x212   :  { %2017 = vst [vmem:[#allocation3 + $0x6c] sm:$0x1] %v2016_v63  ;;  %v1974_v33 = vsel %vm8170_vm8, %v1968_v12, %v1973_v5  ;;  %v1977_v52 = vsel %vm8175_vm9, %v1969_v34, %v1976_v37  ;;  %v1985_v8 = vshll.u32 %v6741_v40, 16  ;;  %v2224_v5 = vor.u32 %v8492_v60, %v8487_v15  ;;  %v2451_v37 = vld [vmem:[#allocation3 + $0x30] sm:$0xf] }
 0x213   :  { %1975 = vst [vmem:[#allocation3 + $0x58] sm:$0xf] %v1974_v33  ;;  %1978 = vst [vmem:[#allocation3 + $0x5c] sm:$0x1] %v1977_v52  ;;  %v2026_v6 = vor.u32 %v2024_v26, %v2023_v43  ;;  %v2027_v31 = vrot.slane %v2023_v43, 4  ;;  %v1984_v56 = vrot.slane %v1982_v47, 7 }
 0x214   :  { %v2234_v25 = vrot.slane %v2232_v17, 4  ;;  %v2237_v36 = vrot.slane %v2235_v45, 5  ;;  %2581 = vrot.lane.b32.xlu0 %v2554_v50, %s6916_s21  ;;  %v2558_v3 = vrot.slane %v2556_v1, 4  ;;  %v2561_v15 = vrot.slane %v2559_v20, 5  ;;  %v2144_v62 = vld [vmem:[#allocation3 + $0x34] sm:$0x1]  ;;  %v8530_v4 = vpop.permute.xlu1 %2987 }
 0x215   :  { %v2032_v42 = vsel %vm8170_vm8, %v2026_v6, %v2031_v49  ;;  %v2035_v41 = vsel %vm8175_vm9, %v2027_v31, %v2034_v55  ;;  %v1987_v38 = vor.u32 %v1985_v8, %v1984_v56  ;;  %v1988_v40 = vrot.slane %v1984_v56, 4  ;;  %2676 = vrot.lane.b32.xlu1 %v8459_v7, %s6920_s12  ;;  %v2456_v26 = vld [vmem:[#allocation3 + $0x44] sm:$0x1]  ;;  %v3024_v1 = vld [vmem:[#allocation3 + $0x54] sm:$0x1] }
 0x216   :  { %2033 = vst [vmem:[#allocation3 + $0x70] sm:$0xf] %v2032_v42  ;;  %2036 = vst [vmem:[#allocation3 + $0x74] sm:$0x1] %v2035_v41  ;;  %v2821_v28 = vshrl.u32 %v2756_v32, 16  ;;  %v2824_v60 = vshll.u32 %v2756_v32, 16  ;;  %v2960_v7 = vsel %vm8095_vm3, %v6609_v58, %v2959_v59  ;;  %v2847_v50 = vsel %vm7002_vm2, %v8410_v16, %v8404_v9 }
 0x217   :  { %v1993_v17 = vsel %vm8170_vm8, %v1987_v38, %v1992_v0  ;;  %v1996_v45 = vsel %vm8175_vm9, %v1988_v40, %v1995_v24  ;;  %v2528_v63 = vshrl.u32 %v2451_v37, 16  ;;  %v2531_v57 = vshll.u32 %v2451_v37, 16 }
 0x218   :  { %1994 = vst [vmem:[#allocation3 + $0x60] sm:$0xf] %v1993_v17  ;;  %1997 = vst [vmem:[#allocation3 + $0x64] sm:$0x1] %v1996_v45  ;;  %v2814_v12 = vrot.slane %v2813_v19, 4  ;;  %v2227_v34 = vshll.u32 %v2142_v44, 16  ;;  %2981 = vrot.lane.b32.xlu0 %v2960_v7, %s6919_s17  ;;  %v2238_v9 = vor.u32 %v2237_v36, %v2234_v25  ;;  %v2562_v49 = vor.u32 %v2561_v15, %v2558_v3  ;;  %v8562_v31 = vpop.permute.xlu1 %2717 }
 0x219   :  { %2886 = vrot.lane.b32.xlu1 %v2847_v50, %s6918_s9  ;;  %v2856_v58 = vrot.slane %v2855_v35, 4  ;;  %v2860_v59 = vrot.slane %v2858_v13, 5  ;;  %v2225_v43 = vrot.slane %v2224_v5, 4  ;;  %v2241_v16 = vshll.u32 %v2144_v62, 16  ;;  %v3029_v0 = vld [vmem:[#allocation3 + $0x68] sm:$0xf] }
 0x21a   :  { %v3025_v47 = vld [vmem:[#allocation3 + $0x58] sm:$0xf]  ;;  %v2823_v19 = vrot.slane %v2821_v28, 4  ;;  %v2826_v33 = vrot.slane %v2824_v60, 5  ;;  %v2530_v52 = vrot.slane %v2528_v63, 4  ;;  %v2533_v55 = vrot.slane %v2531_v57, 5 }
 0x21b   :  { %v2819_v18 = vsel %vm7002_vm2, %v2814_v12, %v2818_v14  ;;  %v2229_v51 = vrot.slane %v2227_v34, 5  ;;  %v3054_v53 = vshrl.u32 %v3025_v47, 16  ;;  %v3057_v11 = vshll.u32 %v3025_v47, 16  ;;  %v2757_v35 = vld [vmem:[#allocation3 + $0x34] sm:$0x1]  ;;  %v6890_v17 = vld [vmem:[%s9784_s3 + $0x8] sm:$0xff]  }
 0x21c   :  { %2577 = vrot.lane.b32.xlu0 %v2526_v39, %s6916_s21  ;;  %v2861_v61 = vsel %vm7002_vm2, %v2856_v58, %v2860_v59  ;;  %v2565_v13 = vshll.u32 %v2456_v26, 16  ;;  %v3042_v20 = vrot.slane %v3040_v21, 4  ;;  %v3045_v6 = vrot.slane %v3043_v22, 5  ;;  %v2452_v25 = vld [vmem:[#allocation3 + $0x34] sm:$0x1]  ;;  %v8575_v50 = vpop.permute.xlu1 %2365  ;;  %6825 = vmatprep.subr.bf16.mxu1 %v6890_v17  ;;  %v6891_v58 = vld [vmem:[%s9784_s3] sm:$0xff]   ;;  %v8580_v59 = vpop.permute.xlu0 %2670 }
 0x21d   :  { %2882 = vrot.lane.b32.xlu1 %v2819_v18, %s6918_s9  ;;  %v2230_v56 = vsel %vm7002_vm2, %v2225_v43, %v2229_v51  ;;  %v2239_v8 = vrot.slane %v2238_v9, 4  ;;  %v2243_v32 = vrot.slane %v2241_v16, 5  ;;  %v2563_v24 = vrot.slane %v2562_v49, 4  ;;  %v3026_v57 = vld [vmem:[#allocation3 + $0x5c] sm:$0x1]  ;;  %6826 = vmatpush3.bf16.msra.mxu1 %v6890_v17 }
 0x21e   :  { %v2827_v5 = vor.u32 %v2826_v33, %v2823_v19  ;;  %v2534_v36 = vor.u32 %v2533_v55, %v2530_v52  ;;  %v3082_v42 = vshrl.u32 %v3029_v0, 16  ;;  %v3085_v41 = vshll.u32 %v3029_v0, 16  ;;  %v3030_v33 = vld [vmem:[#allocation3 + $0x6c] sm:$0x1]  ;;  %6827 = vmatprep.subr.bf16.mxu1 %v6891_v58 }
 0x21f   :  { %v3027_v37 = vld [vmem:[#allocation3 + $0x60] sm:$0xf]  ;;  %v3056_v38 = vrot.slane %v3054_v53, 4  ;;  %v3059_v21 = vrot.slane %v3057_v11, 5  ;;  %v2567_v22 = vrot.slane %v2565_v13, 5  ;;  %v2830_v44 = vshll.u32 %v2757_v35, 16 }
 0x220   :  { %v3068_v40 = vshrl.u32 %v3027_v37, 16  ;;  %v3071_v10 = vshll.u32 %v3027_v37, 16  ;;  %2888 = vrot.lane.b32.xlu0 %v2861_v61, %s6918_s9  ;;  %v2244_v3 = vsel %vm7002_vm2, %v2239_v8, %v2243_v32  ;;  %v2537_v15 = vshll.u32 %v2452_v25, 16  ;;  %v3028_v19 = vld [vmem:[#allocation3 + $0x64] sm:$0x1]  ;;  %v8590_v53 = vpop.permute.xlu1 %2975 }
 0x221   :  { %2269 = vrot.lane.b32.xlu1 %v2230_v56, %s6909_s26  ;;  %v3046_v28 = vor.u32 %v3045_v6, %v3042_v20  ;;  %v3049_v60 = vshll.u32 %v3024_v1, 16  ;;  %v2568_v45 = vsel %vm7002_vm2, %v2563_v24, %v2567_v22  ;;  %v2828_v62 = vrot.slane %v2827_v5, 4  ;;  %6828 = vmatpush3.bf16.msra.mxu1 %v6891_v58  ;;  %v8594_v1 = vpop.permute.xlu0 %2719  ;;  %v3183_v20 = vld [vmem:[#allocation3 + $0x50] sm:$0xe]  ;;  %v3184_v6 = vld [vmem:[#allocation3 + $0x54] sm:$0x1] }
 0x222   :  { %v2535_v63 = vrot.slane %v2534_v36, 4  ;;  %v3084_v7 = vrot.slane %v3082_v42, 4  ;;  %v3060_v12 = vor.u32 %v3059_v21, %v3056_v38  ;;  %v3070_v34 = vrot.slane %v3068_v40, 4  ;;  %v3185_v24 = vld [vmem:[#allocation3 + $0x58] sm:$0xe] }
 0x223   :  { %v3073_v39 = vrot.slane %v3071_v10, 5  ;;  %v3087_v14 = vrot.slane %v3085_v41, 5  ;;  %v2832_v43 = vrot.slane %v2830_v44, 5  ;;  %v2539_v9 = vrot.slane %v2537_v15, 5  ;;  %v3186_v35 = vld [vmem:[#allocation3 + $0x5c] sm:$0x1] }
 0x224   :  { %2271 = vrot.lane.b32.xlu0 %v2244_v3, %s6909_s26  ;;  %v3047_v16 = vrot.slane %v3046_v28, 4  ;;  %v3051_v26 = vrot.slane %v3049_v60, 5  ;;  %v3063_v49 = vshll.u32 %v3026_v57, 16  ;;  %v3061_v55 = vrot.slane %v3060_v12, 4  ;;  %v3327_v42 = vld [vmem:[#allocation3 + $0x58] sm:$0xf]  ;;  %v8600_v41 = vpop.permute.xlu1 %2414 }
 0x225   :  { %2583 = vrot.lane.b32.xlu1 %v2568_v45, %s6916_s21  ;;  %v2833_v47 = vsel %vm7002_vm2, %v2828_v62, %v2832_v43  ;;  %v2540_v52 = vsel %vm7002_vm2, %v2535_v63, %v2539_v9  ;;  %v3074_v18 = vor.u32 %v3073_v39, %v3070_v34  ;;  %v3088_v51 = vor.u32 %v3087_v14, %v3084_v7  ;;  %v3189_v22 = vld [vmem:[#allocation3 + $0x68] sm:$0xe]  ;;  %v3329_v44 = vld [vmem:[#allocation3 + $0x60] sm:$0xf]  ;;  %v8606_v3 = vpop.permute.xlu0 %2666  ;;  %v3188_v28 = vld [vmem:[#allocation3 + $0x64] sm:$0x1] }
 0x226   :  { %v3052_v11 = vsel %vm7002_vm2, %v3047_v16, %v3051_v26  ;;  %v3065_v0 = vrot.slane %v3063_v49, 5  ;;  %v3077_v61 = vshll.u32 %v3028_v19, 16  ;;  %v3091_v13 = vshll.u32 %v3030_v33, 16  ;;  %v3187_v15 = vld [vmem:[#allocation3 + $0x60] sm:$0xe] }
 0x227   :  { %v3075_v8 = vrot.slane %v3074_v18, 4  ;;  %v3089_v32 = vrot.slane %v3088_v51, 4  ;;  %v6613_v36 = vrot.slane %v3183_v20, 9  ;;  %v3217_v37 = vrot.slane %v3184_v6, 5  ;;  %v3190_v60 = vld [vmem:[#allocation3 + $0x6c] sm:$0x1] }
 0x228   :  { %2884 = vrot.lane.b32.xlu0 %v2833_v47, %s6918_s9  ;;  %v3066_v56 = vsel %vm7002_vm2, %v3061_v55, %v3065_v0  ;;  %v3079_v5 = vrot.slane %v3077_v61, 5  ;;  %v3093_v25 = vrot.slane %v3091_v13, 5  ;;  %v6614_v40 = vrot.slane %v3185_v24, 9  ;;  %v3331_v63 = vld [vmem:[#allocation3 + $0x68] sm:$0xf]  ;;  %v8616_v26 = vpop.permute.xlu1 %2361 }
 0x229   :  { %2579 = vrot.lane.b32.xlu1 %v2540_v52, %s6916_s21  ;;  %v3221_v10 = vrot.slane %v3186_v35, 5  ;;  %v3218_v17 = vsel %vm8095_vm3, %v6613_v36, %v3217_v37  ;;  %v3344_v45 = vshrl.u32 %v3327_v42, 16  ;;  %v3347_v62 = vshll.u32 %v3327_v42, 16  ;;  %v3333_v16 = vld [vmem:[#allocation3 + $0x70] sm:$0xf]  ;;  %v8618_v19 = vpop.permute.xlu0 %2715 }
 0x22a   :  { %v3080_v38 = vsel %vm7002_vm2, %v3075_v8, %v3079_v5  ;;  %v3094_v21 = vsel %vm7002_vm2, %v3089_v32, %v3093_v25  ;;  %v6616_v57 = vrot.slane %v3189_v22, 9  ;;  %v3358_v7 = vshrl.u32 %v3329_v44, 16  ;;  %v3328_v51 = vld [vmem:[#allocation3 + $0x5c] sm:$0x1]  ;;  %v3279_v20 = vld [vmem:[#allocation3 + $0x58] sm:$0xf] }
 0x22b   :  { %v3361_v12 = vshll.u32 %v3329_v44, 16  ;;  %v3222_v34 = vsel %vm8095_vm3, %v6614_v40, %v3221_v10  ;;  %v6615_v39 = vrot.slane %v3187_v15, 9  ;;  %v3225_v14 = vrot.slane %v3188_v28, 5  ;;  %v3280_v6 = vld [vmem:[#allocation3 + $0x60] sm:$0xf] }
 0x22c   :  { %3151 = vrot.lane.b32.xlu0 %v3052_v11, %s6909_s26  ;;  %v3229_v58 = vrot.slane %v3190_v60, 5  ;;  %v3372_v43 = vshrl.u32 %v3331_v63, 16  ;;  %v3375_v9 = vshll.u32 %v3331_v63, 16  ;;  %v3346_v49 = vrot.slane %v3344_v45, 4  ;;  %v3330_v8 = vld [vmem:[#allocation3 + $0x64] sm:$0x1]  ;;  %v8626_v25 = vpop.permute.xlu1 %2410 }
 0x22d   :  { %3153 = vrot.lane.b32.xlu1 %v3066_v56, %s6909_s26  ;;  %v3349_v47 = vrot.slane %v3347_v62, 5  ;;  %v3360_v33 = vrot.slane %v3358_v7, 4  ;;  %v3363_v52 = vrot.slane %v3361_v12, 5  ;;  %v3226_v55 = vsel %vm8095_vm3, %v6615_v39, %v3225_v14  ;;  %v3332_v35 = vld [vmem:[#allocation3 + $0x6c] sm:$0x1] }
 0x22e   :  { %v3230_v18 = vsel %vm8095_vm3, %v6616_v57, %v3229_v58  ;;  %v3386_v11 = vshrl.u32 %v3333_v16, 16  ;;  %v3389_v0 = vshll.u32 %v3333_v16, 16  ;;  %v3374_v61 = vrot.slane %v3372_v43, 4  ;;  %v3008_v5 = vld [vmem:[#allocation3 + $0x58] sm:$0xf] }
 0x22f   :  { %v3377_v13 = vrot.slane %v3375_v9, 5  ;;  %v3350_v56 = vor.u32 %v3349_v47, %v3346_v49  ;;  %v3353_v32 = vshll.u32 %v3328_v51, 16  ;;  %v3364_v24 = vor.u32 %v3363_v52, %v3360_v33  ;;  %v3334_v36 = vld [vmem:[#allocation3 + $0x74] sm:$0x1]  ;;  %3016 = vst.msk [vmem:[#allocation2 + $0x24] sm:$0xf] %vm1747_vm4, %v3008_v5 }
 0x230   :  { %3155 = vrot.lane.b32.xlu0 %v3080_v38, %s6909_s26  ;;  %v3388_v37 = vrot.slane %v3386_v11, 4  ;;  %v3391_v42 = vrot.slane %v3389_v0, 5  ;;  %v3009_v38 = vld [vmem:[#allocation3 + $0x60] sm:$0xf]  ;;  %v3367_v40 = vshll.u32 %v3330_v8, 16  ;;  %v3381_v28 = vshll.u32 %v3332_v35, 16  ;;  %v8639_v33 = vpop.permute.xlu1 %2672 }
 0x231   :  { %3157 = vrot.lane.b32.xlu1 %v3094_v21, %s6909_s26  ;;  %v8629_v21 = vpop.permute.xlu0 %2977  ;;  %v3378_v10 = vor.u32 %v3377_v13, %v3374_v61  ;;  %3017 = vst.msk [vmem:[#allocation2 + $0x28] sm:$0xf] %vm1747_vm4, %v3009_v38  ;;  %v3010_v22 = vld [vmem:[#allocation3 + $0x68] sm:$0xf]  ;;  %v3351_v15 = vrot.slane %v3350_v56, 4  ;;  %v3365_v63 = vrot.slane %v3364_v24, 4 }
 0x232   :  { %v3281_v44 = vld [vmem:[#allocation3 + $0x68] sm:$0xf]  ;;  %v3487_v60 = vld [vmem:[#allocation3 + $0x58] sm:$0xe]  ;;  %3018 = vst.msk [vmem:[#allocation2 + $0x2c] sm:$0xf] %vm1747_vm4, %v3010_v22  ;;  %v3392_v39 = vor.u32 %v3391_v42, %v3388_v37 }
 0x233   :  { %v3282_v62 = vld [vmem:[#allocation3 + $0x70] sm:$0xf]  ;;  %v3395_v57 = vshll.u32 %v3334_v36, 16  ;;  %v3489_v14 = vld [vmem:[#allocation3 + $0x60] sm:$0xe]  ;;  %v3369_v9 = vrot.slane %v3367_v40, 5 }
 0x234   :  { %3247 = vrot.lane.b32.xlu0 %v3218_v17, %s6911_s13  ;;  %v3488_v17 = vld [vmem:[#allocation3 + $0x5c] sm:$0x1]  ;;  %v3011_v7 = vld [vmem:[#allocation3 + $0x70] sm:$0xf]  ;;  %v3490_v58 = vld [vmem:[#allocation3 + $0x64] sm:$0x1] }
 0x235   :  { %3249 = vrot.lane.b32.xlu1 %v3222_v34, %s6911_s13  ;;  %v3355_v34 = vrot.slane %v3353_v32, 5  ;;  %3019 = vst.msk [vmem:[#allocation2 + $0x30] sm:$0xf] %vm1747_vm4, %v3011_v7  ;;  %v3379_v16 = vrot.slane %v3378_v10, 4  ;;  %v6621_v49 = vrot.slane %v3487_v60, 9  ;;  %v3521_v47 = vrot.slane %v3488_v17, 5  ;;  %v8644_v61 = vpop.permute.xlu0 %2367 }
 0x236   :  { %v3383_v51 = vrot.slane %v3381_v28, 5  ;;  %v3491_v11 = vld [vmem:[#allocation3 + $0x68] sm:$0xe]  ;;  %v3492_v0 = vld [vmem:[#allocation3 + $0x6c] sm:$0x1]  ;;  %v6622_v56 = vrot.slane %v3489_v14, 9 }
 0x237   :  { %v3525_v8 = vrot.slane %v3490_v58, 5  ;;  %v3393_v5 = vrot.slane %v3392_v39, 4  ;;  %v3493_v36 = vld [vmem:[#allocation3 + $0x70] sm:$0xe]  ;;  %v3494_v37 = vld [vmem:[#allocation3 + $0x74] sm:$0x1]  ;;  %v3522_v40 = vsel %vm8095_vm3, %v6621_v49, %v3521_v47 }
 0x238   :  { %3251 = vrot.lane.b32.xlu0 %v3226_v55, %s6911_s13  ;;  %v3384_v38 = vsel %vm7002_vm2, %v3379_v16, %v3383_v51  ;;  %v6623_v10 = vrot.slane %v3491_v11, 9  ;;  %v3529_v22 = vrot.slane %v3492_v0, 5  ;;  %v8655_v17 = vld [vmem:[#allocation3 + $0x60] sm:$0xf]  ;;  %v2093_v14 = vld [vmem:[#allocation3 + $0x8c] sm:$0x1] }
 0x239   :  { %3253 = vrot.lane.b32.xlu1 %v3230_v18, %s6911_s13  ;;  %v3356_v18 = vsel %vm7002_vm2, %v3351_v15, %v3355_v34  ;;  %v3526_v7 = vsel %vm8095_vm3, %v6622_v56, %v3525_v8  ;;  %v3533_v34 = vrot.slane %v3494_v37, 5  ;;  %v3633_v16 = vld [vmem:[#allocation3 + $0x68] sm:$0xf]  ;;  %v2051_v47 = vld [vmem:[#allocation3 + $0x78] sm:$0xf]  ;;  %v3651_v8 = vshll.u32 %v8655_v17, 16 }
 0x23a   :  { %v2054_v0 = vld [vmem:[#allocation3 + $0x7c] sm:$0x1] }
 0x23c   :  { %3295 = vrot.lane.b32.xlu0 %v3279_v20, %s6913_s29  ;;  %v3370_v20 = vsel %vm7002_vm2, %v3365_v63, %v3369_v9 }
 0x23d   :  { %3297 = vrot.lane.b32.xlu1 %v3280_v6, %s6913_s29  ;;  %v3397_v6 = vrot.slane %v3395_v57, 5 }
 0x23e   :  { %v6817_v45 = vpop.f32.mrf.mxu1 }
 0x23f   :  { %v1725_v12 = vadd.f32 %v8469_v46, %v6817_v45  ;;  %v2090_v45 = vld [vmem:[#allocation3 + $0x88] sm:$0xf]  ;;  %v3398_v9 = vsel %vm7002_vm2, %v3393_v5, %v3397_v6 }
 0x240   :  { %v1716_v43 = vpop.f32.mrf.mxu1  ;;  %3299 = vrot.lane.b32.xlu0 %v3281_v44, %s6913_s29 }
 0x241   :  { %3301 = vrot.lane.b32.xlu1 %v3282_v62, %s6913_s29  ;;  %v1745_v52 = vmax.f32 %v1725_v12, 0.0  ;;  %v1717_v55 = vadd.f32 %v8469_v46, %v1716_v43  ;;  %v6624_v12 = vrot.slane %v3493_v36, 9 }
 0x242   :  { %v6818_v13 = vpop.f32.mrf.mxu1 }
 0x243   :  { %v6746_v32 = vpack.c.bf16 %v1745_v52, %v1745_v52  ;;  %v1743_v24 = vmax.f32 %v1717_v55, 0.0  ;;  %v1728_v35 = vadd.f32 %v8469_v46, %v6818_v13  ;;  %v3530_v52 = vsel %vm8095_vm3, %v6623_v10, %v3529_v22 }
 0x244   :  { %v1719_v42 = vpop.f32.mrf.mxu1  ;;  %3455 = vrot.lane.b32.xlu0 %v3356_v18, %s6916_s21  ;;  %v3648_v55 = vshrl.u32 %v8655_v17, 16  ;;  %v2112_v17 = vld [vmem:[#allocation3 + $0x94] sm:$0x1] }
 0x245   :  { %3457 = vrot.lane.b32.xlu1 %v3370_v20, %s6916_s21  ;;  %v2080_v44 = vshrl.u32 %v6746_v32, 16  ;;  %v2083_v15 = vshll.u32 %v6746_v32, 16  ;;  %v6744_v28 = vpack.c.bf16 %v1743_v24, %v1743_v24  ;;  %v1746_v60 = vmax.f32 %v1728_v35, 0.0  ;;  %v3635_v35 = vld [vmem:[#allocation3 + $0x70] sm:$0xf] }
 0x246   :  { %v1720_v62 = vadd.f32 %v8469_v46, %v1719_v42  ;;  %v8658_v63 = vpop.permute.xlu0 %2420  ;;  %v3662_v32 = vshrl.u32 %v3633_v16, 16  ;;  %v3665_v24 = vshll.u32 %v3633_v16, 16 }
 0x247   :  { %v8660_v57 = vpop.permute.xlu1 %2725  ;;  %v2082_v39 = vrot.slane %v2080_v44, 7  ;;  %v2041_v58 = vshrl.u32 %v6744_v28, 16  ;;  %v6747_v43 = vpack.c.bf16 %v1746_v60, %v1746_v60  ;;  %v2044_v49 = vshll.u32 %v6744_v28, 16  ;;  %v2109_v60 = vld [vmem:[#allocation3 + $0x90] sm:$0xf] }
 0x248   :  { %v1744_v46 = vmax.f32 %v1720_v62, 0.0  ;;  %3459 = vrot.lane.b32.xlu0 %v3384_v38, %s6916_s21  ;;  %v3534_v44 = vsel %vm8095_vm3, %v6624_v12, %v3533_v34  ;;  %v2070_v12 = vld [vmem:[#allocation3 + $0x80] sm:$0xf]  ;;  %v3664_v16 = vrot.slane %v3662_v32, 4  ;;  %v3584_v32 = vld [vmem:[#allocation3 + $0x68] sm:$0xf] }
 0x249   :  { %3461 = vrot.lane.b32.xlu1 %v3398_v9, %s6916_s21  ;;  %v2085_v18 = vor.u32 %v2083_v15, %v2082_v39  ;;  %v2086_v51 = vrot.slane %v2082_v39, 4  ;;  %v2043_v11 = vrot.slane %v2041_v58, 7  ;;  %v2099_v13 = vshrl.u32 %v6747_v43, 16  ;;  %v2073_v58 = vld [vmem:[#allocation3 + $0x84] sm:$0x1] }
 0x24a   :  { %v6745_v20 = vpack.c.bf16 %v1744_v46, %v1744_v46  ;;  %v8671_v6 = vpop.permute.xlu0 %2363  ;;  %v2102_v10 = vshll.u32 %v6747_v43, 16  ;;  %v3650_v43 = vrot.slane %v3648_v55, 4  ;;  %v3653_v9 = vrot.slane %v3651_v8, 5 }
 0x24b   :  { %v2266_v56 = vpop.permute.xlu1 %2265  ;;  %v2091_v5 = vsel %vm8170_vm8, %v2085_v18, %v2090_v45  ;;  %v2094_v36 = vsel %vm8175_vm9, %v2086_v51, %v2093_v14  ;;  %v2046_v37 = vor.u32 %v2044_v49, %v2043_v11  ;;  %v2047_v42 = vrot.slane %v2043_v11, 4  ;;  %v3632_v51 = vld [vmem:[#allocation3 + $0x64] sm:$0x1]  ;;  %v3634_v11 = vld [vmem:[#allocation3 + $0x6c] sm:$0x1] }
 0x24c   :  { %2287 = vst.msk [vmem:[#allocation2 + $0xc] sm:$0xf] %vm2283_vm5, %v2266_v56  ;;  %2092 = vst [vmem:[#allocation3 + $0x88] sm:$0xf] %v2091_v5  ;;  %v2101_v38 = vrot.slane %v2099_v13, 7  ;;  %v2060_v22 = vshrl.u32 %v6745_v20, 16  ;;  %3551 = vrot.lane.b32.xlu0 %v3522_v40, %s6920_s12 }
 0x24d   :  { %2095 = vst [vmem:[#allocation3 + $0x8c] sm:$0x1] %v2094_v36  ;;  %2387 = vst.msk [vmem:[#allocation2 + $0xc] sm:$0xf] %vm2383_vm10, %v8575_v50  ;;  %3553 = vrot.lane.b32.xlu1 %v3526_v7, %s6920_s12  ;;  %v2052_v15 = vsel %vm8170_vm8, %v2046_v37, %v2051_v47  ;;  %v2055_v28 = vsel %vm8175_vm9, %v2047_v42, %v2054_v0  ;;  %v3676_v45 = vshrl.u32 %v3635_v35, 16  ;;  %v3679_v50 = vshll.u32 %v3635_v35, 16 }
 0x24e   :  { %2436 = vst.msk [vmem:[#allocation2 + $0xc] sm:$0xf] %vm2432_vm11, %v8600_v41  ;;  %2053 = vst [vmem:[#allocation3 + $0x78] sm:$0xf] %v2052_v15  ;;  %v2104_v40 = vor.u32 %v2102_v10, %v2101_v38  ;;  %v2105_v62 = vrot.slane %v2101_v38, 4  ;;  %v2062_v7 = vrot.slane %v2060_v22, 7  ;;  %v8691_v34 = vpop.permute.xlu0 %2573 }
 0x24f   :  { %2056 = vst [vmem:[#allocation3 + $0x7c] sm:$0x1] %v2055_v28  ;;  %v2063_v39 = vshll.u32 %v6745_v20, 16  ;;  %v8693_v14 = vpop.permute.xlu1 %2668  ;;  %v3667_v49 = vrot.slane %v3665_v24, 5  ;;  %v3678_v55 = vrot.slane %v3676_v45, 4  ;;  %v3681_v0 = vrot.slane %v3679_v50, 5 }
 0x250   :  { %v2110_v41 = vsel %vm8170_vm8, %v2104_v40, %v2109_v60  ;;  %v2113_v47 = vsel %vm8175_vm9, %v2105_v62, %v2112_v17  ;;  %v2066_v18 = vrot.slane %v2062_v7, 4  ;;  %3555 = vrot.lane.b32.xlu0 %v3530_v52, %s6920_s12  ;;  %v3583_v52 = vld [vmem:[#allocation3 + $0x60] sm:$0xf]  ;;  %v3654_v24 = vor.u32 %v3653_v9, %v3650_v43  ;;  %v3031_v5 = vld [vmem:[#allocation3 + $0x70] sm:$0xf] }
 0x251   :  { %v2065_v46 = vor.u32 %v2063_v39, %v2062_v7  ;;  %3557 = vrot.lane.b32.xlu1 %v3534_v44, %s6920_s12  ;;  %2111 = vst [vmem:[#allocation3 + $0x90] sm:$0xf] %v2110_v41  ;;  %2114 = vst [vmem:[#allocation3 + $0x94] sm:$0x1] %v2113_v47  ;;  %v3668_v35 = vor.u32 %v3667_v49, %v3664_v16  ;;  %v3657_v36 = vshll.u32 %v3632_v51, 16  ;;  %v3671_v37 = vshll.u32 %v3634_v11, 16 }
 0x252   :  { %v2074_v20 = vsel %vm8175_vm9, %v2066_v18, %v2073_v58  ;;  %v8705_v56 = vpop.permute.xlu0 %2973  ;;  %v3585_v42 = vld [vmem:[#allocation3 + $0x70] sm:$0xf]  ;;  %v3636_v38 = vld [vmem:[#allocation3 + $0x74] sm:$0x1]  ;;  %v3682_v10 = vor.u32 %v3681_v0, %v3678_v55  ;;  %v3096_v45 = vshrl.u32 %v3031_v5, 16  ;;  %v3099_v50 = vshll.u32 %v3031_v5, 16 }
 0x253   :  { %v2071_v13 = vsel %vm8170_vm8, %v2065_v46, %v2070_v12  ;;  %v8707_v8 = vpop.permute.xlu1 %2878  ;;  %2075 = vst [vmem:[#allocation3 + $0x84] sm:$0x1] %v2074_v20  ;;  %v3655_v7 = vrot.slane %v3654_v24, 4  ;;  %v3669_v39 = vrot.slane %v3668_v35, 4  ;;  %v3685_v43 = vshll.u32 %v3636_v38, 16 }
 0x254   :  { %2072 = vst [vmem:[#allocation3 + $0x80] sm:$0xf] %v2071_v13  ;;  %3599 = vrot.lane.b32.xlu0 %v3583_v52, %s6917_s0  ;;  %v3791_v41 = vld [vmem:[#allocation3 + $0x60] sm:$0xe]  ;;  %v3659_v47 = vrot.slane %v3657_v36, 5  ;;  %v3673_v46 = vrot.slane %v3671_v37, 5 }
 0x255   :  { %3601 = vrot.lane.b32.xlu1 %v3584_v32, %s6917_s0  ;;  %v3637_v22 = vld [vmem:[#allocation3 + $0x78] sm:$0xf]  ;;  %v3792_v18 = vld [vmem:[#allocation3 + $0x64] sm:$0x1]  ;;  %v3793_v51 = vld [vmem:[#allocation3 + $0x68] sm:$0xe] }
 0x256   :  { %v3638_v44 = vld [vmem:[#allocation3 + $0x7c] sm:$0x1]  ;;  %v8711_v15 = vpop.permute.xlu0 %2416  ;;  %v3690_v60 = vshrl.u32 %v3637_v22, 16  ;;  %v3693_v17 = vshll.u32 %v3637_v22, 16  ;;  %v3033_v40 = vld [vmem:[#allocation3 + $0x78] sm:$0xf]  ;;  %v3660_v24 = vsel %vm7002_vm2, %v3655_v7, %v3659_v47  ;;  %v3674_v35 = vsel %vm7002_vm2, %v3669_v39, %v3673_v46 }
 0x257   :  { %v8713_v28 = vpop.permute.xlu1 %2721  ;;  %v3586_v62 = vld [vmem:[#allocation3 + $0x78] sm:$0xf]  ;;  %v3110_v12 = vshrl.u32 %v3033_v40, 16  ;;  %v3113_v58 = vshll.u32 %v3033_v40, 16  ;;  %v3699_v49 = vshll.u32 %v3638_v44, 16  ;;  %v3683_v0 = vrot.slane %v3682_v10, 4 }
 0x258   :  { %3603 = vrot.lane.b32.xlu0 %v3585_v42, %s6917_s0  ;;  %v3692_v9 = vrot.slane %v3690_v60, 4  ;;  %v3695_v16 = vrot.slane %v3693_v17, 5  ;;  %v3794_v20 = vld [vmem:[#allocation3 + $0x6c] sm:$0x1]  ;;  %v3098_v52 = vrot.slane %v3096_v45, 4  ;;  %v3101_v32 = vrot.slane %v3099_v50, 5 }
 0x259   :  { %3605 = vrot.lane.b32.xlu1 %v3586_v62, %s6917_s0  ;;  %v3112_v5 = vrot.slane %v3110_v12, 4  ;;  %v3115_v36 = vrot.slane %v3113_v58, 5  ;;  %v3037_v37 = vld [vmem:[#allocation3 + $0x88] sm:$0xf]  ;;  %v3687_v42 = vrot.slane %v3685_v43, 5  ;;  %v3701_v10 = vrot.slane %v3699_v49, 5 }
 0x25a   :  { %v2570_v11 = vpop.permute.xlu0 %2569  ;;  %v3696_v13 = vor.u32 %v3695_v16, %v3692_v9  ;;  %v6629_v44 = vrot.slane %v3791_v41, 9  ;;  %v3825_v60 = vrot.slane %v3792_v18, 5  ;;  %v6630_v17 = vrot.slane %v3793_v51, 9  ;;  %v3032_v50 = vld [vmem:[#allocation3 + $0x74] sm:$0x1] }
 0x25b   :  { %v2262_v55 = vpop.permute.xlu1 %2261  ;;  %2594 = vst.msk [vmem:[#allocation2] sm:$0xf] %vm2593_vm13, %v2570_v11  ;;  %v3035_v22 = vld [vmem:[#allocation3 + $0x80] sm:$0xf]  ;;  %v3829_v45 = vrot.slane %v3794_v20, 5  ;;  %v3688_v40 = vsel %vm7002_vm2, %v3683_v0, %v3687_v42  ;;  %v3102_v7 = vor.u32 %v3101_v32, %v3098_v52  ;;  %v3138_v39 = vshrl.u32 %v3037_v37, 16 }
 0x25c   :  { %2285 = vst.msk [vmem:[#allocation2 + $0x4] sm:$0xf] %vm2283_vm5, %v2262_v55  ;;  %3759 = vrot.lane.b32.xlu0 %v3660_v24, %s6918_s9  ;;  %v3697_v38 = vrot.slane %v3696_v13, 4  ;;  %v3116_v12 = vor.u32 %v3115_v36, %v3112_v5  ;;  %v3124_v58 = vshrl.u32 %v3035_v22, 16  ;;  %v3127_v43 = vshll.u32 %v3035_v22, 16 }
 0x25d   :  { %2691 = vst.msk [vmem:[#allocation2] sm:$0xf] %vm2690_vm14, %v8606_v3  ;;  %3761 = vrot.lane.b32.xlu1 %v3674_v35, %s6918_s9  ;;  %v3141_v9 = vshll.u32 %v3037_v37, 16  ;;  %v3826_v47 = vsel %vm8095_vm3, %v6629_v44, %v3825_v60  ;;  %v3830_v46 = vsel %vm8095_vm3, %v6630_v17, %v3829_v45  ;;  %v3103_v18 = vrot.slane %v3102_v7, 4  ;;  %v3795_v51 = vld [vmem:[#allocation3 + $0x70] sm:$0xe] }
 0x25e   :  { %2385 = vst.msk [vmem:[#allocation2 + $0x4] sm:$0xf] %vm2383_vm10, %v8616_v26  ;;  %v8733_v3 = vpop.permute.xlu0 %2678  ;;  %v3702_v62 = vsel %vm7002_vm2, %v3697_v38, %v3701_v10  ;;  %v3796_v11 = vld [vmem:[#allocation3 + $0x74] sm:$0x1]  ;;  %v3140_v55 = vrot.slane %v3138_v39, 4  ;;  %v3117_v0 = vrot.slane %v3116_v12, 4 }
 0x25f   :  { %2434 = vst.msk [vmem:[#allocation2 + $0x4] sm:$0xf] %vm2432_vm11, %v8626_v25  ;;  %v8735_v26 = vpop.permute.xlu1 %2373  ;;  %v3034_v25 = vld [vmem:[#allocation3 + $0x7c] sm:$0x1]  ;;  %v3797_v13 = vld [vmem:[#allocation3 + $0x78] sm:$0xe] }
 0x260   :  { %2740 = vst.msk [vmem:[#allocation2] sm:$0xf] %vm2739_vm15, %v8618_v19  ;;  %3763 = vrot.lane.b32.xlu0 %v3688_v40, %s6918_s9  ;;  %v3105_v19 = vshll.u32 %v3032_v50, 16  ;;  %v3119_v16 = vshll.u32 %v3034_v25, 16  ;;  %v3126_v20 = vrot.slane %v3124_v58, 4  ;;  %v3129_v52 = vrot.slane %v3127_v43, 5 }
 0x261   :  { %3765 = vrot.lane.b32.xlu1 %v3702_v62, %s6918_s9  ;;  %v3143_v32 = vrot.slane %v3141_v9, 5  ;;  %v3798_v35 = vld [vmem:[#allocation3 + $0x7c] sm:$0x1]  ;;  %v6631_v36 = vrot.slane %v3795_v51, 9  ;;  %v3833_v10 = vrot.slane %v3796_v11, 5  ;;  %v6632_v22 = vrot.slane %v3797_v13, 9 }
 0x262   :  { %v8743_v49 = vpop.permute.xlu0 %2727  ;;  %v3107_v24 = vrot.slane %v3105_v19, 5  ;;  %v3121_v5 = vrot.slane %v3119_v16, 5  ;;  %v3036_v44 = vld [vmem:[#allocation3 + $0x84] sm:$0x1]  ;;  %v3038_v60 = vld [vmem:[#allocation3 + $0x8c] sm:$0x1]  ;;  %v3130_v50 = vor.u32 %v3129_v52, %v3126_v20 }
 0x263   :  { %v8745_v41 = vpop.permute.xlu1 %2983  ;;  %v3837_v45 = vrot.slane %v3798_v35, 5  ;;  %v3144_v40 = vor.u32 %v3143_v32, %v3140_v55  ;;  %v3133_v62 = vshll.u32 %v3036_v44, 16  ;;  %v3147_v7 = vshll.u32 %v3038_v60, 16  ;;  %v3191_v19 = vld [vmem:[#allocation3 + $0x70] sm:$0xe] }
 0x264   :  { %3855 = vrot.lane.b32.xlu0 %v3826_v47, %s6919_s17  ;;  %v3108_v38 = vsel %vm7002_vm2, %v3103_v18, %v3107_v24  ;;  %v3122_v17 = vsel %vm7002_vm2, %v3117_v0, %v3121_v5  ;;  %v3834_v12 = vsel %vm8095_vm3, %v6631_v36, %v3833_v10  ;;  %v3131_v43 = vrot.slane %v3130_v50, 4  ;;  %v3192_v16 = vld [vmem:[#allocation3 + $0x74] sm:$0x1]  ;;  %v3193_v47 = vld [vmem:[#allocation3 + $0x78] sm:$0xe] }
 0x265   :  { %3857 = vrot.lane.b32.xlu1 %v3830_v46, %s6919_s17  ;;  %v3838_v58 = vsel %vm8095_vm3, %v6632_v22, %v3837_v45  ;;  %v3145_v9 = vrot.slane %v3144_v40, 4  ;;  %v3194_v46 = vld [vmem:[#allocation3 + $0x7c] sm:$0x1]  ;;  %v3135_v18 = vrot.slane %v3133_v62, 5  ;;  %v3149_v51 = vrot.slane %v3147_v7, 5 }
 0x266   :  { %v8753_v37 = vpop.permute.xlu0 %2880  ;;  %v6617_v55 = vrot.slane %v3191_v19, 9  ;;  %v3335_v0 = vld [vmem:[#allocation3 + $0x78] sm:$0xf]  ;;  %v6618_v52 = vrot.slane %v3193_v47, 9  ;;  %v3197_v32 = vld [vmem:[#allocation3 + $0x88] sm:$0xe] }
 0x267   :  { %v8755_v42 = vpop.permute.xlu1 %2422  ;;  %v3136_v13 = vsel %vm7002_vm2, %v3131_v43, %v3135_v18  ;;  %v3150_v20 = vsel %vm7002_vm2, %v3145_v9, %v3149_v51  ;;  %v3337_v24 = vld [vmem:[#allocation3 + $0x80] sm:$0xf]  ;;  %v3196_v35 = vld [vmem:[#allocation3 + $0x84] sm:$0x1]  ;;  %v3198_v5 = vld [vmem:[#allocation3 + $0x8c] sm:$0x1] }
 0x268   :  { %3159 = vrot.lane.b32.xlu0 %v3108_v38, %s6909_s26  ;;  %v3400_v36 = vshrl.u32 %v3335_v0, 16  ;;  %v3403_v38 = vshll.u32 %v3335_v0, 16  ;;  %v6620_v60 = vrot.slane %v3197_v32, 9  ;;  %v3417_v45 = vshll.u32 %v3337_v24, 16  ;;  %v3012_v0 = vld [vmem:[#allocation3 + $0x78] sm:$0xf] }
 0x269   :  { %3161 = vrot.lane.b32.xlu1 %v3122_v17, %s6909_s26  ;;  %v3414_v17 = vshrl.u32 %v3337_v24, 16  ;;  %v3241_v62 = vrot.slane %v3196_v35, 5  ;;  %v3245_v7 = vrot.slane %v3198_v5, 5  ;;  %3020 = vst.msk [vmem:[#allocation2 + $0x34] sm:$0xf] %vm1747_vm4, %v3012_v0 }
 0x26a   :  { %v2268_v25 = vpop.permute.xlu0 %2267  ;;  %v3336_v32 = vld [vmem:[#allocation3 + $0x7c] sm:$0x1] }
 0x26b   :  { %v2576_v39 = vpop.permute.xlu1 %2575  ;;  %2288 = vst.msk [vmem:[#allocation2 + $0x10] sm:$0xf] %vm2283_vm5, %v2268_v25  ;;  %v3339_v25 = vld [vmem:[#allocation3 + $0x88] sm:$0xf]  ;;  %v3416_v19 = vrot.slane %v3414_v17, 4  ;;  %v3246_v51 = vsel %vm8095_vm3, %v6620_v60, %v3245_v7 }
 0x26c   :  { %2597 = vst.msk [vmem:[#allocation2 + $0xc] sm:$0xf] %vm2593_vm13, %v2576_v39  ;;  %3859 = vrot.lane.b32.xlu0 %v3834_v12, %s6919_s17  ;;  %v3341_v39 = vld [vmem:[#allocation3 + $0x90] sm:$0xf]  ;;  %v3402_v12 = vrot.slane %v3400_v36, 4  ;;  %v3428_v47 = vshrl.u32 %v3339_v25, 16 }
 0x26d   :  { %2388 = vst.msk [vmem:[#allocation2 + $0x10] sm:$0xf] %vm2383_vm10, %v8644_v61  ;;  %3861 = vrot.lane.b32.xlu1 %v3838_v58, %s6919_s17  ;;  %v3405_v58 = vrot.slane %v3403_v38, 5  ;;  %v3340_v60 = vld [vmem:[#allocation3 + $0x8c] sm:$0x1] }
 0x26e   :  { %2694 = vst.msk [vmem:[#allocation2 + $0xc] sm:$0xf] %vm2690_vm14, %v8639_v33  ;;  %v8779_v11 = vpop.permute.xlu0 %2674  ;;  %v3233_v33 = vrot.slane %v3192_v16, 5  ;;  %v3419_v16 = vrot.slane %v3417_v45, 5  ;;  %v3430_v5 = vrot.slane %v3428_v47, 4 }
 0x26f   :  { %2437 = vst.msk [vmem:[#allocation2 + $0x10] sm:$0xf] %vm2432_vm11, %v8711_v15  ;;  %v8781_v61 = vpop.permute.xlu1 %2979  ;;  %v3237_v15 = vrot.slane %v3194_v46, 5  ;;  %v3431_v46 = vshll.u32 %v3339_v25, 16  ;;  %v3406_v24 = vor.u32 %v3405_v58, %v3402_v12  ;;  %v3286_v17 = vld [vmem:[#allocation3 + $0x90] sm:$0xf] }
 0x270   :  { %2743 = vst.msk [vmem:[#allocation2 + $0xc] sm:$0xf] %vm2739_vm15, %v8713_v28  ;;  %3163 = vrot.lane.b32.xlu0 %v3136_v13, %s6909_s26  ;;  %v3195_v28 = vld [vmem:[#allocation3 + $0x80] sm:$0xe]  ;;  %v3234_v44 = vsel %vm8095_vm3, %v6617_v55, %v3233_v33  ;;  %v3442_v55 = vshrl.u32 %v3341_v39, 16  ;;  %v3445_v33 = vshll.u32 %v3341_v39, 16  ;;  %v3420_v35 = vor.u32 %v3419_v16, %v3416_v19 }
 0x271   :  { %3165 = vrot.lane.b32.xlu1 %v3150_v20, %s6909_s26  ;;  %v3238_v50 = vsel %vm8095_vm3, %v6618_v52, %v3237_v15  ;;  %v6619_v40 = vrot.slane %v3195_v28, 9  ;;  %v3013_v13 = vld [vmem:[#allocation3 + $0x80] sm:$0xf]  ;;  %v3014_v20 = vld [vmem:[#allocation3 + $0x88] sm:$0xf]  ;;  %v3433_v36 = vrot.slane %v3431_v46, 5 }
 0x272   :  { %v8789_v10 = vpop.permute.xlu0 %2723  ;;  %3021 = vst.msk [vmem:[#allocation2 + $0x38] sm:$0xf] %vm1747_vm4, %v3013_v13  ;;  %3022 = vst.msk [vmem:[#allocation2 + $0x3c] sm:$0xf] %vm1747_vm4, %v3014_v20  ;;  %v3283_v15 = vld [vmem:[#allocation3 + $0x78] sm:$0xf] }
 0x273   :  { %v8791_v22 = vpop.permute.xlu1 %2369  ;;  %v3242_v18 = vsel %vm8095_vm3, %v6619_v40, %v3241_v62  ;;  %v3338_v28 = vld [vmem:[#allocation3 + $0x84] sm:$0x1]  ;;  %v3444_v38 = vrot.slane %v3442_v55, 4  ;;  %v3421_v45 = vrot.slane %v3420_v35, 4  ;;  %v3495_v12 = vld [vmem:[#allocation3 + $0x78] sm:$0xe] }
 0x274   :  { %3255 = vrot.lane.b32.xlu0 %v3234_v44, %s6911_s13  ;;  %v3447_v44 = vrot.slane %v3445_v33, 5  ;;  %v3496_v58 = vld [vmem:[#allocation3 + $0x7c] sm:$0x1]  ;;  %v3498_v46 = vld [vmem:[#allocation3 + $0x84] sm:$0x1]  ;;  %v6625_v55 = vrot.slane %v3495_v12, 9 }
 0x275   :  { %3257 = vrot.lane.b32.xlu1 %v3238_v50, %s6911_s13  ;;  %v3434_v50 = vor.u32 %v3433_v36, %v3430_v5  ;;  %v3537_v33 = vrot.slane %v3496_v58, 5  ;;  %v3499_v13 = vld [vmem:[#allocation3 + $0x88] sm:$0xe]  ;;  %v3639_v35 = vld [vmem:[#allocation3 + $0x80] sm:$0xf] }
 0x276   :  { %v2264_v43 = vpop.permute.xlu0 %2263  ;;  %v3448_v40 = vor.u32 %v3447_v44, %v3444_v38  ;;  %v6627_v5 = vrot.slane %v3499_v13, 9  ;;  %v3642_v13 = vld [vmem:[#allocation3 + $0x8c] sm:$0x1] }
 0x277   :  { %v8799_v9 = vpop.permute.xlu1 %2418  ;;  %2286 = vst.msk [vmem:[#allocation2 + $0x8] sm:$0xf] %vm2283_vm5, %v2264_v43  ;;  %v3435_v16 = vrot.slane %v3434_v50, 4 }
 0x278   :  { %2386 = vst.msk [vmem:[#allocation2 + $0x8] sm:$0xf] %vm2383_vm10, %v8671_v6  ;;  %3259 = vrot.lane.b32.xlu0 %v3242_v18, %s6911_s13  ;;  %v3449_v47 = vrot.slane %v3448_v40, 4  ;;  %v3643_v40 = vld [vmem:[#allocation3 + $0x90] sm:$0xf] }
 0x279   :  { %3261 = vrot.lane.b32.xlu1 %v3246_v51, %s6911_s13  ;;  %2435 = vst.msk [vmem:[#allocation2 + $0x8] sm:$0xf] %vm2432_vm11, %v8472_v48  ;;  %v3284_v48 = vld [vmem:[#allocation3 + $0x80] sm:$0xf] }
 0x27a   :  { %2596 = vst.msk [vmem:[#allocation2 + $0x8] sm:$0xf] %vm2593_vm13, %v8691_v34  ;;  %v2877_v52 = vpop.permute.xlu0 %2876  ;;  %v3423_v34 = vshll.u32 %v3338_v28, 16  ;;  %v3501_v28 = vld [vmem:[#allocation3 + $0x90] sm:$0xe] }
 0x27b   :  { %v2572_v6 = vpop.permute.xlu1 %2571  ;;  %2693 = vst.msk [vmem:[#allocation2 + $0x8] sm:$0xf] %vm2690_vm14, %v8580_v59  ;;  %v3409_v59 = vshll.u32 %v3336_v32, 16 }
 0x27c   :  { %2901 = vst.msk [vmem:[#allocation2] sm:$0xf] %vm2900_vm0, %v2877_v52  ;;  %3303 = vrot.lane.b32.xlu0 %v3283_v15, %s6913_s29  ;;  %v3425_v62 = vrot.slane %v3423_v34, 5  ;;  %v3500_v15 = vld [vmem:[#allocation3 + $0x8c] sm:$0x1] }
 0x27d   :  { %2595 = vst.msk [vmem:[#allocation2 + $0x4] sm:$0xf] %vm2593_vm13, %v2572_v6  ;;  %3305 = vrot.lane.b32.xlu1 %v3284_v48, %s6913_s29  ;;  %v3641_v48 = vld [vmem:[#allocation3 + $0x88] sm:$0xf]  ;;  %v3545_v36 = vrot.slane %v3500_v15, 5 }
 0x27e   :  { %2742 = vst.msk [vmem:[#allocation2 + $0x8] sm:$0xf] %vm2739_vm15, %v8594_v1  ;;  %v8837_v1 = vpop.permute.xlu0 %2985  ;;  %v3426_v19 = vsel %vm7002_vm2, %v3421_v45, %v3425_v62  ;;  %v3718_v45 = vshrl.u32 %v3641_v48, 16  ;;  %v3721_v50 = vshll.u32 %v3641_v48, 16 }
 0x27f   :  { %2998 = vst.msk [vmem:[#allocation2] sm:$0xf] %vm2997_vm1, %v8705_v56  ;;  %v3342_v56 = vld [vmem:[#allocation3 + $0x94] sm:$0x1] }
 0x280   :  { %2692 = vst.msk [vmem:[#allocation2 + $0x4] sm:$0xf] %vm2690_vm14, %v8693_v14  ;;  %v8839_v14 = vpop.permute.xlu1 %2680  ;;  %v3451_v7 = vshll.u32 %v3342_v56, 16  ;;  %v3707_v56 = vshll.u32 %v3639_v35, 16 }
 0x281   :  { %2903 = vst.msk [vmem:[#allocation2 + $0x8] sm:$0xf] %vm2900_vm0, %v8753_v37  ;;  %v3285_v37 = vld [vmem:[#allocation3 + $0x88] sm:$0xf]  ;;  %3309 = vrot.lane.b32.xlu1 %v3286_v17, %s6913_s29  ;;  %v3538_v17 = vsel %vm8095_vm3, %v6625_v55, %v3537_v33 }
 0x282   :  { %2741 = vst.msk [vmem:[#allocation2 + $0x4] sm:$0xf] %vm2739_vm15, %v8562_v31  ;;  %v3407_v31 = vrot.slane %v3406_v24, 4  ;;  %3307 = vrot.lane.b32.xlu0 %v3285_v37, %s6913_s29  ;;  %v8845_v25 = vpop.permute.xlu0 %2371  ;;  %v3453_v51 = vrot.slane %v3451_v7, 5  ;;  %v3645_v37 = vld [vmem:[#allocation3 + $0x98] sm:$0xf] }
 0x283   :  { %3000 = vst.msk [vmem:[#allocation2 + $0x8] sm:$0xf] %vm2997_vm1, %v8629_v21  ;;  %v3437_v21 = vshll.u32 %v3340_v60, 16  ;;  %v3704_v60 = vshrl.u32 %v3639_v35, 16 }
 0x284   :  { %2902 = vst.msk [vmem:[#allocation2 + $0x4] sm:$0xf] %vm2900_vm0, %v8707_v8  ;;  %v3411_v8 = vrot.slane %v3409_v59, 5  ;;  %v2274_v39 = vpop.permute.xlu1 %2273  ;;  %v3454_v24 = vsel %vm7002_vm2, %v3449_v47, %v3453_v51  ;;  %v6628_v59 = vrot.slane %v3501_v28, 9  ;;  %v3735_v47 = vshll.u32 %v3643_v40, 16 }
 0x285   :  { %2999 = vst.msk [vmem:[#allocation2 + $0x4] sm:$0xf] %vm2997_vm1, %v8590_v53  ;;  %v3497_v53 = vld [vmem:[#allocation3 + $0x80] sm:$0xe]  ;;  %3465 = vrot.lane.b32.xlu1 %v3426_v19, %s6916_s21  ;;  %v3439_v18 = vrot.slane %v3437_v21, 5  ;;  %v3746_v21 = vshrl.u32 %v3645_v37, 16 }
 0x286   :  { %2291 = vst.msk [vmem:[#allocation2 + $0x1c] sm:$0xf] %vm2283_vm5, %v2274_v39  ;;  %v3412_v43 = vsel %vm7002_vm2, %v3407_v31, %v3411_v8  ;;  %v6626_v0 = vrot.slane %v3497_v53, 9  ;;  %v8858_v20 = vpop.permute.xlu0 %2581  ;;  %v3749_v8 = vshll.u32 %v3645_v37, 16  ;;  %v3546_v39 = vsel %vm8095_vm3, %v6627_v5, %v3545_v36  ;;  %v3644_v36 = vld [vmem:[#allocation3 + $0x94] sm:$0x1] }
 0x287   :  { %2391 = vst.msk [vmem:[#allocation2 + $0x1c] sm:$0xf] %vm2383_vm10, %v8735_v26  ;;  %3463 = vrot.lane.b32.xlu0 %v3412_v43, %s6916_s21  ;;  %v3541_v26 = vrot.slane %v3498_v46, 5  ;;  %v3440_v32 = vsel %vm7002_vm2, %v3435_v16, %v3439_v18  ;;  %v3706_v58 = vrot.slane %v3704_v60, 4  ;;  %v3709_v53 = vrot.slane %v3707_v56, 5 }
 0x288   :  { %2440 = vst.msk [vmem:[#allocation2 + $0x1c] sm:$0xf] %vm2432_vm11, %v8755_v42  ;;  %v8860_v52 = vpop.permute.xlu1 %2676  ;;  %v3502_v42 = vld [vmem:[#allocation3 + $0x94] sm:$0x1]  ;;  %v3720_v43 = vrot.slane %v3718_v45, 4  ;;  %v3723_v19 = vrot.slane %v3721_v50, 5 }
 0x289   :  { %3469 = vrot.lane.b32.xlu1 %v3454_v24, %s6916_s21  ;;  %v3549_v34 = vrot.slane %v3502_v42, 5  ;;  %v3542_v31 = vsel %vm8095_vm3, %v6626_v0, %v3541_v26  ;;  %v3732_v16 = vshrl.u32 %v3643_v40, 16  ;;  %v3646_v46 = vld [vmem:[#allocation3 + $0x9c] sm:$0x1]  ;;  %v3748_v18 = vrot.slane %v3746_v21, 4 }
 0x28a   :  { %v8869_v38 = vpop.permute.xlu0 %2981  ;;  %v3751_v51 = vrot.slane %v3749_v8, 5  ;;  %v3640_v0 = vld [vmem:[#allocation3 + $0x84] sm:$0x1]  ;;  %v3710_v26 = vor.u32 %v3709_v53, %v3706_v58  ;;  %v3590_v24 = vld [vmem:[#allocation3 + $0x98] sm:$0xf]  ;;  %v3727_v42 = vshll.u32 %v3642_v13, 16 }
 0x28b   :  { %3467 = vrot.lane.b32.xlu0 %v3440_v32, %s6916_s21  ;;  %v3550_v12 = vsel %vm8095_vm3, %v6628_v59, %v3549_v34  ;;  %v3734_v15 = vrot.slane %v3732_v16, 4  ;;  %v3737_v32 = vrot.slane %v3735_v47, 5  ;;  %v3713_v28 = vshll.u32 %v3640_v0, 16  ;;  %v3802_v50 = vld [vmem:[#allocation3 + $0x8c] sm:$0x1] }
 0x28c   :  { %v6887_v6 = vld [vmem:[#allocation2] sm:$0xff]   ;;  %v8871_v44 = vpop.permute.xlu1 %2886  ;;  %v3752_v35 = vor.u32 %v3751_v51, %v3748_v18  ;;  %v3711_v34 = vrot.slane %v3710_v26, 4  ;;  %v3805_v8 = vld [vmem:[#allocation3 + $0x98] sm:$0xe] }
 0x28d   :  { %6829 = vmatprep.mubr.msk.bf16.mxu1 %vm3986_vm6, %v6887_v6  ;;  %3561 = vrot.lane.b32.xlu1 %v3542_v31, %s6920_s12  ;;  %v3588_v6 = vld [vmem:[#allocation3 + $0x88] sm:$0xf]  ;;  %v3738_v56 = vor.u32 %v3737_v32, %v3734_v15  ;;  %v3715_v37 = vrot.slane %v3713_v28, 5  ;;  %v3741_v31 = vshll.u32 %v3644_v36, 16  ;;  %v6636_v58 = vrot.slane %v3805_v8, 9 }
 0x28e   :  { %v2578_v62 = vpop.permute.xlu0 %2577  ;;  %v3753_v45 = vrot.slane %v3752_v35, 4 }
 0x28f   :  { %3559 = vrot.lane.b32.xlu0 %v3538_v17, %s6920_s12  ;;  %2598 = vst.msk [vmem:[#allocation2 + $0x10] sm:$0xf] %vm2593_vm13, %v2578_v62  ;;  %v3729_v17 = vrot.slane %v3727_v42, 5  ;;  %v3743_v40 = vrot.slane %v3741_v31, 5  ;;  %v3806_v62 = vld [vmem:[#allocation3 + $0x9c] sm:$0x1] }
 0x290   :  { %v2883_v7 = vpop.permute.xlu1 %2882  ;;  %2695 = vst.msk [vmem:[#allocation2 + $0x10] sm:$0xf] %vm2690_vm14, %v8779_v11  ;;  %v3587_v11 = vld [vmem:[#allocation3 + $0x80] sm:$0xf]  ;;  %v3853_v53 = vrot.slane %v3806_v62, 5 }
 0x291   :  { %2904 = vst.msk [vmem:[#allocation2 + $0xc] sm:$0xf] %vm2900_vm0, %v2883_v7  ;;  %3565 = vrot.lane.b32.xlu1 %v3550_v12, %s6920_s12  ;;  %v3804_v12 = vld [vmem:[#allocation3 + $0x94] sm:$0x1] }
 0x292   :  { %3001 = vst.msk [vmem:[#allocation2 + $0xc] sm:$0xf] %vm2997_vm1, %v8781_v61  ;;  %v2889_v55 = vpop.permute.xlu0 %2888  ;;  %v3724_v61 = vor.u32 %v3723_v19, %v3720_v43  ;;  %v3854_v18 = vsel %vm8095_vm3, %v6636_v58, %v3853_v53  ;;  %v6007_v58 = vld [vmem:[#allocation4 + $0x98] sm:$0xf]  ;;  %v6008_v53 = vld [vmem:[#allocation4 + $0x9c] sm:$0x1] }
 0x293   :  { %3563 = vrot.lane.b32.xlu0 %v3546_v39, %s6920_s12  ;;  %2744 = vst.msk [vmem:[#allocation2 + $0x10] sm:$0xf] %vm2739_vm15, %v8789_v10  ;;  %v3755_v10 = vshll.u32 %v3646_v46, 16  ;;  %v3845_v39 = vrot.slane %v3802_v50, 5  ;;  %v3849_v46 = vrot.slane %v3804_v12, 5 }
 0x294   :  { %v2270_v33 = vpop.permute.xlu1 %2269  ;;  %v3725_v60 = vrot.slane %v3724_v61, 4 }
 0x295   :  { %2289 = vst.msk [vmem:[#allocation2 + $0x14] sm:$0xf] %vm2283_vm5, %v2270_v33  ;;  %3609 = vrot.lane.b32.xlu1 %v3588_v6, %s6917_s0 }
 0x296   :  { %2389 = vst.msk [vmem:[#allocation2 + $0x14] sm:$0xf] %vm2383_vm10, %v8791_v22  ;;  %v2272_v48 = vpop.permute.xlu0 %2271  ;;  %v3589_v22 = vld [vmem:[#allocation3 + $0x90] sm:$0xf] }
 0x297   :  { %3607 = vrot.lane.b32.xlu0 %v3587_v11, %s6917_s0  ;;  %2438 = vst.msk [vmem:[#allocation2 + $0x14] sm:$0xf] %vm2432_vm11, %v8799_v9  ;;  %v3757_v9 = vrot.slane %v3755_v10, 5 }
 0x298   :  { %v2584_v5 = vpop.permute.xlu1 %2583  ;;  %2290 = vst.msk [vmem:[#allocation2 + $0x18] sm:$0xf] %vm2283_vm5, %v2272_v48 }
 0x299   :  { %v3890_v59 = vld [vmem:[#allocation2 + $0x8] sm:$0xff]   ;;  %2601 = vst.msk [vmem:[#allocation2 + $0x1c] sm:$0xf] %vm2593_vm13, %v2584_v5  ;;  %3613 = vrot.lane.b32.xlu1 %v3590_v24, %s6917_s0 }
 0x29a   :  { %2390 = vst.msk [vmem:[#allocation2 + $0x18] sm:$0xf] %vm2383_vm10, %v8845_v25  ;;  %6830 = vmatmul.mubr.msk.bf16.vlgmr.msra.gmra.mxu1 %vm3986_vm6, %v3890_v59 }
 0x29b   :  { %2698 = vst.msk [vmem:[#allocation2 + $0x1c] sm:$0xf] %vm2690_vm14, %v8839_v14  ;;  %3611 = vrot.lane.b32.xlu0 %v3589_v22, %s6917_s0  ;;  %v2885_v14 = vpop.permute.xlu0 %2884 }
 0x29c   :  { %2439 = vst.msk [vmem:[#allocation2 + $0x18] sm:$0xf] %vm2432_vm11, %v8658_v63  ;;  %v2580_v25 = vpop.permute.xlu1 %2579  ;;  %v3739_v63 = vrot.slane %v3738_v56, 4 }
 0x29d   :  { %2747 = vst.msk [vmem:[#allocation2 + $0x1c] sm:$0xf] %vm2739_vm15, %v8480_v54  ;;  %v3716_v54 = vsel %vm7002_vm2, %v3711_v34, %v3715_v37 }
 0x29e   :  { %2600 = vst.msk [vmem:[#allocation2 + $0x18] sm:$0xf] %vm2593_vm13, %v8858_v20  ;;  %2599 = vst.msk [vmem:[#allocation2 + $0x14] sm:$0xf] %vm2593_vm13, %v2580_v25  ;;  %v3799_v20 = vld [vmem:[#allocation3 + $0x80] sm:$0xe] }
 0x29f   :  { %2908 = vst.msk [vmem:[#allocation2 + $0x1c] sm:$0xf] %vm2900_vm0, %v8504_v29  ;;  %2905 = vst.msk [vmem:[#allocation2 + $0x10] sm:$0xf] %vm2900_vm0, %v2885_v14  ;;  %v3730_v29 = vsel %vm7002_vm2, %v3725_v60, %v3729_v17  ;;  %3767 = vrot.lane.b32.xlu0 %v3716_v54, %s6918_s9  ;;  %v6633_v21 = vrot.slane %v3799_v20, 9 }
 0x2a0   :  { %2697 = vst.msk [vmem:[#allocation2 + $0x18] sm:$0xf] %vm2690_vm14, %v8733_v3  ;;  %2696 = vst.msk [vmem:[#allocation2 + $0x14] sm:$0xf] %vm2690_vm14, %v8860_v52  ;;  %3769 = vrot.lane.b32.xlu1 %v3730_v29, %s6918_s9  ;;  %v3801_v3 = vld [vmem:[#allocation3 + $0x88] sm:$0xe]  ;;  %v3152_v52 = vpop.permute.xlu0 %3151 }
 0x2a1   :  { %3005 = vst.msk [vmem:[#allocation2 + $0x1c] sm:$0xf] %vm2997_vm1, %v8530_v4  ;;  %3002 = vst.msk [vmem:[#allocation2 + $0x10] sm:$0xf] %vm2997_vm1, %v8869_v38  ;;  %v3800_v4 = vld [vmem:[#allocation3 + $0x84] sm:$0x1]  ;;  %v3154_v38 = vpop.permute.xlu1 %3153 }
 0x2a2   :  { %2746 = vst.msk [vmem:[#allocation2 + $0x18] sm:$0xf] %vm2739_vm15, %v8743_v49  ;;  %2745 = vst.msk [vmem:[#allocation2 + $0x14] sm:$0xf] %vm2739_vm15, %v8660_v57  ;;  %v3758_v49 = vsel %vm7002_vm2, %v3753_v45, %v3757_v9  ;;  %v3744_v57 = vsel %vm7002_vm2, %v3739_v63, %v3743_v40  ;;  %v3841_v7 = vrot.slane %v3800_v4, 5 }
 0x2a3   :  { %2907 = vst.msk [vmem:[#allocation2 + $0x18] sm:$0xf] %vm2900_vm0, %v2889_v55  ;;  %2906 = vst.msk [vmem:[#allocation2 + $0x14] sm:$0xf] %vm2900_vm0, %v8871_v44  ;;  %3771 = vrot.lane.b32.xlu0 %v3744_v57, %s6918_s9  ;;  %v3803_v44 = vld [vmem:[#allocation3 + $0x90] sm:$0xe] }
 0x2a4   :  { %3004 = vst.msk [vmem:[#allocation2 + $0x18] sm:$0xf] %vm2997_vm1, %v8837_v1  ;;  %3003 = vst.msk [vmem:[#allocation2 + $0x14] sm:$0xf] %vm2997_vm1, %v8745_v41  ;;  %v6634_v1 = vrot.slane %v3801_v3, 9  ;;  %3773 = vrot.lane.b32.xlu1 %v3758_v49, %s6918_s9  ;;  %v3156_v43 = vpop.permute.xlu0 %3155  ;;  %v3842_v19 = vsel %vm8095_vm3, %v6633_v21, %v3841_v7  ;;  %v6635_v47 = vrot.slane %v3803_v44, 9 }
 0x2a5   :  { %3175 = vst.msk [vmem:[#allocation2 + $0x20] sm:$0xf] %vm2283_vm5, %v3152_v52  ;;  %3176 = vst.msk [vmem:[#allocation2 + $0x24] sm:$0xf] %vm2283_vm5, %v3154_v38  ;;  %v3158_v41 = vpop.permute.xlu1 %3157  ;;  %v5369_v54 = vld [vmem:[#allocation4 + $0x50] sm:$0xf] }
 0x2a6   :  { %3177 = vst.msk [vmem:[#allocation2 + $0x28] sm:$0xf] %vm2283_vm5, %v3156_v43  ;;  %3178 = vst.msk [vmem:[#allocation2 + $0x2c] sm:$0xf] %vm2283_vm5, %v3158_v41  ;;  %v3846_v16 = vsel %vm8095_vm3, %v6634_v1, %v3845_v39  ;;  %v3850_v0 = vsel %vm8095_vm3, %v6635_v47, %v3849_v46  ;;  %v5952_v7 = vld [vmem:[#allocation4 + $0x98] sm:$0xf] }
 0x2a7   :  { %3863 = vrot.lane.b32.xlu0 %v3842_v19, %s6919_s17  ;;  %v6108_v43 = vshrl.u32 %v6007_v58, 16  ;;  %v6111_v41 = vshll.u32 %v6007_v58, 16  ;;  %v6117_v19 = vshll.u32 %v6008_v53, 16 }
 0x2a8   :  { %3865 = vrot.lane.b32.xlu1 %v3846_v16, %s6919_s17  ;;  %v3248_v51 = vpop.permute.xlu0 %3247 }
 0x2a9   :  { %v3250_v55 = vpop.permute.xlu1 %3249  ;;  %3271 = vst.msk [vmem:[#allocation2 + $0x20] sm:$0xf] %vm2383_vm10, %v3248_v51  ;;  %v6110_v46 = vrot.slane %v6108_v43, 4 }
 0x2aa   :  { %3272 = vst.msk [vmem:[#allocation2 + $0x24] sm:$0xf] %vm2383_vm10, %v3250_v55  ;;  %v6119_v55 = vrot.slane %v6117_v19, 5 }
 0x2ab   :  { %v6892_v33 = vld [vmem:[#allocation2 + $0x10] sm:$0xff]   ;;  %3867 = vrot.lane.b32.xlu0 %v3850_v0, %s6919_s17  ;;  %v6893_v13 = vld [vmem:[#allocation2 + $0x18] sm:$0xff]  }
 0x2ac   :  { %3869 = vrot.lane.b32.xlu1 %v3854_v18, %s6919_s17  ;;  %6833 = vmatprep.mubr.msk.bf16.mxu1 %vm3986_vm6, %v6892_v33  ;;  %v3252_v11 = vpop.permute.xlu0 %3251  ;;  %v6113_v18 = vrot.slane %v6111_v41, 5  ;;  %v5385_v33 = vld [vmem:[#allocation4 + $0x50] sm:$0xf]  ;;  %v5386_v0 = vld [vmem:[#allocation4 + $0x54] sm:$0x1] }
 0x2ad   :  { %v3254_v6 = vpop.permute.xlu1 %3253  ;;  %6834 = vmatmul.mubr.msk.bf16.gmra.mxu1 %vm3986_vm6, %v6893_v13  ;;  %3273 = vst.msk [vmem:[#allocation2 + $0x28] sm:$0xf] %vm2383_vm10, %v3252_v11 }
 0x2ae   :  { %3274 = vst.msk [vmem:[#allocation2 + $0x2c] sm:$0xf] %vm2383_vm10, %v3254_v6  ;;  %v6114_v51 = vor.u32 %v6113_v18, %v6110_v46  ;;  %v5402_v6 = vshrl.u32 %v5385_v33, 16 }
 0x2b0   :  { %v3296_v26 = vpop.permute.xlu0 %3295  ;;  %5975 = vrot.lane.b32.xlu1 %v5952_v7, %s6917_s0 }
 0x2b1   :  { %v3298_v61 = vpop.permute.xlu1 %3297  ;;  %3319 = vst.msk [vmem:[#allocation2 + $0x20] sm:$0xf] %vm2432_vm11, %v3296_v26  ;;  %v5405_v26 = vshll.u32 %v5385_v33, 16 }
 0x2b2   :  { %3320 = vst.msk [vmem:[#allocation2 + $0x24] sm:$0xf] %vm2432_vm11, %v3298_v61  ;;  %v5411_v61 = vshll.u32 %v5386_v0, 16 }
 0x2b4   :  { %v3300_v15 = vpop.permute.xlu0 %3299 }
 0x2b5   :  { %v3302_v32 = vpop.permute.xlu1 %3301  ;;  %3321 = vst.msk [vmem:[#allocation2 + $0x28] sm:$0xf] %vm2432_vm11, %v3300_v15  ;;  %v6167_v15 = vld [vmem:[#allocation4 + $0x98] sm:$0xe] }
 0x2b6   :  { %3322 = vst.msk [vmem:[#allocation2 + $0x2c] sm:$0xf] %vm2432_vm11, %v3302_v32  ;;  %v6115_v32 = vrot.slane %v6114_v51, 4  ;;  %v9056_v51 = vld [vmem:[%s9785_s4] ss:$0 sm:$0xff] }
 0x2b8   :  { %v3456_v10 = vpop.permute.xlu0 %3455 }
 0x2b9   :  { %v3458_v24 = vpop.permute.xlu1 %3457  ;;  %3479 = vst.msk [vmem:[#allocation2 + $0x20] sm:$0xf] %vm2593_vm13, %v3456_v10  ;;  %v6168_v10 = vld [vmem:[#allocation4 + $0x9c] sm:$0x1] }
 0x2ba   :  { %3480 = vst.msk [vmem:[#allocation2 + $0x24] sm:$0xf] %vm2593_vm13, %v3458_v24  ;;  %v6722_v24 = vrot.slane %v6167_v15, 9 }
 0x2bc   :  { %v3460_v28 = vpop.permute.xlu0 %3459 }
 0x2bd   :  { %v3462_v42 = vpop.permute.xlu1 %3461  ;;  %3481 = vst.msk [vmem:[#allocation2 + $0x28] sm:$0xf] %vm2593_vm13, %v3460_v28  ;;  %v5404_v28 = vrot.slane %v5402_v6, 4 }
 0x2be   :  { %3482 = vst.msk [vmem:[#allocation2 + $0x2c] sm:$0xf] %vm2593_vm13, %v3462_v42  ;;  %v5407_v42 = vrot.slane %v5405_v26, 5 }
 0x2c0   :  { %v3552_v35 = vpop.permute.xlu0 %3551 }
 0x2c1   :  { %v3554_v48 = vpop.permute.xlu1 %3553  ;;  %3575 = vst.msk [vmem:[#allocation2 + $0x20] sm:$0xf] %vm2690_vm14, %v3552_v35  ;;  %v6215_v35 = vrot.slane %v6168_v10, 5 }
 0x2c2   :  { %3576 = vst.msk [vmem:[#allocation2 + $0x24] sm:$0xf] %vm2690_vm14, %v3554_v48  ;;  %v6120_v48 = vsel %vm7002_vm2, %v6115_v32, %v6119_v55 }
 0x2c3   :  { %6135 = vrot.lane.b32.xlu1 %v6120_v48, %s6918_s9 }
 0x2c4   :  { %v3556_v5 = vpop.permute.xlu0 %3555 }
 0x2c5   :  { %v3558_v36 = vpop.permute.xlu1 %3557  ;;  %3577 = vst.msk [vmem:[#allocation2 + $0x28] sm:$0xf] %vm2690_vm14, %v3556_v5  ;;  %v5545_v5 = vld [vmem:[#allocation4 + $0x50] sm:$0xe] }
 0x2c6   :  { %3578 = vst.msk [vmem:[#allocation2 + $0x2c] sm:$0xf] %vm2690_vm14, %v3558_v36  ;;  %v5546_v36 = vld [vmem:[#allocation4 + $0x54] sm:$0x1] }
 0x2c8   :  { %v3600_v59 = vpop.permute.xlu0 %3599 }
 0x2c9   :  { %v3602_v22 = vpop.permute.xlu1 %3601  ;;  %3623 = vst.msk [vmem:[#allocation2 + $0x20] sm:$0xf] %vm2739_vm15, %v3600_v59 }
 0x2ca   :  { %3624 = vst.msk [vmem:[#allocation2 + $0x24] sm:$0xf] %vm2739_vm15, %v3602_v22 }
 0x2cc   :  { %v3604_v34 = vpop.permute.xlu0 %3603 }
 0x2cd   :  { %v3606_v60 = vpop.permute.xlu1 %3605  ;;  %3625 = vst.msk [vmem:[#allocation2 + $0x28] sm:$0xf] %vm2739_vm15, %v3604_v34  ;;  %v5408_v34 = vor.u32 %v5407_v42, %v5404_v28 }
 0x2ce   :  { %3626 = vst.msk [vmem:[#allocation2 + $0x2c] sm:$0xf] %vm2739_vm15, %v3606_v60  ;;  %v5413_v60 = vrot.slane %v5411_v61, 5 }
 0x2d0   :  { %v3760_v56 = vpop.permute.xlu0 %3759 }
 0x2d1   :  { %v3762_v9 = vpop.permute.xlu1 %3761  ;;  %3783 = vst.msk [vmem:[#allocation2 + $0x20] sm:$0xf] %vm2900_vm0, %v3760_v56  ;;  %v5126_v56 = vld [vmem:[#allocation4 + $0x48] sm:$0xf] }
 0x2d2   :  { %3784 = vst.msk [vmem:[#allocation2 + $0x24] sm:$0xf] %vm2900_vm0, %v3762_v9  ;;  %v5127_v9 = vld [vmem:[#allocation4 + $0x4c] sm:$0x1] }
 0x2d4   :  { %v3764_v37 = vpop.permute.xlu0 %3763 }
 0x2d5   :  { %v3766_v17 = vpop.permute.xlu1 %3765  ;;  %3785 = vst.msk [vmem:[#allocation2 + $0x28] sm:$0xf] %vm2900_vm0, %v3764_v37  ;;  %v6216_v37 = vsel %vm8095_vm3, %v6722_v24, %v6215_v35 }
 0x2d6   :  { %3786 = vst.msk [vmem:[#allocation2 + $0x2c] sm:$0xf] %vm2900_vm0, %v3766_v17  ;;  %v5227_v17 = vshrl.u32 %v5126_v56, 16  ;;  %6231 = vrot.lane.b32.xlu1 %v6216_v37, %s6919_s17 }
 0x2d8   :  { %v3856_v31 = vpop.permute.xlu0 %3855 }
 0x2d9   :  { %v3858_v45 = vpop.permute.xlu1 %3857  ;;  %3879 = vst.msk [vmem:[#allocation2 + $0x20] sm:$0xf] %vm2997_vm1, %v3856_v31  ;;  %v5230_v31 = vshll.u32 %v5126_v56, 16 }
 0x2da   :  { %3880 = vst.msk [vmem:[#allocation2 + $0x24] sm:$0xf] %vm2997_vm1, %v3858_v45  ;;  %v5236_v45 = vshll.u32 %v5127_v9, 16 }
 0x2dc   :  { %v3160_v14 = vpop.permute.xlu0 %3159 }
 0x2dd   :  { %v3162_v25 = vpop.permute.xlu1 %3161  ;;  %3179 = vst.msk [vmem:[#allocation2 + $0x30] sm:$0xf] %vm2283_vm5, %v3160_v14  ;;  %v5409_v14 = vrot.slane %v5408_v34, 4 }
 0x2de   :  { %3180 = vst.msk [vmem:[#allocation2 + $0x34] sm:$0xf] %vm2283_vm5, %v3162_v25  ;;  %v6699_v25 = vrot.slane %v5545_v5, 9 }
 0x2e0   :  { %v3895_v29 = vld [vmem:[#allocation2 + $0x20] sm:$0xf]  ;;  %v3860_v63 = vpop.permute.xlu0 %3859 }
 0x2e1   :  { %v3862_v20 = vpop.permute.xlu1 %3861  ;;  %v3896_v4 = vld [vmem:[#allocation2 + $0x24] sm:$0xf]  ;;  %5377 = vst.msk [vmem:[#allocation2 + $0x20] sm:$0xf] %vm1747_vm4, %v5369_v54  ;;  %v5579_v54 = vrot.slane %v5546_v36, 5 }
 0x2e2   :  { %3881 = vst.msk [vmem:[#allocation2 + $0x28] sm:$0xf] %vm2997_vm1, %v3860_v63  ;;  %3882 = vst.msk [vmem:[#allocation2 + $0x2c] sm:$0xf] %vm2997_vm1, %v3862_v20  ;;  %v6642_v3 = vcombine.low %v3895_v29, %v3896_v4  ;;  %v5229_v29 = vrot.slane %v5227_v17, 4  ;;  %v5232_v63 = vrot.slane %v5230_v31, 5 }
 0x2e3   :  { %v4190_v31 = vld [vmem:[#allocation4 + $0x8] sm:$0xf] }
 0x2e4   :  { %6837 = vmatprep.mubr.msk.bf16.mxu1 %vm3986_vm6, %v6642_v3  ;;  %v3164_v50 = vpop.permute.xlu0 %3163  ;;  %v5414_v3 = vsel %vm7002_vm2, %v5409_v14, %v5413_v60 }
 0x2e5   :  { %v3166_v40 = vpop.permute.xlu1 %3165  ;;  %3181 = vst.msk [vmem:[#allocation2 + $0x38] sm:$0xf] %vm2283_vm5, %v3164_v50  ;;  %5513 = vrot.lane.b32.xlu0 %v5414_v3, %s6909_s26  ;;  %v5071_v50 = vld [vmem:[#allocation4 + $0x48] sm:$0xf] }
 0x2e6   :  { %3182 = vst.msk [vmem:[#allocation2 + $0x3c] sm:$0xf] %vm2283_vm5, %v3166_v40  ;;  %v5233_v40 = vor.u32 %v5232_v63, %v5229_v29  ;;  %5094 = vrot.lane.b32.xlu1 %v5071_v50, %s6917_s0 }
 0x2e8   :  { %v3256_v49 = vpop.permute.xlu0 %3255 }
 0x2e9   :  { %v3258_v52 = vpop.permute.xlu1 %3257  ;;  %v6894_v38 = vld [vmem:[#allocation2 + $0x28] sm:$0xff]   ;;  %3275 = vst.msk [vmem:[#allocation2 + $0x30] sm:$0xf] %vm2383_vm10, %v3256_v49  ;;  %v5238_v49 = vrot.slane %v5236_v45, 5 }
 0x2ea   :  { %3276 = vst.msk [vmem:[#allocation2 + $0x34] sm:$0xf] %vm2383_vm10, %v3258_v52  ;;  %6838 = vmatmul.mubr.msk.bf16.gmra.mxu1 %vm3986_vm6, %v6894_v38  ;;  %v5580_v52 = vsel %vm8095_vm3, %v6699_v25, %v5579_v54  ;;  %v5286_v38 = vld [vmem:[#allocation4 + $0x48] sm:$0xe]  ;;  %v4193_v45 = vld [vmem:[#allocation4 + $0xc] sm:$0x1] }
 0x2eb   :  { %5609 = vrot.lane.b32.xlu0 %v5580_v52, %s6911_s13  ;;  %v4251_v52 = vld [vmem:[#allocation4 + $0x24] sm:$0x1] }
 0x2ec   :  { %v3260_v21 = vpop.permute.xlu0 %3259 }
 0x2ed   :  { %v3262_v8 = vpop.permute.xlu1 %3261  ;;  %3277 = vst.msk [vmem:[#allocation2 + $0x38] sm:$0xf] %vm2383_vm10, %v3260_v21  ;;  %v5287_v21 = vld [vmem:[#allocation4 + $0x4c] sm:$0x1] }
 0x2ee   :  { %3278 = vst.msk [vmem:[#allocation2 + $0x3c] sm:$0xf] %vm2383_vm10, %v3262_v8  ;;  %v5234_v8 = vrot.slane %v5233_v40, 4 }
 0x2f0   :  { %v3304_v62 = vpop.permute.xlu0 %3303  ;;  %v5239_v7 = vsel %vm7002_vm2, %v5234_v8, %v5238_v49  ;;  %v4248_v49 = vld [vmem:[#allocation4 + $0x20] sm:$0xf] }
 0x2f1   :  { %v3306_v57 = vpop.permute.xlu1 %3305  ;;  %3323 = vst.msk [vmem:[#allocation2 + $0x30] sm:$0xf] %vm2432_vm11, %v3304_v62  ;;  %5254 = vrot.lane.b32.xlu1 %v5239_v7, %s6918_s9  ;;  %v4209_v7 = vld [vmem:[#allocation4 + $0x10] sm:$0xf] }
 0x2f2   :  { %3324 = vst.msk [vmem:[#allocation2 + $0x34] sm:$0xf] %vm2432_vm11, %v3306_v57 }
 0x2f4   :  { %v3308_v1 = vpop.permute.xlu0 %3307 }
 0x2f5   :  { %v3310_v39 = vpop.permute.xlu1 %3309  ;;  %3325 = vst.msk [vmem:[#allocation2 + $0x38] sm:$0xf] %vm2432_vm11, %v3308_v1  ;;  %v6698_v1 = vrot.slane %v5286_v38, 9 }
 0x2f6   :  { %3326 = vst.msk [vmem:[#allocation2 + $0x3c] sm:$0xf] %vm2432_vm11, %v3310_v39  ;;  %v5334_v39 = vrot.slane %v5287_v21, 5 }
 0x2f8   :  { %v5335_v58 = vsel %vm8095_vm3, %v6698_v1, %v5334_v39  ;;  %v4212_v1 = vld [vmem:[#allocation4 + $0x14] sm:$0x1] }
 0x2f9   :  { %v3464_v44 = vpop.permute.xlu0 %3463  ;;  %v3466_v12 = vpop.permute.xlu1 %3465  ;;  %5350 = vrot.lane.b32.xlu1 %v5335_v58, %s6919_s17 }
 0x2fa   :  { %3483 = vst.msk [vmem:[#allocation2 + $0x30] sm:$0xf] %vm2593_vm13, %v3464_v44  ;;  %3484 = vst.msk [vmem:[#allocation2 + $0x34] sm:$0xf] %vm2593_vm13, %v3466_v12 }
 0x2fd   :  { %v3468_v16 = vpop.permute.xlu0 %3467  ;;  %v3470_v47 = vpop.permute.xlu1 %3469 }
 0x2fe   :  { %3485 = vst.msk [vmem:[#allocation2 + $0x38] sm:$0xf] %vm2593_vm13, %v3468_v16  ;;  %3486 = vst.msk [vmem:[#allocation2 + $0x3c] sm:$0xf] %vm2593_vm13, %v3470_v47 }
 0x301   :  { %v3560_v13 = vpop.permute.xlu0 %3559  ;;  %v3562_v11 = vpop.permute.xlu1 %3561 }
 0x302   :  { %3579 = vst.msk [vmem:[#allocation2 + $0x30] sm:$0xf] %vm2690_vm14, %v3560_v13  ;;  %3580 = vst.msk [vmem:[#allocation2 + $0x34] sm:$0xf] %vm2690_vm14, %v3562_v11 }
 0x305   :  { %v3564_v59 = vpop.permute.xlu0 %3563  ;;  %v3566_v22 = vpop.permute.xlu1 %3565 }
 0x306   :  { %3581 = vst.msk [vmem:[#allocation2 + $0x38] sm:$0xf] %vm2690_vm14, %v3564_v59  ;;  %3582 = vst.msk [vmem:[#allocation2 + $0x3c] sm:$0xf] %vm2690_vm14, %v3566_v22  ;;  %v4229_v59 = vld [vmem:[#allocation4 + $0x18] sm:$0xf] }
 0x307   :  { %v4232_v22 = vld [vmem:[#allocation4 + $0x1c] sm:$0x1] }
 0x309   :  { %v3608_v20 = vpop.permute.xlu0 %3607  ;;  %v3610_v4 = vpop.permute.xlu1 %3609 }
 0x30a   :  { %3627 = vst.msk [vmem:[#allocation2 + $0x30] sm:$0xf] %vm2739_vm15, %v3608_v20  ;;  %3628 = vst.msk [vmem:[#allocation2 + $0x34] sm:$0xf] %vm2739_vm15, %v3610_v4 }
 0x30d   :  { %v3612_v62 = vpop.permute.xlu0 %3611  ;;  %v3614_v57 = vpop.permute.xlu1 %3613 }
 0x30e   :  { %3629 = vst.msk [vmem:[#allocation2 + $0x38] sm:$0xf] %vm2739_vm15, %v3612_v62  ;;  %3630 = vst.msk [vmem:[#allocation2 + $0x3c] sm:$0xf] %vm2739_vm15, %v3614_v57 }
 0x311   :  { %v3768_v44 = vpop.permute.xlu0 %3767 }
 0x312   :  { %v3770_v12 = vpop.permute.xlu1 %3769  ;;  %3787 = vst.msk [vmem:[#allocation2 + $0x30] sm:$0xf] %vm2900_vm0, %v3768_v44 }
 0x313   :  { %3788 = vst.msk [vmem:[#allocation2 + $0x34] sm:$0xf] %vm2900_vm0, %v3770_v12 }
 0x315   :  { %v3772_v53 = vpop.permute.xlu0 %3771 }
 0x316   :  { %v3774_v43 = vpop.permute.xlu1 %3773  ;;  %3789 = vst.msk [vmem:[#allocation2 + $0x38] sm:$0xf] %vm2900_vm0, %v3772_v53 }
 0x317   :  { %3790 = vst.msk [vmem:[#allocation2 + $0x3c] sm:$0xf] %vm2900_vm0, %v3774_v43 }
 0x319   :  { %v3864_v41 = vpop.permute.xlu0 %3863 }
 0x31a   :  { %v3866_v19 = vpop.permute.xlu1 %3865  ;;  %3883 = vst.msk [vmem:[#allocation2 + $0x30] sm:$0xf] %vm2997_vm1, %v3864_v41 }
 0x31b   :  { %3884 = vst.msk [vmem:[#allocation2 + $0x34] sm:$0xf] %vm2997_vm1, %v3866_v19 }
 0x31d   :  { %v3868_v16 = vpop.permute.xlu0 %3867 }
 0x31e   :  { %v3870_v47 = vpop.permute.xlu1 %3869  ;;  %3885 = vst.msk [vmem:[#allocation2 + $0x38] sm:$0xf] %vm2997_vm1, %v3868_v16 }
 0x31f   :  { %3886 = vst.msk [vmem:[#allocation2 + $0x3c] sm:$0xf] %vm2997_vm1, %v3870_v47 }
 0x322   :  { %v6895_v46 = vld [vmem:[#allocation2 + $0x30] sm:$0xff]  }
 0x323   :  { %6841 = vmatprep.mubr.msk.bf16.mxu1 %vm3986_vm6, %v6895_v46 }
 0x326   :  { %v6896_v18 = vld [vmem:[#allocation2 + $0x38] sm:$0xff]  }
 0x327   :  { %6842 = vmatmul.mubr.msk.bf16.gmra.mxu1 %vm3986_vm6, %v6896_v18 }
 0x35a   :  { %v6831_v55 = vpop.f32.mrf.mxu1 }
 0x35b   :  { %v4058_v33 = vadd.f32 %v6831_v55, %v9056_v51 }
 0x35c   :  { %v4049_v0 = vpop.f32.mrf.mxu1 }
 0x35d   :  { %v4114_v13 = vmax.f32 %v4058_v33, 0.0  ;;  %v4050_v11 = vadd.f32 %v9056_v51, %v4049_v0 }
 0x35e   :  { %v6832_v6 = vpop.f32.mrf.mxu1 }
 0x35f   :  { %v6750_v26 = vpack.c.bf16 %v4114_v13, %v4114_v13  ;;  %v4112_v61 = vmax.f32 %v4050_v11, 0.0  ;;  %v4061_v15 = vadd.f32 %v6832_v6, %v9056_v51 }
 0x360   :  { %v4052_v32 = vpop.f32.mrf.mxu1 }
 0x361   :  { %v4219_v10 = vshrl.u32 %v6750_v26, 16  ;;  %v6748_v24 = vpack.c.bf16 %v4112_v61, %v4112_v61  ;;  %v4115_v28 = vmax.f32 %v4061_v15, 0.0  ;;  %v4053_v42 = vadd.f32 %v9056_v51, %v4052_v32 }
 0x362   :  { %v4222_v48 = vshll.u32 %v6750_v26, 16 }
 0x363   :  { %v4221_v35 = vrot.slane %v4219_v10, 7  ;;  %v4180_v5 = vshrl.u32 %v6748_v24, 16  ;;  %v6751_v36 = vpack.c.bf16 %v4115_v28, %v4115_v28  ;;  %v4183_v34 = vshll.u32 %v6748_v24, 16  ;;  %v4307_v24 = vld [vmem:[#allocation4 + $0x38] sm:$0xf] }
 0x364   :  { %v4113_v60 = vmax.f32 %v4053_v42, 0.0 }
 0x365   :  { %v4224_v56 = vor.u32 %v4222_v48, %v4221_v35  ;;  %v4225_v9 = vrot.slane %v4221_v35, 4  ;;  %v4182_v37 = vrot.slane %v4180_v5, 7  ;;  %v4238_v17 = vshrl.u32 %v6751_v36, 16  ;;  %v4310_v48 = vld [vmem:[#allocation4 + $0x3c] sm:$0x1] }
 0x366   :  { %v6749_v14 = vpack.c.bf16 %v4113_v60, %v4113_v60  ;;  %v4241_v4 = vshll.u32 %v6751_v36, 16 }
 0x367   :  { %v4230_v25 = vsel %vm8170_vm8, %v4224_v56, %v4229_v59  ;;  %v4233_v54 = vsel %vm8175_vm9, %v4225_v9, %v4232_v22  ;;  %v4185_v29 = vor.u32 %v4183_v34, %v4182_v37  ;;  %v4186_v63 = vrot.slane %v4182_v37, 4 }
 0x368   :  { %4231 = vst [vmem:[#allocation4 + $0x18] sm:$0xf] %v4230_v25  ;;  %4234 = vst [vmem:[#allocation4 + $0x1c] sm:$0x1] %v4233_v54  ;;  %v4240_v20 = vrot.slane %v4238_v17, 7  ;;  %v4199_v3 = vshrl.u32 %v6749_v14, 16 }
 0x369   :  { %v4191_v50 = vsel %vm8170_vm8, %v4185_v29, %v4190_v31  ;;  %v4194_v40 = vsel %vm8175_vm9, %v4186_v63, %v4193_v45  ;;  %v4202_v62 = vshll.u32 %v6749_v14, 16  ;;  %v4268_v45 = vld [vmem:[#allocation4 + $0x28] sm:$0xf]  ;;  %v4271_v14 = vld [vmem:[#allocation4 + $0x2c] sm:$0x1] }
 0x36a   :  { %4192 = vst [vmem:[#allocation4 + $0x8] sm:$0xf] %v4191_v50  ;;  %4195 = vst [vmem:[#allocation4 + $0xc] sm:$0x1] %v4194_v40  ;;  %v4243_v38 = vor.u32 %v4241_v4, %v4240_v20  ;;  %v4244_v21 = vrot.slane %v4240_v20, 4  ;;  %v4201_v8 = vrot.slane %v4199_v3, 7 }
 0x36c   :  { %v4249_v44 = vsel %vm8170_vm8, %v4243_v38, %v4248_v49  ;;  %v4252_v12 = vsel %vm8175_vm9, %v4244_v21, %v4251_v52  ;;  %v4204_v58 = vor.u32 %v4202_v62, %v4201_v8  ;;  %v4205_v53 = vrot.slane %v4201_v8, 4  ;;  %v4326_v62 = vld [vmem:[#allocation4 + $0x40] sm:$0xf] }
 0x36d   :  { %v6835_v57 = vpop.f32.mrf.mxu1  ;;  %4250 = vst [vmem:[#allocation4 + $0x20] sm:$0xf] %v4249_v44  ;;  %4253 = vst [vmem:[#allocation4 + $0x24] sm:$0x1] %v4252_v12 }
 0x36e   :  { %v4074_v39 = vadd.f32 %v6835_v57, %v9056_v51  ;;  %v4210_v16 = vsel %vm8170_vm8, %v4204_v58, %v4209_v7  ;;  %v4213_v47 = vsel %vm8175_vm9, %v4205_v53, %v4212_v1  ;;  %v4329_v57 = vld [vmem:[#allocation4 + $0x44] sm:$0x1]  ;;  %v5514_v1 = vpop.permute.xlu0 %5513  ;;  %v4287_v53 = vld [vmem:[#allocation4 + $0x30] sm:$0xf] }
 0x36f   :  { %v4065_v43 = vpop.f32.mrf.mxu1  ;;  %4211 = vst [vmem:[#allocation4 + $0x10] sm:$0xf] %v4210_v16  ;;  %4214 = vst [vmem:[#allocation4 + $0x14] sm:$0x1] %v4213_v47  ;;  %v4510_v0 = vld [vmem:[#allocation4 + $0x18] sm:$0xf] }
 0x370   :  { %v4118_v41 = vmax.f32 %v4074_v39, 0.0  ;;  %v4066_v19 = vadd.f32 %v9056_v51, %v4065_v43  ;;  %v4563_v11 = vshrl.u32 %v4510_v0, 16  ;;  %v4566_v6 = vshll.u32 %v4510_v0, 16  ;;  %v4491_v32 = vld [vmem:[#allocation4 + $0x18] sm:$0xf] }
 0x371   :  { %v6836_v46 = vpop.f32.mrf.mxu1  ;;  %4499 = vst.msk [vmem:[#allocation2 + $0xc] sm:$0xf] %vm1747_vm4, %v4491_v32  ;;  %v4511_v38 = vld [vmem:[#allocation4 + $0x1c] sm:$0x1]  ;;  %v4290_v43 = vld [vmem:[#allocation4 + $0x34] sm:$0x1] }
 0x372   :  { %v6754_v18 = vpack.c.bf16 %v4118_v41, %v4118_v41  ;;  %v4116_v55 = vmax.f32 %v4066_v19, 0.0  ;;  %v4077_v33 = vadd.f32 %v6836_v46, %v9056_v51  ;;  %v4565_v42 = vrot.slane %v4563_v11, 4  ;;  %5537 = vst.msk [vmem:[#allocation2 + $0x20] sm:$0xf] %vm2283_vm5, %v5514_v1 }
 0x373   :  { %v4068_v13 = vpop.f32.mrf.mxu1  ;;  %v4568_v59 = vrot.slane %v4566_v6, 5  ;;  %v4572_v41 = vshll.u32 %v4511_v38, 16 }
 0x374   :  { %v4297_v26 = vshrl.u32 %v6754_v18, 16  ;;  %v6752_v61 = vpack.c.bf16 %v4116_v55, %v4116_v55  ;;  %v4119_v15 = vmax.f32 %v4077_v33, 0.0  ;;  %v4300_v10 = vshll.u32 %v6754_v18, 16  ;;  %v4672_v60 = vld [vmem:[#allocation4 + $0x20] sm:$0xe] }
 0x375   :  { %v4069_v28 = vadd.f32 %v9056_v51, %v4068_v13  ;;  %v4673_v56 = vld [vmem:[#allocation4 + $0x24] sm:$0x1]  ;;  %v6679_v54 = vrot.slane %v4672_v60, 9  ;;  %v4569_v7 = vor.u32 %v4568_v59, %v4565_v42  ;;  %v4512_v19 = vld [vmem:[#allocation4 + $0x20] sm:$0xf]  ;;  %v5610_v13 = vpop.permute.xlu0 %5609 }
 0x376   :  { %v4299_v35 = vrot.slane %v4297_v26, 7  ;;  %v4258_v5 = vshrl.u32 %v6752_v61, 16  ;;  %v6755_v36 = vpack.c.bf16 %v4119_v15, %v4119_v15  ;;  %v4261_v22 = vshll.u32 %v6752_v61, 16  ;;  %v4492_v55 = vld [vmem:[#allocation4 + $0x20] sm:$0xf] }
 0x377   :  { %v4117_v34 = vmax.f32 %v4069_v28, 0.0  ;;  %v4714_v29 = vrot.slane %v4673_v56, 5  ;;  %v4490_v33 = vld [vmem:[#allocation4 + $0x10] sm:$0xf]  ;;  %v4570_v0 = vrot.slane %v4569_v7, 4  ;;  %v4577_v26 = vshrl.u32 %v4512_v19, 16 }
 0x378   :  { %v4302_v9 = vor.u32 %v4300_v10, %v4299_v35  ;;  %v4303_v37 = vrot.slane %v4299_v35, 4  ;;  %v4260_v17 = vrot.slane %v4258_v5, 7  ;;  %v4316_v31 = vshrl.u32 %v6755_v36, 16  ;;  %4500 = vst.msk [vmem:[#allocation2 + $0x10] sm:$0xf] %vm1747_vm4, %v4492_v55 }
 0x379   :  { %v6753_v25 = vpack.c.bf16 %v4117_v34, %v4117_v34  ;;  %v4319_v40 = vshll.u32 %v6755_v36, 16  ;;  %v4715_v52 = vsel %vm8095_vm3, %v6679_v54, %v4714_v29  ;;  %4498 = vst.msk [vmem:[#allocation2 + $0x8] sm:$0xf] %vm1747_vm4, %v4490_v33  ;;  %v4580_v61 = vshll.u32 %v4512_v19, 16  ;;  %v4513_v5 = vld [vmem:[#allocation4 + $0x24] sm:$0x1] }
 0x37a   :  { %v4308_v63 = vsel %vm8170_vm8, %v4302_v9, %v4307_v24  ;;  %v4311_v20 = vsel %vm8175_vm9, %v4303_v37, %v4310_v48  ;;  %v4263_v4 = vor.u32 %v4261_v22, %v4260_v17  ;;  %v4264_v3 = vrot.slane %v4260_v17, 4  ;;  %4736 = vrot.lane.b32.xlu0 %v4715_v52, %s6911_s13  ;;  %5633 = vst.msk [vmem:[#allocation2 + $0x20] sm:$0xf] %vm2383_vm10, %v5610_v13 }
 0x37b   :  { %4309 = vst [vmem:[#allocation4 + $0x38] sm:$0xf] %v4308_v63  ;;  %4312 = vst [vmem:[#allocation4 + $0x3c] sm:$0x1] %v4311_v20  ;;  %v4318_v50 = vrot.slane %v4316_v31, 7  ;;  %v4277_v49 = vshrl.u32 %v6753_v25, 16 }
 0x37c   :  { %v4269_v21 = vsel %vm8170_vm8, %v4263_v4, %v4268_v45  ;;  %v4272_v8 = vsel %vm8175_vm9, %v4264_v3, %v4271_v14  ;;  %v4280_v58 = vshll.u32 %v6753_v25, 16  ;;  %v4574_v10 = vrot.slane %v4572_v41, 5  ;;  %v4508_v20 = vld [vmem:[#allocation4 + $0x10] sm:$0xf] }
 0x37d   :  { %4270 = vst [vmem:[#allocation4 + $0x28] sm:$0xf] %v4269_v21  ;;  %4273 = vst [vmem:[#allocation4 + $0x2c] sm:$0x1] %v4272_v8  ;;  %v4321_v39 = vor.u32 %v4319_v40, %v4318_v50  ;;  %v4322_v44 = vrot.slane %v4318_v50, 4  ;;  %v4279_v12 = vrot.slane %v4277_v49, 7 }
 0x37e   :  { %v4575_v48 = vsel %vm7002_vm2, %v4570_v0, %v4574_v10  ;;  %v4579_v36 = vrot.slane %v4577_v26, 4  ;;  %v4582_v59 = vrot.slane %v4580_v61, 5  ;;  %v4586_v45 = vshll.u32 %v4513_v5, 16 }
 0x37f   :  { %v4327_v16 = vsel %vm8170_vm8, %v4321_v39, %v4326_v62  ;;  %v4330_v47 = vsel %vm8175_vm9, %v4322_v44, %v4329_v57  ;;  %v4282_v46 = vor.u32 %v4280_v58, %v4279_v12  ;;  %v4283_v18 = vrot.slane %v4279_v12, 4 }
 0x380   :  { %4328 = vst [vmem:[#allocation4 + $0x40] sm:$0xf] %v4327_v16  ;;  %4331 = vst [vmem:[#allocation4 + $0x44] sm:$0x1] %v4330_v47  ;;  %v4583_v31 = vor.u32 %v4582_v59, %v4579_v36  ;;  %v4588_v50 = vrot.slane %v4586_v45, 5  ;;  %v4549_v8 = vshrl.u32 %v4508_v20, 16 }
 0x381   :  { %v4288_v11 = vsel %vm8170_vm8, %v4282_v46, %v4287_v53  ;;  %v4291_v6 = vsel %vm8175_vm9, %v4283_v18, %v4290_v43  ;;  %v4552_v62 = vshll.u32 %v4508_v20, 16  ;;  %v4509_v18 = vld [vmem:[#allocation4 + $0x14] sm:$0x1] }
 0x382   :  { %4289 = vst [vmem:[#allocation4 + $0x30] sm:$0xf] %v4288_v11  ;;  %4292 = vst [vmem:[#allocation4 + $0x34] sm:$0x1] %v4291_v6  ;;  %v5069_v15 = vld [vmem:[#allocation4 + $0x38] sm:$0xf] }
 0x383   :  { %v4766_v32 = vld [vmem:[#allocation4 + $0x38] sm:$0xf]  ;;  %5090 = vrot.lane.b32.xlu1 %v5069_v15, %s6917_s0  ;;  %v4679_v28 = vld [vmem:[#allocation4 + $0x3c] sm:$0x1]  ;;  %v4584_v63 = vrot.slane %v4583_v31, 4  ;;  %v4551_v12 = vrot.slane %v4549_v8, 4 }
 0x384   :  { %4788 = vrot.lane.b32.xlu0 %v4766_v32, %s6913_s29  ;;  %v4678_v24 = vld [vmem:[#allocation4 + $0x38] sm:$0xe]  ;;  %v4981_v35 = vld [vmem:[#allocation4 + $0x3c] sm:$0x1]  ;;  %v4764_v22 = vld [vmem:[#allocation4 + $0x28] sm:$0xf] }
 0x385   :  { %v4980_v42 = vld [vmem:[#allocation4 + $0x38] sm:$0xe]  ;;  %v6682_v34 = vrot.slane %v4678_v24, 9  ;;  %v4726_v60 = vrot.slane %v4679_v28, 5  ;;  %v5026_v9 = vrot.slane %v4981_v35, 5  ;;  %v4589_v21 = vsel %vm7002_vm2, %v4584_v63, %v4588_v50 }
 0x386   :  { %v6689_v56 = vrot.slane %v4980_v42, 9  ;;  %v5282_v37 = vld [vmem:[#allocation4 + $0x38] sm:$0xe]  ;;  %v5283_v17 = vld [vmem:[#allocation4 + $0x3c] sm:$0x1]  ;;  %v4554_v58 = vrot.slane %v4552_v62, 5 }
 0x387   :  { %4638 = vrot.lane.b32.xlu1 %v4575_v48, %s6909_s26  ;;  %v4727_v14 = vsel %vm8095_vm3, %v6682_v34, %v4726_v60  ;;  %v6696_v54 = vrot.slane %v5282_v37, 9  ;;  %v5326_v29 = vrot.slane %v5283_v17, 5  ;;  %v5070_v3 = vld [vmem:[#allocation4 + $0x40] sm:$0xf]  ;;  %v4976_v40 = vld [vmem:[#allocation4 + $0x28] sm:$0xe] }
 0x388   :  { %4784 = vrot.lane.b32.xlu0 %v4764_v22, %s6913_s29  ;;  %v5027_v25 = vsel %vm8095_vm3, %v6689_v56, %v5026_v9  ;;  %v4977_v49 = vld [vmem:[#allocation4 + $0x2c] sm:$0x1]  ;;  %v4674_v52 = vld [vmem:[#allocation4 + $0x28] sm:$0xe]  ;;  %v4767_v57 = vld [vmem:[#allocation4 + $0x40] sm:$0xf]  ;;  %v4555_v55 = vor.u32 %v4554_v58, %v4551_v12 }
 0x389   :  { %v5327_v4 = vsel %vm8095_vm3, %v6696_v54, %v5326_v29  ;;  %v4675_v38 = vld [vmem:[#allocation4 + $0x2c] sm:$0x1]  ;;  %v6687_v7 = vrot.slane %v4976_v40, 9  ;;  %v5018_v1 = vrot.slane %v4977_v49, 5  ;;  %v6680_v39 = vrot.slane %v4674_v52, 9 }
 0x38a   :  { %v4718_v44 = vrot.slane %v4675_v38, 5  ;;  %v5284_v41 = vld [vmem:[#allocation4 + $0x40] sm:$0xe]  ;;  %v5285_v19 = vld [vmem:[#allocation4 + $0x44] sm:$0x1]  ;;  %v4558_v26 = vshll.u32 %v4509_v18, 16 }
 0x38b   :  { %4742 = vrot.lane.b32.xlu1 %v4727_v14, %s6911_s13  ;;  %v5019_v53 = vsel %vm8095_vm3, %v6687_v7, %v5018_v1  ;;  %v4982_v16 = vld [vmem:[#allocation4 + $0x40] sm:$0xe]  ;;  %v4983_v47 = vld [vmem:[#allocation4 + $0x44] sm:$0x1]  ;;  %v5068_v46 = vld [vmem:[#allocation4 + $0x30] sm:$0xf] }
 0x38c   :  { %5044 = vrot.lane.b32.xlu0 %v5027_v25, %s6920_s12  ;;  %v4719_v43 = vsel %vm8095_vm3, %v6680_v39, %v4718_v44  ;;  %v4765_v33 = vld [vmem:[#allocation4 + $0x30] sm:$0xf]  ;;  %v6697_v0 = vrot.slane %v5284_v41, 9  ;;  %v5330_v13 = vrot.slane %v5285_v19, 5  ;;  %v6690_v11 = vrot.slane %v4982_v16, 9 }
 0x38d   :  { %v5030_v6 = vrot.slane %v4983_v47, 5  ;;  %v4556_v32 = vrot.slane %v4555_v55, 4  ;;  %v4495_v10 = vld [vmem:[#allocation4 + $0x38] sm:$0xf]  ;;  %v4560_v24 = vrot.slane %v4558_v26, 5 }
 0x38e   :  { %v5331_v61 = vsel %vm8095_vm3, %v6697_v0, %v5330_v13  ;;  %4503 = vst.msk [vmem:[#allocation2 + $0x1c] sm:$0xf] %vm1747_vm4, %v4495_v10  ;;  %v4493_v28 = vld [vmem:[#allocation4 + $0x28] sm:$0xf]  ;;  %v4494_v5 = vld [vmem:[#allocation4 + $0x30] sm:$0xf] }
 0x38f   :  { %5346 = vrot.lane.b32.xlu1 %v5327_v4, %s6919_s17  ;;  %v5031_v15 = vsel %vm8095_vm3, %v6690_v11, %v5030_v6  ;;  %4501 = vst.msk [vmem:[#allocation2 + $0x14] sm:$0xf] %vm1747_vm4, %v4493_v28  ;;  %v4561_v42 = vsel %vm7002_vm2, %v4556_v32, %v4560_v24  ;;  %4502 = vst.msk [vmem:[#allocation2 + $0x18] sm:$0xf] %vm1747_vm4, %v4494_v5  ;;  %v4518_v34 = vld [vmem:[#allocation4 + $0x38] sm:$0xf] }
 0x390   :  { %5092 = vrot.lane.b32.xlu0 %v5070_v3, %s6917_s0  ;;  %v4619_v31 = vshrl.u32 %v4518_v34, 16  ;;  %v4622_v45 = vshll.u32 %v4518_v34, 16  ;;  %v4385_v29 = vld [vmem:[#allocation4 + $0x68] sm:$0xf]  ;;  %v4820_v40 = vld [vmem:[#allocation4 + $0x38] sm:$0xf] }
 0x391   :  { %v4388_v49 = vld [vmem:[#allocation4 + $0x6c] sm:$0x1]  ;;  %v4346_v39 = vld [vmem:[#allocation4 + $0x58] sm:$0xf]  ;;  %v4349_v44 = vld [vmem:[#allocation4 + $0x5c] sm:$0x1] }
 0x392   :  { %v4624_v8 = vrot.slane %v4622_v45, 5  ;;  %v4909_v58 = vshrl.u32 %v4820_v40, 16  ;;  %v4404_v47 = vld [vmem:[#allocation4 + $0x70] sm:$0xf]  ;;  %v5122_v0 = vld [vmem:[#allocation4 + $0x38] sm:$0xf] }
 0x393   :  { %4790 = vrot.lane.b32.xlu1 %v4767_v57, %s6913_s29  ;;  %v4365_v6 = vld [vmem:[#allocation4 + $0x60] sm:$0xf]  ;;  %v4368_v26 = vld [vmem:[#allocation4 + $0x64] sm:$0x1] }
 0x394   :  { %4640 = vrot.lane.b32.xlu0 %v4589_v21, %s6909_s26  ;;  %v4621_v21 = vrot.slane %v4619_v31, 4 }
 0x397   :  { %4738 = vrot.lane.b32.xlu1 %v4719_v43, %s6911_s13 }
 0x398   :  { %5040 = vrot.lane.b32.xlu0 %v5019_v53, %s6920_s12  ;;  %v4912_v53 = vshll.u32 %v4820_v40, 16 }
 0x39a   :  { %v4914_v5 = vrot.slane %v4912_v53, 5 }
 0x39b   :  { %4786 = vrot.lane.b32.xlu1 %v4765_v33, %s6913_s29 }
 0x39c   :  { %5088 = vrot.lane.b32.xlu0 %v5068_v46, %s6917_s0  ;;  %v4407_v46 = vld [vmem:[#allocation4 + $0x74] sm:$0x1] }
 0x39f   :  { %5046 = vrot.lane.b32.xlu1 %v5031_v15, %s6920_s12  ;;  %v4625_v15 = vor.u32 %v4624_v8, %v4621_v21  ;;  %v5123_v21 = vld [vmem:[#allocation4 + $0x3c] sm:$0x1] }
 0x3a0   :  { %5348 = vrot.lane.b32.xlu0 %v5331_v61, %s6919_s17  ;;  %v4519_v61 = vld [vmem:[#allocation4 + $0x3c] sm:$0x1] }
 0x3a4   :  { %4636 = vrot.lane.b32.xlu0 %v4561_v42, %s6909_s26  ;;  %v4676_v42 = vld [vmem:[#allocation4 + $0x30] sm:$0xe] }
 0x3aa   :  { %v6839_v35 = vpop.f32.mrf.mxu1 }
 0x3ab   :  { %v4090_v48 = vadd.f32 %v6839_v35, %v9056_v51  ;;  %v4677_v35 = vld [vmem:[#allocation4 + $0x34] sm:$0x1] }
 0x3ac   :  { %v4081_v36 = vpop.f32.mrf.mxu1 }
 0x3ad   :  { %v4122_v59 = vmax.f32 %v4090_v48, 0.0  ;;  %v4082_v22 = vadd.f32 %v9056_v51, %v4081_v36  ;;  %v4911_v48 = vrot.slane %v4909_v58, 4  ;;  %v5199_v36 = vshrl.u32 %v5122_v0, 16 }
 0x3ae   :  { %v6840_v60 = vpop.f32.mrf.mxu1 }
 0x3af   :  { %v6758_v56 = vpack.c.bf16 %v4122_v59, %v4122_v59  ;;  %v4120_v9 = vmax.f32 %v4082_v22, 0.0  ;;  %v4093_v37 = vadd.f32 %v6840_v60, %v9056_v51  ;;  %v5202_v59 = vshll.u32 %v5122_v0, 16 }
 0x3b0   :  { %v4084_v17 = vpop.f32.mrf.mxu1 }
 0x3b1   :  { %v4375_v14 = vshrl.u32 %v6758_v56, 16  ;;  %v6756_v25 = vpack.c.bf16 %v4120_v9, %v4120_v9  ;;  %v4123_v54 = vmax.f32 %v4093_v37, 0.0  ;;  %v4085_v63 = vadd.f32 %v9056_v51, %v4084_v17  ;;  %v4978_v17 = vld [vmem:[#allocation4 + $0x30] sm:$0xe] }
 0x3b2   :  { %v4378_v4 = vshll.u32 %v6758_v56, 16  ;;  %v4628_v9 = vshll.u32 %v4519_v61, 16  ;;  %v6681_v37 = vrot.slane %v4676_v42, 9 }
 0x3b3   :  { %v4377_v20 = vrot.slane %v4375_v14, 7  ;;  %v4336_v3 = vshrl.u32 %v6756_v25, 16  ;;  %v6759_v50 = vpack.c.bf16 %v4123_v54, %v4123_v54  ;;  %v4339_v52 = vshll.u32 %v6756_v25, 16  ;;  %v4979_v54 = vld [vmem:[#allocation4 + $0x34] sm:$0x1] }
 0x3b4   :  { %v4121_v38 = vmax.f32 %v4085_v63, 0.0  ;;  %v4626_v14 = vrot.slane %v4625_v15, 4  ;;  %v4722_v25 = vrot.slane %v4677_v35, 5  ;;  %v4630_v40 = vrot.slane %v4628_v9, 5  ;;  %v5124_v9 = vld [vmem:[#allocation4 + $0x40] sm:$0xf] }
 0x3b5   :  { %v4380_v62 = vor.u32 %v4378_v4, %v4377_v20  ;;  %v4381_v57 = vrot.slane %v4377_v20, 4  ;;  %v4338_v7 = vrot.slane %v4336_v3, 7  ;;  %v4394_v1 = vshrl.u32 %v6759_v50, 16 }
 0x3b6   :  { %v6757_v12 = vpack.c.bf16 %v4121_v38, %v4121_v38  ;;  %v4397_v55 = vshll.u32 %v6759_v50, 16  ;;  %v4915_v4 = vor.u32 %v4914_v5, %v4911_v48  ;;  %v5201_v3 = vrot.slane %v5199_v36, 4  ;;  %v4515_v36 = vld [vmem:[#allocation4 + $0x2c] sm:$0x1] }
 0x3b7   :  { %v4386_v43 = vsel %vm8170_vm8, %v4380_v62, %v4385_v29  ;;  %v4389_v41 = vsel %vm8175_vm9, %v4381_v57, %v4388_v49  ;;  %v4341_v19 = vor.u32 %v4339_v52, %v4338_v7  ;;  %v4342_v16 = vrot.slane %v4338_v7, 4  ;;  %v4821_v29 = vld [vmem:[#allocation4 + $0x3c] sm:$0x1] }
 0x3b8   :  { %4387 = vst [vmem:[#allocation4 + $0x68] sm:$0xf] %v4386_v43  ;;  %4390 = vst [vmem:[#allocation4 + $0x6c] sm:$0x1] %v4389_v41  ;;  %v4396_v18 = vrot.slane %v4394_v1, 7  ;;  %v4355_v33 = vshrl.u32 %v6757_v12, 16  ;;  %v4631_v8 = vsel %vm7002_vm2, %v4626_v14, %v4630_v40  ;;  %v4723_v62 = vsel %vm8095_vm3, %v6681_v37, %v4722_v25  ;;  %v9190_v25 = vpop.permute.xlu1 %5975 }
 0x3b9   :  { %v4347_v13 = vsel %vm8170_vm8, %v4341_v19, %v4346_v39  ;;  %v4350_v11 = vsel %vm8175_vm9, %v4342_v16, %v4349_v44  ;;  %v4358_v28 = vshll.u32 %v6757_v12, 16  ;;  %v5204_v50 = vrot.slane %v5202_v59, 5  ;;  %v4514_v1 = vld [vmem:[#allocation4 + $0x28] sm:$0xf]  ;;  %v5280_v44 = vld [vmem:[#allocation4 + $0x30] sm:$0xe] }
 0x3ba   :  { %4348 = vst [vmem:[#allocation4 + $0x58] sm:$0xf] %v4347_v13  ;;  %4351 = vst [vmem:[#allocation4 + $0x5c] sm:$0x1] %v4350_v11  ;;  %v4399_v32 = vor.u32 %v4397_v55, %v4396_v18  ;;  %v4400_v10 = vrot.slane %v4396_v18, 4  ;;  %v4357_v24 = vrot.slane %v4355_v33, 7 }
 0x3bb   :  { %v6688_v49 = vrot.slane %v4978_v17, 9  ;;  %v5022_v52 = vrot.slane %v4979_v54, 5  ;;  %v4918_v38 = vshll.u32 %v4821_v29, 16  ;;  %v4916_v57 = vrot.slane %v4915_v4, 4  ;;  %v4816_v39 = vld [vmem:[#allocation4 + $0x28] sm:$0xf] }
 0x3bc   :  { %v4405_v22 = vsel %vm8170_vm8, %v4399_v32, %v4404_v47  ;;  %v4408_v34 = vsel %vm8175_vm9, %v4400_v10, %v4407_v46  ;;  %v4360_v60 = vor.u32 %v4358_v28, %v4357_v24  ;;  %v4361_v56 = vrot.slane %v4357_v24, 4  ;;  %v5281_v12 = vld [vmem:[#allocation4 + $0x34] sm:$0x1]  ;;  %v4817_v59 = vld [vmem:[#allocation4 + $0x2c] sm:$0x1] }
 0x3bd   :  { %4406 = vst [vmem:[#allocation4 + $0x70] sm:$0xf] %v4405_v22  ;;  %4409 = vst [vmem:[#allocation4 + $0x74] sm:$0x1] %v4408_v34  ;;  %v5205_v7 = vor.u32 %v5204_v50, %v5201_v3  ;;  %v5023_v58 = vsel %vm8095_vm3, %v6688_v49, %v5022_v52  ;;  %v4920_v53 = vrot.slane %v4918_v38, 5  ;;  %v5208_v43 = vshll.u32 %v5123_v21, 16 }
 0x3be   :  { %v4366_v31 = vsel %vm8170_vm8, %v4360_v60, %v4365_v6  ;;  %v4369_v45 = vsel %vm8175_vm9, %v4361_v56, %v4368_v26  ;;  %v4591_v41 = vshrl.u32 %v4514_v1, 16  ;;  %v4594_v19 = vshll.u32 %v4514_v1, 16  ;;  %v4822_v56 = vld [vmem:[#allocation4 + $0x40] sm:$0xf] }
 0x3bf   :  { %4367 = vst [vmem:[#allocation4 + $0x60] sm:$0xf] %v4366_v31  ;;  %4370 = vst [vmem:[#allocation4 + $0x64] sm:$0x1] %v4369_v45  ;;  %v5946_v63 = vld [vmem:[#allocation4 + $0x68] sm:$0xf]  ;;  %v4921_v46 = vsel %vm7002_vm2, %v4916_v57, %v4920_v53 }
 0x3c0   :  { %v5643_v20 = vld [vmem:[#allocation4 + $0x68] sm:$0xf]  ;;  %5963 = vrot.lane.b32.xlu1 %v5946_v63, %s6917_s0  ;;  %v4881_v16 = vshrl.u32 %v4816_v39, 16  ;;  %v4884_v47 = vshll.u32 %v4816_v39, 16  ;;  %v5206_v18 = vrot.slane %v5205_v7, 4  ;;  %v6695_v55 = vrot.slane %v5280_v44, 9 }
 0x3c1   :  { %5661 = vrot.lane.b32.xlu0 %v5643_v20, %s6913_s29  ;;  %v5322_v33 = vrot.slane %v5281_v12, 5  ;;  %v5551_v0 = vld [vmem:[#allocation4 + $0x68] sm:$0xe]  ;;  %v5552_v13 = vld [vmem:[#allocation4 + $0x6c] sm:$0x1]  ;;  %v5210_v11 = vrot.slane %v5208_v43, 5 }
 0x3c2   :  { %v4593_v6 = vrot.slane %v4591_v41, 4  ;;  %v4596_v26 = vrot.slane %v4594_v19, 5  ;;  %v4883_v61 = vrot.slane %v4881_v16, 4  ;;  %v4886_v15 = vrot.slane %v4884_v47, 5  ;;  %v6155_v42 = vld [vmem:[#allocation4 + $0x68] sm:$0xe] }
 0x3c3   :  { %v5211_v32 = vsel %vm7002_vm2, %v5206_v18, %v5210_v11  ;;  %v5323_v10 = vsel %vm8095_vm3, %v6695_v55, %v5322_v33  ;;  %v6702_v24 = vrot.slane %v5551_v0, 9  ;;  %v5591_v28 = vrot.slane %v5552_v13, 5  ;;  %v6156_v35 = vld [vmem:[#allocation4 + $0x6c] sm:$0x1]  ;;  %v5853_v48 = vld [vmem:[#allocation4 + $0x68] sm:$0xe] }
 0x3c4   :  { %4646 = vrot.lane.b32.xlu1 %v4631_v8, %s6909_s26  ;;  %v5854_v5 = vld [vmem:[#allocation4 + $0x6c] sm:$0x1]  ;;  %v6716_v22 = vrot.slane %v6155_v42, 9  ;;  %v4597_v34 = vor.u32 %v4596_v26, %v4593_v6  ;;  %v4887_v60 = vor.u32 %v4886_v15, %v4883_v61  ;;  %v5641_v17 = vld [vmem:[#allocation4 + $0x58] sm:$0xf]  ;;  %v6191_v31 = vrot.slane %v6156_v35, 5  ;;  %v9198_v8 = vpop.permute.xlu1 %6135 }
 0x3c5   :  { %4740 = vrot.lane.b32.xlu0 %v4723_v62, %s6911_s13  ;;  %v5592_v37 = vsel %vm8095_vm3, %v6702_v24, %v5591_v28  ;;  %v6709_v45 = vrot.slane %v5853_v48, 9  ;;  %v5891_v14 = vrot.slane %v5854_v5, 5  ;;  %v4600_v54 = vshll.u32 %v4515_v36, 16  ;;  %v5547_v12 = vld [vmem:[#allocation4 + $0x58] sm:$0xe] }
 0x3c6   :  { %v4890_v29 = vshll.u32 %v4817_v59, 16  ;;  %v4923_v63 = vshrl.u32 %v4822_v56, 16  ;;  %v4926_v20 = vshll.u32 %v4822_v56, 16  ;;  %v5213_v4 = vshrl.u32 %v5124_v9, 16  ;;  %v5849_v53 = vld [vmem:[#allocation4 + $0x58] sm:$0xe] }
 0x3c7   :  { %v5216_v3 = vshll.u32 %v5124_v9, 16  ;;  %v6192_v50 = vsel %vm8095_vm3, %v6716_v22, %v6191_v31  ;;  %v5892_v40 = vsel %vm8095_vm3, %v6709_v45, %v5891_v14  ;;  %v4598_v49 = vrot.slane %v4597_v34, 4  ;;  %v5850_v43 = vld [vmem:[#allocation4 + $0x5c] sm:$0x1]  ;;  %v4823_v41 = vld [vmem:[#allocation4 + $0x44] sm:$0x1] }
 0x3c8   :  { %5042 = vrot.lane.b32.xlu1 %v5023_v58, %s6920_s12  ;;  %v4888_v52 = vrot.slane %v4887_v60, 4  ;;  %v4602_v38 = vrot.slane %v4600_v54, 5  ;;  %v4892_v21 = vrot.slane %v4890_v29, 5  ;;  %v4925_v62 = vrot.slane %v4923_v63, 4  ;;  %v5548_v58 = vld [vmem:[#allocation4 + $0x5c] sm:$0x1]  ;;  %v9208_v6 = vpop.permute.xlu1 %6231 }
 0x3c9   :  { %4948 = vrot.lane.b32.xlu0 %v4921_v46, %s6916_s21  ;;  %v4928_v57 = vrot.slane %v4926_v20, 5  ;;  %v5215_v7 = vrot.slane %v5213_v4, 4  ;;  %v5218_v1 = vrot.slane %v5216_v3, 5  ;;  %v5125_v19 = vld [vmem:[#allocation4 + $0x44] sm:$0x1]  ;;  %v6700_v33 = vrot.slane %v5547_v12, 9 }
 0x3ca   :  { %v4603_v39 = vsel %vm7002_vm2, %v4598_v49, %v4602_v38  ;;  %v4893_v44 = vsel %vm7002_vm2, %v4888_v52, %v4892_v21  ;;  %v4818_v16 = vld [vmem:[#allocation4 + $0x30] sm:$0xf]  ;;  %v5583_v0 = vrot.slane %v5548_v58, 5  ;;  %v6707_v13 = vrot.slane %v5849_v53, 9  ;;  %v4819_v5 = vld [vmem:[#allocation4 + $0x34] sm:$0x1] }
 0x3cb   :  { %v5644_v47 = vld [vmem:[#allocation4 + $0x70] sm:$0xf]  ;;  %v4929_v46 = vor.u32 %v4928_v57, %v4925_v62  ;;  %v5219_v18 = vor.u32 %v5218_v1, %v5215_v7  ;;  %v5883_v11 = vrot.slane %v5850_v43, 5  ;;  %v4932_v26 = vshll.u32 %v4823_v41, 16  ;;  %v5372_v60 = vld [vmem:[#allocation4 + $0x68] sm:$0xf] }
 0x3cc   :  { %5250 = vrot.lane.b32.xlu1 %v5211_v32, %s6918_s9  ;;  %v5947_v55 = vld [vmem:[#allocation4 + $0x70] sm:$0xf]  ;;  %v5222_v61 = vshll.u32 %v5125_v19, 16  ;;  %v4895_v15 = vshrl.u32 %v4818_v16, 16  ;;  %v5584_v42 = vsel %vm8095_vm3, %v6700_v33, %v5583_v0  ;;  %5380 = vst.msk [vmem:[#allocation2 + $0x2c] sm:$0xf] %vm1747_vm4, %v5372_v60  ;;  %v9217_v31 = vpop.permute.xlu1 %5094 }
 0x3cd   :  { %5344 = vrot.lane.b32.xlu0 %v5323_v10, %s6919_s17  ;;  %v4516_v32 = vld [vmem:[#allocation4 + $0x30] sm:$0xf]  ;;  %v4898_v10 = vshll.u32 %v4818_v16, 16  ;;  %v4930_v24 = vrot.slane %v4929_v46, 4  ;;  %v5884_v35 = vsel %vm8095_vm3, %v6707_v13, %v5883_v11  ;;  %v5220_v48 = vrot.slane %v5219_v18, 4 }
 0x3ce   :  { %v5120_v28 = vld [vmem:[#allocation4 + $0x30] sm:$0xf]  ;;  %v4605_v36 = vshrl.u32 %v4516_v32, 16  ;;  %v4934_v59 = vrot.slane %v4932_v26, 5  ;;  %v5224_v22 = vrot.slane %v5222_v61, 5  ;;  %v4897_v34 = vrot.slane %v4895_v15, 4 }
 0x3cf   :  { %v4900_v56 = vrot.slane %v4898_v10, 5  ;;  %v4608_v9 = vshll.u32 %v4516_v32, 16  ;;  %v5855_v54 = vld [vmem:[#allocation4 + $0x70] sm:$0xe]  ;;  %v5856_v29 = vld [vmem:[#allocation4 + $0x74] sm:$0x1] }
 0x3d0   :  { %5615 = vrot.lane.b32.xlu1 %v5592_v37, %s6911_s13  ;;  %v5185_v37 = vshrl.u32 %v5120_v28, 16  ;;  %v4935_v45 = vsel %vm7002_vm2, %v4930_v24, %v4934_v59  ;;  %v5225_v14 = vsel %vm7002_vm2, %v5220_v48, %v5224_v22  ;;  %v4904_v63 = vshll.u32 %v4819_v5, 16  ;;  %v4517_v20 = vld [vmem:[#allocation4 + $0x34] sm:$0x1]  ;;  %v5553_v3 = vld [vmem:[#allocation4 + $0x70] sm:$0xe]  ;;  %v9229_v16 = vpop.permute.xlu1 %5254 }
 0x3d1   :  { %5657 = vrot.lane.b32.xlu0 %v5641_v17, %s6913_s29  ;;  %v5188_v17 = vshll.u32 %v5120_v28, 16  ;;  %v4607_v4 = vrot.slane %v4605_v36, 4  ;;  %v4901_v49 = vor.u32 %v4900_v56, %v4897_v34  ;;  %v4610_v52 = vrot.slane %v4608_v9, 5  ;;  %v5121_v38 = vld [vmem:[#allocation4 + $0x34] sm:$0x1] }
 0x3d2   :  { %v5187_v21 = vrot.slane %v5185_v37, 4  ;;  %v5642_v7 = vld [vmem:[#allocation4 + $0x60] sm:$0xf]  ;;  %v6703_v58 = vrot.slane %v5553_v3, 9  ;;  %v6157_v43 = vld [vmem:[#allocation4 + $0x70] sm:$0xe] }
 0x3d3   :  { %v5190_v62 = vrot.slane %v5188_v17, 5  ;;  %v5945_v1 = vld [vmem:[#allocation4 + $0x60] sm:$0xf]  ;;  %v6158_v41 = vld [vmem:[#allocation4 + $0x74] sm:$0x1]  ;;  %v4614_v46 = vshll.u32 %v4517_v20, 16  ;;  %v4611_v13 = vor.u32 %v4610_v52, %v4607_v4 }
 0x3d4   :  { %6219 = vrot.lane.b32.xlu1 %v6192_v50, %s6919_s17  ;;  %v5554_v50 = vld [vmem:[#allocation4 + $0x74] sm:$0x1]  ;;  %v5194_v18 = vshll.u32 %v5121_v38, 16  ;;  %v4902_v0 = vrot.slane %v4901_v49, 4  ;;  %v5391_v11 = vld [vmem:[#allocation4 + $0x68] sm:$0xf] }
 0x3d5   :  { %5917 = vrot.lane.b32.xlu0 %v5892_v40, %s6920_s12  ;;  %v4489_v40 = vld [vmem:[#allocation4 + $0x8] sm:$0xf]  ;;  %v5595_v53 = vrot.slane %v5554_v50, 5  ;;  %v6717_v15 = vrot.slane %v6157_v43, 9  ;;  %v6195_v32 = vrot.slane %v6158_v41, 5  ;;  %v5191_v10 = vor.u32 %v5190_v62, %v5187_v21 }
 0x3d6   :  { %4497 = vst.msk [vmem:[#allocation2 + $0x4] sm:$0xf] %vm1747_vm4, %v4489_v40  ;;  %v4616_v5 = vrot.slane %v4614_v46, 5  ;;  %v9239_v36 = vrot.slane %v5194_v18, 5  ;;  %v5444_v59 = vshrl.u32 %v5391_v11, 16  ;;  %v5447_v22 = vshll.u32 %v5391_v11, 16 }
 0x3d7   :  { %v6907_v37 = vld [vmem:[%s9785_s4] ss:$0 sm:$0xff]  ;;  %v5693_v50 = vld [vmem:[#allocation4 + $0x68] sm:$0xf]  ;;  %v4466_v40 = vld [vmem:[#allocation4 + $0x8c] sm:$0x1] }
 0x3d8   :  { %4642 = vrot.lane.b32.xlu1 %v4603_v39, %s6909_s26  ;;  %v6710_v39 = vrot.slane %v5855_v54, 9  ;;  %v4612_v54 = vrot.slane %v4611_v13, 4  ;;  %v9256_v21 = vrot.slane %v5444_v59, 4  ;;  %v9258_v62 = vrot.slane %v5447_v22, 5  ;;  %v5549_v59 = vld [vmem:[#allocation4 + $0x60] sm:$0xe] }
 0x3d9   :  { %4944 = vrot.lane.b32.xlu0 %v4893_v44, %s6916_s21  ;;  %v5895_v44 = vrot.slane %v5856_v29, 5  ;;  %v9250_v29 = vrot.slane %v5191_v10, 4  ;;  %v5734_v41 = vshrl.u32 %v5693_v50, 16  ;;  %v5550_v22 = vld [vmem:[#allocation4 + $0x64] sm:$0x1] }
 0x3da   :  { %v4617_v43 = vsel %vm7002_vm2, %v4612_v54, %v4616_v5  ;;  %v5450_v5 = vor.u32 %v9258_v62, %v9256_v21 }
 0x3db   :  { %v5896_v61 = vsel %vm8095_vm3, %v6710_v39, %v5895_v44  ;;  %v5370_v44 = vld [vmem:[#allocation4 + $0x58] sm:$0xf] }
 0x3dc   :  { %5663 = vrot.lane.b32.xlu1 %v5644_v47, %s6913_s29  ;;  %v4906_v47 = vrot.slane %v4904_v63, 5  ;;  %5378 = vst.msk [vmem:[#allocation2 + $0x24] sm:$0xf] %vm1747_vm4, %v5370_v44 }
 0x3dd   :  { %5965 = vrot.lane.b32.xlu0 %v5947_v55, %s6917_s0 }
 0x3de   :  { %v4907_v9 = vsel %vm7002_vm2, %v4902_v0, %v4906_v47  ;;  %v4485_v0 = vld [vmem:[#allocation4 + $0x94] sm:$0x1] }
 0x3e0   :  { %5611 = vrot.lane.b32.xlu1 %v5584_v42, %s6911_s13 }
 0x3e1   :  { %5913 = vrot.lane.b32.xlu0 %v5884_v35, %s6920_s12  ;;  %v5596_v35 = vsel %vm8095_vm3, %v6703_v58, %v5595_v53  ;;  %v4427_v58 = vld [vmem:[#allocation4 + $0x7c] sm:$0x1] }
 0x3e4   :  { %4950 = vrot.lane.b32.xlu1 %v4935_v45, %s6916_s21  ;;  %v9246_v45 = vpop.permute.xlu1 %5350 }
 0x3e5   :  { %5252 = vrot.lane.b32.xlu0 %v5225_v14, %s6918_s9  ;;  %v6196_v14 = vsel %vm8095_vm3, %v6717_v15, %v6195_v32  ;;  %v5995_v32 = vld [vmem:[#allocation4 + $0x68] sm:$0xf] }
 0x3e6   :  { %v6027_v54 = vshll.u32 %v5995_v32, 16 }
 0x3e7   :  { %v6843_v57 = vpop.f32.mrf.mxu1 }
 0x3e8   :  { %v4106_v12 = vadd.f32 %v6843_v57, %v9056_v51  ;;  %5659 = vrot.lane.b32.xlu1 %v5642_v7, %s6913_s29 }
 0x3e9   :  { %v4097_v19 = vpop.f32.mrf.mxu1  ;;  %5961 = vrot.lane.b32.xlu0 %v5945_v1, %s6917_s0 }
 0x3ea   :  { %v4126_v55 = vmax.f32 %v4106_v12, 0.0  ;;  %v4098_v33 = vadd.f32 %v9056_v51, %v4097_v19  ;;  %v4424_v12 = vld [vmem:[#allocation4 + $0x78] sm:$0xf]  ;;  %v5737_v19 = vshll.u32 %v5693_v50, 16 }
 0x3eb   :  { %v6844_v26 = vpop.f32.mrf.mxu1 }
 0x3ec   :  { %v6762_v24 = vpack.c.bf16 %v4126_v55, %v4126_v55  ;;  %v4124_v28 = vmax.f32 %v4098_v33, 0.0  ;;  %v4109_v42 = vadd.f32 %v6844_v26, %v9056_v51  ;;  %5919 = vrot.lane.b32.xlu1 %v5896_v61, %s6920_s12  ;;  %v4463_v51 = vld [vmem:[#allocation4 + $0x88] sm:$0xf]  ;;  %v9252_v52 = vpop.permute.xlu0 %4736  ;;  %v4482_v33 = vld [vmem:[#allocation4 + $0x90] sm:$0xf] }
 0x3ed   :  { %v4100_v48 = vpop.f32.mrf.mxu1  ;;  %5617 = vrot.lane.b32.xlu0 %v5596_v35, %s6911_s13  ;;  %v5197_v35 = vsel %vm7002_vm2, %v9250_v29, %v9239_v36  ;;  %v5371_v36 = vld [vmem:[#allocation4 + $0x60] sm:$0xf] }
 0x3ee   :  { %v4453_v34 = vshrl.u32 %v6762_v24, 16  ;;  %v6760_v60 = vpack.c.bf16 %v4124_v28, %v4124_v28  ;;  %v4127_v56 = vmax.f32 %v4109_v42, 0.0  ;;  %v4101_v17 = vadd.f32 %v6907_v37, %v4100_v48  ;;  %v4443_v28 = vld [vmem:[#allocation4 + $0x80] sm:$0xf]  ;;  %v4446_v42 = vld [vmem:[#allocation4 + $0x84] sm:$0x1] }
 0x3ef   :  { %v4456_v20 = vshll.u32 %v6762_v24, 16  ;;  %v5392_v48 = vld [vmem:[#allocation4 + $0x6c] sm:$0x1]  ;;  %v5736_v37 = vrot.slane %v5734_v41, 4  ;;  %5379 = vst.msk [vmem:[#allocation2 + $0x28] sm:$0xf] %vm1747_vm4, %v5371_v36 }
 0x3f0   :  { %v4455_v63 = vrot.slane %v4453_v34, 7  ;;  %v4414_v4 = vshrl.u32 %v6760_v60, 16  ;;  %v6763_v3 = vpack.c.bf16 %v4127_v56, %v4127_v56  ;;  %v4417_v49 = vshll.u32 %v6760_v60, 16  ;;  %4946 = vrot.lane.b32.xlu1 %v4907_v9, %s6916_s21 }
 0x3f1   :  { %v4125_v38 = vmax.f32 %v4101_v17, 0.0  ;;  %6221 = vrot.lane.b32.xlu0 %v6196_v14, %s6919_s17  ;;  %v5739_v17 = vrot.slane %v5737_v19, 5  ;;  %v6024_v14 = vshrl.u32 %v5995_v32, 16  ;;  %v6154_v32 = vld [vmem:[#allocation4 + $0x64] sm:$0x1] }
 0x3f2   :  { %v4458_v57 = vor.u32 %v4456_v20, %v4455_v63  ;;  %v4459_v7 = vrot.slane %v4455_v63, 4  ;;  %v4416_v1 = vrot.slane %v4414_v4, 7  ;;  %v4472_v39 = vshrl.u32 %v6763_v3, 16 }
 0x3f3   :  { %v6761_v53 = vpack.c.bf16 %v4125_v38, %v4125_v38  ;;  %v4475_v11 = vshll.u32 %v6763_v3, 16  ;;  %v5851_v38 = vld [vmem:[#allocation4 + $0x60] sm:$0xe] }
 0x3f4   :  { %v4464_v47 = vsel %vm8170_vm8, %v4458_v57, %v4463_v51  ;;  %v4467_v46 = vsel %vm8175_vm9, %v4459_v7, %v4466_v40  ;;  %v4419_v18 = vor.u32 %v4417_v49, %v4416_v1  ;;  %v4420_v55 = vrot.slane %v4416_v1, 4  ;;  %v5373_v51 = vld [vmem:[#allocation4 + $0x70] sm:$0xf]  ;;  %v5852_v1 = vld [vmem:[#allocation4 + $0x64] sm:$0x1] }
 0x3f5   :  { %4465 = vst [vmem:[#allocation4 + $0x88] sm:$0xf] %v4464_v47  ;;  %4468 = vst [vmem:[#allocation4 + $0x8c] sm:$0x1] %v4467_v46  ;;  %v4474_v13 = vrot.slane %v4472_v39, 7  ;;  %v4433_v26 = vshrl.u32 %v6761_v53, 16  ;;  %v9267_v61 = vpop.permute.xlu1 %5090  ;;  %4644 = vrot.lane.b32.xlu0 %v4617_v43, %s6909_s26 }
 0x3f6   :  { %v9269_v15 = vpop.permute.xlu0 %4788  ;;  %v4425_v10 = vsel %vm8170_vm8, %v4419_v18, %v4424_v12  ;;  %v4428_v24 = vsel %vm8175_vm9, %v4420_v55, %v4427_v58  ;;  %v4436_v9 = vshll.u32 %v6761_v53, 16  ;;  %5381 = vst.msk [vmem:[#allocation2 + $0x30] sm:$0xf] %vm1747_vm4, %v5373_v51  ;;  %v5453_v40 = vshll.u32 %v5392_v48, 16  ;;  %v5694_v39 = vld [vmem:[#allocation4 + $0x6c] sm:$0x1] }
 0x3f7   :  { %4426 = vst [vmem:[#allocation4 + $0x78] sm:$0xf] %v4425_v10  ;;  %4429 = vst [vmem:[#allocation4 + $0x7c] sm:$0x1] %v4428_v24  ;;  %v4477_v34 = vor.u32 %v4475_v11, %v4474_v13  ;;  %v4478_v60 = vrot.slane %v4474_v13, 4  ;;  %v4435_v56 = vrot.slane %v4433_v26, 7  ;;  %v5740_v58 = vor.u32 %v5739_v17, %v5736_v37 }
 0x3f8   :  { %v6701_v49 = vrot.slane %v5549_v59, 9  ;;  %v5451_v57 = vrot.slane %v5450_v5, 4  ;;  %v5587_v7 = vrot.slane %v5550_v22, 5  ;;  %v6026_v53 = vrot.slane %v6024_v14, 4  ;;  %v5996_v46 = vld [vmem:[#allocation4 + $0x6c] sm:$0x1] }
 0x3f9   :  { %v4483_v29 = vsel %vm8170_vm8, %v4477_v34, %v4482_v33  ;;  %v4486_v63 = vsel %vm8175_vm9, %v4478_v60, %v4485_v0  ;;  %v4438_v20 = vor.u32 %v4436_v9, %v4435_v56  ;;  %v4439_v4 = vrot.slane %v4435_v56, 4  ;;  %v4639_v3 = vpop.permute.xlu1 %4638  ;;  %5248 = vrot.lane.b32.xlu0 %v5197_v35, %s6918_s9  ;;  %v5689_v13 = vld [vmem:[#allocation4 + $0x58] sm:$0xf]  ;;  %v6153_v26 = vld [vmem:[#allocation4 + $0x60] sm:$0xe] }
 0x3fa   :  { %v4785_v50 = vpop.permute.xlu0 %4784  ;;  %4484 = vst [vmem:[#allocation4 + $0x90] sm:$0xf] %v4483_v29  ;;  %4487 = vst [vmem:[#allocation4 + $0x94] sm:$0x1] %v4486_v63  ;;  %v6029_v43 = vrot.slane %v6027_v54, 5  ;;  %v5455_v23 = vrot.slane %v5453_v40, 5  ;;  %v5588_v55 = vsel %vm8095_vm3, %v6701_v49, %v5587_v7 }
 0x3fb   :  { %4659 = vst.msk [vmem:[#allocation2 + $0xc] sm:$0xf] %vm2283_vm5, %v4639_v3  ;;  %v4444_v21 = vsel %vm8170_vm8, %v4438_v20, %v4443_v28  ;;  %v4447_v62 = vsel %vm8175_vm9, %v4439_v4, %v4446_v42  ;;  %v5743_v30 = vshll.u32 %v5694_v39, 16  ;;  %v6708_v19 = vrot.slane %v5851_v38, 9  ;;  %v5387_v48 = vld [vmem:[#allocation4 + $0x58] sm:$0xf] }
 0x3fc   :  { %4445 = vst [vmem:[#allocation4 + $0x80] sm:$0xf] %v4444_v21  ;;  %4448 = vst [vmem:[#allocation4 + $0x84] sm:$0x1] %v4447_v62  ;;  %v5950_v44 = vld [vmem:[#allocation4 + $0x88] sm:$0xf]  ;;  %v5456_v18 = vsel %vm7002_vm2, %v5451_v57, %v5455_v23  ;;  %v6030_v0 = vor.u32 %v6029_v43, %v6026_v53 }
 0x3fd   :  { %v5647_v12 = vld [vmem:[#allocation4 + $0x88] sm:$0xf]  ;;  %5971 = vrot.lane.b32.xlu1 %v5950_v44, %s6917_s0  ;;  %v5887_v47 = vrot.slane %v5852_v1, 5  ;;  %v5741_v33 = vrot.slane %v5740_v58, 4  ;;  %v5745_v10 = vrot.slane %v5743_v30, 5  ;;  %v6033_v24 = vshll.u32 %v5996_v46, 16 }
 0x3fe   :  { %v9294_v41 = vpop.permute.xlu0 %5044  ;;  %5669 = vrot.lane.b32.xlu0 %v5647_v12, %s6913_s29  ;;  %v5706_v42 = vshrl.u32 %v5689_v13, 16  ;;  %v5709_v35 = vshll.u32 %v5689_v13, 16  ;;  %v6031_v59 = vrot.slane %v6030_v0, 4  ;;  %v6715_v22 = vrot.slane %v6153_v26, 9  ;;  %v5559_v36 = vld [vmem:[#allocation4 + $0x88] sm:$0xe] }
 0x3ff   :  { %v5888_v28 = vsel %vm8095_vm3, %v6708_v19, %v5887_v47  ;;  %v5746_v5 = vsel %vm7002_vm2, %v5741_v33, %v5745_v10  ;;  %v6187_v34 = vrot.slane %v6154_v32, 5  ;;  %v6035_v56 = vrot.slane %v6033_v24, 5  ;;  %v5393_v29 = vld [vmem:[#allocation4 + $0x70] sm:$0xf]  ;;  %v5861_v20 = vld [vmem:[#allocation4 + $0x88] sm:$0xe]  ;;  %v9332_v32 = vpop.permute.xlu1 %4742 }
 0x400   :  { %v5416_v9 = vshrl.u32 %v5387_v48, 16  ;;  %v5708_v51 = vrot.slane %v5706_v42, 4  ;;  %v5711_v37 = vrot.slane %v5709_v35, 5  ;;  %v5419_v17 = vshll.u32 %v5387_v48, 16  ;;  %v5862_v4 = vld [vmem:[#allocation4 + $0x8c] sm:$0x1] }
 0x401   :  { %5519 = vrot.lane.b32.xlu1 %v5456_v18, %s6909_s26  ;;  %v6036_v14 = vsel %vm7002_vm2, %v6031_v59, %v6035_v56  ;;  %v6188_v54 = vsel %vm8095_vm3, %v6715_v22, %v6187_v34  ;;  %v5690_v3 = vld [vmem:[#allocation4 + $0x5c] sm:$0x1]  ;;  %v5458_v21 = vshrl.u32 %v5393_v29, 16  ;;  %v5461_v62 = vshll.u32 %v5393_v29, 16  ;;  %v5645_v57 = vld [vmem:[#allocation4 + $0x78] sm:$0xf] }
 0x402   :  { %v9302_v11 = vpop.permute.xlu0 %5092  ;;  %5613 = vrot.lane.b32.xlu0 %v5588_v55, %s6911_s13  ;;  %v5418_v40 = vrot.slane %v5416_v9, 4  ;;  %v5712_v49 = vor.u32 %v5711_v37, %v5708_v51  ;;  %v5421_v38 = vrot.slane %v5419_v17, 5  ;;  %v6706_v7 = vrot.slane %v5559_v36, 9  ;;  %v6163_v58 = vld [vmem:[#allocation4 + $0x88] sm:$0xe] }
 0x403   :  { %v6713_v39 = vrot.slane %v5861_v20, 9  ;;  %v5907_v44 = vrot.slane %v5862_v4, 5  ;;  %v6164_v53 = vld [vmem:[#allocation4 + $0x8c] sm:$0x1]  ;;  %v5715_v43 = vshll.u32 %v5690_v3, 16  ;;  %v5460_v47 = vrot.slane %v5458_v21, 4 }
 0x404   :  { %v5388_v23 = vld [vmem:[#allocation4 + $0x5c] sm:$0x1]  ;;  %v5713_v30 = vrot.slane %v5712_v49, 4  ;;  %v5422_v19 = vor.u32 %v5421_v38, %v5418_v40  ;;  %v5463_v46 = vrot.slane %v5461_v62, 5  ;;  %v5695_v18 = vld [vmem:[#allocation4 + $0x70] sm:$0xf] }
 0x405   :  { %5915 = vrot.lane.b32.xlu1 %v5888_v28, %s6920_s12  ;;  %v5908_v33 = vsel %vm8095_vm3, %v6713_v39, %v5907_v44  ;;  %v6720_v0 = vrot.slane %v6163_v58, 9  ;;  %v6207_v13 = vrot.slane %v6164_v53, 5  ;;  %v5997_v26 = vld [vmem:[#allocation4 + $0x70] sm:$0xf]  ;;  %v5394_v24 = vld [vmem:[#allocation4 + $0x74] sm:$0x1] }
 0x406   :  { %v4641_v60 = vpop.permute.xlu0 %4640  ;;  %5821 = vrot.lane.b32.xlu0 %v5746_v5, %s6916_s21  ;;  %v5717_v28 = vrot.slane %v5715_v43, 5  ;;  %v5425_v42 = vshll.u32 %v5388_v23, 16  ;;  %v5748_v35 = vshrl.u32 %v5695_v18, 16  ;;  %v5464_v48 = vor.u32 %v5463_v46, %v5460_v47  ;;  %v5951_v4 = vld [vmem:[#allocation4 + $0x90] sm:$0xf] }
 0x407   :  { %4660 = vst.msk [vmem:[#allocation2 + $0x10] sm:$0xf] %vm2283_vm5, %v4641_v60  ;;  %v5751_v5 = vshll.u32 %v5695_v18, 16  ;;  %v6038_v59 = vshrl.u32 %v5997_v26, 16  ;;  %v6041_v22 = vshll.u32 %v5997_v26, 16  ;;  %v6208_v34 = vsel %vm8095_vm3, %v6720_v0, %v6207_v13 }
 0x408   :  { %4756 = vst.msk [vmem:[#allocation2 + $0x10] sm:$0xf] %vm2383_vm10, %v9252_v52  ;;  %v5560_v52 = vld [vmem:[#allocation4 + $0x8c] sm:$0x1]  ;;  %v5718_v60 = vsel %vm7002_vm2, %v5713_v30, %v5717_v28  ;;  %v5423_v56 = vrot.slane %v5422_v19, 4  ;;  %v5467_v9 = vshll.u32 %v5394_v24, 16 }
 0x409   :  { %4804 = vst.msk [vmem:[#allocation2 + $0x10] sm:$0xf] %vm2432_vm11, %v4785_v50  ;;  %6123 = vrot.lane.b32.xlu1 %v6036_v14, %s6918_s9  ;;  %v5948_v50 = vld [vmem:[#allocation4 + $0x78] sm:$0xf]  ;;  %v5607_v1 = vrot.slane %v5560_v52, 5  ;;  %v5427_v37 = vrot.slane %v5425_v42, 5  ;;  %v9345_v14 = vpop.permute.xlu1 %5346 }
 0x40a   :  { %v9320_v63 = vpop.permute.xlu0 %5040  ;;  %6217 = vrot.lane.b32.xlu0 %v6188_v54, %s6919_s17  ;;  %v5750_v17 = vrot.slane %v5748_v35, 4  ;;  %v5465_v54 = vrot.slane %v5464_v48, 4  ;;  %v5753_v36 = vrot.slane %v5751_v5, 5  ;;  %v6040_v29 = vrot.slane %v6038_v59, 4  ;;  %v5555_v40 = vld [vmem:[#allocation4 + $0x78] sm:$0xe] }
 0x40b   :  { %v5608_v55 = vsel %vm8095_vm3, %v6706_v7, %v5607_v1  ;;  %v6043_v52 = vrot.slane %v6041_v22, 5  ;;  %v5428_v20 = vsel %vm7002_vm2, %v5423_v56, %v5427_v37  ;;  %v5469_v3 = vrot.slane %v5467_v9, 5  ;;  %v5857_v49 = vld [vmem:[#allocation4 + $0x78] sm:$0xe]  ;;  %v5858_v38 = vld [vmem:[#allocation4 + $0x7c] sm:$0x1] }
 0x40c   :  { %v5696_v21 = vld [vmem:[#allocation4 + $0x74] sm:$0x1]  ;;  %v5754_v7 = vor.u32 %v5753_v36, %v5750_v17  ;;  %v5389_v39 = vld [vmem:[#allocation4 + $0x60] sm:$0xf]  ;;  %v5648_v44 = vld [vmem:[#allocation4 + $0x90] sm:$0xf] }
 0x40d   :  { %5967 = vrot.lane.b32.xlu1 %v5948_v50, %s6917_s0  ;;  %v5556_v50 = vld [vmem:[#allocation4 + $0x7c] sm:$0x1]  ;;  %v5998_v62 = vld [vmem:[#allocation4 + $0x74] sm:$0x1]  ;;  %v6044_v1 = vor.u32 %v6043_v52, %v6040_v29  ;;  %v6704_v58 = vrot.slane %v5555_v40, 9  ;;  %v6711_v43 = vrot.slane %v5857_v49, 9  ;;  %v9353_v30 = vpop.permute.xlu1 %4790 }
 0x40e   :  { %v9324_v12 = vpop.permute.xlu0 %5088  ;;  %5665 = vrot.lane.b32.xlu0 %v5645_v57, %s6913_s29  ;;  %v5470_v57 = vsel %vm7002_vm2, %v5465_v54, %v5469_v3  ;;  %v5599_v53 = vrot.slane %v5556_v50, 5  ;;  %v5899_v23 = vrot.slane %v5858_v38, 5  ;;  %v5757_v19 = vshll.u32 %v5696_v21, 16  ;;  %v5993_v24 = vld [vmem:[#allocation4 + $0x60] sm:$0xf] }
 0x40f   :  { %v6047_v47 = vshll.u32 %v5998_v62, 16  ;;  %v5430_v46 = vshrl.u32 %v5389_v39, 16  ;;  %v5433_v18 = vshll.u32 %v5389_v39, 16  ;;  %v5755_v13 = vrot.slane %v5754_v7, 4  ;;  %v6159_v35 = vld [vmem:[#allocation4 + $0x78] sm:$0xe] }
 0x410   :  { %v5900_v0 = vsel %vm8095_vm3, %v6711_v43, %v5899_v23  ;;  %v6045_v26 = vrot.slane %v6044_v1, 4  ;;  %v5759_v28 = vrot.slane %v5757_v19, 5  ;;  %v6160_v48 = vld [vmem:[#allocation4 + $0x7c] sm:$0x1]  ;;  %v5390_v56 = vld [vmem:[#allocation4 + $0x64] sm:$0x1] }
 0x411   :  { %5623 = vrot.lane.b32.xlu1 %v5608_v55, %s6911_s13  ;;  %v5691_v55 = vld [vmem:[#allocation4 + $0x60] sm:$0xf]  ;;  %v6049_v42 = vrot.slane %v6047_v47, 5  ;;  %v5432_v5 = vrot.slane %v5430_v46, 4  ;;  %v5435_v59 = vrot.slane %v5433_v18, 5  ;;  %v6010_v9 = vshrl.u32 %v5993_v24, 16 }
 0x412   :  { %v9334_v10 = vpop.permute.xlu0 %5348  ;;  %5925 = vrot.lane.b32.xlu0 %v5908_v33, %s6920_s12  ;;  %v5600_v33 = vsel %vm8095_vm3, %v6704_v58, %v5599_v53  ;;  %v5720_v22 = vshrl.u32 %v5691_v55, 16  ;;  %v5760_v37 = vsel %vm7002_vm2, %v5755_v13, %v5759_v28  ;;  %v6718_v54 = vrot.slane %v6159_v35, 9  ;;  %v5399_v29 = vld [vmem:[#allocation4 + $0x88] sm:$0xf]  ;;  %v6165_v52 = vld [vmem:[#allocation4 + $0x90] sm:$0xe] }
 0x413   :  { %v6050_v17 = vsel %vm7002_vm2, %v6045_v26, %v6049_v42  ;;  %v6199_v36 = vrot.slane %v6160_v48, 5  ;;  %v5436_v3 = vor.u32 %v5435_v59, %v5432_v5  ;;  %v5439_v40 = vshll.u32 %v5390_v56, 16  ;;  %v5701_v38 = vld [vmem:[#allocation4 + $0x88] sm:$0xf]  ;;  %v5994_v21 = vld [vmem:[#allocation4 + $0x64] sm:$0x1] }
 0x414   :  { %v5722_v50 = vrot.slane %v5720_v22, 4  ;;  %v6012_v62 = vrot.slane %v6010_v9, 4  ;;  %v5500_v7 = vshrl.u32 %v5399_v29, 16  ;;  %v5503_v1 = vshll.u32 %v5399_v29, 16  ;;  %v5863_v43 = vld [vmem:[#allocation4 + $0x90] sm:$0xe] }
 0x415   :  { %6227 = vrot.lane.b32.xlu1 %v6208_v34, %s6919_s17  ;;  %v5723_v34 = vshll.u32 %v5691_v55, 16  ;;  %v6200_v39 = vsel %vm8095_vm3, %v6718_v54, %v6199_v36  ;;  %v6721_v58 = vrot.slane %v6165_v52, 9  ;;  %v5864_v19 = vld [vmem:[#allocation4 + $0x94] sm:$0x1]  ;;  %v5400_v47 = vld [vmem:[#allocation4 + $0x8c] sm:$0x1] }
 0x416   :  { %v4637_v51 = vpop.permute.xlu0 %4636  ;;  %5817 = vrot.lane.b32.xlu0 %v5718_v60, %s6916_s21  ;;  %v9363_v60 = vpop.permute.xlu1 %4738  ;;  %v5790_v46 = vshrl.u32 %v5701_v38, 16  ;;  %v5793_v18 = vshll.u32 %v5701_v38, 16  ;;  %v5437_v55 = vrot.slane %v5436_v3, 4  ;;  %v6019_v13 = vshll.u32 %v5994_v21, 16  ;;  %v6003_v26 = vld [vmem:[#allocation4 + $0x88] sm:$0xf] }
 0x417   :  { %4658 = vst.msk [vmem:[#allocation2 + $0x8] sm:$0xf] %vm2283_vm5, %v4637_v51  ;;  %v6013_v51 = vshll.u32 %v5993_v24, 16  ;;  %v5725_v49 = vrot.slane %v5723_v34, 5  ;;  %v5646_v24 = vld [vmem:[#allocation4 + $0x80] sm:$0xf] }
 0x418   :  { %v6714_v28 = vrot.slane %v5863_v43, 9  ;;  %v5502_v35 = vrot.slane %v5500_v7, 4  ;;  %v5505_v48 = vrot.slane %v5503_v1, 5  ;;  %v5911_v59 = vrot.slane %v5864_v19, 5  ;;  %v9379_v34 = vld [vmem:[#allocation4 + $0x80] sm:$0xe] }
 0x419   :  { %5515 = vrot.lane.b32.xlu1 %v5428_v20, %s6909_s26  ;;  %v6166_v20 = vld [vmem:[#allocation4 + $0x94] sm:$0x1]  ;;  %v5509_v22 = vshll.u32 %v5400_v47, 16  ;;  %v5376_v56 = vld [vmem:[#allocation4 + $0x88] sm:$0xf]  ;;  %v5792_v9 = vrot.slane %v5790_v46, 4 }
 0x41a   :  { %5973 = vrot.lane.b32.xlu0 %v5951_v4, %s6917_s0  ;;  %v5692_v4 = vld [vmem:[#allocation4 + $0x64] sm:$0x1]  ;;  %v6211_v53 = vrot.slane %v6166_v20, 5  ;;  %v9373_v23 = vpop.permute.xlu1 %4786  ;;  %5384 = vst.msk [vmem:[#allocation2 + $0x3c] sm:$0xf] %vm1747_vm4, %v5376_v56  ;;  %v5441_v54 = vrot.slane %v5439_v40, 5 }
 0x41b   :  { %v6021_v52 = vrot.slane %v6019_v13, 5  ;;  %v5558_v20 = vld [vmem:[#allocation4 + $0x84] sm:$0x1]  ;;  %v5395_v38 = vld [vmem:[#allocation4 + $0x78] sm:$0xf] }
 0x41c   :  { %v6212_v5 = vsel %vm8095_vm3, %v6721_v58, %v6211_v53  ;;  %v5697_v21 = vld [vmem:[#allocation4 + $0x78] sm:$0xf]  ;;  %v5859_v7 = vld [vmem:[#allocation4 + $0x80] sm:$0xe]  ;;  %v5702_v40 = vld [vmem:[#allocation4 + $0x8c] sm:$0x1] }
 0x41d   :  { %5671 = vrot.lane.b32.xlu1 %v5648_v44, %s6913_s29  ;;  %v5949_v44 = vld [vmem:[#allocation4 + $0x80] sm:$0xf]  ;;  %v5374_v1 = vld [vmem:[#allocation4 + $0x78] sm:$0xf]  ;;  %v6004_v19 = vld [vmem:[#allocation4 + $0x8c] sm:$0x1] }
 0x41e   :  { %5521 = vrot.lane.b32.xlu0 %v5470_v57, %s6909_s26  ;;  %v6015_v57 = vrot.slane %v6013_v51, 5  ;;  %v5795_v51 = vrot.slane %v5793_v18, 5  ;;  %5382 = vst.msk [vmem:[#allocation2 + $0x34] sm:$0xf] %vm1747_vm4, %v5374_v1  ;;  %v5472_v47 = vshrl.u32 %v5395_v38, 16  ;;  %v5475_v46 = vshll.u32 %v5395_v38, 16 }
 0x41f   :  { %v5762_v18 = vshrl.u32 %v5697_v21, 16 }
 0x420   :  { %v6016_v42 = vor.u32 %v6015_v57, %v6012_v62  ;;  %v5912_v62 = vsel %vm8095_vm3, %v6714_v28, %v5911_v59  ;;  %v5442_v57 = vsel %vm7002_vm2, %v5437_v55, %v5441_v54  ;;  %v5796_v58 = vor.u32 %v5795_v51, %v5792_v9  ;;  %v5375_v59 = vld [vmem:[#allocation4 + $0x80] sm:$0xf] }
 0x421   :  { %5619 = vrot.lane.b32.xlu1 %v5600_v33, %s6911_s13  ;;  %v5726_v33 = vor.u32 %v5725_v49, %v5722_v50  ;;  %v5506_v50 = vor.u32 %v5505_v48, %v5502_v35  ;;  %v6705_v49 = vrot.slane %v9379_v34, 9  ;;  %v5799_v28 = vshll.u32 %v5702_v40, 16  ;;  %v5999_v48 = vld [vmem:[#allocation4 + $0x78] sm:$0xf]  ;;  %v6161_v51 = vld [vmem:[#allocation4 + $0x80] sm:$0xe] }
 0x422   :  { %5921 = vrot.lane.b32.xlu0 %v5900_v0, %s6920_s12  ;;  %v5729_v0 = vshll.u32 %v5692_v4, 16  ;;  %v9384_v4 = vpop.permute.xlu1 %5046  ;;  %v6017_v3 = vrot.slane %v6016_v42, 4  ;;  %v5797_v34 = vrot.slane %v5796_v58, 4  ;;  %v6089_v9 = vshll.u32 %v6004_v19, 16  ;;  %5383 = vst.msk [vmem:[#allocation2 + $0x38] sm:$0xf] %vm1747_vm4, %v5375_v59 }
 0x423   :  { %v5727_v36 = vrot.slane %v5726_v33, 4  ;;  %v5765_v33 = vshll.u32 %v5697_v21, 16  ;;  %v5507_v13 = vrot.slane %v5506_v50, 4  ;;  %v5477_v54 = vrot.slane %v5475_v46, 5  ;;  %v5396_v19 = vld [vmem:[#allocation4 + $0x7c] sm:$0x1] }
 0x424   :  { %v5731_v29 = vrot.slane %v5729_v0, 5  ;;  %v6022_v35 = vsel %vm7002_vm2, %v6017_v3, %v6021_v52  ;;  %v6052_v3 = vshrl.u32 %v5999_v48, 16  ;;  %v6055_v50 = vshll.u32 %v5999_v48, 16 }
 0x425   :  { %5823 = vrot.lane.b32.xlu1 %v5760_v37, %s6916_s21  ;;  %v6080_v37 = vshrl.u32 %v6003_v26, 16  ;;  %v6719_v40 = vrot.slane %v6161_v51, 9 }
 0x426   :  { %6125 = vrot.lane.b32.xlu0 %v6050_v17, %s6918_s9  ;;  %v6083_v17 = vshll.u32 %v6003_v26, 16  ;;  %v5603_v26 = vrot.slane %v5558_v20, 5  ;;  %v5732_v42 = vsel %vm7002_vm2, %v5727_v36, %v5731_v29  ;;  %v5764_v36 = vrot.slane %v5762_v18, 4 }
 0x427   :  { %v6082_v53 = vrot.slane %v6080_v37, 4  ;;  %v6162_v37 = vld [vmem:[#allocation4 + $0x84] sm:$0x1]  ;;  %v5767_v29 = vrot.slane %v5765_v33, 5  ;;  %v5698_v33 = vld [vmem:[#allocation4 + $0x7c] sm:$0x1] }
 0x428   :  { %v6085_v43 = vrot.slane %v6083_v17, 5  ;;  %v5474_v17 = vrot.slane %v5472_v47, 4  ;;  %v6203_v58 = vrot.slane %v6162_v37, 5 }
 0x429   :  { %6223 = vrot.lane.b32.xlu1 %v6200_v39, %s6919_s17  ;;  %v5511_v39 = vrot.slane %v5509_v22, 5  ;;  %v5768_v47 = vor.u32 %v5767_v29, %v5764_v36 }
 0x42a   :  { %5969 = vrot.lane.b32.xlu0 %v5949_v44, %s6917_s0  ;;  %v5860_v44 = vld [vmem:[#allocation4 + $0x84] sm:$0x1]  ;;  %v6086_v56 = vor.u32 %v6085_v43, %v6082_v53  ;;  %v5703_v53 = vld [vmem:[#allocation4 + $0x90] sm:$0xf]  ;;  %v5397_v43 = vld [vmem:[#allocation4 + $0x80] sm:$0xf]  ;;  %v6204_v59 = vsel %vm8095_vm3, %v6719_v40, %v6203_v58 }
 0x42b   :  { %v5903_v22 = vrot.slane %v5860_v44, 5  ;;  %v6091_v44 = vrot.slane %v6089_v9, 5  ;;  %v5486_v48 = vshrl.u32 %v5397_v43, 16  ;;  %v6006_v9 = vld [vmem:[#allocation4 + $0x94] sm:$0x1] }
 0x42d   :  { %5667 = vrot.lane.b32.xlu1 %v5646_v24, %s6913_s29  ;;  %v6712_v24 = vrot.slane %v5859_v7, 9  ;;  %v5801_v7 = vrot.slane %v5799_v28, 5 }
 0x42e   :  { %6229 = vrot.lane.b32.xlu0 %v6212_v5, %s6919_s17  ;;  %v6005_v5 = vld [vmem:[#allocation4 + $0x90] sm:$0xf] }
 0x42f   :  { %v6094_v38 = vshrl.u32 %v6005_v5, 16  ;;  %v6097_v21 = vshll.u32 %v6005_v5, 16  ;;  %v5904_v1 = vsel %vm8095_vm3, %v6712_v24, %v5903_v22  ;;  %v5481_v22 = vshll.u32 %v5396_v19, 16 }
 0x431   :  { %5927 = vrot.lane.b32.xlu1 %v5912_v62, %s6920_s12  ;;  %v5512_v62 = vsel %vm7002_vm2, %v5507_v13, %v5511_v39  ;;  %v6087_v39 = vrot.slane %v6086_v56, 4  ;;  %v6054_v13 = vrot.slane %v6052_v3, 4  ;;  %v6096_v24 = vrot.slane %v6094_v38, 4  ;;  %v6000_v56 = vld [vmem:[#allocation4 + $0x7c] sm:$0x1] }
 0x432   :  { %5517 = vrot.lane.b32.xlu0 %v5442_v57, %s6909_s26  ;;  %v9394_v55 = vpop.permute.xlu1 %5963  ;;  %v5604_v57 = vsel %vm8095_vm3, %v6705_v49, %v5603_v26  ;;  %v5802_v49 = vsel %vm7002_vm2, %v5797_v34, %v5801_v7  ;;  %v6057_v26 = vrot.slane %v6055_v50, 5  ;;  %v6099_v28 = vrot.slane %v6097_v21, 5 }
 0x433   :  { %v9396_v0 = vpop.permute.xlu0 %5661  ;;  %v6092_v5 = vsel %vm7002_vm2, %v6087_v39, %v6091_v44  ;;  %v5771_v34 = vshll.u32 %v5698_v33, 16  ;;  %v5488_v50 = vrot.slane %v5486_v48, 4  ;;  %v6061_v21 = vshll.u32 %v6000_v56, 16  ;;  %v5699_v33 = vld [vmem:[#allocation4 + $0x80] sm:$0xf] }
 0x434   :  { %v6058_v36 = vor.u32 %v6057_v26, %v6054_v13  ;;  %v6100_v29 = vor.u32 %v6099_v28, %v6096_v24  ;;  %v4671_v24 = vld [vmem:[#allocation4 + $0x1c] sm:$0x1]  ;;  %v6001_v28 = vld [vmem:[#allocation4 + $0x80] sm:$0xf]  ;;  %v4668_v48 = vld [vmem:[#allocation4 + $0x10] sm:$0xe] }
 0x435   :  { %5819 = vrot.lane.b32.xlu1 %v5732_v42, %s6916_s21  ;;  %v5804_v42 = vshrl.u32 %v5703_v53, 16  ;;  %v5773_v7 = vrot.slane %v5771_v34, 5  ;;  %v6063_v13 = vrot.slane %v6061_v21, 5  ;;  %v5776_v56 = vshrl.u32 %v5699_v33, 16 }
 0x436   :  { %6121 = vrot.lane.b32.xlu0 %v6022_v35, %s6918_s9  ;;  %v4647_v52 = vpop.permute.xlu1 %4646  ;;  %v5807_v35 = vshll.u32 %v5703_v53, 16  ;;  %v6059_v44 = vrot.slane %v6058_v36, 4  ;;  %v6101_v58 = vrot.slane %v6100_v29, 4  ;;  %v5704_v53 = vld [vmem:[#allocation4 + $0x94] sm:$0x1]  ;;  %v6066_v29 = vshrl.u32 %v6001_v28, 16 }
 0x437   :  { %v9405_v20 = vpop.permute.xlu0 %4740  ;;  %4663 = vst.msk [vmem:[#allocation2 + $0x1c] sm:$0xf] %vm2283_vm5, %v4647_v52  ;;  %v5806_v52 = vrot.slane %v5804_v42, 4  ;;  %v5813_v42 = vshll.u32 %v5704_v53, 16  ;;  %v6677_v21 = vrot.slane %v4668_v48, 9 }
 0x438   :  { %4759 = vst.msk [vmem:[#allocation2 + $0x1c] sm:$0xf] %vm2383_vm10, %v9332_v32  ;;  %v5478_v32 = vor.u32 %v5477_v54, %v5474_v17  ;;  %v5769_v54 = vrot.slane %v5768_v47, 4  ;;  %v5809_v3 = vrot.slane %v5807_v35, 5  ;;  %v4670_v47 = vld [vmem:[#allocation4 + $0x18] sm:$0xe] }
 0x439   :  { %5527 = vrot.lane.b32.xlu1 %v5512_v62, %s6909_s26  ;;  %4807 = vst.msk [vmem:[#allocation2 + $0x1c] sm:$0xf] %vm2432_vm11, %v9353_v30  ;;  %v5489_v30 = vshll.u32 %v5397_v43, 16  ;;  %v6103_v62 = vshll.u32 %v6006_v9, 16  ;;  %v5398_v43 = vld [vmem:[#allocation4 + $0x84] sm:$0x1] }
 0x43a   :  { %5621 = vrot.lane.b32.xlu0 %v5604_v57, %s6911_s13  ;;  %v9422_v46 = vpop.permute.xlu1 %5042  ;;  %v5479_v17 = vrot.slane %v5478_v32, 4  ;;  %v5483_v57 = vrot.slane %v5481_v22, 5  ;;  %v5774_v39 = vsel %vm7002_vm2, %v5769_v54, %v5773_v7  ;;  %v5810_v19 = vor.u32 %v5809_v3, %v5806_v52  ;;  %v4812_v3 = vld [vmem:[#allocation4 + $0x18] sm:$0xf] }
 0x43b   :  { %v9424_v18 = vpop.permute.xlu0 %4948  ;;  %v5491_v38 = vrot.slane %v5489_v30, 5  ;;  %v6105_v26 = vrot.slane %v6103_v62, 5  ;;  %v5495_v35 = vshll.u32 %v5398_v43, 16  ;;  %v4669_v30 = vld [vmem:[#allocation4 + $0x14] sm:$0x1]  ;;  %v6064_v22 = vsel %vm7002_vm2, %v6059_v44, %v6063_v13 }
 0x43c   :  { %v5779_v9 = vshll.u32 %v5699_v33, 16  ;;  %v5811_v54 = vrot.slane %v5810_v19, 4  ;;  %v6069_v52 = vshll.u32 %v6001_v28, 16  ;;  %v4706_v62 = vrot.slane %v4669_v30, 5 }
 0x43d   :  { %5923 = vrot.lane.b32.xlu1 %v5904_v1, %s6920_s12  ;;  %v5492_v32 = vor.u32 %v5491_v38, %v5488_v50  ;;  %v6106_v34 = vsel %vm7002_vm2, %v6101_v58, %v6105_v26  ;;  %v6678_v50 = vrot.slane %v4670_v47, 9  ;;  %v4710_v38 = vrot.slane %v4671_v24, 5 }
 0x43e   :  { %5829 = vrot.lane.b32.xlu0 %v5802_v49, %s6916_s21  ;;  %v9432_v51 = vpop.permute.xlu1 %5250  ;;  %v5484_v49 = vsel %vm7002_vm2, %v5479_v17, %v5483_v57  ;;  %v4814_v17 = vld [vmem:[#allocation4 + $0x20] sm:$0xf]  ;;  %v5815_v57 = vrot.slane %v5813_v42, 5  ;;  %v5497_v7 = vrot.slane %v5495_v35, 5  ;;  %v5778_v43 = vrot.slane %v5776_v56, 4 }
 0x43f   :  { %v9434_v37 = vpop.permute.xlu0 %5344  ;;  %v5493_v36 = vrot.slane %v5492_v32, 4  ;;  %v4870_v44 = vshll.u32 %v4814_v17, 16  ;;  %v4856_v19 = vshll.u32 %v4812_v3, 16  ;;  %v6068_v33 = vrot.slane %v6066_v29, 4  ;;  %v6002_v35 = vld [vmem:[#allocation4 + $0x84] sm:$0x1] }
 0x440   :  { %v5816_v32 = vsel %vm7002_vm2, %v5811_v54, %v5815_v57  ;;  %v6071_v13 = vrot.slane %v6069_v52, 5  ;;  %v6075_v56 = vshll.u32 %v6002_v35, 16  ;;  %v4815_v29 = vld [vmem:[#allocation4 + $0x24] sm:$0x1]  ;;  %v5118_v57 = vld [vmem:[#allocation4 + $0x28] sm:$0xf] }
 0x441   :  { %6131 = vrot.lane.b32.xlu1 %v6092_v5, %s6918_s9  ;;  %v5498_v47 = vsel %vm7002_vm2, %v5493_v36, %v5497_v7  ;;  %v4872_v24 = vrot.slane %v4870_v44, 5  ;;  %v4858_v30 = vrot.slane %v4856_v19, 5  ;;  %v4763_v36 = vld [vmem:[#allocation4 + $0x20] sm:$0xf] }
 0x442   :  { %6225 = vrot.lane.b32.xlu0 %v6204_v59, %s6919_s17  ;;  %v9438_v40 = vpop.permute.xlu1 %5615  ;;  %v5116_v7 = vld [vmem:[#allocation4 + $0x20] sm:$0xf]  ;;  %v6077_v44 = vrot.slane %v6075_v56, 5 }
 0x443   :  { %v5658_v1 = vpop.permute.xlu0 %5657  ;;  %v5157_v35 = vshrl.u32 %v5116_v7, 16 }
 0x444   :  { %5681 = vst.msk [vmem:[#allocation2 + $0x20] sm:$0xf] %vm2432_vm11, %v5658_v1  ;;  %v4867_v1 = vshrl.u32 %v4814_v17, 16 }
 0x445   :  { %5523 = vrot.lane.b32.xlu1 %v5484_v49, %s6909_s26  ;;  %v5781_v49 = vrot.slane %v5779_v9, 5  ;;  %v6921_v9 = vmov 0.0  }
 0x446   :  { %5825 = vrot.lane.b32.xlu0 %v5774_v39, %s6916_s21  ;;  %v9447_v5 = vpop.permute.xlu1 %6219  ;;  %v4853_v39 = vshrl.u32 %v4812_v3, 16  ;;  %v4869_v26 = vrot.slane %v4867_v1, 4  ;;  %6845 = vmatprep.subr.bf16.mxu0 %v6921_v9  ;;  %v4813_v3 = vld [vmem:[#allocation4 + $0x1c] sm:$0x1] }
 0x447   :  { %v9449_v59 = vpop.permute.xlu0 %5917 }
 0x448   :  { %v4855_v48 = vrot.slane %v4853_v39, 4  ;;  %v4873_v52 = vor.u32 %v4872_v24, %v4869_v26 }
 0x449   :  { %6127 = vrot.lane.b32.xlu1 %v6064_v22, %s6918_s9  ;;  %v4707_v22 = vsel %vm8095_vm3, %v6677_v21, %v4706_v62 }
 0x44a   :  { %6133 = vrot.lane.b32.xlu0 %v6106_v34, %s6918_s9  ;;  %v4643_v58 = vpop.permute.xlu1 %4642  ;;  %v6072_v34 = vor.u32 %v6071_v13, %v6068_v33  ;;  %v4874_v19 = vrot.slane %v4873_v52, 4  ;;  %v5171_v33 = vshrl.u32 %v5118_v57, 16  ;;  %v5174_v13 = vshll.u32 %v5118_v57, 16 }
 0x44b   :  { %v4945_v53 = vpop.permute.xlu0 %4944  ;;  %4661 = vst.msk [vmem:[#allocation2 + $0x14] sm:$0xf] %vm2283_vm5, %v4643_v58  ;;  %v4876_v58 = vshll.u32 %v4815_v29, 16 }
 0x44c   :  { %4964 = vst.msk [vmem:[#allocation2 + $0x10] sm:$0xf] %vm2593_vm13, %v4945_v53  ;;  %v6073_v62 = vrot.slane %v6072_v34, 4  ;;  %v4862_v53 = vshll.u32 %v4813_v3, 16  ;;  %v5173_v29 = vrot.slane %v5171_v33, 4  ;;  %v5176_v52 = vrot.slane %v5174_v13, 5 }
 0x44d   :  { %4757 = vst.msk [vmem:[#allocation2 + $0x14] sm:$0xf] %vm2383_vm10, %v9363_v60  ;;  %5831 = vrot.lane.b32.xlu1 %v5816_v32, %s6916_s21  ;;  %v4711_v60 = vsel %vm8095_vm3, %v6678_v50, %v4710_v38  ;;  %v4859_v50 = vor.u32 %v4858_v30, %v4855_v48  ;;  %v4762_v38 = vld [vmem:[#allocation4 + $0x18] sm:$0xf]  ;;  %v5160_v48 = vshll.u32 %v5116_v7, 16  ;;  %v4878_v30 = vrot.slane %v4876_v58, 5 }
 0x44e   :  { %5060 = vst.msk [vmem:[#allocation2 + $0x10] sm:$0xf] %vm2690_vm14, %v9320_v63  ;;  %5525 = vrot.lane.b32.xlu0 %v5498_v47, %s6909_s26  ;;  %v9473_v28 = vpop.permute.xlu1 %5663  ;;  %v5700_v63 = vld [vmem:[#allocation4 + $0x84] sm:$0x1]  ;;  %v6078_v24 = vsel %vm7002_vm2, %v6073_v62, %v6077_v44  ;;  %v4504_v3 = vld [vmem:[#allocation4] sm:$0xf]  ;;  %v5177_v58 = vor.u32 %v5176_v52, %v5173_v29 }
 0x44f   :  { %4805 = vst.msk [vmem:[#allocation2 + $0x14] sm:$0xf] %vm2432_vm11, %v9373_v23  ;;  %v9475_v42 = vpop.permute.xlu0 %5965  ;;  %v5782_v23 = vor.u32 %v5781_v49, %v5778_v43  ;;  %v4974_v43 = vld [vmem:[#allocation4 + $0x20] sm:$0xe]  ;;  %v4860_v32 = vrot.slane %v4859_v50, 4  ;;  %v4521_v57 = vshrl.u32 %v4504_v3, 16 }
 0x450   :  { %5108 = vst.msk [vmem:[#allocation2 + $0x10] sm:$0xf] %vm2739_vm15, %v9324_v12  ;;  %v5785_v12 = vshll.u32 %v5700_v63, 16  ;;  %v4975_v47 = vld [vmem:[#allocation4 + $0x24] sm:$0x1]  ;;  %v4524_v7 = vshll.u32 %v4504_v3, 16 }
 0x451   :  { %4734 = vrot.lane.b32.xlu1 %v4711_v60, %s6911_s13  ;;  %v5783_v21 = vrot.slane %v5782_v23, 4  ;;  %v4972_v60 = vld [vmem:[#allocation4 + $0x18] sm:$0xe]  ;;  %v4973_v63 = vld [vmem:[#allocation4 + $0x1c] sm:$0x1]  ;;  %v6686_v23 = vrot.slane %v4974_v43, 9 }
 0x452   :  { %4732 = vrot.lane.b32.xlu0 %v4707_v22, %s6911_s13  ;;  %v9484_v17 = vpop.permute.xlu1 %5611  ;;  %v5787_v1 = vrot.slane %v5785_v12, 5  ;;  %v4864_v22 = vrot.slane %v4862_v53, 5  ;;  %v5014_v34 = vrot.slane %v4975_v47, 5  ;;  %v5119_v62 = vld [vmem:[#allocation4 + $0x2c] sm:$0x1] }
 0x453   :  { %v9486_v54 = vpop.permute.xlu0 %5913  ;;  %v5117_v53 = vld [vmem:[#allocation4 + $0x24] sm:$0x1]  ;;  %v5180_v47 = vshll.u32 %v5119_v62, 16  ;;  %v5067_v33 = vld [vmem:[#allocation4 + $0x28] sm:$0xf] }
 0x454   :  { %v5788_v26 = vsel %vm7002_vm2, %v5783_v21, %v5787_v1  ;;  %v4865_v50 = vsel %vm7002_vm2, %v4860_v32, %v4864_v22  ;;  %v4506_v21 = vld [vmem:[#allocation4 + $0x8] sm:$0xf]  ;;  %v5066_v13 = vld [vmem:[#allocation4 + $0x20] sm:$0xf]  ;;  %v5178_v22 = vrot.slane %v5177_v58, 4 }
 0x455   :  { %4782 = vrot.lane.b32.xlu1 %v4763_v36, %s6913_s29  ;;  %v6685_v36 = vrot.slane %v4972_v60, 9  ;;  %v4538_v32 = vshll.u32 %v4506_v21, 16  ;;  %v4523_v60 = vrot.slane %v4521_v57, 4  ;;  %v5182_v52 = vrot.slane %v5180_v47, 5  ;;  %v5276_v3 = vld [vmem:[#allocation4 + $0x20] sm:$0xe] }
 0x456   :  { %4780 = vrot.lane.b32.xlu0 %v4762_v38, %s6913_s29  ;;  %v4951_v49 = vpop.permute.xlu1 %4950  ;;  %v5159_v38 = vrot.slane %v5157_v35, 4  ;;  %v4488_v35 = vld [vmem:[#allocation4] sm:$0xf]  ;;  %v4808_v62 = vld [vmem:[#allocation4 + $0x8] sm:$0xf]  ;;  %v6693_v58 = vrot.slane %v5276_v3, 9 }
 0x457   :  { %v9490_v39 = vpop.permute.xlu0 %5252  ;;  %4967 = vst.msk [vmem:[#allocation2 + $0x1c] sm:$0xf] %vm2593_vm13, %v4951_v49  ;;  %v4540_v29 = vrot.slane %v4538_v32, 5  ;;  %v4828_v47 = vshll.u32 %v4808_v62, 16 }
 0x458   :  { %5063 = vst.msk [vmem:[#allocation2 + $0x1c] sm:$0xf] %vm2690_vm14, %v9384_v4  ;;  %v5010_v4 = vrot.slane %v4973_v63, 5  ;;  %v4526_v63 = vrot.slane %v4524_v7, 5 }
 0x459   :  { %5827 = vrot.lane.b32.xlu1 %v5788_v26, %s6916_s21  ;;  %5111 = vst.msk [vmem:[#allocation2 + $0x1c] sm:$0xf] %vm2739_vm15, %v9217_v31  ;;  %v4879_v31 = vsel %vm7002_vm2, %v4874_v19, %v4878_v30  ;;  %v4535_v19 = vshrl.u32 %v4506_v21, 16  ;;  %v5166_v26 = vshll.u32 %v5117_v53, 16  ;;  %v4507_v21 = vld [vmem:[#allocation4 + $0xc] sm:$0x1] }
 0x45a   :  { %6129 = vrot.lane.b32.xlu0 %v6078_v24, %s6918_s9  ;;  %5271 = vst.msk [vmem:[#allocation2 + $0x1c] sm:$0xf] %vm2900_vm0, %v9229_v16  ;;  %v9505_v12 = vpop.permute.xlu1 %5659  ;;  %v5162_v16 = vrot.slane %v5160_v48, 5  ;;  %v5011_v43 = vsel %vm8095_vm3, %v6685_v36, %v5010_v4  ;;  %v5278_v24 = vld [vmem:[#allocation4 + $0x28] sm:$0xe] }
 0x45b   :  { %v9507_v56 = vpop.permute.xlu0 %5961  ;;  %5367 = vst.msk [vmem:[#allocation2 + $0x1c] sm:$0xf] %vm2997_vm1, %v9246_v45  ;;  %v5015_v45 = vsel %vm8095_vm3, %v6686_v23, %v5014_v34  ;;  %v4505_v23 = vld [vmem:[#allocation4 + $0x4] sm:$0x1]  ;;  %v5279_v36 = vld [vmem:[#allocation4 + $0x2c] sm:$0x1] }
 0x45c   :  { %v5163_v49 = vor.u32 %v5162_v16, %v5159_v38  ;;  %4496 = vst.msk [vmem:[#allocation2] sm:$0xf] %vm1747_vm4, %v4488_v35  ;;  %v4537_v4 = vrot.slane %v4535_v19, 4  ;;  %v4527_v38 = vor.u32 %v4526_v63, %v4523_v60  ;;  %v4530_v16 = vshll.u32 %v4505_v23, 16  ;;  %v4810_v19 = vld [vmem:[#allocation4 + $0x10] sm:$0xf] }
 0x45d   :  { %4942 = vrot.lane.b32.xlu1 %v4879_v31, %s6916_s21  ;;  %v5277_v31 = vld [vmem:[#allocation4 + $0x24] sm:$0x1]  ;;  %v6694_v7 = vrot.slane %v5278_v24, 9  ;;  %v4666_v60 = vld [vmem:[#allocation4 + $0x8] sm:$0xe]  ;;  %v4839_v63 = vshrl.u32 %v4810_v19, 16 }
 0x45e   :  { %4940 = vrot.lane.b32.xlu0 %v4865_v50, %s6916_s21  ;;  %v9517_v1 = vpop.permute.xlu1 %5919  ;;  %v5164_v34 = vrot.slane %v5163_v49, 4  ;;  %v5168_v50 = vrot.slane %v5166_v26, 5  ;;  %v5314_v53 = vrot.slane %v5277_v31, 5  ;;  %v4825_v49 = vshrl.u32 %v4808_v62, 16  ;;  %v4665_v26 = vld [vmem:[#allocation4 + $0x4] sm:$0x1] }
 0x45f   :  { %v9519_v44 = vpop.permute.xlu0 %5617  ;;  %v4532_v32 = vrot.slane %v4530_v16, 5  ;;  %v4842_v35 = vshll.u32 %v4810_v19, 16  ;;  %v4841_v3 = vrot.slane %v4839_v63, 4  ;;  %v4809_v31 = vld [vmem:[#allocation4 + $0xc] sm:$0x1]  ;;  %vm6922_vm4 = vmmov 0  }
 0x460   :  { %v4968_v19 = vld [vmem:[#allocation4 + $0x8] sm:$0xe]  ;;  %6861 = vmatprep.mubr.msk.bf16.mxu0 %vm6922_vm4, %v6921_v9 }
 0x461   :  { %5038 = vrot.lane.b32.xlu1 %v5015_v45, %s6920_s12  ;;  %v5318_v45 = vrot.slane %v5279_v36, 5  ;;  %v4830_v36 = vrot.slane %v4828_v47, 5 }
 0x462   :  { %5036 = vrot.lane.b32.xlu0 %v5011_v43, %s6920_s12  ;;  %v4947_v48 = vpop.permute.xlu1 %4946  ;;  %v4541_v43 = vor.u32 %v4540_v29, %v4537_v4  ;;  %v6676_v4 = vrot.slane %v4666_v60, 9  ;;  %v6683_v60 = vrot.slane %v4968_v19, 9 }
 0x463   :  { %v9527_v30 = vpop.permute.xlu0 %6221  ;;  %4965 = vst.msk [vmem:[#allocation2 + $0x14] sm:$0xf] %vm2593_vm13, %v4947_v48  ;;  %v4827_v48 = vrot.slane %v4825_v49, 4 }
 0x464   :  { %5061 = vst.msk [vmem:[#allocation2 + $0x14] sm:$0xf] %vm2690_vm14, %v9422_v46  ;;  %v5183_v46 = vsel %vm7002_vm2, %v5178_v22, %v5182_v52  ;;  %v4542_v24 = vrot.slane %v4541_v43, 4 }
 0x465   :  { %5086 = vrot.lane.b32.xlu1 %v5067_v33, %s6917_s0  ;;  %5109 = vst.msk [vmem:[#allocation2 + $0x14] sm:$0xf] %vm2739_vm15, %v9267_v61  ;;  %v5169_v61 = vsel %vm7002_vm2, %v5164_v34, %v5168_v50  ;;  %v4698_v34 = vrot.slane %v4665_v26, 5 }
 0x466   :  { %5084 = vrot.lane.b32.xlu0 %v5066_v13, %s6917_s0  ;;  %5269 = vst.msk [vmem:[#allocation2 + $0x14] sm:$0xf] %vm2900_vm0, %v9432_v51  ;;  %v4544_v51 = vshll.u32 %v4507_v21, 16  ;;  %v4664_v13 = vld [vmem:[#allocation4] sm:$0xe] }
 0x467   :  { %v4645_v57 = vpop.permute.xlu0 %4644  ;;  %5365 = vst.msk [vmem:[#allocation2 + $0x14] sm:$0xf] %vm2997_vm1, %v9345_v14  ;;  %v4528_v14 = vrot.slane %v4527_v38, 4  ;;  %v6675_v23 = vrot.slane %v4664_v13, 9  ;;  %v4811_v21 = vld [vmem:[#allocation4 + $0x14] sm:$0x1] }
 0x468   :  { %4662 = vst.msk [vmem:[#allocation2 + $0x18] sm:$0xf] %vm2283_vm5, %v4645_v57  ;;  %v4834_v57 = vshll.u32 %v4809_v31, 16  ;;  %v4848_v43 = vshll.u32 %v4811_v21, 16  ;;  %v5115_v31 = vld [vmem:[#allocation4 + $0x1c] sm:$0x1] }
 0x469   :  { %4758 = vst.msk [vmem:[#allocation2 + $0x18] sm:$0xf] %vm2383_vm10, %v9405_v20  ;;  %5246 = vrot.lane.b32.xlu1 %v5183_v46, %s6918_s9  ;;  %v5319_v20 = vsel %vm8095_vm3, %v6694_v7, %v5318_v45  ;;  %v4533_v22 = vsel %vm7002_vm2, %v4528_v14, %v4532_v32  ;;  %v4699_v50 = vsel %vm8095_vm3, %v6675_v23, %v4698_v34  ;;  %v5112_v7 = vld [vmem:[#allocation4 + $0x10] sm:$0xf]  ;;  %v5114_v45 = vld [vmem:[#allocation4 + $0x18] sm:$0xf] }
 0x46a   :  { %5244 = vrot.lane.b32.xlu0 %v5169_v61, %s6918_s9  ;;  %4806 = vst.msk [vmem:[#allocation2 + $0x18] sm:$0xf] %vm2432_vm11, %v9269_v15  ;;  %v5315_v15 = vsel %vm8095_vm3, %v6693_v58, %v5314_v53  ;;  %v4760_v61 = vld [vmem:[#allocation4 + $0x8] sm:$0xf]  ;;  %v4761_v58 = vld [vmem:[#allocation4 + $0x10] sm:$0xf] }
 0x46b   :  { %4966 = vst.msk [vmem:[#allocation2 + $0x18] sm:$0xf] %vm2593_vm13, %v9424_v18  ;;  %v5249_v33 = vpop.permute.xlu0 %5248  ;;  %v4667_v18 = vld [vmem:[#allocation4 + $0xc] sm:$0x1]  ;;  %v5129_v32 = vshrl.u32 %v5112_v7, 16  ;;  %v4836_v47 = vrot.slane %v4834_v57, 5 }
 0x46c   :  { %5062 = vst.msk [vmem:[#allocation2 + $0x18] sm:$0xf] %vm2690_vm14, %v9294_v41  ;;  %v4546_v41 = vrot.slane %v4544_v51, 5  ;;  %v4702_v52 = vrot.slane %v4667_v18, 5  ;;  %v4969_v14 = vld [vmem:[#allocation4 + $0xc] sm:$0x1] }
 0x46d   :  { %5268 = vst.msk [vmem:[#allocation2 + $0x10] sm:$0xf] %vm2900_vm0, %v5249_v33  ;;  %5342 = vrot.lane.b32.xlu1 %v5319_v20, %s6919_s17  ;;  %v4970_v20 = vld [vmem:[#allocation4 + $0x10] sm:$0xe]  ;;  %v5143_v13 = vshrl.u32 %v5114_v45, 16  ;;  %v5146_v26 = vshll.u32 %v5114_v45, 16 }
 0x46e   :  { %5110 = vst.msk [vmem:[#allocation2 + $0x18] sm:$0xf] %vm2739_vm15, %v9302_v11  ;;  %5340 = vrot.lane.b32.xlu0 %v5315_v15, %s6919_s17  ;;  %v4547_v29 = vsel %vm7002_vm2, %v4542_v24, %v4546_v41  ;;  %v4703_v62 = vsel %vm8095_vm3, %v6676_v4, %v4702_v52  ;;  %v4850_v24 = vrot.slane %v4848_v43, 5  ;;  %v5002_v41 = vrot.slane %v4969_v14, 5  ;;  %v5065_v45 = vld [vmem:[#allocation4 + $0x18] sm:$0xf] }
 0x46f   :  { %5364 = vst.msk [vmem:[#allocation2 + $0x10] sm:$0xf] %vm2997_vm1, %v9434_v37  ;;  %v9573_v11 = vpop.permute.xlu1 %5971  ;;  %v6684_v18 = vrot.slane %v4970_v20, 9  ;;  %v5148_v4 = vrot.slane %v5146_v26, 5  ;;  %v5273_v43 = vld [vmem:[#allocation4 + $0x14] sm:$0x1] }
 0x470   :  { %5270 = vst.msk [vmem:[#allocation2 + $0x18] sm:$0xf] %vm2900_vm0, %v9490_v39  ;;  %v9575_v37 = vpop.permute.xlu0 %5669  ;;  %v4844_v39 = vrot.slane %v4842_v35, 5  ;;  %v5274_v14 = vld [vmem:[#allocation4 + $0x18] sm:$0xe] }
 0x471   :  { %5366 = vst.msk [vmem:[#allocation2 + $0x18] sm:$0xf] %vm2997_vm1, %v9334_v10  ;;  %4634 = vrot.lane.b32.xlu1 %v4547_v29, %s6909_s26  ;;  %v4831_v10 = vor.u32 %v4830_v36, %v4827_v48  ;;  %v5131_v48 = vrot.slane %v5129_v32, 4  ;;  %v5145_v36 = vrot.slane %v5143_v13, 4  ;;  %v5113_v29 = vld [vmem:[#allocation4 + $0x14] sm:$0x1] }
 0x472   :  { %4632 = vrot.lane.b32.xlu0 %v4533_v22, %s6909_s26  ;;  %v4845_v46 = vor.u32 %v4844_v39, %v4841_v3  ;;  %v5138_v21 = vshll.u32 %v5113_v29, 16  ;;  %v5275_v32 = vld [vmem:[#allocation4 + $0x1c] sm:$0x1] }
 0x473   :  { %v5520_v38 = vpop.permute.xlu1 %5519  ;;  %v4832_v53 = vrot.slane %v4831_v10, 4 }
 0x474   :  { %v9583_v16 = vpop.permute.xlu0 %5613  ;;  %5540 = vst.msk [vmem:[#allocation2 + $0x2c] sm:$0xf] %vm2283_vm5, %v5520_v38  ;;  %v4846_v33 = vrot.slane %v4845_v46, 4  ;;  %v5149_v38 = vor.u32 %v5148_v4, %v5145_v36  ;;  %v5140_v19 = vrot.slane %v5138_v21, 5 }
 0x475   :  { %5636 = vst.msk [vmem:[#allocation2 + $0x2c] sm:$0xf] %vm2383_vm10, %v9438_v40  ;;  %4730 = vrot.lane.b32.xlu1 %v4703_v62, %s6911_s13  ;;  %v5132_v40 = vshll.u32 %v5112_v7, 16  ;;  %v4837_v15 = vsel %vm7002_vm2, %v4832_v53, %v4836_v47  ;;  %v5152_v62 = vshll.u32 %v5115_v31, 16  ;;  %v5064_v7 = vld [vmem:[#allocation4 + $0x10] sm:$0xf] }
 0x476   :  { %4728 = vrot.lane.b32.xlu0 %v4699_v50, %s6911_s13  ;;  %5684 = vst.msk [vmem:[#allocation2 + $0x2c] sm:$0xf] %vm2432_vm11, %v9473_v28  ;;  %v4971_v28 = vld [vmem:[#allocation4 + $0x14] sm:$0x1]  ;;  %v4851_v23 = vsel %vm7002_vm2, %v4846_v33, %v4850_v24  ;;  %v5003_v50 = vsel %vm8095_vm3, %v6683_v60, %v5002_v41  ;;  %v5272_v53 = vld [vmem:[#allocation4 + $0x10] sm:$0xe] }
 0x477   :  { %v9594_v51 = vpop.permute.xlu1 %5915  ;;  %v5134_v22 = vrot.slane %v5132_v40, 5  ;;  %v5006_v34 = vrot.slane %v4971_v28, 5  ;;  %v5154_v40 = vrot.slane %v5152_v62, 5  ;;  %v6691_v13 = vrot.slane %v5272_v53, 9 }
 0x478   :  { %v9596_v49 = vpop.permute.xlu0 %5821  ;;  %v5306_v28 = vrot.slane %v5273_v43, 5  ;;  %v5310_v24 = vrot.slane %v5275_v32, 5 }
 0x479   :  { %4778 = vrot.lane.b32.xlu1 %v4761_v58, %s6913_s29  ;;  %v5135_v39 = vor.u32 %v5134_v22, %v5131_v48  ;;  %v5007_v10 = vsel %vm8095_vm3, %v6684_v18, %v5006_v34  ;;  %v5150_v58 = vrot.slane %v5149_v38, 4 }
 0x47a   :  { %4776 = vrot.lane.b32.xlu0 %v4760_v61, %s6913_s29  ;;  %v5307_v27 = vsel %vm8095_vm3, %v6691_v13, %v5306_v28 }
 0x47b   :  { %v9602_v63 = vpop.permute.xlu1 %6123  ;;  %v5136_v61 = vrot.slane %v5135_v39, 4  ;;  %v5155_v26 = vsel %vm7002_vm2, %v5150_v58, %v5154_v40 }
 0x47c   :  { %v9604_v35 = vpop.permute.xlu0 %6217 }
 0x47d   :  { %4938 = vrot.lane.b32.xlu1 %v4851_v23, %s6916_s21  ;;  %v5141_v20 = vsel %vm7002_vm2, %v5136_v61, %v5140_v19 }
 0x47e   :  { %4936 = vrot.lane.b32.xlu0 %v4837_v15, %s6916_s21  ;;  %v6692_v15 = vrot.slane %v5274_v14, 9 }
 0x47f   :  { %v9610_v52 = vpop.permute.xlu1 %5967 }
 0x480   :  { %v5666_v3 = vpop.permute.xlu0 %5665 }
 0x481   :  { %5034 = vrot.lane.b32.xlu1 %v5007_v10, %s6920_s12 }
 0x482   :  { %5032 = vrot.lane.b32.xlu0 %v5003_v50, %s6920_s12 }
 0x483   :  { %v9618_v57 = vpop.permute.xlu1 %5623 }
 0x484   :  { %v9620_v46 = vpop.permute.xlu0 %5925 }
 0x485   :  { %5082 = vrot.lane.b32.xlu1 %v5065_v45, %s6917_s0 }
 0x486   :  { %5080 = vrot.lane.b32.xlu0 %v5064_v7, %s6917_s0 }
 0x487   :  { %v9624_v47 = vpop.permute.xlu1 %6227 }
 0x488   :  { %v5818_v33 = vpop.permute.xlu0 %5817 }
 0x489   :  { %5841 = vst.msk [vmem:[#allocation2 + $0x20] sm:$0xf] %vm2593_vm13, %v5818_v33  ;;  %5242 = vrot.lane.b32.xlu1 %v5155_v26, %s6918_s9 }
 0x48a   :  { %5937 = vst.msk [vmem:[#allocation2 + $0x20] sm:$0xf] %vm2690_vm14, %v9486_v54  ;;  %5240 = vrot.lane.b32.xlu0 %v5141_v20, %s6918_s9  ;;  %v5311_v54 = vsel %vm8095_vm3, %v6692_v15, %v5310_v24  ;;  %v6901_v15 = vld [vmem:[#allocation2 + $0x18] sm:$0xff]  }
 0x48b   :  { %5985 = vst.msk [vmem:[#allocation2 + $0x20] sm:$0xf] %vm2739_vm15, %v9507_v56  ;;  %v5516_v60 = vpop.permute.xlu1 %5515 }
 0x48c   :  { %v9637_v41 = vpop.permute.xlu0 %5973  ;;  %5538 = vst.msk [vmem:[#allocation2 + $0x24] sm:$0xf] %vm2283_vm5, %v5516_v60 }
 0x48d   :  { %5634 = vst.msk [vmem:[#allocation2 + $0x24] sm:$0xf] %vm2383_vm10, %v9484_v17  ;;  %5338 = vrot.lane.b32.xlu1 %v5311_v54, %s6919_s17 }
 0x48e   :  { %5336 = vrot.lane.b32.xlu0 %v5307_v27, %s6919_s17  ;;  %5682 = vst.msk [vmem:[#allocation2 + $0x24] sm:$0xf] %vm2432_vm11, %v9505_v12 }
 0x48f   :  { %v5672_v56 = vpop.permute.xlu1 %5671 }
 0x490   :  { %v5522_v18 = vpop.permute.xlu0 %5521 }
 0x491   :  { %5541 = vst.msk [vmem:[#allocation2 + $0x30] sm:$0xf] %vm2283_vm5, %v5522_v18 }
 0x492   :  { %5637 = vst.msk [vmem:[#allocation2 + $0x30] sm:$0xf] %vm2383_vm10, %v9519_v44  ;;  %6269 = vperm.xlu0 %6882, %v6266_v2  }
 0x493   :  { %5685 = vst.msk [vmem:[#allocation2 + $0x30] sm:$0xf] %vm2432_vm11, %v5666_v3  ;;  %v5620_v17 = vpop.permute.xlu1 %5619 }
 0x494   :  { %v5922_v48 = vpop.permute.xlu0 %5921 }
 0x497   :  { %v5824_v22 = vpop.permute.xlu1 %5823 }
 0x498   :  { %v6126_v23 = vpop.permute.xlu0 %6125  ;;  %5844 = vst.msk [vmem:[#allocation2 + $0x2c] sm:$0xf] %vm2593_vm13, %v5824_v22 }
 0x499   :  { %5940 = vst.msk [vmem:[#allocation2 + $0x2c] sm:$0xf] %vm2690_vm14, %v9517_v1 }
 0x49a   :  { %5988 = vst.msk [vmem:[#allocation2 + $0x2c] sm:$0xf] %vm2739_vm15, %v9610_v52 }
 0x49b   :  { %v6224_v12 = vpop.permute.xlu1 %6223 }
 0x49c   :  { %v5970_v44 = vpop.permute.xlu0 %5969 }
 0x49f   :  { %v5668_v34 = vpop.permute.xlu1 %5667 }
 0x4a0   :  { %v6230_v36 = vpop.permute.xlu0 %6229 }
 0x4a3   :  { %v5928_v4 = vpop.permute.xlu1 %5927 }
 0x4a4   :  { %v5518_v29 = vpop.permute.xlu0 %5517 }
 0x4a5   :  { %5539 = vst.msk [vmem:[#allocation2 + $0x28] sm:$0xf] %vm2283_vm5, %v5518_v29  ;;  %v6249_v29 = vld [vmem:[%s9787_s5] sm:$0xf] }
 0x4a6   :  { %5635 = vst.msk [vmem:[#allocation2 + $0x28] sm:$0xf] %vm2383_vm10, %v9583_v16 }
 0x4a7   :  { %5683 = vst.msk [vmem:[#allocation2 + $0x28] sm:$0xf] %vm2432_vm11, %v9396_v0  ;;  %v5820_v1 = vpop.permute.xlu1 %5819 }
 0x4a8   :  { %5843 = vst.msk [vmem:[#allocation2 + $0x28] sm:$0xf] %vm2593_vm13, %v9596_v49  ;;  %v6122_v3 = vpop.permute.xlu0 %6121  ;;  %5842 = vst.msk [vmem:[#allocation2 + $0x24] sm:$0xf] %vm2593_vm13, %v5820_v1 }
 0x4a9   :  { %5939 = vst.msk [vmem:[#allocation2 + $0x28] sm:$0xf] %vm2690_vm14, %v9449_v59  ;;  %5938 = vst.msk [vmem:[#allocation2 + $0x24] sm:$0xf] %vm2690_vm14, %v9594_v51 }
 0x4aa   :  { %6145 = vst.msk [vmem:[#allocation2 + $0x20] sm:$0xf] %vm2900_vm0, %v6122_v3 }
 0x4ab   :  { %5987 = vst.msk [vmem:[#allocation2 + $0x28] sm:$0xf] %vm2739_vm15, %v9475_v42  ;;  %5986 = vst.msk [vmem:[#allocation2 + $0x24] sm:$0xf] %vm2739_vm15, %v9394_v55  ;;  %v5528_v0 = vpop.permute.xlu1 %5527 }
 0x4ac   :  { %6241 = vst.msk [vmem:[#allocation2 + $0x20] sm:$0xf] %vm2997_vm1, %v9604_v35  ;;  %v5622_v59 = vpop.permute.xlu0 %5621 }
 0x4ad   :  { %6147 = vst.msk [vmem:[#allocation2 + $0x28] sm:$0xf] %vm2900_vm0, %v6126_v23  ;;  %6146 = vst.msk [vmem:[#allocation2 + $0x24] sm:$0xf] %vm2900_vm0, %v9602_v63 }
 0x4ae   :  { %6243 = vst.msk [vmem:[#allocation2 + $0x28] sm:$0xf] %vm2997_vm1, %v9527_v30  ;;  %6242 = vst.msk [vmem:[#allocation2 + $0x24] sm:$0xf] %vm2997_vm1, %v9447_v5 }
 0x4af   :  { %5544 = vst.msk [vmem:[#allocation2 + $0x3c] sm:$0xf] %vm2283_vm5, %v5528_v0  ;;  %v5924_v42 = vpop.permute.xlu1 %5923 }
 0x4b0   :  { %5640 = vst.msk [vmem:[#allocation2 + $0x3c] sm:$0xf] %vm2383_vm10, %v9618_v57  ;;  %v5830_v55 = vpop.permute.xlu0 %5829 }
 0x4b1   :  { %5688 = vst.msk [vmem:[#allocation2 + $0x3c] sm:$0xf] %vm2432_vm11, %v5672_v56  ;;  %v6902_v56 = vld [vmem:[#allocation2 + $0x10] sm:$0xff]  }
 0x4b3   :  { %v6132_v16 = vpop.permute.xlu1 %6131 }
 0x4b4   :  { %v6226_v51 = vpop.permute.xlu0 %6225 }
 0x4b7   :  { %v5524_v49 = vpop.permute.xlu1 %5523 }
 0x4b8   :  { %v5826_v63 = vpop.permute.xlu0 %5825  ;;  %5542 = vst.msk [vmem:[#allocation2 + $0x34] sm:$0xf] %vm2283_vm5, %v5524_v49 }
 0x4b9   :  { %5845 = vst.msk [vmem:[#allocation2 + $0x30] sm:$0xf] %vm2593_vm13, %v5826_v63 }
 0x4ba   :  { %5638 = vst.msk [vmem:[#allocation2 + $0x34] sm:$0xf] %vm2383_vm10, %v5620_v17  ;;  %v6322_v17 = vsel %vm3986_vm6, %v6902_v56, 0 }
 0x4bb   :  { %5941 = vst.msk [vmem:[#allocation2 + $0x30] sm:$0xf] %vm2690_vm14, %v5922_v48  ;;  %v6128_v5 = vpop.permute.xlu1 %6127 }
 0x4bc   :  { %5686 = vst.msk [vmem:[#allocation2 + $0x34] sm:$0xf] %vm2432_vm11, %v5668_v34  ;;  %v6134_v30 = vpop.permute.xlu0 %6133 }
 0x4bd   :  { %5989 = vst.msk [vmem:[#allocation2 + $0x30] sm:$0xf] %vm2739_vm15, %v5970_v44 }
 0x4be   :  { %6148 = vst.msk [vmem:[#allocation2 + $0x2c] sm:$0xf] %vm2900_vm0, %v6128_v5 }
 0x4bf   :  { %6244 = vst.msk [vmem:[#allocation2 + $0x2c] sm:$0xf] %vm2997_vm1, %v6224_v12  ;;  %v5832_v35 = vpop.permute.xlu1 %5831 }
 0x4c0   :  { %v5526_v52 = vpop.permute.xlu0 %5525  ;;  %5848 = vst.msk [vmem:[#allocation2 + $0x3c] sm:$0xf] %vm2593_vm13, %v5832_v35 }
 0x4c1   :  { %5543 = vst.msk [vmem:[#allocation2 + $0x38] sm:$0xf] %vm2283_vm5, %v5526_v52 }
 0x4c2   :  { %5944 = vst.msk [vmem:[#allocation2 + $0x3c] sm:$0xf] %vm2690_vm14, %v5928_v4 }
 0x4c3   :  { %5639 = vst.msk [vmem:[#allocation2 + $0x38] sm:$0xf] %vm2383_vm10, %v5622_v59  ;;  %v4735_v39 = vpop.permute.xlu1 %4734 }
 0x4c4   :  { %5992 = vst.msk [vmem:[#allocation2 + $0x3c] sm:$0xf] %vm2739_vm15, %v9190_v25  ;;  %v4733_v31 = vpop.permute.xlu0 %4732 }
 0x4c5   :  { %5687 = vst.msk [vmem:[#allocation2 + $0x38] sm:$0xf] %vm2432_vm11, %v9575_v37 }
 0x4c6   :  { %6152 = vst.msk [vmem:[#allocation2 + $0x3c] sm:$0xf] %vm2900_vm0, %v9198_v8  ;;  %v6899_v53 = vld [vmem:[#allocation2 + $0x28] sm:$0xff]  }
 0x4c7   :  { %5847 = vst.msk [vmem:[#allocation2 + $0x38] sm:$0xf] %vm2593_vm13, %v5830_v55  ;;  %v4783_v25 = vpop.permute.xlu1 %4782  ;;  %v6331_v14 = vsel %vm3986_vm6, %v6899_v53, 0 }
 0x4c8   :  { %6248 = vst.msk [vmem:[#allocation2 + $0x3c] sm:$0xf] %vm2997_vm1, %v9208_v6  ;;  %v4781_v8 = vpop.permute.xlu0 %4780 }
 0x4c9   :  { %5943 = vst.msk [vmem:[#allocation2 + $0x38] sm:$0xf] %vm2690_vm14, %v9620_v46 }
 0x4ca   :  { %4755 = vst.msk [vmem:[#allocation2 + $0xc] sm:$0xf] %vm2383_vm10, %v4735_v39  ;;  %4754 = vst.msk [vmem:[#allocation2 + $0x8] sm:$0xf] %vm2383_vm10, %v4733_v31 }
 0x4cb   :  { %5991 = vst.msk [vmem:[#allocation2 + $0x38] sm:$0xf] %vm2739_vm15, %v9637_v41  ;;  %v5828_v6 = vpop.permute.xlu1 %5827  ;;  %v6325_v41 = vsel %vm3986_vm6, %v6901_v15, 0 }
 0x4cc   :  { %6151 = vst.msk [vmem:[#allocation2 + $0x38] sm:$0xf] %vm2900_vm0, %v6134_v30  ;;  %v6130_v37 = vpop.permute.xlu0 %6129 }
 0x4cd   :  { %6247 = vst.msk [vmem:[#allocation2 + $0x38] sm:$0xf] %vm2997_vm1, %v6230_v36 }
 0x4ce   :  { %4803 = vst.msk [vmem:[#allocation2 + $0xc] sm:$0xf] %vm2432_vm11, %v4783_v25  ;;  %4802 = vst.msk [vmem:[#allocation2 + $0x8] sm:$0xf] %vm2432_vm11, %v4781_v8 }
 0x4cf   :  { %5846 = vst.msk [vmem:[#allocation2 + $0x34] sm:$0xf] %vm2593_vm13, %v5828_v6  ;;  %v4943_v10 = vpop.permute.xlu1 %4942 }
 0x4d0   :  { %6149 = vst.msk [vmem:[#allocation2 + $0x30] sm:$0xf] %vm2900_vm0, %v6130_v37  ;;  %v4941_v38 = vpop.permute.xlu0 %4940 }
 0x4d1   :  { %5942 = vst.msk [vmem:[#allocation2 + $0x34] sm:$0xf] %vm2690_vm14, %v5924_v42 }
 0x4d2   :  { %6245 = vst.msk [vmem:[#allocation2 + $0x30] sm:$0xf] %vm2997_vm1, %v6226_v51 }
 0x4d3   :  { %5990 = vst.msk [vmem:[#allocation2 + $0x34] sm:$0xf] %vm2739_vm15, %v9573_v11  ;;  %v5039_v62 = vpop.permute.xlu1 %5038 }
 0x4d4   :  { %v6897_v50 = vld [vmem:[#allocation2 + $0x38] sm:$0xff]   ;;  %6150 = vst.msk [vmem:[#allocation2 + $0x34] sm:$0xf] %vm2900_vm0, %v6132_v16  ;;  %v5037_v57 = vpop.permute.xlu0 %5036 }
 0x4d5   :  { %6246 = vst.msk [vmem:[#allocation2 + $0x34] sm:$0xf] %vm2997_vm1, %v9624_v47  ;;  %v6337_v21 = vsel %vm3986_vm6, %v6897_v50, 0  ;;  %v6900_v47 = vld [vmem:[#allocation2 + $0x20] sm:$0xff]  }
 0x4d6   :  { %4963 = vst.msk [vmem:[#allocation2 + $0xc] sm:$0xf] %vm2593_vm13, %v4943_v10  ;;  %4962 = vst.msk [vmem:[#allocation2 + $0x8] sm:$0xf] %vm2593_vm13, %v4941_v38  ;;  %6846 = vmatpush3.bf16.xpose.msra.mxu0 %v6337_v21  ;;  %v6328_v13 = vsel %vm3986_vm6, %v6900_v47, 0 }
 0x4d7   :  { %6847 = vmatprep.subr.bf16.mxu0 %v6921_v9  ;;  %5059 = vst.msk [vmem:[#allocation2 + $0xc] sm:$0xf] %vm2690_vm14, %v5039_v62  ;;  %5058 = vst.msk [vmem:[#allocation2 + $0x8] sm:$0xf] %vm2690_vm14, %v5037_v57  ;;  %v5087_v11 = vpop.permute.xlu1 %5086 }
 0x4d8   :  { %v5085_v46 = vpop.permute.xlu0 %5084  ;;  %5107 = vst.msk [vmem:[#allocation2 + $0xc] sm:$0xf] %vm2739_vm15, %v5087_v11 }
 0x4d9   :  { %5106 = vst.msk [vmem:[#allocation2 + $0x8] sm:$0xf] %vm2739_vm15, %v5085_v46 }
 0x4db   :  { %v5247_v61 = vpop.permute.xlu1 %5246 }
 0x4dc   :  { %v6898_v7 = vld [vmem:[#allocation2 + $0x30] sm:$0xff]   ;;  %v5245_v58 = vpop.permute.xlu0 %5244  ;;  %5267 = vst.msk [vmem:[#allocation2 + $0xc] sm:$0xf] %vm2900_vm0, %v5247_v61 }
 0x4dd   :  { %v6334_v45 = vsel %vm3986_vm6, %v6898_v7, 0  ;;  %5266 = vst.msk [vmem:[#allocation2 + $0x8] sm:$0xf] %vm2900_vm0, %v5245_v58 }
 0x4de   :  { %6848 = vmatpush3.bf16.xpose.msra.mxu0 %v6334_v45 }
 0x4df   :  { %6849 = vmatprep.subr.bf16.mxu0 %v6921_v9  ;;  %v5343_v43 = vpop.permute.xlu1 %5342 }
 0x4e0   :  { %v5341_v19 = vpop.permute.xlu0 %5340  ;;  %5363 = vst.msk [vmem:[#allocation2 + $0xc] sm:$0xf] %vm2997_vm1, %v5343_v43 }
 0x4e1   :  { %5362 = vst.msk [vmem:[#allocation2 + $0x8] sm:$0xf] %vm2997_vm1, %v5341_v19 }
 0x4e3   :  { %v4635_v40 = vpop.permute.xlu1 %4634 }
 0x4e4   :  { %v4633_v32 = vpop.permute.xlu0 %4632  ;;  %4657 = vst.msk [vmem:[#allocation2 + $0x4] sm:$0xf] %vm2283_vm5, %v4635_v40 }
 0x4e5   :  { %4656 = vst.msk [vmem:[#allocation2] sm:$0xf] %vm2283_vm5, %v4633_v32 }
 0x4e6   :  { %6850 = vmatpush3.bf16.xpose.msra.mxu0 %v6331_v14 }
 0x4e7   :  { %6851 = vmatprep.subr.bf16.mxu0 %v6921_v9  ;;  %v4731_v20 = vpop.permute.xlu1 %4730 }
 0x4e8   :  { %v4729_v33 = vpop.permute.xlu0 %4728  ;;  %4753 = vst.msk [vmem:[#allocation2 + $0x4] sm:$0xf] %vm2383_vm10, %v4731_v20  ;;  %v6903_v23 = vld [vmem:[#allocation2 + $0x8] sm:$0xff]  }
 0x4e9   :  { %4752 = vst.msk [vmem:[#allocation2] sm:$0xf] %vm2383_vm10, %v4729_v33  ;;  %v6319_v34 = vsel %vm3986_vm6, %v6903_v23, 0 }
 0x4eb   :  { %v4779_v28 = vpop.permute.xlu1 %4778 }
 0x4ec   :  { %v4777_v26 = vpop.permute.xlu0 %4776  ;;  %4801 = vst.msk [vmem:[#allocation2 + $0x4] sm:$0xf] %vm2432_vm11, %v4779_v28 }
 0x4ed   :  { %4800 = vst.msk [vmem:[#allocation2] sm:$0xf] %vm2432_vm11, %v4777_v26 }
 0x4ee   :  { %6852 = vmatpush3.bf16.xpose.msra.mxu0 %v6328_v13 }
 0x4ef   :  { %6853 = vmatprep.subr.bf16.mxu0 %v6921_v9  ;;  %v4939_v60 = vpop.permute.xlu1 %4938 }
 0x4f0   :  { %v4937_v24 = vpop.permute.xlu0 %4936  ;;  %4961 = vst.msk [vmem:[#allocation2 + $0x4] sm:$0xf] %vm2593_vm13, %v4939_v60 }
 0x4f1   :  { %4960 = vst.msk [vmem:[#allocation2] sm:$0xf] %vm2593_vm13, %v4937_v24 }
 0x4f3   :  { %v5035_v54 = vpop.permute.xlu1 %5034 }
 0x4f4   :  { %v5033_v27 = vpop.permute.xlu0 %5032  ;;  %5057 = vst.msk [vmem:[#allocation2 + $0x4] sm:$0xf] %vm2690_vm14, %v5035_v54 }
 0x4f5   :  { %5056 = vst.msk [vmem:[#allocation2] sm:$0xf] %vm2690_vm14, %v5033_v27 }
 0x4f6   :  { %6854 = vmatpush3.bf16.xpose.msra.mxu0 %v6325_v41 }
 0x4f7   :  { %6855 = vmatprep.subr.bf16.mxu0 %v6921_v9  ;;  %v5083_v2 = vpop.permute.xlu1 %5082 }
 0x4f8   :  { %v5081_v18 = vpop.permute.xlu0 %5080  ;;  %5105 = vst.msk [vmem:[#allocation2 + $0x4] sm:$0xf] %vm2739_vm15, %v5083_v2 }
 0x4f9   :  { %5104 = vst.msk [vmem:[#allocation2] sm:$0xf] %vm2739_vm15, %v5081_v18 }
 0x4fb   :  { %v5243_v22 = vpop.permute.xlu1 %5242 }
 0x4fc   :  { %v5241_v48 = vpop.permute.xlu0 %5240  ;;  %5265 = vst.msk [vmem:[#allocation2 + $0x4] sm:$0xf] %vm2900_vm0, %v5243_v22 }
 0x4fd   :  { %5264 = vst.msk [vmem:[#allocation2] sm:$0xf] %vm2900_vm0, %v5241_v48 }
 0x4fe   :  { %6856 = vmatpush3.bf16.xpose.msra.mxu0 %v6322_v17 }
 0x4ff   :  { %6857 = vmatprep.subr.bf16.mxu0 %v6921_v9  ;;  %v5339_v44 = vpop.permute.xlu1 %5338 }
 0x500   :  { %v5337_v12 = vpop.permute.xlu0 %5336  ;;  %5361 = vst.msk [vmem:[#allocation2 + $0x4] sm:$0xf] %vm2997_vm1, %v5339_v44 }
 0x501   :  { %5360 = vst.msk [vmem:[#allocation2] sm:$0xf] %vm2997_vm1, %v5337_v12 }
 0x506   :  { %6858 = vmatpush3.bf16.xpose.msra.mxu0 %v6319_v34 }
 0x507   :  { %6859 = vmatprep.subr.bf16.mxu0 %v6921_v9 }
 0x508   :  { %v6904_v36 = vld [vmem:[#allocation2] sm:$0xff]  }
 0x509   :  { %v6316_v4 = vsel %vm3986_vm6, %v6904_v36, 0 }
 0x50d   :  { %v6270_v1 = vpop.permute.xlu0 %6269 }
 0x50e   :  { %6860 = vmatpush3.bf16.xpose.msra.mxu0 %v6316_v4 }
 0x515   :  { %6862 = vmatmul.mubr.msk.bf16.vlgmr.msra.gmra.mxu0 %vm3986_vm6, %v6249_v29 }
 0x5d5   :  { %v6373_v3 = vpop.f32.mrf.mxu0 }
 0x5d6   :  { %v6374_v0 = vadd.f32 %v6373_v3, %v6270_v1 }
 0x5d7   :  { %v6863_v59 = vpop.f32.mrf.mxu0 }
 0x5d8   :  { %v6379_v42 = vmax.f32 %v6374_v0, 0.0 }
 0x5d9   :  { %v6376_v55 = vpop.f32.mrf.mxu0 }
 0x5da   :  { %6380 = vst [vmem:[%s9788_s7] sm:$0xff] %v6379_v42 }
 0x5db   :  { %v6864_v9 = vpop.f32.mrf.mxu0 }

</bundles_post_ra>
